<compile_context>
chip_gen: v7x
topology: tpu7x:2x2x1
jax: 0.10.0
libtpu: 0.0.40
codegen_flags: <defaults>
</compile_context>

<pallas_src>
import functools

import jax
import jax.numpy as jnp
from jax import lax
from jax.experimental import pallas as pl
from jax.experimental.pallas import tpu as pltpu

_VMEM_LIMIT = 48 * 1024 * 1024  # comfortably above v5e's 16 MiB default, below v7x physical


# ---------------------------------------------------------------------------
# Kernels
# ---------------------------------------------------------------------------

def _matmul_bias_kernel(p_ref, w_ref, b_ref, o_ref):
    """Conv expressed as one lane-dense matmul over gathered tap-channels + bias.

    p_ref: (1, M, Kc) patches for one image, M = Ho*Wo, Kc = KH*KW*Cin
    w_ref: (Kc, Cout)   VMEM-resident weights
    b_ref: (1, Cout)    VMEM-resident bias
    o_ref: (1, M, Cout) spatially-flattened, lane-dense output
    """
    y = jnp.dot(p_ref[0], w_ref[...], preferred_element_type=jnp.float32)
    o_ref[0] = (y + b_ref[...]).astype(o_ref.dtype)


def _conv2d_taps_kernel(x_ref, w_ref, b_ref, o_ref):
    """Stride-1 'same' KxK conv: one MXU matmul per kernel tap, f32 accumulation.

    x_ref: (1, Hp, Wp, Cin) padded input image
    w_ref: (KH, KW, Cin, Cout) VMEM-resident weights
    b_ref: (1, Cout)
    o_ref: (1, Ho*Wo, Cout) spatially-flattened, lane-dense output
    """
    kh, kw, cin, cout = w_ref.shape
    _, hp, wp, _ = x_ref.shape
    ho, wo = hp - kh + 1, wp - kw + 1
    acc = jnp.zeros((ho * wo, cout), jnp.float32)
    for i in range(kh):                     # static unroll: kh*kw MXU calls
        for j in range(kw):
            win = x_ref[0, i:i + ho, j:j + wo, :].reshape(ho * wo, cin)
            acc = acc + jnp.dot(win, w_ref[i, j],
                                preferred_element_type=jnp.float32)
    o_ref[0] = (acc + b_ref[...]).astype(o_ref.dtype)


def _bn_lrelu_kernel(y_ref, g_ref, b_ref, o_ref, *, eps, slope):
    """Training-mode BatchNorm2d (per-channel batch stats over N*H*W) + LeakyReLU.

    y_ref/o_ref: (M, C) with M = N*Ho*Wo (flattened in the wrapper, free reshape)
    g_ref/b_ref: (1, C) affine params
    """
    y = y_ref[...].astype(jnp.float32)
    mean = jnp.mean(y, axis=0, keepdims=True)
    d = y - mean
    var = jnp.mean(d * d, axis=0, keepdims=True)
    z = d * lax.rsqrt(var + eps) * g_ref[...] + b_ref[...]
    o_ref[...] = jnp.where(z >= 0, z, slope * z).astype(o_ref.dtype)


# ---------------------------------------------------------------------------
# pallas_call wrappers
# ---------------------------------------------------------------------------

def conv2d_via_patches(x, w, b, *, stride, pad):
    """Conv2d as a single lane-dense matmul over K*K*Cin gathered tap-channels.

    Used where im2col is cheap: the 2-channel 9x9 front conv and the strided 3x3
    down-convs (output already downsampled).  x: (N, H, W, Cin) NHWC.
    """
    n, h, wid, cin = x.shape
    kh, kw, _, cout = w.shape
    ho = (h + 2 * pad - kh) // stride + 1
    wo = (wid + 2 * pad - kw) // stride + 1
    xp = jnp.pad(x, ((0, 0), (pad, pad), (pad, pad), (0, 0)))
    taps = []
    for i in range(kh):
        for j in range(kw):
            taps.append(lax.slice(
                xp,
                (0, i, j, 0),
                (n, i + (ho - 1) * stride + 1, j + (wo - 1) * stride + 1, cin),
                (1, stride, stride, 1)))
    kc = kh * kw * cin
    m = ho * wo
    patches = jnp.concatenate(taps, axis=-1).reshape(n, m, kc)
    wr = w.reshape(kc, cout)                 # matches (i, j, ci) tap order above

    out = pl.pallas_call(
        _matmul_bias_kernel,
        out_shape=jax.ShapeDtypeStruct((n, m, cout), x.dtype),
        grid=(n,),
        in_specs=[
            pl.BlockSpec((1, m, kc), lambda bb: (bb, 0, 0)),
            pl.BlockSpec((kc, cout), lambda bb: (0, 0)),    # resident
            pl.BlockSpec((1, cout), lambda bb: (0, 0)),     # resident
        ],
        out_specs=pl.BlockSpec((1, m, cout), lambda bb: (bb, 0, 0)),
        compiler_params=pltpu.CompilerParams(
            dimension_semantics=("parallel",), vmem_limit_bytes=_VMEM_LIMIT),
    )(patches, wr, b)
    return out.reshape(n, ho, wo, cout)


def conv2d_same_taps(x, w, b):
    """Stride-1 'same' KxK conv over many channels (no im2col blow-up)."""
    n, h, wid, cin = x.shape
    kh, kw, _, cout = w.shape
    ph, pw = kh // 2, kw // 2
    xp = jnp.pad(x, ((0, 0), (ph, ph), (pw, pw), (0, 0)))
    hp, wp = h + 2 * ph, wid + 2 * pw
    m = h * wid

    out = pl.pallas_call(
        _conv2d_taps_kernel,
        out_shape=jax.ShapeDtypeStruct((n, m, cout), x.dtype),
        grid=(n,),
        in_specs=[
            pl.BlockSpec((1, hp, wp, cin), lambda bb: (bb, 0, 0, 0)),
            pl.BlockSpec((kh, kw, cin, cout), lambda bb: (0, 0, 0, 0)),  # resident
            pl.BlockSpec((1, cout), lambda bb: (0, 0)),                  # resident
        ],
        out_specs=pl.BlockSpec((1, m, cout), lambda bb: (bb, 0, 0)),
        compiler_params=pltpu.CompilerParams(
            dimension_semantics=("parallel",), vmem_limit_bytes=_VMEM_LIMIT),
    )(xp, w, b)
    return out.reshape(n, h, wid, cout)


def batchnorm_leakyrelu(x, gamma, beta, *, eps=1e-5, slope=0.1):
    """Fused BatchNorm2d(batch statistics) + LeakyReLU over an NHWC tensor."""
    n, h, w, c = x.shape
    m = n * h * w
    xf = x.reshape(m, c)                      # free XLA reshape (channels stay minor)
    kern = functools.partial(_bn_lrelu_kernel, eps=eps, slope=slope)
    out = pl.pallas_call(
        kern,
        out_shape=jax.ShapeDtypeStruct((m, c), x.dtype),
        grid=(1,),
        in_specs=[
            pl.BlockSpec((m, c), lambda i: (0, 0)),
            pl.BlockSpec((1, c), lambda i: (0, 0)),
            pl.BlockSpec((1, c), lambda i: (0, 0)),
        ],
        out_specs=pl.BlockSpec((m, c), lambda i: (0, 0)),
        compiler_params=pltpu.CompilerParams(
            dimension_semantics=("arbitrary",), vmem_limit_bytes=_VMEM_LIMIT),
    )(xf, gamma, beta)
    return out.reshape(n, h, w, c)


# ---------------------------------------------------------------------------
# Encoder module (JAX/Pallas port of the PyTorch Encoder)
# ---------------------------------------------------------------------------

class EncoderPallas:
    """Forward-only port of the CsiNet-Pro Encoder."""

    def __init__(self, n_chan, H, W, latent_chan=256, sample_factors=(4, 2, 2), *, key):
        self.img_total = H * W
        self.n_chan = n_chan
        self.latent_chan = latent_chan
        self.sample_factors = tuple(sample_factors)
        L = latent_chan
        ks = jax.random.split(key, 18)
        s = 0.05  # keep activations O(1) so the f32 check stays tight

        def nrm(k, shape):
            return s * jax.random.normal(k, shape, jnp.float32)

        # conv weights stored in HWIO (channels-last) layout; vectors stored as (1, C)
        # so they are already in the shape the kernels consume (parameter transform).
        self.params = dict(
            c1_w=nrm(ks[0], (9, 9, 2, L)), c1_b=nrm(ks[1], (1, L)),
            d1_w=nrm(ks[2], (3, 3, L, L)), d1_b=nrm(ks[3], (1, L)),
            g1=1.0 + nrm(ks[4], (1, L)),   b1=nrm(ks[5], (1, L)),
            c2_w=nrm(ks[6], (5, 5, L, L)), c2_b=nrm(ks[7], (1, L)),
            d2_w=nrm(ks[8], (3, 3, L, L)), d2_b=nrm(ks[9], (1, L)),
            g2=1.0 + nrm(ks[10], (1, L)),  b2=nrm(ks[11], (1, L)),
            c3_w=nrm(ks[12], (5, 5, L, L)), c3_b=nrm(ks[13], (1, L)),
            d3_w=nrm(ks[14], (3, 3, L, L)), d3_b=nrm(ks[15], (1, L)),
            g3=1.0 + nrm(ks[16], (1, L)),  b3=nrm(ks[17], (1, L)),
        )

    def __call__(self, x_nchw):
        p = self.params
        sf = self.sample_factors
        x = jnp.transpose(x_nchw, (0, 2, 3, 1))        # NCHW -> NHWC once at the boundary

        # stage 1: 9x9 conv (Cin=2 -> im2col matmul), strided 3x3 down, BN + LeakyReLU
        x = conv2d_via_patches(x, p["c1_w"], p["c1_b"], stride=1, pad=4)
        x = conv2d_via_patches(x, p["d1_w"], p["d1_b"], stride=sf[0], pad=1)
        x = batchnorm_leakyrelu(x, p["g1"], p["b1"])

        # stage 2: 5x5 conv (per-tap MXU accumulation), strided 3x3 down, BN + LeakyReLU
        x = conv2d_same_taps(x, p["c2_w"], p["c2_b"])
        x = conv2d_via_patches(x, p["d2_w"], p["d2_b"], stride=sf[1], pad=1)
        x = batchnorm_leakyrelu(x, p["g2"], p["b2"])

        # stage 3
        x = conv2d_same_taps(x, p["c3_w"], p["c3_b"])
        x = conv2d_via_patches(x, p["d3_w"], p["d3_b"], stride=sf[2], pad=1)
        x = batchnorm_leakyrelu(x, p["g3"], p["b3"])

        return jnp.transpose(x, (0, 3, 1, 2))          # back to NCHW at the boundary


# ---------------------------------------------------------------------------
# Pure-JAX reference (mirrors the PyTorch forward) for verification
# ---------------------------------------------------------------------------

def reference_forward(enc, x_nchw):
    p = enc.params
    dn = ("NHWC", "HWIO", "NHWC")
    x = jnp.transpose(x_nchw, (0, 2, 3, 1))
    stages = (
        (p["c1_w"], p["c1_b"], p["d1_w"], p["d1_b"], p["g1"], p["b1"], enc.sample_factors[0]),
        (p["c2_w"], p["c2_b"], p["d2_w"], p["d2_b"], p["g2"], p["b2"], enc.sample_factors[1]),
        (p["c3_w"], p["c3_b"], p["d3_w"], p["d3_b"], p["g3"], p["b3"], enc.sample_factors[2]),
    )
    for cw, cb, dw, db, g, b, s in stages:
        x = lax.conv_general_dilated(x, cw, (1, 1), "SAME", dimension_numbers=dn) + cb
        x = lax.conv_general_dilated(x, dw, (s, s), ((1, 1), (1, 1)),
                                     dimension_numbers=dn) + db
        mean = jnp.mean(x, axis=(0, 1, 2), keepdims=True)
        var = jnp.mean((x - mean) ** 2, axis=(0, 1, 2), keepdims=True)
        x = (x - mean) * lax.rsqrt(var + 1e-5) * g + b
        x = jnp.where(x >= 0, x, 0.1 * x)
    return jnp.transpose(x, (0, 3, 1, 2))


if __name__ == "__main__":
    key = jax.random.PRNGKey(0)
    kp, kx = jax.random.split(key)

    # Small test shapes: batch=2, 2 input channels, 64x64 spatial, latent_chan=32.
    batch, H, W, latent = 2, 64, 64, 32
    enc = EncoderPallas(n_chan=2, H=H, W=W, latent_chan=latent,
                        sample_factors=(4, 2, 2), key=kp)
    x = jax.random.normal(kx, (batch, 2, H, W), jnp.float32)   # NCHW, like PyTorch

    y = jax.block_until_ready(enc(x))                          # (2, 32, 4, 4)

    y_ref = jax.block_until_ready(reference_forward(enc, x))
    assert y.shape == y_ref.shape, (y.shape, y_ref.shape)
    err = float(jnp.max(jnp.abs(y - y_ref)))
    assert err < 1e-3, f"max abs error vs reference: {err}"

    print("KERNEL_OK")
</pallas_src>

<mosaic_0001>
module attributes {stable_mosaic.version = 11 : i64} {
  func.func @_matmul_bias_kernel(%arg0: i32, %arg1: memref<1x4096x162xf32, #tpu.memory_space<vmem>>, %arg2: memref<162x32xf32, #tpu.memory_space<vmem>>, %arg3: memref<1x32xf32, #tpu.memory_space<vmem>>, %arg4: memref<1x4096x32xf32, #tpu.memory_space<vmem>>) attributes {dimension_semantics = [#tpu.dimension_semantics<parallel>], iteration_bounds = array<i64: 2>, scalar_prefetch = 0 : i64, scratch_operands = 0 : i64, tpu.core_type = #tpu.core_type<tc>, window_params = [{transform_indices = @transform_0, window_bounds = array<i64: 1, 4096, 162>}, {pipeline_mode = #tpu.pipeline_mode<synchronous>, transform_indices = @transform_1, window_bounds = array<i64: 162, 32>}, {pipeline_mode = #tpu.pipeline_mode<synchronous>, transform_indices = @transform_2, window_bounds = array<i64: 1, 32>}, {transform_indices = @transform_3, window_bounds = array<i64: 1, 4096, 32>}]} {
    %c0 = arith.constant 0 : index
    %c0_0 = arith.constant 0 : index
    %c0_1 = arith.constant 0 : index
    %0 = vector.load %arg1[%c0, %c0_0, %c0_1] : memref<1x4096x162xf32, #tpu.memory_space<vmem>>, vector<1x4096x162xf32>
    %1 = vector.shape_cast %0 : vector<1x4096x162xf32> to vector<4096x162xf32>
    %c0_2 = arith.constant 0 : index
    %c0_3 = arith.constant 0 : index
    %2 = vector.load %arg2[%c0_2, %c0_3] : memref<162x32xf32, #tpu.memory_space<vmem>>, vector<162x32xf32>
    %cst = arith.constant dense<0.000000e+00> : vector<4096x32xf32>
    %3 = tpu.matmul %1, %2, %cst {dimension_numbers = #tpu.dot_dimension_numbers<[1], [0], [0], [1], [0, 0, 1, 1], [], []>} : vector<4096x162xf32>, vector<162x32xf32>, vector<4096x32xf32> -> vector<4096x32xf32>
    %c0_4 = arith.constant 0 : index
    %c0_5 = arith.constant 0 : index
    %4 = vector.load %arg3[%c0_4, %c0_5] : memref<1x32xf32, #tpu.memory_space<vmem>>, vector<1x32xf32>
    %5 = vector.broadcast %4 : vector<1x32xf32> to vector<4096x32xf32>
    %6 = arith.addf %3, %5 : vector<4096x32xf32>
    %c0_6 = arith.constant 0 : index
    %c0_7 = arith.constant 0 : index
    %c0_8 = arith.constant 0 : index
    %7 = vector.load %arg4[%c0_6, %c0_7, %c0_8] : memref<1x4096x32xf32, #tpu.memory_space<vmem>>, vector<1x4096x32xf32>
    %8 = vector.shape_cast %7 : vector<1x4096x32xf32> to vector<4096x32xf32>
    %9 = vector.shape_cast %6 : vector<4096x32xf32> to vector<1x4096x32xf32>
    tpu.vector_store %arg4[%c0_6, %c0_7, %c0_8], %9 {strides = array<i32>} : memref<1x4096x32xf32, #tpu.memory_space<vmem>>, vector<1x4096x32xf32>,
    return
  }
  func.func @transform_0(%arg0: i32) -> (i32, i32, i32) {
    %c0_i32 = arith.constant 0 : i32
    %c0_i32_0 = arith.constant 0 : i32
    %c0_i32_1 = arith.constant 0 : i32
    return %arg0, %c0_i32, %c0_i32_0 : i32, i32, i32
  }
  func.func @transform_1(%arg0: i32) -> (i32, i32) {
    %c0_i32 = arith.constant 0 : i32
    %c0_i32_0 = arith.constant 0 : i32
    %c0_i32_1 = arith.constant 0 : i32
    return %c0_i32, %c0_i32_0 : i32, i32
  }
  func.func @transform_2(%arg0: i32) -> (i32, i32) {
    %c0_i32 = arith.constant 0 : i32
    %c0_i32_0 = arith.constant 0 : i32
    %c0_i32_1 = arith.constant 0 : i32
    return %c0_i32, %c0_i32_0 : i32, i32
  }
  func.func @transform_3(%arg0: i32) -> (i32, i32, i32) {
    %c0_i32 = arith.constant 0 : i32
    %c0_i32_0 = arith.constant 0 : i32
    %c0_i32_1 = arith.constant 0 : i32
    return %arg0, %c0_i32, %c0_i32_0 : i32, i32, i32
  }
}

</mosaic_0001>

<bundles_post_ra>
// kernel: tpu_custom_call.1
= control target key start
LH: loop header
LB: loop body
LE: loop exit
PB: predicated region body
PF: predicated region fallthrough
CT: control target
= control target key end

     0   :  { %s6583_s12 = smov 0   ;;  %s9803_s0 = inlined_call_operand.vmem [shape: f32[2,4096,162], index: 0, kind: input, shape index: {}]   ;;  %s9804_s1 = inlined_call_operand.vmem [shape: f32[162,32], index: 1, kind: input, shape index: {}]   ;;  %s9805_s2 = inlined_call_operand.vmem [shape: f32[1,32], index: 2, kind: input, shape index: {}]   ;;  %s9806_s3 = inlined_call_operand.vmem [shape: f32[2,4096,32], index: 3, kind: output, shape index: {}]  }
   0x1 LB: > { %s5957_s13 = sadd.s32 4294967295, %s6559_s12   ;;  %p5961_p0 = scmp.ge.s32.totalorder %s6559_s12, 1  ;;  %s6559_s12 = sphi %s6583_s12, %s13_s12  }
   0x2   : > { %p137_p1 = scmp.lt.s32.totalorder %s6559_s12, 3 }
   0x4   : > { %p138_p2 = pnand %p5961_p0, %p137_p1 }
   0x5   : > { %v1195_v0 = vld [vmem:[%s9804_s1] sm:$0xff] (!%p138_p2)  ;;  %v1196_v1 = vld [vmem:[%s9804_s1 + $0x8] sm:$0xff] (!%p138_p2)  ;;  %v1197_v2 = vld [vmem:[%s9804_s1 + $0x10] sm:$0xff] (!%p138_p2)  ;;  %v6561_v3 = vmov (!%p138_p2), 0.0|0.0   ;;  %p161_p3 = scmp.lt.s32.totalorder (!%p138_p2), %s5957_s13, 1  ;;  %vm1223_vm0 = vcmask (!%p138_p2), 277504  }
   0x6   : > { %141 = sbr.rel (%p138_p2) target bundleno = 1284 (0x504), region = 32  ;;  %6484 = vmatprep.subr.bf16.mxu0 (!%p138_p2), %v6561_v3  ;;  %6514 = vmatprep.subr.bf16.mxu1 (!%p138_p2), %v6561_v3  ;;  %v6485_v4 = vpack.c.bf16 (!%p138_p2), %v1196_v1, %v1195_v0  ;;  %v1198_v5 = vld [vmem:[%s9804_s1 + $0x18] sm:$0xff] (!%p138_p2)  ;;  %v1199_v7 = vld [vmem:[%s9804_s1 + $0x20] sm:$0xff] (!%p138_p2)  ;;  %v1200_v8 = vld [vmem:[%s9804_s1 + $0x28] sm:$0xff] (!%p138_p2)  ;;  %v6562_v33 = vmov (!%p138_p2), 0.0   ;;  %vm2760_vm1 = vcmask (!%p138_p2), 1041408  }
   0x7   : > { %v6488_v6 = vpack.c.bf16 (!%p138_p2), %v1198_v5, %v1197_v2  ;;  %v6491_v9 = vpack.c.bf16 (!%p138_p2), %v1200_v8, %v1199_v7  ;;  %v1201_v12 = vld [vmem:[%s9804_s1 + $0x30] sm:$0xff] (!%p138_p2)  ;;  %v1202_v13 = vld [vmem:[%s9804_s1 + $0x38] sm:$0xff] (!%p138_p2)  ;;  %v1203_v15 = vld [vmem:[%s9804_s1 + $0x40] sm:$0xff] (!%p138_p2)  ;;  %vm5389_vm2 = vcmask (!%p138_p2), 261120  }
   0x8   : > { %6486 = vmatpush1.bf16.msra.mxu0 (!%p138_p2), %v6485_v4  ;;  %6525 = vmatpush1.bf16.msra.mxu1 (!%p138_p2), %v6485_v4  ;;  %v6494_v14 = vpack.c.bf16 (!%p138_p2), %v1202_v13, %v1201_v12  ;;  %v1204_v16 = vld [vmem:[%s9804_s1 + $0x48] sm:$0xff] (!%p138_p2)  ;;  %v1205_v18 = vld [vmem:[%s9804_s1 + $0x50] sm:$0xff] (!%p138_p2)  ;;  %v1206_v19 = vld [vmem:[%s9804_s1 + $0x58] sm:$0xff] (!%p138_p2) }
   0x9   : > { %6487 = vmatprep.subr.bf16.mxu0 (!%p138_p2), %v6561_v3  ;;  %6515 = vmatprep.subr.bf16.mxu1 (!%p138_p2), %v6561_v3  ;;  %v6497_v17 = vpack.c.bf16 (!%p138_p2), %v1204_v16, %v1203_v15  ;;  %v6500_v20 = vpack.c.bf16 (!%p138_p2), %v1206_v19, %v1205_v18  ;;  %v1207_v21 = vld [vmem:[%s9804_s1 + $0x60] sm:$0xff] (!%p138_p2)  ;;  %v1208_v22 = vld [vmem:[%s9804_s1 + $0x68] sm:$0xff] (!%p138_p2)  ;;  %v1209_v24 = vld [vmem:[%s9804_s1 + $0x70] sm:$0xff] (!%p138_p2) }
   0xa   : > { %v6503_v23 = vpack.c.bf16 (!%p138_p2), %v1208_v22, %v1207_v21  ;;  %v1210_v25 = vld [vmem:[%s9804_s1 + $0x78] sm:$0xff] (!%p138_p2)  ;;  %v1211_v27 = vld [vmem:[%s9804_s1 + $0x80] sm:$0xff] (!%p138_p2)  ;;  %v1212_v28 = vld [vmem:[%s9804_s1 + $0x88] sm:$0xff] (!%p138_p2) }
   0xb   : > { %v6506_v26 = vpack.c.bf16 (!%p138_p2), %v1210_v25, %v1209_v24  ;;  %v6509_v29 = vpack.c.bf16 (!%p138_p2), %v1212_v28, %v1211_v27  ;;  %v1213_v30 = vld [vmem:[%s9804_s1 + $0x90] sm:$0xff] (!%p138_p2)  ;;  %v1214_v31 = vld [vmem:[%s9804_s1 + $0x98] sm:$0xff] (!%p138_p2)  ;;  %v1215_v34 = vld [vmem:[%s9804_s1 + $0xa0] sm:$0x3] (!%p138_p2) }
   0xc   : > { %6489 = vmatpush1.bf16.msra.mxu0 (!%p138_p2), %v6488_v6  ;;  %6526 = vmatpush1.bf16.msra.mxu1 (!%p138_p2), %v6488_v6  ;;  %v6512_v32 = vpack.c.bf16 (!%p138_p2), %v1214_v31, %v1213_v30 }
   0xd   : > { %s9808_s13 = smov (!%p161_p3, %s5957_s13), 1  ;;  %6490 = vmatprep.subr.bf16.mxu0 %v6561_v3  ;;  %6516 = vmatprep.subr.bf16.mxu1 %v6561_v3 }
   0xe   : > { %s6482_s26 = sshll.u32 %s9808_s13, 13  ;;  %s6483_s9 = sshll.u32 %s9808_s13, 12 }
   0xf   : > { %s6619_s29 = scalar_lea.vmem %s9803_s0, %s6482_s26  ;;  %s7017_s16 = scalar_lea.vmem %s9806_s3, %s6483_s9 }
  0x10   : > { %v172_v10 = vld [vmem:[%s6619_s29 + $0x8] sm:$0xff]  ;;  %6492 = vmatpush1.bf16.msra.mxu0 %v6491_v9  ;;  %6527 = vmatpush1.bf16.msra.mxu1 %v6491_v9  ;;  %v171_v35 = vld [vmem:[%s6619_s29] sm:$0xff]  ;;  %v174_v37 = vld [vmem:[%s6619_s29 + $0x18] sm:$0xff] }
  0x11   : > { %v684_v11 = vld [vmem:[%s6619_s29 + $0x1008] sm:$0xff]  ;;  %5968 = vmatprep.mubr.msk.f32.mxu0 %vm1223_vm0, %v172_v10  ;;  %6493 = vmatprep.subr.bf16.mxu0 %v6561_v3  ;;  %v683_v36 = vld [vmem:[%s6619_s29 + $0x1000] sm:$0xff]  ;;  %v686_v38 = vld [vmem:[%s6619_s29 + $0x1018] sm:$0xff] }
  0x12   : > { %6224 = vmatprep.mubr.msk.f32.mxu1 %vm1223_vm0, %v684_v11  ;;  %6517 = vmatprep.subr.bf16.mxu1 %v6561_v3  ;;  %v173_v39 = vld [vmem:[%s6619_s29 + $0x10] sm:$0xff]  ;;  %v176_v41 = vld [vmem:[%s6619_s29 + $0x28] sm:$0xff]  ;;  %v175_v43 = vld [vmem:[%s6619_s29 + $0x20] sm:$0xff] }
  0x13   : > { %v685_v40 = vld [vmem:[%s6619_s29 + $0x1010] sm:$0xff]  ;;  %v688_v42 = vld [vmem:[%s6619_s29 + $0x1028] sm:$0xff]  ;;  %v687_v44 = vld [vmem:[%s6619_s29 + $0x1020] sm:$0xff] }
  0x14   : > { %6495 = vmatpush1.bf16.msra.mxu0 %v6494_v14  ;;  %6528 = vmatpush1.bf16.msra.mxu1 %v6494_v14  ;;  %v178_v45 = vld [vmem:[%s6619_s29 + $0x38] sm:$0xff]  ;;  %v177_v47 = vld [vmem:[%s6619_s29 + $0x30] sm:$0xff]  ;;  %v180_v49 = vld [vmem:[%s6619_s29 + $0x48] sm:$0xff] }
  0x15   : > { %6496 = vmatprep.subr.bf16.mxu0 %v6561_v3  ;;  %6518 = vmatprep.subr.bf16.mxu1 %v6561_v3  ;;  %v690_v46 = vld [vmem:[%s6619_s29 + $0x1038] sm:$0xff]  ;;  %v689_v48 = vld [vmem:[%s6619_s29 + $0x1030] sm:$0xff]  ;;  %v692_v50 = vld [vmem:[%s6619_s29 + $0x1048] sm:$0xff] }
  0x16   : > { %v179_v51 = vld [vmem:[%s6619_s29 + $0x40] sm:$0xff]  ;;  %v182_v53 = vld [vmem:[%s6619_s29 + $0x58] sm:$0xff]  ;;  %v181_v55 = vld [vmem:[%s6619_s29 + $0x50] sm:$0xff] }
  0x17   : > { %v691_v52 = vld [vmem:[%s6619_s29 + $0x1040] sm:$0xff]  ;;  %v694_v54 = vld [vmem:[%s6619_s29 + $0x1058] sm:$0xff]  ;;  %v693_v56 = vld [vmem:[%s6619_s29 + $0x1050] sm:$0xff] }
  0x18   : > { %6498 = vmatpush1.bf16.msra.mxu0 %v6497_v17  ;;  %6529 = vmatpush1.bf16.msra.mxu1 %v6497_v17  ;;  %v184_v57 = vld [vmem:[%s6619_s29 + $0x68] sm:$0xff]  ;;  %v183_v59 = vld [vmem:[%s6619_s29 + $0x60] sm:$0xff]  ;;  %v186_v61 = vld [vmem:[%s6619_s29 + $0x78] sm:$0xff] }
  0x19   : > { %6499 = vmatprep.subr.bf16.mxu0 %v6561_v3  ;;  %6519 = vmatprep.subr.bf16.mxu1 %v6561_v3  ;;  %v696_v58 = vld [vmem:[%s6619_s29 + $0x1068] sm:$0xff]  ;;  %v695_v60 = vld [vmem:[%s6619_s29 + $0x1060] sm:$0xff]  ;;  %v698_v62 = vld [vmem:[%s6619_s29 + $0x1078] sm:$0xff] }
  0x1a   : > { %v185_v63 = vld [vmem:[%s6619_s29 + $0x70] sm:$0xff]  ;;  %v188_v1 = vld [vmem:[%s6619_s29 + $0x88] sm:$0xff]  ;;  %v699_v4 = vld [vmem:[%s6619_s29 + $0x1080] sm:$0xff] }
  0x1b   : > { %v697_v0 = vld [vmem:[%s6619_s29 + $0x1070] sm:$0xff]  ;;  %v700_v2 = vld [vmem:[%s6619_s29 + $0x1088] sm:$0xff]  ;;  %v190_v5 = vld [vmem:[%s6619_s29 + $0x98] sm:$0xff] }
  0x1c   : > { %6501 = vmatpush1.bf16.msra.mxu0 %v6500_v20  ;;  %6530 = vmatpush1.bf16.msra.mxu1 %v6500_v20  ;;  %v702_v6 = vld [vmem:[%s6619_s29 + $0x1098] sm:$0xff]  ;;  %v189_v7 = vld [vmem:[%s6619_s29 + $0x90] sm:$0xff]  ;;  %v192_v9 = vld [vmem:[%s6619_s29 + $0xa8] sm:$0xff] }
  0x1d   : > { %6502 = vmatprep.subr.bf16.mxu0 %v6561_v3  ;;  %6520 = vmatprep.subr.bf16.mxu1 %v6561_v3  ;;  %v701_v8 = vld [vmem:[%s6619_s29 + $0x1090] sm:$0xff]  ;;  %v704_v10 = vld [vmem:[%s6619_s29 + $0x10a8] sm:$0xff]  ;;  %v191_v11 = vld [vmem:[%s6619_s29 + $0xa0] sm:$0xff] }
  0x1e   : > { %v703_v12 = vld [vmem:[%s6619_s29 + $0x10a0] sm:$0xff]  ;;  %v194_v13 = vld [vmem:[%s6619_s29 + $0xb8] sm:$0xff]  ;;  %v193_v15 = vld [vmem:[%s6619_s29 + $0xb0] sm:$0xff] }
  0x1f   : > { %v706_v14 = vld [vmem:[%s6619_s29 + $0x10b8] sm:$0xff]  ;;  %v705_v16 = vld [vmem:[%s6619_s29 + $0x10b0] sm:$0xff]  ;;  %v196_v17 = vld [vmem:[%s6619_s29 + $0xc8] sm:$0xff] }
  0x20   : > { %6504 = vmatpush1.bf16.msra.mxu0 %v6503_v23  ;;  %6531 = vmatpush1.bf16.msra.mxu1 %v6503_v23  ;;  %v708_v18 = vld [vmem:[%s6619_s29 + $0x10c8] sm:$0xff]  ;;  %v195_v19 = vld [vmem:[%s6619_s29 + $0xc0] sm:$0xff]  ;;  %v198_v21 = vld [vmem:[%s6619_s29 + $0xd8] sm:$0xff] }
  0x21   : > { %6505 = vmatprep.subr.bf16.mxu0 %v6561_v3  ;;  %6521 = vmatprep.subr.bf16.mxu1 %v6561_v3  ;;  %v707_v20 = vld [vmem:[%s6619_s29 + $0x10c0] sm:$0xff]  ;;  %v710_v22 = vld [vmem:[%s6619_s29 + $0x10d8] sm:$0xff]  ;;  %v197_v23 = vld [vmem:[%s6619_s29 + $0xd0] sm:$0xff] }
  0x22   : > { %v709_v24 = vld [vmem:[%s6619_s29 + $0x10d0] sm:$0xff]  ;;  %v200_v25 = vld [vmem:[%s6619_s29 + $0xe8] sm:$0xff]  ;;  %v199_v27 = vld [vmem:[%s6619_s29 + $0xe0] sm:$0xff] }
  0x23   : > { %v711_v28 = vld [vmem:[%s6619_s29 + $0x10e0] sm:$0xff]  ;;  %v714_v30 = vld [vmem:[%s6619_s29 + $0x10f8] sm:$0xff]  ;;  %v201_v31 = vld [vmem:[%s6619_s29 + $0xf0] sm:$0xff] }
  0x24   : > { %6507 = vmatpush1.bf16.msra.mxu0 %v6506_v26  ;;  %6532 = vmatpush1.bf16.msra.mxu1 %v6506_v26  ;;  %v712_v26 = vld [vmem:[%s6619_s29 + $0x10e8] sm:$0xff] }
  0x25   : > { %6508 = vmatprep.subr.bf16.mxu0 %v6561_v3  ;;  %6522 = vmatprep.subr.bf16.mxu1 %v6561_v3 }
  0x28   : > { %6510 = vmatpush1.bf16.msra.mxu0 %v6509_v29  ;;  %6533 = vmatpush1.bf16.msra.mxu1 %v6509_v29  ;;  %v202_v29 = vld [vmem:[%s6619_s29 + $0xf8] sm:$0xff] }
  0x29   : > { %6511 = vmatprep.subr.bf16.mxu0 %v6561_v3  ;;  %6523 = vmatprep.subr.bf16.mxu1 %v6561_v3  ;;  %v187_v3 = vld [vmem:[%s6619_s29 + $0x80] sm:$0xff] }
  0x2c   : > { %6513 = vmatpush1.bf16.msra.mxu0 %v6512_v32  ;;  %6534 = vmatpush1.bf16.msra.mxu1 %v6512_v32  ;;  %v713_v32 = vld [vmem:[%s6619_s29 + $0x10f0] sm:$0xff] }
  0x2d   : > { %2804 = vmatprep.subr.mxu0 %v6562_v33  ;;  %6524 = vmatprep.subr.mxu1 %v6562_v33  ;;  %v204_v33 = vld [vmem:[%s6619_s29 + $0x108] sm:$0xff] }
  0x30   : > { %5967 = vmatpush1.msk.msra.mxu0 %vm2760_vm1, %v1215_v34  ;;  %6535 = vmatpush1.msk.msra.mxu1 %vm2760_vm1, %v1215_v34  ;;  %v716_v34 = vld [vmem:[%s6619_s29 + $0x1108] sm:$0xff] }
  0x31   : > { %2829 = vmatmul.mubr.f32.vlgmr.msra.gmra.mrb[0].mxu0 %v171_v35  ;;  %4109 = vmatmul.mubr.f32.vlgmr.msra.gmra.mrb[0].mxu1 %v683_v36  ;;  %v203_v35 = vld [vmem:[%s6619_s29 + $0x100] sm:$0xff] }
  0x32   : > { %5969 = vmatprep.mubr.msk.f32.mxu0 %vm1223_vm0, %v174_v37  ;;  %6225 = vmatprep.mubr.msk.f32.mxu1 %vm1223_vm0, %v686_v38  ;;  %v715_v36 = vld [vmem:[%s6619_s29 + $0x1100] sm:$0xff]  ;;  %v206_v37 = vld [vmem:[%s6619_s29 + $0x118] sm:$0xff] }
  0x33   : > { %v718_v38 = vld [vmem:[%s6619_s29 + $0x1118] sm:$0xff] }
  0x35   : > { %2834 = vmatmul.mubr.f32.gmra.mrb[2].mxu0 %v173_v39  ;;  %4114 = vmatmul.mubr.f32.gmra.mrb[2].mxu1 %v685_v40  ;;  %v205_v39 = vld [vmem:[%s6619_s29 + $0x110] sm:$0xff] }
  0x36   : > { %5970 = vmatprep.mubr.msk.f32.mxu0 %vm1223_vm0, %v176_v41  ;;  %6226 = vmatprep.mubr.msk.f32.mxu1 %vm1223_vm0, %v688_v42  ;;  %v717_v40 = vld [vmem:[%s6619_s29 + $0x1110] sm:$0xff]  ;;  %v208_v41 = vld [vmem:[%s6619_s29 + $0x128] sm:$0xff] }
  0x37   : > { %v720_v42 = vld [vmem:[%s6619_s29 + $0x1128] sm:$0xff] }
  0x39   : > { %2839 = vmatmul.mubr.f32.gmra.mrb[4].mxu0 %v175_v43  ;;  %4119 = vmatmul.mubr.f32.gmra.mrb[4].mxu1 %v687_v44  ;;  %v207_v43 = vld [vmem:[%s6619_s29 + $0x120] sm:$0xff] }
  0x3a   : > { %5971 = vmatprep.mubr.msk.f32.mxu0 %vm1223_vm0, %v178_v45  ;;  %6227 = vmatprep.mubr.msk.f32.mxu1 %vm1223_vm0, %v690_v46  ;;  %v719_v44 = vld [vmem:[%s6619_s29 + $0x1120] sm:$0xff]  ;;  %v210_v45 = vld [vmem:[%s6619_s29 + $0x138] sm:$0xff] }
  0x3b   : > { %v722_v46 = vld [vmem:[%s6619_s29 + $0x1138] sm:$0xff] }
  0x3d   : > { %2844 = vmatmul.mubr.f32.gmra.mrb[6].mxu0 %v177_v47  ;;  %4124 = vmatmul.mubr.f32.gmra.mrb[6].mxu1 %v689_v48  ;;  %v209_v47 = vld [vmem:[%s6619_s29 + $0x130] sm:$0xff] }
  0x3e   : > { %5972 = vmatprep.mubr.msk.f32.mxu0 %vm1223_vm0, %v180_v49  ;;  %6228 = vmatprep.mubr.msk.f32.mxu1 %vm1223_vm0, %v692_v50  ;;  %v721_v48 = vld [vmem:[%s6619_s29 + $0x1130] sm:$0xff]  ;;  %v212_v49 = vld [vmem:[%s6619_s29 + $0x148] sm:$0xff] }
  0x3f   : > { %v724_v50 = vld [vmem:[%s6619_s29 + $0x1148] sm:$0xff] }
  0x41   : > { %2849 = vmatmul.mubr.f32.gmra.mrb[8].mxu0 %v179_v51  ;;  %4129 = vmatmul.mubr.f32.gmra.mrb[8].mxu1 %v691_v52  ;;  %v211_v51 = vld [vmem:[%s6619_s29 + $0x140] sm:$0xff] }
  0x42   : > { %5973 = vmatprep.mubr.msk.f32.mxu0 %vm1223_vm0, %v182_v53  ;;  %6229 = vmatprep.mubr.msk.f32.mxu1 %vm1223_vm0, %v694_v54  ;;  %v723_v52 = vld [vmem:[%s6619_s29 + $0x1140] sm:$0xff]  ;;  %v214_v53 = vld [vmem:[%s6619_s29 + $0x158] sm:$0xff] }
  0x43   : > { %v726_v54 = vld [vmem:[%s6619_s29 + $0x1158] sm:$0xff] }
  0x45   : > { %2854 = vmatmul.mubr.f32.gmra.mrb[10].mxu0 %v181_v55  ;;  %4134 = vmatmul.mubr.f32.gmra.mrb[10].mxu1 %v693_v56  ;;  %v213_v55 = vld [vmem:[%s6619_s29 + $0x150] sm:$0xff] }
  0x46   : > { %5974 = vmatprep.mubr.msk.f32.mxu0 %vm1223_vm0, %v184_v57  ;;  %6230 = vmatprep.mubr.msk.f32.mxu1 %vm1223_vm0, %v696_v58  ;;  %v725_v56 = vld [vmem:[%s6619_s29 + $0x1150] sm:$0xff]  ;;  %v216_v57 = vld [vmem:[%s6619_s29 + $0x168] sm:$0xff] }
  0x47   : > { %v728_v58 = vld [vmem:[%s6619_s29 + $0x1168] sm:$0xff] }
  0x49   : > { %2859 = vmatmul.mubr.f32.gmra.mrb[12].mxu0 %v183_v59  ;;  %4139 = vmatmul.mubr.f32.gmra.mrb[12].mxu1 %v695_v60  ;;  %v215_v59 = vld [vmem:[%s6619_s29 + $0x160] sm:$0xff] }
  0x4a   : > { %5975 = vmatprep.mubr.msk.f32.mxu0 %vm1223_vm0, %v186_v61  ;;  %6231 = vmatprep.mubr.msk.f32.mxu1 %vm1223_vm0, %v698_v62  ;;  %v727_v60 = vld [vmem:[%s6619_s29 + $0x1160] sm:$0xff]  ;;  %v218_v61 = vld [vmem:[%s6619_s29 + $0x178] sm:$0xff] }
  0x4b   : > { %v730_v62 = vld [vmem:[%s6619_s29 + $0x1178] sm:$0xff] }
  0x4d   : > { %2864 = vmatmul.mubr.f32.gmra.mrb[14].mxu0 %v185_v63  ;;  %4144 = vmatmul.mubr.f32.gmra.mrb[14].mxu1 %v697_v0  ;;  %v217_v63 = vld [vmem:[%s6619_s29 + $0x170] sm:$0xff] }
  0x4e   : > { %5976 = vmatprep.mubr.msk.f32.mxu0 %vm1223_vm0, %v188_v1  ;;  %6232 = vmatprep.mubr.msk.f32.mxu1 %vm1223_vm0, %v700_v2  ;;  %v729_v0 = vld [vmem:[%s6619_s29 + $0x1170] sm:$0xff]  ;;  %v220_v1 = vld [vmem:[%s6619_s29 + $0x188] sm:$0xff] }
  0x4f   : > { %v732_v2 = vld [vmem:[%s6619_s29 + $0x1188] sm:$0xff] }
  0x51   : > { %2869 = vmatmul.mubr.f32.gmra.mrb[16].mxu0 %v187_v3  ;;  %4149 = vmatmul.mubr.f32.gmra.mrb[16].mxu1 %v699_v4  ;;  %v219_v3 = vld [vmem:[%s6619_s29 + $0x180] sm:$0xff] }
  0x52   : > { %5977 = vmatprep.mubr.msk.f32.mxu0 %vm1223_vm0, %v190_v5  ;;  %6233 = vmatprep.mubr.msk.f32.mxu1 %vm1223_vm0, %v702_v6  ;;  %v731_v4 = vld [vmem:[%s6619_s29 + $0x1180] sm:$0xff]  ;;  %v222_v5 = vld [vmem:[%s6619_s29 + $0x198] sm:$0xff] }
  0x53   : > { %v734_v6 = vld [vmem:[%s6619_s29 + $0x1198] sm:$0xff] }
  0x55   : > { %2874 = vmatmul.mubr.f32.gmra.mrb[18].mxu0 %v189_v7  ;;  %4154 = vmatmul.mubr.f32.gmra.mrb[18].mxu1 %v701_v8  ;;  %v221_v7 = vld [vmem:[%s6619_s29 + $0x190] sm:$0xff] }
  0x56   : > { %5978 = vmatprep.mubr.msk.f32.mxu0 %vm1223_vm0, %v192_v9  ;;  %6234 = vmatprep.mubr.msk.f32.mxu1 %vm1223_vm0, %v704_v10  ;;  %v733_v8 = vld [vmem:[%s6619_s29 + $0x1190] sm:$0xff]  ;;  %v224_v9 = vld [vmem:[%s6619_s29 + $0x1a8] sm:$0xff] }
  0x57   : > { %v736_v10 = vld [vmem:[%s6619_s29 + $0x11a8] sm:$0xff] }
  0x59   : > { %2879 = vmatmul.mubr.f32.gmra.mrb[20].mxu0 %v191_v11  ;;  %4159 = vmatmul.mubr.f32.gmra.mrb[20].mxu1 %v703_v12  ;;  %v223_v11 = vld [vmem:[%s6619_s29 + $0x1a0] sm:$0xff] }
  0x5a   : > { %5979 = vmatprep.mubr.msk.f32.mxu0 %vm1223_vm0, %v194_v13  ;;  %6235 = vmatprep.mubr.msk.f32.mxu1 %vm1223_vm0, %v706_v14  ;;  %v735_v12 = vld [vmem:[%s6619_s29 + $0x11a0] sm:$0xff]  ;;  %v226_v13 = vld [vmem:[%s6619_s29 + $0x1b8] sm:$0xff] }
  0x5b   : > { %v738_v14 = vld [vmem:[%s6619_s29 + $0x11b8] sm:$0xff] }
  0x5d   : > { %2884 = vmatmul.mubr.f32.gmra.mrb[22].mxu0 %v193_v15  ;;  %4164 = vmatmul.mubr.f32.gmra.mrb[22].mxu1 %v705_v16  ;;  %v225_v15 = vld [vmem:[%s6619_s29 + $0x1b0] sm:$0xff] }
  0x5e   : > { %5980 = vmatprep.mubr.msk.f32.mxu0 %vm1223_vm0, %v196_v17  ;;  %6236 = vmatprep.mubr.msk.f32.mxu1 %vm1223_vm0, %v708_v18  ;;  %v737_v16 = vld [vmem:[%s6619_s29 + $0x11b0] sm:$0xff]  ;;  %v228_v17 = vld [vmem:[%s6619_s29 + $0x1c8] sm:$0xff] }
  0x5f   : > { %v740_v18 = vld [vmem:[%s6619_s29 + $0x11c8] sm:$0xff] }
  0x61   : > { %2889 = vmatmul.mubr.f32.gmra.mrb[24].mxu0 %v195_v19  ;;  %4169 = vmatmul.mubr.f32.gmra.mrb[24].mxu1 %v707_v20  ;;  %v227_v19 = vld [vmem:[%s6619_s29 + $0x1c0] sm:$0xff] }
  0x62   : > { %5981 = vmatprep.mubr.msk.f32.mxu0 %vm1223_vm0, %v198_v21  ;;  %6237 = vmatprep.mubr.msk.f32.mxu1 %vm1223_vm0, %v710_v22  ;;  %v739_v20 = vld [vmem:[%s6619_s29 + $0x11c0] sm:$0xff]  ;;  %v230_v21 = vld [vmem:[%s6619_s29 + $0x1d8] sm:$0xff] }
  0x63   : > { %v742_v22 = vld [vmem:[%s6619_s29 + $0x11d8] sm:$0xff] }
  0x65   : > { %2894 = vmatmul.mubr.f32.gmra.mrb[26].mxu0 %v197_v23  ;;  %4174 = vmatmul.mubr.f32.gmra.mrb[26].mxu1 %v709_v24  ;;  %v229_v23 = vld [vmem:[%s6619_s29 + $0x1d0] sm:$0xff] }
  0x66   : > { %5982 = vmatprep.mubr.msk.f32.mxu0 %vm1223_vm0, %v200_v25  ;;  %6238 = vmatprep.mubr.msk.f32.mxu1 %vm1223_vm0, %v712_v26  ;;  %v741_v24 = vld [vmem:[%s6619_s29 + $0x11d0] sm:$0xff]  ;;  %v232_v25 = vld [vmem:[%s6619_s29 + $0x1e8] sm:$0xff] }
  0x67   : > { %v744_v26 = vld [vmem:[%s6619_s29 + $0x11e8] sm:$0xff] }
  0x69   : > { %2899 = vmatmul.mubr.f32.gmra.mrb[28].mxu0 %v199_v27  ;;  %4179 = vmatmul.mubr.f32.gmra.mrb[28].mxu1 %v711_v28  ;;  %v231_v27 = vld [vmem:[%s6619_s29 + $0x1e0] sm:$0xff] }
  0x6a   : > { %5983 = vmatprep.mubr.msk.f32.mxu0 %vm1223_vm0, %v202_v29  ;;  %6239 = vmatprep.mubr.msk.f32.mxu1 %vm1223_vm0, %v714_v30  ;;  %v743_v28 = vld [vmem:[%s6619_s29 + $0x11e0] sm:$0xff]  ;;  %v234_v29 = vld [vmem:[%s6619_s29 + $0x1f8] sm:$0xff] }
  0x6b   : > { %v746_v30 = vld [vmem:[%s6619_s29 + $0x11f8] sm:$0xff] }
  0x6d   : > { %2904 = vmatmul.mubr.f32.gmra.mrb[30].mxu0 %v201_v31  ;;  %4184 = vmatmul.mubr.f32.gmra.mrb[30].mxu1 %v713_v32  ;;  %v233_v31 = vld [vmem:[%s6619_s29 + $0x1f0] sm:$0xff] }
  0x6e   : > { %5984 = vmatprep.mubr.msk.f32.mxu0 %vm1223_vm0, %v204_v33  ;;  %6240 = vmatprep.mubr.msk.f32.mxu1 %vm1223_vm0, %v716_v34  ;;  %v745_v32 = vld [vmem:[%s6619_s29 + $0x11f0] sm:$0xff]  ;;  %v236_v33 = vld [vmem:[%s6619_s29 + $0x208] sm:$0xff] }
  0x6f   : > { %v748_v34 = vld [vmem:[%s6619_s29 + $0x1208] sm:$0xff] }
  0x71   : > { %2909 = vmatmul.mubr.f32.gmra.mrb[32].mxu0 %v203_v35  ;;  %4189 = vmatmul.mubr.f32.gmra.mrb[32].mxu1 %v715_v36  ;;  %v235_v35 = vld [vmem:[%s6619_s29 + $0x200] sm:$0xff] }
  0x72   : > { %5985 = vmatprep.mubr.msk.f32.mxu0 %vm1223_vm0, %v206_v37  ;;  %6241 = vmatprep.mubr.msk.f32.mxu1 %vm1223_vm0, %v718_v38  ;;  %v747_v36 = vld [vmem:[%s6619_s29 + $0x1200] sm:$0xff]  ;;  %v238_v37 = vld [vmem:[%s6619_s29 + $0x218] sm:$0xff] }
  0x73   : > { %v750_v38 = vld [vmem:[%s6619_s29 + $0x1218] sm:$0xff] }
  0x75   : > { %2914 = vmatmul.mubr.f32.gmra.mrb[34].mxu0 %v205_v39  ;;  %4194 = vmatmul.mubr.f32.gmra.mrb[34].mxu1 %v717_v40  ;;  %v237_v39 = vld [vmem:[%s6619_s29 + $0x210] sm:$0xff] }
  0x76   : > { %5986 = vmatprep.mubr.msk.f32.mxu0 %vm1223_vm0, %v208_v41  ;;  %6242 = vmatprep.mubr.msk.f32.mxu1 %vm1223_vm0, %v720_v42  ;;  %v749_v40 = vld [vmem:[%s6619_s29 + $0x1210] sm:$0xff]  ;;  %v240_v41 = vld [vmem:[%s6619_s29 + $0x228] sm:$0xff] }
  0x77   : > { %v752_v42 = vld [vmem:[%s6619_s29 + $0x1228] sm:$0xff] }
  0x79   : > { %2919 = vmatmul.mubr.f32.gmra.mrb[36].mxu0 %v207_v43  ;;  %4199 = vmatmul.mubr.f32.gmra.mrb[36].mxu1 %v719_v44  ;;  %v239_v43 = vld [vmem:[%s6619_s29 + $0x220] sm:$0xff] }
  0x7a   : > { %5987 = vmatprep.mubr.msk.f32.mxu0 %vm1223_vm0, %v210_v45  ;;  %6243 = vmatprep.mubr.msk.f32.mxu1 %vm1223_vm0, %v722_v46  ;;  %v751_v44 = vld [vmem:[%s6619_s29 + $0x1220] sm:$0xff]  ;;  %v242_v45 = vld [vmem:[%s6619_s29 + $0x238] sm:$0xff] }
  0x7b   : > { %v754_v46 = vld [vmem:[%s6619_s29 + $0x1238] sm:$0xff] }
  0x7d   : > { %2924 = vmatmul.mubr.f32.gmra.mrb[38].mxu0 %v209_v47  ;;  %4204 = vmatmul.mubr.f32.gmra.mrb[38].mxu1 %v721_v48  ;;  %v241_v47 = vld [vmem:[%s6619_s29 + $0x230] sm:$0xff] }
  0x7e   : > { %5988 = vmatprep.mubr.msk.f32.mxu0 %vm1223_vm0, %v212_v49  ;;  %6244 = vmatprep.mubr.msk.f32.mxu1 %vm1223_vm0, %v724_v50  ;;  %v753_v48 = vld [vmem:[%s6619_s29 + $0x1230] sm:$0xff]  ;;  %v244_v49 = vld [vmem:[%s6619_s29 + $0x248] sm:$0xff] }
  0x7f   : > { %v756_v50 = vld [vmem:[%s6619_s29 + $0x1248] sm:$0xff] }
  0x81   : > { %2929 = vmatmul.mubr.f32.gmra.mrb[40].mxu0 %v211_v51  ;;  %4209 = vmatmul.mubr.f32.gmra.mrb[40].mxu1 %v723_v52  ;;  %v243_v51 = vld [vmem:[%s6619_s29 + $0x240] sm:$0xff] }
  0x82   : > { %5989 = vmatprep.mubr.msk.f32.mxu0 %vm1223_vm0, %v214_v53  ;;  %6245 = vmatprep.mubr.msk.f32.mxu1 %vm1223_vm0, %v726_v54  ;;  %v755_v52 = vld [vmem:[%s6619_s29 + $0x1240] sm:$0xff]  ;;  %v246_v53 = vld [vmem:[%s6619_s29 + $0x258] sm:$0xff] }
  0x83   : > { %v758_v54 = vld [vmem:[%s6619_s29 + $0x1258] sm:$0xff] }
  0x85   : > { %2934 = vmatmul.mubr.f32.gmra.mrb[42].mxu0 %v213_v55  ;;  %4214 = vmatmul.mubr.f32.gmra.mrb[42].mxu1 %v725_v56  ;;  %v245_v55 = vld [vmem:[%s6619_s29 + $0x250] sm:$0xff] }
  0x86   : > { %5990 = vmatprep.mubr.msk.f32.mxu0 %vm1223_vm0, %v216_v57  ;;  %6246 = vmatprep.mubr.msk.f32.mxu1 %vm1223_vm0, %v728_v58  ;;  %v757_v56 = vld [vmem:[%s6619_s29 + $0x1250] sm:$0xff]  ;;  %v248_v57 = vld [vmem:[%s6619_s29 + $0x268] sm:$0xff] }
  0x87   : > { %v760_v58 = vld [vmem:[%s6619_s29 + $0x1268] sm:$0xff] }
  0x89   : > { %2939 = vmatmul.mubr.f32.gmra.mrb[44].mxu0 %v215_v59  ;;  %4219 = vmatmul.mubr.f32.gmra.mrb[44].mxu1 %v727_v60  ;;  %v247_v59 = vld [vmem:[%s6619_s29 + $0x260] sm:$0xff] }
  0x8a   : > { %5991 = vmatprep.mubr.msk.f32.mxu0 %vm1223_vm0, %v218_v61  ;;  %6247 = vmatprep.mubr.msk.f32.mxu1 %vm1223_vm0, %v730_v62  ;;  %v759_v60 = vld [vmem:[%s6619_s29 + $0x1260] sm:$0xff]  ;;  %v250_v61 = vld [vmem:[%s6619_s29 + $0x278] sm:$0xff] }
  0x8b   : > { %v762_v62 = vld [vmem:[%s6619_s29 + $0x1278] sm:$0xff] }
  0x8d   : > { %2944 = vmatmul.mubr.f32.gmra.mrb[46].mxu0 %v217_v63  ;;  %4224 = vmatmul.mubr.f32.gmra.mrb[46].mxu1 %v729_v0  ;;  %v249_v63 = vld [vmem:[%s6619_s29 + $0x270] sm:$0xff] }
  0x8e   : > { %5992 = vmatprep.mubr.msk.f32.mxu0 %vm1223_vm0, %v220_v1  ;;  %6248 = vmatprep.mubr.msk.f32.mxu1 %vm1223_vm0, %v732_v2  ;;  %v761_v0 = vld [vmem:[%s6619_s29 + $0x1270] sm:$0xff]  ;;  %v252_v1 = vld [vmem:[%s6619_s29 + $0x288] sm:$0xff] }
  0x8f   : > { %v764_v2 = vld [vmem:[%s6619_s29 + $0x1288] sm:$0xff] }
  0x91   : > { %2949 = vmatmul.mubr.f32.gmra.mrb[48].mxu0 %v219_v3  ;;  %4229 = vmatmul.mubr.f32.gmra.mrb[48].mxu1 %v731_v4  ;;  %v251_v3 = vld [vmem:[%s6619_s29 + $0x280] sm:$0xff] }
  0x92   : > { %5993 = vmatprep.mubr.msk.f32.mxu0 %vm1223_vm0, %v222_v5  ;;  %6249 = vmatprep.mubr.msk.f32.mxu1 %vm1223_vm0, %v734_v6  ;;  %v763_v4 = vld [vmem:[%s6619_s29 + $0x1280] sm:$0xff]  ;;  %v254_v5 = vld [vmem:[%s6619_s29 + $0x298] sm:$0xff] }
  0x93   : > { %v766_v6 = vld [vmem:[%s6619_s29 + $0x1298] sm:$0xff] }
  0x95   : > { %2954 = vmatmul.mubr.f32.gmra.mrb[50].mxu0 %v221_v7  ;;  %4234 = vmatmul.mubr.f32.gmra.mrb[50].mxu1 %v733_v8  ;;  %v253_v7 = vld [vmem:[%s6619_s29 + $0x290] sm:$0xff] }
  0x96   : > { %5994 = vmatprep.mubr.msk.f32.mxu0 %vm1223_vm0, %v224_v9  ;;  %6250 = vmatprep.mubr.msk.f32.mxu1 %vm1223_vm0, %v736_v10  ;;  %v765_v8 = vld [vmem:[%s6619_s29 + $0x1290] sm:$0xff]  ;;  %v256_v9 = vld [vmem:[%s6619_s29 + $0x2a8] sm:$0xff] }
  0x97   : > { %v768_v10 = vld [vmem:[%s6619_s29 + $0x12a8] sm:$0xff] }
  0x99   : > { %2959 = vmatmul.mubr.f32.gmra.mrb[52].mxu0 %v223_v11  ;;  %4239 = vmatmul.mubr.f32.gmra.mrb[52].mxu1 %v735_v12  ;;  %v255_v11 = vld [vmem:[%s6619_s29 + $0x2a0] sm:$0xff] }
  0x9a   : > { %5995 = vmatprep.mubr.msk.f32.mxu0 %vm1223_vm0, %v226_v13  ;;  %6251 = vmatprep.mubr.msk.f32.mxu1 %vm1223_vm0, %v738_v14  ;;  %v767_v12 = vld [vmem:[%s6619_s29 + $0x12a0] sm:$0xff]  ;;  %v258_v13 = vld [vmem:[%s6619_s29 + $0x2b8] sm:$0xff] }
  0x9b   : > { %v770_v14 = vld [vmem:[%s6619_s29 + $0x12b8] sm:$0xff] }
  0x9d   : > { %2964 = vmatmul.mubr.f32.gmra.mrb[54].mxu0 %v225_v15  ;;  %4244 = vmatmul.mubr.f32.gmra.mrb[54].mxu1 %v737_v16  ;;  %v257_v15 = vld [vmem:[%s6619_s29 + $0x2b0] sm:$0xff] }
  0x9e   : > { %5996 = vmatprep.mubr.msk.f32.mxu0 %vm1223_vm0, %v228_v17  ;;  %6252 = vmatprep.mubr.msk.f32.mxu1 %vm1223_vm0, %v740_v18  ;;  %v769_v16 = vld [vmem:[%s6619_s29 + $0x12b0] sm:$0xff]  ;;  %v260_v17 = vld [vmem:[%s6619_s29 + $0x2c8] sm:$0xff] }
  0x9f   : > { %v772_v18 = vld [vmem:[%s6619_s29 + $0x12c8] sm:$0xff] }
  0xa1   : > { %2969 = vmatmul.mubr.f32.gmra.mrb[56].mxu0 %v227_v19  ;;  %4249 = vmatmul.mubr.f32.gmra.mrb[56].mxu1 %v739_v20  ;;  %v259_v19 = vld [vmem:[%s6619_s29 + $0x2c0] sm:$0xff] }
  0xa2   : > { %5997 = vmatprep.mubr.msk.f32.mxu0 %vm1223_vm0, %v230_v21  ;;  %6253 = vmatprep.mubr.msk.f32.mxu1 %vm1223_vm0, %v742_v22  ;;  %v771_v20 = vld [vmem:[%s6619_s29 + $0x12c0] sm:$0xff]  ;;  %v262_v21 = vld [vmem:[%s6619_s29 + $0x2d8] sm:$0xff] }
  0xa3   : > { %v774_v22 = vld [vmem:[%s6619_s29 + $0x12d8] sm:$0xff] }
  0xa5   : > { %2974 = vmatmul.mubr.f32.gmra.mrb[58].mxu0 %v229_v23  ;;  %4254 = vmatmul.mubr.f32.gmra.mrb[58].mxu1 %v741_v24  ;;  %v261_v23 = vld [vmem:[%s6619_s29 + $0x2d0] sm:$0xff] }
  0xa6   : > { %5998 = vmatprep.mubr.msk.f32.mxu0 %vm1223_vm0, %v232_v25  ;;  %6254 = vmatprep.mubr.msk.f32.mxu1 %vm1223_vm0, %v744_v26  ;;  %v773_v24 = vld [vmem:[%s6619_s29 + $0x12d0] sm:$0xff]  ;;  %v264_v25 = vld [vmem:[%s6619_s29 + $0x2e8] sm:$0xff] }
  0xa7   : > { %v776_v26 = vld [vmem:[%s6619_s29 + $0x12e8] sm:$0xff] }
  0xa9   : > { %2979 = vmatmul.mubr.f32.gmra.mrb[60].mxu0 %v231_v27  ;;  %4259 = vmatmul.mubr.f32.gmra.mrb[60].mxu1 %v743_v28  ;;  %v263_v27 = vld [vmem:[%s6619_s29 + $0x2e0] sm:$0xff] }
  0xaa   : > { %5999 = vmatprep.mubr.msk.f32.mxu0 %vm1223_vm0, %v234_v29  ;;  %6255 = vmatprep.mubr.msk.f32.mxu1 %vm1223_vm0, %v746_v30  ;;  %v775_v28 = vld [vmem:[%s6619_s29 + $0x12e0] sm:$0xff]  ;;  %v266_v29 = vld [vmem:[%s6619_s29 + $0x2f8] sm:$0xff] }
  0xab   : > { %v778_v30 = vld [vmem:[%s6619_s29 + $0x12f8] sm:$0xff] }
  0xad   : > { %2984 = vmatmul.mubr.f32.gmra.mrb[62].mxu0 %v233_v31  ;;  %4264 = vmatmul.mubr.f32.gmra.mrb[62].mxu1 %v745_v32  ;;  %v265_v31 = vld [vmem:[%s6619_s29 + $0x2f0] sm:$0xff] }
  0xae   : > { %6000 = vmatprep.mubr.msk.f32.mxu0 %vm1223_vm0, %v236_v33  ;;  %6256 = vmatprep.mubr.msk.f32.mxu1 %vm1223_vm0, %v748_v34  ;;  %v777_v32 = vld [vmem:[%s6619_s29 + $0x12f0] sm:$0xff]  ;;  %v268_v33 = vld [vmem:[%s6619_s29 + $0x308] sm:$0xff] }
  0xaf   : > { %v780_v34 = vld [vmem:[%s6619_s29 + $0x1308] sm:$0xff] }
  0xb1   : > { %2989 = vmatmul.mubr.f32.gmra.mrb[64].mxu0 %v235_v35  ;;  %4269 = vmatmul.mubr.f32.gmra.mrb[64].mxu1 %v747_v36  ;;  %v267_v35 = vld [vmem:[%s6619_s29 + $0x300] sm:$0xff] }
  0xb2   : > { %6001 = vmatprep.mubr.msk.f32.mxu0 %vm1223_vm0, %v238_v37  ;;  %6257 = vmatprep.mubr.msk.f32.mxu1 %vm1223_vm0, %v750_v38  ;;  %v779_v36 = vld [vmem:[%s6619_s29 + $0x1300] sm:$0xff]  ;;  %v270_v37 = vld [vmem:[%s6619_s29 + $0x318] sm:$0xff] }
  0xb3   : > { %v782_v38 = vld [vmem:[%s6619_s29 + $0x1318] sm:$0xff] }
  0xb5   : > { %2994 = vmatmul.mubr.f32.gmra.mrb[66].mxu0 %v237_v39  ;;  %4274 = vmatmul.mubr.f32.gmra.mrb[66].mxu1 %v749_v40  ;;  %v269_v39 = vld [vmem:[%s6619_s29 + $0x310] sm:$0xff] }
  0xb6   : > { %6002 = vmatprep.mubr.msk.f32.mxu0 %vm1223_vm0, %v240_v41  ;;  %6258 = vmatprep.mubr.msk.f32.mxu1 %vm1223_vm0, %v752_v42  ;;  %v781_v40 = vld [vmem:[%s6619_s29 + $0x1310] sm:$0xff]  ;;  %v272_v41 = vld [vmem:[%s6619_s29 + $0x328] sm:$0xff] }
  0xb7   : > { %v784_v42 = vld [vmem:[%s6619_s29 + $0x1328] sm:$0xff] }
  0xb9   : > { %2999 = vmatmul.mubr.f32.gmra.mrb[68].mxu0 %v239_v43  ;;  %4279 = vmatmul.mubr.f32.gmra.mrb[68].mxu1 %v751_v44  ;;  %v271_v43 = vld [vmem:[%s6619_s29 + $0x320] sm:$0xff] }
  0xba   : > { %6003 = vmatprep.mubr.msk.f32.mxu0 %vm1223_vm0, %v242_v45  ;;  %6259 = vmatprep.mubr.msk.f32.mxu1 %vm1223_vm0, %v754_v46  ;;  %v783_v44 = vld [vmem:[%s6619_s29 + $0x1320] sm:$0xff]  ;;  %v274_v45 = vld [vmem:[%s6619_s29 + $0x338] sm:$0xff] }
  0xbb   : > { %v786_v46 = vld [vmem:[%s6619_s29 + $0x1338] sm:$0xff] }
  0xbd   : > { %3004 = vmatmul.mubr.f32.gmra.mrb[70].mxu0 %v241_v47  ;;  %4284 = vmatmul.mubr.f32.gmra.mrb[70].mxu1 %v753_v48  ;;  %v273_v47 = vld [vmem:[%s6619_s29 + $0x330] sm:$0xff] }
  0xbe   : > { %6004 = vmatprep.mubr.msk.f32.mxu0 %vm1223_vm0, %v244_v49  ;;  %6260 = vmatprep.mubr.msk.f32.mxu1 %vm1223_vm0, %v756_v50  ;;  %v785_v48 = vld [vmem:[%s6619_s29 + $0x1330] sm:$0xff]  ;;  %v276_v49 = vld [vmem:[%s6619_s29 + $0x348] sm:$0xff] }
  0xbf   : > { %v788_v50 = vld [vmem:[%s6619_s29 + $0x1348] sm:$0xff] }
  0xc1   : > { %3009 = vmatmul.mubr.f32.gmra.mrb[72].mxu0 %v243_v51  ;;  %4289 = vmatmul.mubr.f32.gmra.mrb[72].mxu1 %v755_v52  ;;  %v275_v51 = vld [vmem:[%s6619_s29 + $0x340] sm:$0xff] }
  0xc2   : > { %6005 = vmatprep.mubr.msk.f32.mxu0 %vm1223_vm0, %v246_v53  ;;  %6261 = vmatprep.mubr.msk.f32.mxu1 %vm1223_vm0, %v758_v54  ;;  %v787_v52 = vld [vmem:[%s6619_s29 + $0x1340] sm:$0xff]  ;;  %v278_v53 = vld [vmem:[%s6619_s29 + $0x358] sm:$0xff] }
  0xc3   : > { %v790_v54 = vld [vmem:[%s6619_s29 + $0x1358] sm:$0xff] }
  0xc5   : > { %3014 = vmatmul.mubr.f32.gmra.mrb[74].mxu0 %v245_v55  ;;  %4294 = vmatmul.mubr.f32.gmra.mrb[74].mxu1 %v757_v56  ;;  %v7006_v55 = vld [vmem:[%s9805_s2] ss:$0 sm:$0xff]  ;;  %v277_v56 = vld [vmem:[%s6619_s29 + $0x350] sm:$0xff] }
  0xc6   : > { %6006 = vmatprep.mubr.msk.f32.mxu0 %vm1223_vm0, %v248_v57  ;;  %6262 = vmatprep.mubr.msk.f32.mxu1 %vm1223_vm0, %v760_v58  ;;  %v789_v57 = vld [vmem:[%s6619_s29 + $0x1350] sm:$0xff]  ;;  %v280_v58 = vld [vmem:[%s6619_s29 + $0x368] sm:$0xff] }
  0xc9   : > { %3019 = vmatmul.mubr.f32.gmra.mrb[76].mxu0 %v247_v59  ;;  %4299 = vmatmul.mubr.f32.gmra.mrb[76].mxu1 %v759_v60  ;;  %v792_v59 = vld [vmem:[%s6619_s29 + $0x1368] sm:$0xff] }
  0xca   : > { %6007 = vmatprep.mubr.msk.f32.mxu0 %vm1223_vm0, %v250_v61  ;;  %6263 = vmatprep.mubr.msk.f32.mxu1 %vm1223_vm0, %v762_v62 }
  0xcd   : > { %3024 = vmatmul.mubr.f32.gmra.mrb[78].mxu0 %v249_v63  ;;  %4304 = vmatmul.mubr.f32.gmra.mrb[78].mxu1 %v761_v0 }
  0xce   : > { %6008 = vmatprep.mubr.msk.f32.mxu0 %vm1223_vm0, %v252_v1  ;;  %6264 = vmatprep.mubr.msk.f32.mxu1 %vm1223_vm0, %v764_v2  ;;  %v279_v2 = vld [vmem:[%s6619_s29 + $0x360] sm:$0xff] }
  0xd1   : > { %3029 = vmatmul.mubr.f32.gmra.mrb[80].mxu0 %v251_v3  ;;  %4309 = vmatmul.mubr.f32.gmra.mrb[80].mxu1 %v763_v4  ;;  %v791_v3 = vld [vmem:[%s6619_s29 + $0x1360] sm:$0xff]  ;;  %v282_v4 = vld [vmem:[%s6619_s29 + $0x378] sm:$0xff] }
  0xd2   : > { %6009 = vmatprep.mubr.msk.f32.mxu0 %vm1223_vm0, %v254_v5  ;;  %6265 = vmatprep.mubr.msk.f32.mxu1 %vm1223_vm0, %v766_v6  ;;  %v794_v5 = vld [vmem:[%s6619_s29 + $0x1378] sm:$0xff] }
  0xd5   : > { %3034 = vmatmul.mubr.f32.gmra.mrb[82].mxu0 %v253_v7  ;;  %4314 = vmatmul.mubr.f32.gmra.mrb[82].mxu1 %v765_v8 }
  0xd6   : > { %6010 = vmatprep.mubr.msk.f32.mxu0 %vm1223_vm0, %v256_v9  ;;  %6266 = vmatprep.mubr.msk.f32.mxu1 %vm1223_vm0, %v768_v10 }
  0xd9   : > { %3039 = vmatmul.mubr.f32.gmra.mrb[84].mxu0 %v255_v11  ;;  %4319 = vmatmul.mubr.f32.gmra.mrb[84].mxu1 %v767_v12  ;;  %v281_v12 = vld [vmem:[%s6619_s29 + $0x370] sm:$0xff] }
  0xda   : > { %6011 = vmatprep.mubr.msk.f32.mxu0 %vm1223_vm0, %v258_v13  ;;  %6267 = vmatprep.mubr.msk.f32.mxu1 %vm1223_vm0, %v770_v14  ;;  %v793_v13 = vld [vmem:[%s6619_s29 + $0x1370] sm:$0xff]  ;;  %v284_v14 = vld [vmem:[%s6619_s29 + $0x388] sm:$0xff] }
  0xdd   : > { %3044 = vmatmul.mubr.f32.gmra.mrb[86].mxu0 %v257_v15  ;;  %4324 = vmatmul.mubr.f32.gmra.mrb[86].mxu1 %v769_v16  ;;  %v796_v15 = vld [vmem:[%s6619_s29 + $0x1388] sm:$0xff] }
  0xde   : > { %6012 = vmatprep.mubr.msk.f32.mxu0 %vm1223_vm0, %v260_v17  ;;  %6268 = vmatprep.mubr.msk.f32.mxu1 %vm1223_vm0, %v772_v18 }
  0xe1   : > { %3049 = vmatmul.mubr.f32.gmra.mrb[88].mxu0 %v259_v19  ;;  %4329 = vmatmul.mubr.f32.gmra.mrb[88].mxu1 %v771_v20 }
  0xe2   : > { %6013 = vmatprep.mubr.msk.f32.mxu0 %vm1223_vm0, %v262_v21  ;;  %6269 = vmatprep.mubr.msk.f32.mxu1 %vm1223_vm0, %v774_v22  ;;  %v283_v22 = vld [vmem:[%s6619_s29 + $0x380] sm:$0xff] }
  0xe5   : > { %3054 = vmatmul.mubr.f32.gmra.mrb[90].mxu0 %v261_v23  ;;  %4334 = vmatmul.mubr.f32.gmra.mrb[90].mxu1 %v773_v24  ;;  %v795_v23 = vld [vmem:[%s6619_s29 + $0x1380] sm:$0xff]  ;;  %v286_v24 = vld [vmem:[%s6619_s29 + $0x398] sm:$0xff] }
  0xe6   : > { %6014 = vmatprep.mubr.msk.f32.mxu0 %vm1223_vm0, %v264_v25  ;;  %6270 = vmatprep.mubr.msk.f32.mxu1 %vm1223_vm0, %v776_v26  ;;  %v798_v25 = vld [vmem:[%s6619_s29 + $0x1398] sm:$0xff] }
  0xe9   : > { %3059 = vmatmul.mubr.f32.gmra.mrb[92].mxu0 %v263_v27  ;;  %4339 = vmatmul.mubr.f32.gmra.mrb[92].mxu1 %v775_v28 }
  0xea   : > { %6015 = vmatprep.mubr.msk.f32.mxu0 %vm1223_vm0, %v266_v29  ;;  %6271 = vmatprep.mubr.msk.f32.mxu1 %vm1223_vm0, %v778_v30 }
  0xed   : > { %3064 = vmatmul.mubr.f32.gmra.mrb[94].mxu0 %v265_v31  ;;  %4344 = vmatmul.mubr.f32.gmra.mrb[94].mxu1 %v777_v32  ;;  %v285_v32 = vld [vmem:[%s6619_s29 + $0x390] sm:$0xff] }
  0xee   : > { %6016 = vmatprep.mubr.msk.f32.mxu0 %vm1223_vm0, %v268_v33  ;;  %6272 = vmatprep.mubr.msk.f32.mxu1 %vm1223_vm0, %v780_v34  ;;  %v797_v33 = vld [vmem:[%s6619_s29 + $0x1390] sm:$0xff]  ;;  %v288_v34 = vld [vmem:[%s6619_s29 + $0x3a8] sm:$0xff] }
  0xf1   : > { %3069 = vmatmul.mubr.f32.gmra.mrb[96].mxu0 %v267_v35  ;;  %4349 = vmatmul.mubr.f32.gmra.mrb[96].mxu1 %v779_v36  ;;  %v800_v35 = vld [vmem:[%s6619_s29 + $0x13a8] sm:$0xff] }
  0xf2   : > { %6017 = vmatprep.mubr.msk.f32.mxu0 %vm1223_vm0, %v270_v37  ;;  %6273 = vmatprep.mubr.msk.f32.mxu1 %vm1223_vm0, %v782_v38 }
  0xf5   : > { %3074 = vmatmul.mubr.f32.gmra.mrb[98].mxu0 %v269_v39  ;;  %4354 = vmatmul.mubr.f32.gmra.mrb[98].mxu1 %v781_v40 }
  0xf6   : > { %6018 = vmatprep.mubr.msk.f32.mxu0 %vm1223_vm0, %v272_v41  ;;  %6274 = vmatprep.mubr.msk.f32.mxu1 %vm1223_vm0, %v784_v42  ;;  %v287_v42 = vld [vmem:[%s6619_s29 + $0x3a0] sm:$0xff] }
  0xf9   : > { %3079 = vmatmul.mubr.f32.gmra.mrb[100].mxu0 %v271_v43  ;;  %4359 = vmatmul.mubr.f32.gmra.mrb[100].mxu1 %v783_v44  ;;  %v799_v43 = vld [vmem:[%s6619_s29 + $0x13a0] sm:$0xff]  ;;  %v290_v44 = vld [vmem:[%s6619_s29 + $0x3b8] sm:$0xff] }
  0xfa   : > { %6019 = vmatprep.mubr.msk.f32.mxu0 %vm1223_vm0, %v274_v45  ;;  %6275 = vmatprep.mubr.msk.f32.mxu1 %vm1223_vm0, %v786_v46  ;;  %v802_v45 = vld [vmem:[%s6619_s29 + $0x13b8] sm:$0xff] }
  0xfd   : > { %3084 = vmatmul.mubr.f32.gmra.mrb[102].mxu0 %v273_v47  ;;  %4364 = vmatmul.mubr.f32.gmra.mrb[102].mxu1 %v785_v48 }
  0xfe   : > { %6020 = vmatprep.mubr.msk.f32.mxu0 %vm1223_vm0, %v276_v49  ;;  %6276 = vmatprep.mubr.msk.f32.mxu1 %vm1223_vm0, %v788_v50 }
 0x101   : > { %3089 = vmatmul.mubr.f32.gmra.mrb[104].mxu0 %v275_v51  ;;  %4369 = vmatmul.mubr.f32.gmra.mrb[104].mxu1 %v787_v52  ;;  %v289_v52 = vld [vmem:[%s6619_s29 + $0x3b0] sm:$0xff] }
 0x102   : > { %6021 = vmatprep.mubr.msk.f32.mxu0 %vm1223_vm0, %v278_v53  ;;  %6277 = vmatprep.mubr.msk.f32.mxu1 %vm1223_vm0, %v790_v54  ;;  %v801_v53 = vld [vmem:[%s6619_s29 + $0x13b0] sm:$0xff]  ;;  %v292_v54 = vld [vmem:[%s6619_s29 + $0x3c8] sm:$0xff] }
 0x104   : > { %v2830_v60 = vpop.f32.mrb[0].mxu0  ;;  %v4110_v61 = vpop.f32.mrb[0].mxu1 }
 0x105   : > { %v2831_v62 = vadd.f32 %v7006_v55, %v2830_v60  ;;  %v4111_v63 = vadd.f32 %v7006_v55, %v4110_v61  ;;  %v2832_v0 = vpop.f32.mrb[1].mxu0  ;;  %3094 = vmatmul.mubr.f32.gmra.mrb[106].mxu0 %v277_v56  ;;  %v4112_v1 = vpop.f32.mrb[1].mxu1  ;;  %4374 = vmatmul.mubr.f32.gmra.mrb[106].mxu1 %v789_v57  ;;  %v804_v56 = vld [vmem:[%s6619_s29 + $0x13c8] sm:$0xff] }
 0x106   : > { %6022 = vmatprep.mubr.msk.f32.mxu0 %vm1223_vm0, %v280_v58  ;;  %6278 = vmatprep.mubr.msk.f32.mxu1 %vm1223_vm0, %v792_v59  ;;  %v803_v0 = vld [vmem:[%s6619_s29 + $0x13c0] sm:$0xff]  ;;  %v294_v1 = vld [vmem:[%s6619_s29 + $0x3d8] sm:$0xff] }
 0x107   : > { %5390 = vst.msk [vmem:[%s7017_s16] sm:$0xff] %vm5389_vm2, %v2831_v62  ;;  %5646 = vst.msk [vmem:[%s7017_s16 + $0x800] sm:$0xff] %vm5389_vm2, %v4111_v63  ;;  %v291_v63 = vld [vmem:[%s6619_s29 + $0x3c0] sm:$0xff] }
 0x108   : > { %v2835_v6 = vpop.f32.mrb[2].mxu0  ;;  %v4115_v7 = vpop.f32.mrb[2].mxu1 }
 0x109   : > { %v2836_v8 = vadd.f32 %v7006_v55, %v2835_v6  ;;  %v4116_v9 = vadd.f32 %v7006_v55, %v4115_v7  ;;  %v2837_v10 = vpop.f32.mrb[3].mxu0  ;;  %3099 = vmatmul.mubr.f32.gmra.mrb[108].mxu0 %v279_v2  ;;  %v4117_v11 = vpop.f32.mrb[3].mxu1  ;;  %4379 = vmatmul.mubr.f32.gmra.mrb[108].mxu1 %v791_v3  ;;  %v806_v2 = vld [vmem:[%s6619_s29 + $0x13d8] sm:$0xff] }
 0x10a   : > { %6023 = vmatprep.mubr.msk.f32.mxu0 %vm1223_vm0, %v282_v4  ;;  %6279 = vmatprep.mubr.msk.f32.mxu1 %vm1223_vm0, %v794_v5  ;;  %v805_v10 = vld [vmem:[%s6619_s29 + $0x13d0] sm:$0xff]  ;;  %v296_v11 = vld [vmem:[%s6619_s29 + $0x3e8] sm:$0xff] }
 0x10b   : > { %5391 = vst.msk [vmem:[%s7017_s16 + $0x8] sm:$0xff] %vm5389_vm2, %v2836_v8  ;;  %5647 = vst.msk [vmem:[%s7017_s16 + $0x808] sm:$0xff] %vm5389_vm2, %v4116_v9  ;;  %v293_v9 = vld [vmem:[%s6619_s29 + $0x3d0] sm:$0xff] }
 0x10c   : > { %v2840_v16 = vpop.f32.mrb[4].mxu0  ;;  %v4120_v17 = vpop.f32.mrb[4].mxu1 }
 0x10d   : > { %v2841_v18 = vadd.f32 %v7006_v55, %v2840_v16  ;;  %v4121_v19 = vadd.f32 %v7006_v55, %v4120_v17  ;;  %v2842_v20 = vpop.f32.mrb[5].mxu0  ;;  %3104 = vmatmul.mubr.f32.gmra.mrb[110].mxu0 %v281_v12  ;;  %v4122_v21 = vpop.f32.mrb[5].mxu1  ;;  %4384 = vmatmul.mubr.f32.gmra.mrb[110].mxu1 %v793_v13  ;;  %v808_v12 = vld [vmem:[%s6619_s29 + $0x13e8] sm:$0xff] }
 0x10e   : > { %6024 = vmatprep.mubr.msk.f32.mxu0 %vm1223_vm0, %v284_v14  ;;  %6280 = vmatprep.mubr.msk.f32.mxu1 %vm1223_vm0, %v796_v15  ;;  %v807_v20 = vld [vmem:[%s6619_s29 + $0x13e0] sm:$0xff]  ;;  %v298_v21 = vld [vmem:[%s6619_s29 + $0x3f8] sm:$0xff] }
 0x10f   : > { %5392 = vst.msk [vmem:[%s7017_s16 + $0x10] sm:$0xff] %vm5389_vm2, %v2841_v18  ;;  %5648 = vst.msk [vmem:[%s7017_s16 + $0x810] sm:$0xff] %vm5389_vm2, %v4121_v19  ;;  %v295_v19 = vld [vmem:[%s6619_s29 + $0x3e0] sm:$0xff] }
 0x110   : > { %v2845_v26 = vpop.f32.mrb[6].mxu0  ;;  %v4125_v27 = vpop.f32.mrb[6].mxu1 }
 0x111   : > { %v2846_v28 = vadd.f32 %v7006_v55, %v2845_v26  ;;  %v4126_v29 = vadd.f32 %v7006_v55, %v4125_v27  ;;  %v2847_v30 = vpop.f32.mrb[7].mxu0  ;;  %3109 = vmatmul.mubr.f32.gmra.mrb[112].mxu0 %v283_v22  ;;  %v4127_v31 = vpop.f32.mrb[7].mxu1  ;;  %4389 = vmatmul.mubr.f32.gmra.mrb[112].mxu1 %v795_v23  ;;  %v810_v22 = vld [vmem:[%s6619_s29 + $0x13f8] sm:$0xff] }
 0x112   : > { %6025 = vmatprep.mubr.msk.f32.mxu0 %vm1223_vm0, %v286_v24  ;;  %6281 = vmatprep.mubr.msk.f32.mxu1 %vm1223_vm0, %v798_v25  ;;  %v809_v30 = vld [vmem:[%s6619_s29 + $0x13f0] sm:$0xff]  ;;  %v300_v31 = vld [vmem:[%s6619_s29 + $0x408] sm:$0xff] }
 0x113   : > { %5393 = vst.msk [vmem:[%s7017_s16 + $0x18] sm:$0xff] %vm5389_vm2, %v2846_v28  ;;  %5649 = vst.msk [vmem:[%s7017_s16 + $0x818] sm:$0xff] %vm5389_vm2, %v4126_v29  ;;  %v297_v29 = vld [vmem:[%s6619_s29 + $0x3f0] sm:$0xff] }
 0x114   : > { %v2850_v36 = vpop.f32.mrb[8].mxu0  ;;  %v4130_v37 = vpop.f32.mrb[8].mxu1 }
 0x115   : > { %v2851_v38 = vadd.f32 %v7006_v55, %v2850_v36  ;;  %v4131_v39 = vadd.f32 %v7006_v55, %v4130_v37  ;;  %v2852_v40 = vpop.f32.mrb[9].mxu0  ;;  %3114 = vmatmul.mubr.f32.gmra.mrb[114].mxu0 %v285_v32  ;;  %v4132_v41 = vpop.f32.mrb[9].mxu1  ;;  %4394 = vmatmul.mubr.f32.gmra.mrb[114].mxu1 %v797_v33  ;;  %v812_v32 = vld [vmem:[%s6619_s29 + $0x1408] sm:$0xff] }
 0x116   : > { %6026 = vmatprep.mubr.msk.f32.mxu0 %vm1223_vm0, %v288_v34  ;;  %6282 = vmatprep.mubr.msk.f32.mxu1 %vm1223_vm0, %v800_v35  ;;  %v811_v40 = vld [vmem:[%s6619_s29 + $0x1400] sm:$0xff]  ;;  %v302_v41 = vld [vmem:[%s6619_s29 + $0x418] sm:$0xff] }
 0x117   : > { %5394 = vst.msk [vmem:[%s7017_s16 + $0x20] sm:$0xff] %vm5389_vm2, %v2851_v38  ;;  %5650 = vst.msk [vmem:[%s7017_s16 + $0x820] sm:$0xff] %vm5389_vm2, %v4131_v39  ;;  %v299_v39 = vld [vmem:[%s6619_s29 + $0x400] sm:$0xff] }
 0x118   : > { %v2855_v46 = vpop.f32.mrb[10].mxu0  ;;  %v4135_v47 = vpop.f32.mrb[10].mxu1 }
 0x119   : > { %v2856_v48 = vadd.f32 %v7006_v55, %v2855_v46  ;;  %v4136_v49 = vadd.f32 %v7006_v55, %v4135_v47  ;;  %v2857_v50 = vpop.f32.mrb[11].mxu0  ;;  %3119 = vmatmul.mubr.f32.gmra.mrb[116].mxu0 %v287_v42  ;;  %v4137_v51 = vpop.f32.mrb[11].mxu1  ;;  %4399 = vmatmul.mubr.f32.gmra.mrb[116].mxu1 %v799_v43  ;;  %v814_v42 = vld [vmem:[%s6619_s29 + $0x1418] sm:$0xff] }
 0x11a   : > { %6027 = vmatprep.mubr.msk.f32.mxu0 %vm1223_vm0, %v290_v44  ;;  %6283 = vmatprep.mubr.msk.f32.mxu1 %vm1223_vm0, %v802_v45  ;;  %v813_v50 = vld [vmem:[%s6619_s29 + $0x1410] sm:$0xff]  ;;  %v304_v51 = vld [vmem:[%s6619_s29 + $0x428] sm:$0xff] }
 0x11b   : > { %5395 = vst.msk [vmem:[%s7017_s16 + $0x28] sm:$0xff] %vm5389_vm2, %v2856_v48  ;;  %5651 = vst.msk [vmem:[%s7017_s16 + $0x828] sm:$0xff] %vm5389_vm2, %v4136_v49  ;;  %v301_v49 = vld [vmem:[%s6619_s29 + $0x410] sm:$0xff] }
 0x11c   : > { %v2860_v57 = vpop.f32.mrb[12].mxu0  ;;  %v4140_v58 = vpop.f32.mrb[12].mxu1 }
 0x11d   : > { %v2861_v59 = vadd.f32 %v7006_v55, %v2860_v57  ;;  %v4141_v60 = vadd.f32 %v7006_v55, %v4140_v58  ;;  %v2862_v61 = vpop.f32.mrb[13].mxu0  ;;  %3124 = vmatmul.mubr.f32.gmra.mrb[118].mxu0 %v289_v52  ;;  %v4142_v62 = vpop.f32.mrb[13].mxu1  ;;  %4404 = vmatmul.mubr.f32.gmra.mrb[118].mxu1 %v801_v53  ;;  %v816_v52 = vld [vmem:[%s6619_s29 + $0x1428] sm:$0xff] }
 0x11e   : > { %6028 = vmatprep.mubr.msk.f32.mxu0 %vm1223_vm0, %v292_v54  ;;  %6284 = vmatprep.mubr.msk.f32.mxu1 %vm1223_vm0, %v804_v56  ;;  %v815_v61 = vld [vmem:[%s6619_s29 + $0x1420] sm:$0xff]  ;;  %v306_v62 = vld [vmem:[%s6619_s29 + $0x438] sm:$0xff] }
 0x11f   : > { %5396 = vst.msk [vmem:[%s7017_s16 + $0x30] sm:$0xff] %vm5389_vm2, %v2861_v59  ;;  %5652 = vst.msk [vmem:[%s7017_s16 + $0x830] sm:$0xff] %vm5389_vm2, %v4141_v60  ;;  %v303_v60 = vld [vmem:[%s6619_s29 + $0x420] sm:$0xff] }
 0x120   : > { %v2865_v3 = vpop.f32.mrb[14].mxu0  ;;  %v4145_v4 = vpop.f32.mrb[14].mxu1 }
 0x121   : > { %v2866_v5 = vadd.f32 %v7006_v55, %v2865_v3  ;;  %v4146_v6 = vadd.f32 %v7006_v55, %v4145_v4  ;;  %v2867_v7 = vpop.f32.mrb[15].mxu0  ;;  %3129 = vmatmul.mubr.f32.gmra.mrb[120].mxu0 %v291_v63  ;;  %v4147_v8 = vpop.f32.mrb[15].mxu1  ;;  %4409 = vmatmul.mubr.f32.gmra.mrb[120].mxu1 %v803_v0  ;;  %v818_v63 = vld [vmem:[%s6619_s29 + $0x1438] sm:$0xff] }
 0x122   : > { %6029 = vmatprep.mubr.msk.f32.mxu0 %vm1223_vm0, %v294_v1  ;;  %6285 = vmatprep.mubr.msk.f32.mxu1 %vm1223_vm0, %v806_v2  ;;  %v817_v7 = vld [vmem:[%s6619_s29 + $0x1430] sm:$0xff]  ;;  %v308_v8 = vld [vmem:[%s6619_s29 + $0x448] sm:$0xff] }
 0x123   : > { %5397 = vst.msk [vmem:[%s7017_s16 + $0x38] sm:$0xff] %vm5389_vm2, %v2866_v5  ;;  %5653 = vst.msk [vmem:[%s7017_s16 + $0x838] sm:$0xff] %vm5389_vm2, %v4146_v6  ;;  %v305_v6 = vld [vmem:[%s6619_s29 + $0x430] sm:$0xff] }
 0x124   : > { %v2870_v13 = vpop.f32.mrb[16].mxu0  ;;  %v4150_v14 = vpop.f32.mrb[16].mxu1 }
 0x125   : > { %v2871_v15 = vadd.f32 %v7006_v55, %v2870_v13  ;;  %v4151_v16 = vadd.f32 %v7006_v55, %v4150_v14  ;;  %v2872_v17 = vpop.f32.mrb[17].mxu0  ;;  %3134 = vmatmul.mubr.f32.gmra.mrb[122].mxu0 %v293_v9  ;;  %v4152_v18 = vpop.f32.mrb[17].mxu1  ;;  %4414 = vmatmul.mubr.f32.gmra.mrb[122].mxu1 %v805_v10  ;;  %v820_v9 = vld [vmem:[%s6619_s29 + $0x1448] sm:$0xff] }
 0x126   : > { %6030 = vmatprep.mubr.msk.f32.mxu0 %vm1223_vm0, %v296_v11  ;;  %6286 = vmatprep.mubr.msk.f32.mxu1 %vm1223_vm0, %v808_v12  ;;  %v819_v17 = vld [vmem:[%s6619_s29 + $0x1440] sm:$0xff]  ;;  %v310_v18 = vld [vmem:[%s6619_s29 + $0x458] sm:$0xff] }
 0x127   : > { %5398 = vst.msk [vmem:[%s7017_s16 + $0x40] sm:$0xff] %vm5389_vm2, %v2871_v15  ;;  %5654 = vst.msk [vmem:[%s7017_s16 + $0x840] sm:$0xff] %vm5389_vm2, %v4151_v16  ;;  %v307_v16 = vld [vmem:[%s6619_s29 + $0x440] sm:$0xff] }
 0x128   : > { %v2875_v23 = vpop.f32.mrb[18].mxu0  ;;  %v4155_v24 = vpop.f32.mrb[18].mxu1 }
 0x129   : > { %v2876_v25 = vadd.f32 %v7006_v55, %v2875_v23  ;;  %v4156_v26 = vadd.f32 %v7006_v55, %v4155_v24  ;;  %v2877_v27 = vpop.f32.mrb[19].mxu0  ;;  %3139 = vmatmul.mubr.f32.gmra.mrb[124].mxu0 %v295_v19  ;;  %v4157_v28 = vpop.f32.mrb[19].mxu1  ;;  %4419 = vmatmul.mubr.f32.gmra.mrb[124].mxu1 %v807_v20  ;;  %v822_v19 = vld [vmem:[%s6619_s29 + $0x1458] sm:$0xff] }
 0x12a   : > { %6031 = vmatprep.mubr.msk.f32.mxu0 %vm1223_vm0, %v298_v21  ;;  %6287 = vmatprep.mubr.msk.f32.mxu1 %vm1223_vm0, %v810_v22  ;;  %v821_v27 = vld [vmem:[%s6619_s29 + $0x1450] sm:$0xff]  ;;  %v312_v28 = vld [vmem:[%s6619_s29 + $0x468] sm:$0xff] }
 0x12b   : > { %5399 = vst.msk [vmem:[%s7017_s16 + $0x48] sm:$0xff] %vm5389_vm2, %v2876_v25  ;;  %5655 = vst.msk [vmem:[%s7017_s16 + $0x848] sm:$0xff] %vm5389_vm2, %v4156_v26  ;;  %v309_v26 = vld [vmem:[%s6619_s29 + $0x450] sm:$0xff] }
 0x12c   : > { %v2880_v33 = vpop.f32.mrb[20].mxu0  ;;  %v4160_v34 = vpop.f32.mrb[20].mxu1 }
 0x12d   : > { %v2881_v35 = vadd.f32 %v7006_v55, %v2880_v33  ;;  %v4161_v36 = vadd.f32 %v7006_v55, %v4160_v34  ;;  %v2882_v37 = vpop.f32.mrb[21].mxu0  ;;  %3144 = vmatmul.mubr.f32.gmra.mrb[126].mxu0 %v297_v29  ;;  %v4162_v38 = vpop.f32.mrb[21].mxu1  ;;  %4424 = vmatmul.mubr.f32.gmra.mrb[126].mxu1 %v809_v30  ;;  %v824_v29 = vld [vmem:[%s6619_s29 + $0x1468] sm:$0xff] }
 0x12e   : > { %6032 = vmatprep.mubr.msk.f32.mxu0 %vm1223_vm0, %v300_v31  ;;  %6288 = vmatprep.mubr.msk.f32.mxu1 %vm1223_vm0, %v812_v32  ;;  %v823_v37 = vld [vmem:[%s6619_s29 + $0x1460] sm:$0xff]  ;;  %v314_v38 = vld [vmem:[%s6619_s29 + $0x478] sm:$0xff] }
 0x12f   : > { %5400 = vst.msk [vmem:[%s7017_s16 + $0x50] sm:$0xff] %vm5389_vm2, %v2881_v35  ;;  %5656 = vst.msk [vmem:[%s7017_s16 + $0x850] sm:$0xff] %vm5389_vm2, %v4161_v36  ;;  %v311_v36 = vld [vmem:[%s6619_s29 + $0x460] sm:$0xff] }
 0x130   : > { %v2885_v43 = vpop.f32.mrb[22].mxu0  ;;  %v4165_v44 = vpop.f32.mrb[22].mxu1 }
 0x131   : > { %v2886_v45 = vadd.f32 %v7006_v55, %v2885_v43  ;;  %v4166_v46 = vadd.f32 %v7006_v55, %v4165_v44  ;;  %v2887_v47 = vpop.f32.mrb[23].mxu0  ;;  %3149 = vmatmul.mubr.f32.gmra.mrb[128].mxu0 %v299_v39  ;;  %v4167_v48 = vpop.f32.mrb[23].mxu1  ;;  %4429 = vmatmul.mubr.f32.gmra.mrb[128].mxu1 %v811_v40  ;;  %v826_v39 = vld [vmem:[%s6619_s29 + $0x1478] sm:$0xff] }
 0x132   : > { %6033 = vmatprep.mubr.msk.f32.mxu0 %vm1223_vm0, %v302_v41  ;;  %6289 = vmatprep.mubr.msk.f32.mxu1 %vm1223_vm0, %v814_v42  ;;  %v825_v47 = vld [vmem:[%s6619_s29 + $0x1470] sm:$0xff]  ;;  %v316_v48 = vld [vmem:[%s6619_s29 + $0x488] sm:$0xff] }
 0x133   : > { %5401 = vst.msk [vmem:[%s7017_s16 + $0x58] sm:$0xff] %vm5389_vm2, %v2886_v45  ;;  %5657 = vst.msk [vmem:[%s7017_s16 + $0x858] sm:$0xff] %vm5389_vm2, %v4166_v46  ;;  %v313_v46 = vld [vmem:[%s6619_s29 + $0x470] sm:$0xff] }
 0x134   : > { %v2890_v53 = vpop.f32.mrb[24].mxu0  ;;  %v4170_v54 = vpop.f32.mrb[24].mxu1 }
 0x135   : > { %v2891_v56 = vadd.f32 %v7006_v55, %v2890_v53  ;;  %v4171_v57 = vadd.f32 %v7006_v55, %v4170_v54  ;;  %v2892_v58 = vpop.f32.mrb[25].mxu0  ;;  %3154 = vmatmul.mubr.f32.gmra.mrb[130].mxu0 %v301_v49  ;;  %v4172_v59 = vpop.f32.mrb[25].mxu1  ;;  %4434 = vmatmul.mubr.f32.gmra.mrb[130].mxu1 %v813_v50  ;;  %v828_v49 = vld [vmem:[%s6619_s29 + $0x1488] sm:$0xff] }
 0x136   : > { %6034 = vmatprep.mubr.msk.f32.mxu0 %vm1223_vm0, %v304_v51  ;;  %6290 = vmatprep.mubr.msk.f32.mxu1 %vm1223_vm0, %v816_v52  ;;  %v827_v58 = vld [vmem:[%s6619_s29 + $0x1480] sm:$0xff]  ;;  %v318_v59 = vld [vmem:[%s6619_s29 + $0x498] sm:$0xff] }
 0x137   : > { %5402 = vst.msk [vmem:[%s7017_s16 + $0x60] sm:$0xff] %vm5389_vm2, %v2891_v56  ;;  %5658 = vst.msk [vmem:[%s7017_s16 + $0x860] sm:$0xff] %vm5389_vm2, %v4171_v57  ;;  %v315_v57 = vld [vmem:[%s6619_s29 + $0x480] sm:$0xff] }
 0x138   : > { %v2895_v0 = vpop.f32.mrb[26].mxu0  ;;  %v4175_v1 = vpop.f32.mrb[26].mxu1 }
 0x139   : > { %v2896_v2 = vadd.f32 %v7006_v55, %v2895_v0  ;;  %v4176_v3 = vadd.f32 %v7006_v55, %v4175_v1  ;;  %v2897_v4 = vpop.f32.mrb[27].mxu0  ;;  %3159 = vmatmul.mubr.f32.gmra.mrb[132].mxu0 %v303_v60  ;;  %v4177_v5 = vpop.f32.mrb[27].mxu1  ;;  %4439 = vmatmul.mubr.f32.gmra.mrb[132].mxu1 %v815_v61  ;;  %v830_v60 = vld [vmem:[%s6619_s29 + $0x1498] sm:$0xff] }
 0x13a   : > { %6035 = vmatprep.mubr.msk.f32.mxu0 %vm1223_vm0, %v306_v62  ;;  %6291 = vmatprep.mubr.msk.f32.mxu1 %vm1223_vm0, %v818_v63  ;;  %v829_v4 = vld [vmem:[%s6619_s29 + $0x1490] sm:$0xff]  ;;  %v320_v5 = vld [vmem:[%s6619_s29 + $0x4a8] sm:$0xff] }
 0x13b   : > { %5403 = vst.msk [vmem:[%s7017_s16 + $0x68] sm:$0xff] %vm5389_vm2, %v2896_v2  ;;  %5659 = vst.msk [vmem:[%s7017_s16 + $0x868] sm:$0xff] %vm5389_vm2, %v4176_v3  ;;  %v317_v3 = vld [vmem:[%s6619_s29 + $0x490] sm:$0xff] }
 0x13c   : > { %v2900_v10 = vpop.f32.mrb[28].mxu0  ;;  %v4180_v11 = vpop.f32.mrb[28].mxu1 }
 0x13d   : > { %v2901_v12 = vadd.f32 %v7006_v55, %v2900_v10  ;;  %v4181_v13 = vadd.f32 %v7006_v55, %v4180_v11  ;;  %v2902_v14 = vpop.f32.mrb[29].mxu0  ;;  %3164 = vmatmul.mubr.f32.gmra.mrb[134].mxu0 %v305_v6  ;;  %v4182_v15 = vpop.f32.mrb[29].mxu1  ;;  %4444 = vmatmul.mubr.f32.gmra.mrb[134].mxu1 %v817_v7  ;;  %v832_v6 = vld [vmem:[%s6619_s29 + $0x14a8] sm:$0xff] }
 0x13e   : > { %6036 = vmatprep.mubr.msk.f32.mxu0 %vm1223_vm0, %v308_v8  ;;  %6292 = vmatprep.mubr.msk.f32.mxu1 %vm1223_vm0, %v820_v9  ;;  %v831_v14 = vld [vmem:[%s6619_s29 + $0x14a0] sm:$0xff]  ;;  %v322_v15 = vld [vmem:[%s6619_s29 + $0x4b8] sm:$0xff] }
 0x13f   : > { %5404 = vst.msk [vmem:[%s7017_s16 + $0x70] sm:$0xff] %vm5389_vm2, %v2901_v12  ;;  %5660 = vst.msk [vmem:[%s7017_s16 + $0x870] sm:$0xff] %vm5389_vm2, %v4181_v13  ;;  %v319_v13 = vld [vmem:[%s6619_s29 + $0x4a0] sm:$0xff] }
 0x140   : > { %v2905_v20 = vpop.f32.mrb[30].mxu0  ;;  %v4185_v21 = vpop.f32.mrb[30].mxu1 }
 0x141   : > { %v2906_v22 = vadd.f32 %v7006_v55, %v2905_v20  ;;  %v4186_v23 = vadd.f32 %v7006_v55, %v4185_v21  ;;  %v2907_v24 = vpop.f32.mrb[31].mxu0  ;;  %3169 = vmatmul.mubr.f32.gmra.mrb[136].mxu0 %v307_v16  ;;  %v4187_v25 = vpop.f32.mrb[31].mxu1  ;;  %4449 = vmatmul.mubr.f32.gmra.mrb[136].mxu1 %v819_v17  ;;  %v834_v16 = vld [vmem:[%s6619_s29 + $0x14b8] sm:$0xff] }
 0x142   : > { %6037 = vmatprep.mubr.msk.f32.mxu0 %vm1223_vm0, %v310_v18  ;;  %6293 = vmatprep.mubr.msk.f32.mxu1 %vm1223_vm0, %v822_v19  ;;  %v833_v24 = vld [vmem:[%s6619_s29 + $0x14b0] sm:$0xff]  ;;  %v324_v25 = vld [vmem:[%s6619_s29 + $0x4c8] sm:$0xff] }
 0x143   : > { %5405 = vst.msk [vmem:[%s7017_s16 + $0x78] sm:$0xff] %vm5389_vm2, %v2906_v22  ;;  %5661 = vst.msk [vmem:[%s7017_s16 + $0x878] sm:$0xff] %vm5389_vm2, %v4186_v23  ;;  %v321_v23 = vld [vmem:[%s6619_s29 + $0x4b0] sm:$0xff] }
 0x144   : > { %v2910_v30 = vpop.f32.mrb[32].mxu0  ;;  %v4190_v31 = vpop.f32.mrb[32].mxu1 }
 0x145   : > { %v2911_v32 = vadd.f32 %v7006_v55, %v2910_v30  ;;  %v4191_v33 = vadd.f32 %v7006_v55, %v4190_v31  ;;  %v2912_v34 = vpop.f32.mrb[33].mxu0  ;;  %3174 = vmatmul.mubr.f32.gmra.mrb[138].mxu0 %v309_v26  ;;  %v4192_v35 = vpop.f32.mrb[33].mxu1  ;;  %4454 = vmatmul.mubr.f32.gmra.mrb[138].mxu1 %v821_v27  ;;  %v836_v26 = vld [vmem:[%s6619_s29 + $0x14c8] sm:$0xff] }
 0x146   : > { %6038 = vmatprep.mubr.msk.f32.mxu0 %vm1223_vm0, %v312_v28  ;;  %6294 = vmatprep.mubr.msk.f32.mxu1 %vm1223_vm0, %v824_v29  ;;  %v835_v34 = vld [vmem:[%s6619_s29 + $0x14c0] sm:$0xff]  ;;  %v326_v35 = vld [vmem:[%s6619_s29 + $0x4d8] sm:$0xff] }
 0x147   : > { %5406 = vst.msk [vmem:[%s7017_s16 + $0x80] sm:$0xff] %vm5389_vm2, %v2911_v32  ;;  %5662 = vst.msk [vmem:[%s7017_s16 + $0x880] sm:$0xff] %vm5389_vm2, %v4191_v33  ;;  %v323_v33 = vld [vmem:[%s6619_s29 + $0x4c0] sm:$0xff] }
 0x148   : > { %v2915_v40 = vpop.f32.mrb[34].mxu0  ;;  %v4195_v41 = vpop.f32.mrb[34].mxu1 }
 0x149   : > { %v2916_v42 = vadd.f32 %v7006_v55, %v2915_v40  ;;  %v4196_v43 = vadd.f32 %v7006_v55, %v4195_v41  ;;  %v2917_v44 = vpop.f32.mrb[35].mxu0  ;;  %3179 = vmatmul.mubr.f32.gmra.mrb[140].mxu0 %v311_v36  ;;  %v4197_v45 = vpop.f32.mrb[35].mxu1  ;;  %4459 = vmatmul.mubr.f32.gmra.mrb[140].mxu1 %v823_v37  ;;  %v838_v36 = vld [vmem:[%s6619_s29 + $0x14d8] sm:$0xff] }
 0x14a   : > { %6039 = vmatprep.mubr.msk.f32.mxu0 %vm1223_vm0, %v314_v38  ;;  %6295 = vmatprep.mubr.msk.f32.mxu1 %vm1223_vm0, %v826_v39  ;;  %v837_v44 = vld [vmem:[%s6619_s29 + $0x14d0] sm:$0xff]  ;;  %v328_v45 = vld [vmem:[%s6619_s29 + $0x4e8] sm:$0xff] }
 0x14b   : > { %5407 = vst.msk [vmem:[%s7017_s16 + $0x88] sm:$0xff] %vm5389_vm2, %v2916_v42  ;;  %5663 = vst.msk [vmem:[%s7017_s16 + $0x888] sm:$0xff] %vm5389_vm2, %v4196_v43  ;;  %v325_v43 = vld [vmem:[%s6619_s29 + $0x4d0] sm:$0xff] }
 0x14c   : > { %v2920_v50 = vpop.f32.mrb[36].mxu0  ;;  %v4200_v51 = vpop.f32.mrb[36].mxu1 }
 0x14d   : > { %v2921_v52 = vadd.f32 %v7006_v55, %v2920_v50  ;;  %v4201_v53 = vadd.f32 %v7006_v55, %v4200_v51  ;;  %v2922_v54 = vpop.f32.mrb[37].mxu0  ;;  %3184 = vmatmul.mubr.f32.gmra.mrb[142].mxu0 %v313_v46  ;;  %v4202_v56 = vpop.f32.mrb[37].mxu1  ;;  %4464 = vmatmul.mubr.f32.gmra.mrb[142].mxu1 %v825_v47  ;;  %v840_v46 = vld [vmem:[%s6619_s29 + $0x14e8] sm:$0xff] }
 0x14e   : > { %6040 = vmatprep.mubr.msk.f32.mxu0 %vm1223_vm0, %v316_v48  ;;  %6296 = vmatprep.mubr.msk.f32.mxu1 %vm1223_vm0, %v828_v49  ;;  %v839_v54 = vld [vmem:[%s6619_s29 + $0x14e0] sm:$0xff]  ;;  %v330_v56 = vld [vmem:[%s6619_s29 + $0x4f8] sm:$0xff] }
 0x14f   : > { %5408 = vst.msk [vmem:[%s7017_s16 + $0x90] sm:$0xff] %vm5389_vm2, %v2921_v52  ;;  %5664 = vst.msk [vmem:[%s7017_s16 + $0x890] sm:$0xff] %vm5389_vm2, %v4201_v53  ;;  %v327_v53 = vld [vmem:[%s6619_s29 + $0x4e0] sm:$0xff] }
 0x150   : > { %v2925_v61 = vpop.f32.mrb[38].mxu0  ;;  %v4205_v62 = vpop.f32.mrb[38].mxu1 }
 0x151   : > { %v2926_v63 = vadd.f32 %v7006_v55, %v2925_v61  ;;  %v4206_v0 = vadd.f32 %v7006_v55, %v4205_v62  ;;  %v2927_v1 = vpop.f32.mrb[39].mxu0  ;;  %3189 = vmatmul.mubr.f32.gmra.mrb[144].mxu0 %v315_v57  ;;  %v4207_v2 = vpop.f32.mrb[39].mxu1  ;;  %4469 = vmatmul.mubr.f32.gmra.mrb[144].mxu1 %v827_v58  ;;  %v842_v57 = vld [vmem:[%s6619_s29 + $0x14f8] sm:$0xff] }
 0x152   : > { %6041 = vmatprep.mubr.msk.f32.mxu0 %vm1223_vm0, %v318_v59  ;;  %6297 = vmatprep.mubr.msk.f32.mxu1 %vm1223_vm0, %v830_v60  ;;  %v841_v1 = vld [vmem:[%s6619_s29 + $0x14f0] sm:$0xff]  ;;  %v332_v2 = vld [vmem:[%s6619_s29 + $0x508] sm:$0xff] }
 0x153   : > { %5409 = vst.msk [vmem:[%s7017_s16 + $0x98] sm:$0xff] %vm5389_vm2, %v2926_v63  ;;  %5665 = vst.msk [vmem:[%s7017_s16 + $0x898] sm:$0xff] %vm5389_vm2, %v4206_v0  ;;  %v329_v0 = vld [vmem:[%s6619_s29 + $0x4f0] sm:$0xff] }
 0x154   : > { %v2930_v7 = vpop.f32.mrb[40].mxu0  ;;  %v4210_v8 = vpop.f32.mrb[40].mxu1 }
 0x155   : > { %v2931_v9 = vadd.f32 %v7006_v55, %v2930_v7  ;;  %v4211_v10 = vadd.f32 %v7006_v55, %v4210_v8  ;;  %v2932_v11 = vpop.f32.mrb[41].mxu0  ;;  %3194 = vmatmul.mubr.f32.gmra.mrb[146].mxu0 %v317_v3  ;;  %v4212_v12 = vpop.f32.mrb[41].mxu1  ;;  %4474 = vmatmul.mubr.f32.gmra.mrb[146].mxu1 %v829_v4  ;;  %v844_v3 = vld [vmem:[%s6619_s29 + $0x1508] sm:$0xff] }
 0x156   : > { %6042 = vmatprep.mubr.msk.f32.mxu0 %vm1223_vm0, %v320_v5  ;;  %6298 = vmatprep.mubr.msk.f32.mxu1 %vm1223_vm0, %v832_v6  ;;  %v843_v11 = vld [vmem:[%s6619_s29 + $0x1500] sm:$0xff]  ;;  %v334_v12 = vld [vmem:[%s6619_s29 + $0x518] sm:$0xff] }
 0x157   : > { %5410 = vst.msk [vmem:[%s7017_s16 + $0xa0] sm:$0xff] %vm5389_vm2, %v2931_v9  ;;  %5666 = vst.msk [vmem:[%s7017_s16 + $0x8a0] sm:$0xff] %vm5389_vm2, %v4211_v10  ;;  %v331_v10 = vld [vmem:[%s6619_s29 + $0x500] sm:$0xff] }
 0x158   : > { %v2935_v17 = vpop.f32.mrb[42].mxu0  ;;  %v4215_v18 = vpop.f32.mrb[42].mxu1 }
 0x159   : > { %v2936_v19 = vadd.f32 %v7006_v55, %v2935_v17  ;;  %v4216_v20 = vadd.f32 %v7006_v55, %v4215_v18  ;;  %v2937_v21 = vpop.f32.mrb[43].mxu0  ;;  %3199 = vmatmul.mubr.f32.gmra.mrb[148].mxu0 %v319_v13  ;;  %v4217_v22 = vpop.f32.mrb[43].mxu1  ;;  %4479 = vmatmul.mubr.f32.gmra.mrb[148].mxu1 %v831_v14  ;;  %v846_v13 = vld [vmem:[%s6619_s29 + $0x1518] sm:$0xff] }
 0x15a   : > { %6043 = vmatprep.mubr.msk.f32.mxu0 %vm1223_vm0, %v322_v15  ;;  %6299 = vmatprep.mubr.msk.f32.mxu1 %vm1223_vm0, %v834_v16  ;;  %v845_v21 = vld [vmem:[%s6619_s29 + $0x1510] sm:$0xff]  ;;  %v336_v22 = vld [vmem:[%s6619_s29 + $0x528] sm:$0xff] }
 0x15b   : > { %5411 = vst.msk [vmem:[%s7017_s16 + $0xa8] sm:$0xff] %vm5389_vm2, %v2936_v19  ;;  %5667 = vst.msk [vmem:[%s7017_s16 + $0x8a8] sm:$0xff] %vm5389_vm2, %v4216_v20  ;;  %v333_v20 = vld [vmem:[%s6619_s29 + $0x510] sm:$0xff] }
 0x15c   : > { %v2940_v27 = vpop.f32.mrb[44].mxu0  ;;  %v4220_v28 = vpop.f32.mrb[44].mxu1 }
 0x15d   : > { %v2941_v29 = vadd.f32 %v7006_v55, %v2940_v27  ;;  %v4221_v30 = vadd.f32 %v7006_v55, %v4220_v28  ;;  %v2942_v31 = vpop.f32.mrb[45].mxu0  ;;  %3204 = vmatmul.mubr.f32.gmra.mrb[150].mxu0 %v321_v23  ;;  %v4222_v32 = vpop.f32.mrb[45].mxu1  ;;  %4484 = vmatmul.mubr.f32.gmra.mrb[150].mxu1 %v833_v24  ;;  %v848_v23 = vld [vmem:[%s6619_s29 + $0x1528] sm:$0xff] }
 0x15e   : > { %6044 = vmatprep.mubr.msk.f32.mxu0 %vm1223_vm0, %v324_v25  ;;  %6300 = vmatprep.mubr.msk.f32.mxu1 %vm1223_vm0, %v836_v26  ;;  %v847_v31 = vld [vmem:[%s6619_s29 + $0x1520] sm:$0xff]  ;;  %v338_v32 = vld [vmem:[%s6619_s29 + $0x538] sm:$0xff] }
 0x15f   : > { %5412 = vst.msk [vmem:[%s7017_s16 + $0xb0] sm:$0xff] %vm5389_vm2, %v2941_v29  ;;  %5668 = vst.msk [vmem:[%s7017_s16 + $0x8b0] sm:$0xff] %vm5389_vm2, %v4221_v30  ;;  %v335_v30 = vld [vmem:[%s6619_s29 + $0x520] sm:$0xff] }
 0x160   : > { %v2945_v37 = vpop.f32.mrb[46].mxu0  ;;  %v4225_v38 = vpop.f32.mrb[46].mxu1 }
 0x161   : > { %v2946_v39 = vadd.f32 %v7006_v55, %v2945_v37  ;;  %v4226_v40 = vadd.f32 %v7006_v55, %v4225_v38  ;;  %v2947_v41 = vpop.f32.mrb[47].mxu0  ;;  %3209 = vmatmul.mubr.f32.gmra.mrb[152].mxu0 %v323_v33  ;;  %v4227_v42 = vpop.f32.mrb[47].mxu1  ;;  %4489 = vmatmul.mubr.f32.gmra.mrb[152].mxu1 %v835_v34  ;;  %v850_v33 = vld [vmem:[%s6619_s29 + $0x1538] sm:$0xff] }
 0x162   : > { %6045 = vmatprep.mubr.msk.f32.mxu0 %vm1223_vm0, %v326_v35  ;;  %6301 = vmatprep.mubr.msk.f32.mxu1 %vm1223_vm0, %v838_v36  ;;  %v849_v41 = vld [vmem:[%s6619_s29 + $0x1530] sm:$0xff]  ;;  %v340_v42 = vld [vmem:[%s6619_s29 + $0x548] sm:$0xff] }
 0x163   : > { %5413 = vst.msk [vmem:[%s7017_s16 + $0xb8] sm:$0xff] %vm5389_vm2, %v2946_v39  ;;  %5669 = vst.msk [vmem:[%s7017_s16 + $0x8b8] sm:$0xff] %vm5389_vm2, %v4226_v40  ;;  %v337_v40 = vld [vmem:[%s6619_s29 + $0x530] sm:$0xff] }
 0x164   : > { %v2950_v47 = vpop.f32.mrb[48].mxu0  ;;  %v4230_v48 = vpop.f32.mrb[48].mxu1 }
 0x165   : > { %v2951_v49 = vadd.f32 %v7006_v55, %v2950_v47  ;;  %v4231_v50 = vadd.f32 %v7006_v55, %v4230_v48  ;;  %v2952_v51 = vpop.f32.mrb[49].mxu0  ;;  %3214 = vmatmul.mubr.f32.gmra.mrb[154].mxu0 %v325_v43  ;;  %v4232_v52 = vpop.f32.mrb[49].mxu1  ;;  %4494 = vmatmul.mubr.f32.gmra.mrb[154].mxu1 %v837_v44  ;;  %v852_v43 = vld [vmem:[%s6619_s29 + $0x1548] sm:$0xff] }
 0x166   : > { %6046 = vmatprep.mubr.msk.f32.mxu0 %vm1223_vm0, %v328_v45  ;;  %6302 = vmatprep.mubr.msk.f32.mxu1 %vm1223_vm0, %v840_v46  ;;  %v851_v51 = vld [vmem:[%s6619_s29 + $0x1540] sm:$0xff]  ;;  %v342_v52 = vld [vmem:[%s6619_s29 + $0x558] sm:$0xff] }
 0x167   : > { %5414 = vst.msk [vmem:[%s7017_s16 + $0xc0] sm:$0xff] %vm5389_vm2, %v2951_v49  ;;  %5670 = vst.msk [vmem:[%s7017_s16 + $0x8c0] sm:$0xff] %vm5389_vm2, %v4231_v50  ;;  %v339_v50 = vld [vmem:[%s6619_s29 + $0x540] sm:$0xff] }
 0x168   : > { %v2955_v58 = vpop.f32.mrb[50].mxu0  ;;  %v4235_v59 = vpop.f32.mrb[50].mxu1 }
 0x169   : > { %v2956_v60 = vadd.f32 %v7006_v55, %v2955_v58  ;;  %v4236_v61 = vadd.f32 %v7006_v55, %v4235_v59  ;;  %v2957_v62 = vpop.f32.mrb[51].mxu0  ;;  %3219 = vmatmul.mubr.f32.gmra.mrb[156].mxu0 %v327_v53  ;;  %v4237_v63 = vpop.f32.mrb[51].mxu1  ;;  %4499 = vmatmul.mubr.f32.gmra.mrb[156].mxu1 %v839_v54  ;;  %v854_v53 = vld [vmem:[%s6619_s29 + $0x1558] sm:$0xff] }
 0x16a   : > { %6047 = vmatprep.mubr.msk.f32.mxu0 %vm1223_vm0, %v330_v56  ;;  %6303 = vmatprep.mubr.msk.f32.mxu1 %vm1223_vm0, %v842_v57  ;;  %v853_v62 = vld [vmem:[%s6619_s29 + $0x1550] sm:$0xff]  ;;  %v344_v63 = vld [vmem:[%s6619_s29 + $0x568] sm:$0xff] }
 0x16b   : > { %5415 = vst.msk [vmem:[%s7017_s16 + $0xc8] sm:$0xff] %vm5389_vm2, %v2956_v60  ;;  %5671 = vst.msk [vmem:[%s7017_s16 + $0x8c8] sm:$0xff] %vm5389_vm2, %v4236_v61  ;;  %v341_v61 = vld [vmem:[%s6619_s29 + $0x550] sm:$0xff] }
 0x16c   : > { %v2960_v4 = vpop.f32.mrb[52].mxu0  ;;  %v4240_v5 = vpop.f32.mrb[52].mxu1 }
 0x16d   : > { %v2961_v6 = vadd.f32 %v7006_v55, %v2960_v4  ;;  %v4241_v7 = vadd.f32 %v7006_v55, %v4240_v5  ;;  %v2962_v8 = vpop.f32.mrb[53].mxu0  ;;  %3224 = vmatmul.mubr.f32.gmra.mrb[158].mxu0 %v329_v0  ;;  %v4242_v9 = vpop.f32.mrb[53].mxu1  ;;  %4504 = vmatmul.mubr.f32.gmra.mrb[158].mxu1 %v841_v1 }
 0x16e   : > { %6048 = vmatprep.mubr.msk.f32.mxu0 %vm1223_vm0, %v332_v2  ;;  %6304 = vmatprep.mubr.msk.f32.mxu1 %vm1223_vm0, %v844_v3  ;;  %v7406_v2 = vld [vmem:[%s9805_s2] ss:$0 sm:$0xff]  ;;  %v346_v9 = vld [vmem:[%s6619_s29 + $0x578] sm:$0xff] }
 0x16f   : > { %5416 = vst.msk [vmem:[%s7017_s16 + $0xd0] sm:$0xff] %vm5389_vm2, %v2961_v6  ;;  %5672 = vst.msk [vmem:[%s7017_s16 + $0x8d0] sm:$0xff] %vm5389_vm2, %v4241_v7  ;;  %v343_v7 = vld [vmem:[%s6619_s29 + $0x560] sm:$0xff] }
 0x170   : > { %v2965_v14 = vpop.f32.mrb[54].mxu0  ;;  %v4245_v15 = vpop.f32.mrb[54].mxu1  ;;  %v855_v8 = vld [vmem:[%s6619_s29 + $0x1560] sm:$0xff] }
 0x171   : > { %v2966_v16 = vadd.f32 %v7006_v55, %v2965_v14  ;;  %v4246_v17 = vadd.f32 %v7006_v55, %v4245_v15  ;;  %v2967_v18 = vpop.f32.mrb[55].mxu0  ;;  %3229 = vmatmul.mubr.f32.gmra.mrb[160].mxu0 %v331_v10  ;;  %v4247_v19 = vpop.f32.mrb[55].mxu1  ;;  %4509 = vmatmul.mubr.f32.gmra.mrb[160].mxu1 %v843_v11  ;;  %v858_v10 = vld [vmem:[%s6619_s29 + $0x1578] sm:$0xff] }
 0x172   : > { %6049 = vmatprep.mubr.msk.f32.mxu0 %vm1223_vm0, %v334_v12  ;;  %6305 = vmatprep.mubr.msk.f32.mxu1 %vm1223_vm0, %v846_v13  ;;  %v857_v18 = vld [vmem:[%s6619_s29 + $0x1570] sm:$0xff]  ;;  %v348_v19 = vld [vmem:[%s6619_s29 + $0x588] sm:$0xff] }
 0x173   : > { %5417 = vst.msk [vmem:[%s7017_s16 + $0xd8] sm:$0xff] %vm5389_vm2, %v2966_v16  ;;  %5673 = vst.msk [vmem:[%s7017_s16 + $0x8d8] sm:$0xff] %vm5389_vm2, %v4246_v17  ;;  %v345_v17 = vld [vmem:[%s6619_s29 + $0x570] sm:$0xff] }
 0x174   : > { %v2970_v24 = vpop.f32.mrb[56].mxu0  ;;  %v4250_v25 = vpop.f32.mrb[56].mxu1 }
 0x175   : > { %v2971_v26 = vadd.f32 %v7006_v55, %v2970_v24  ;;  %v4251_v27 = vadd.f32 %v7006_v55, %v4250_v25  ;;  %v2972_v28 = vpop.f32.mrb[57].mxu0  ;;  %3234 = vmatmul.mubr.f32.gmra.mrb[162].mxu0 %v333_v20  ;;  %v4252_v29 = vpop.f32.mrb[57].mxu1  ;;  %4514 = vmatmul.mubr.f32.gmra.mrb[162].mxu1 %v845_v21  ;;  %v860_v20 = vld [vmem:[%s6619_s29 + $0x1588] sm:$0xff] }
 0x176   : > { %6050 = vmatprep.mubr.msk.f32.mxu0 %vm1223_vm0, %v336_v22  ;;  %6306 = vmatprep.mubr.msk.f32.mxu1 %vm1223_vm0, %v848_v23  ;;  %v859_v28 = vld [vmem:[%s6619_s29 + $0x1580] sm:$0xff]  ;;  %v350_v29 = vld [vmem:[%s6619_s29 + $0x598] sm:$0xff] }
 0x177   : > { %5418 = vst.msk [vmem:[%s7017_s16 + $0xe0] sm:$0xff] %vm5389_vm2, %v2971_v26  ;;  %5674 = vst.msk [vmem:[%s7017_s16 + $0x8e0] sm:$0xff] %vm5389_vm2, %v4251_v27  ;;  %v347_v27 = vld [vmem:[%s6619_s29 + $0x580] sm:$0xff] }
 0x178   : > { %v2975_v34 = vpop.f32.mrb[58].mxu0  ;;  %v4255_v35 = vpop.f32.mrb[58].mxu1 }
 0x179   : > { %v2976_v36 = vadd.f32 %v7006_v55, %v2975_v34  ;;  %v4256_v37 = vadd.f32 %v7006_v55, %v4255_v35  ;;  %v2977_v38 = vpop.f32.mrb[59].mxu0  ;;  %3239 = vmatmul.mubr.f32.gmra.mrb[164].mxu0 %v335_v30  ;;  %v4257_v39 = vpop.f32.mrb[59].mxu1  ;;  %4519 = vmatmul.mubr.f32.gmra.mrb[164].mxu1 %v847_v31  ;;  %v862_v30 = vld [vmem:[%s6619_s29 + $0x1598] sm:$0xff] }
 0x17a   : > { %6051 = vmatprep.mubr.msk.f32.mxu0 %vm1223_vm0, %v338_v32  ;;  %6307 = vmatprep.mubr.msk.f32.mxu1 %vm1223_vm0, %v850_v33  ;;  %v861_v38 = vld [vmem:[%s6619_s29 + $0x1590] sm:$0xff]  ;;  %v352_v39 = vld [vmem:[%s6619_s29 + $0x5a8] sm:$0xff] }
 0x17b   : > { %5419 = vst.msk [vmem:[%s7017_s16 + $0xe8] sm:$0xff] %vm5389_vm2, %v2976_v36  ;;  %5675 = vst.msk [vmem:[%s7017_s16 + $0x8e8] sm:$0xff] %vm5389_vm2, %v4256_v37  ;;  %v349_v37 = vld [vmem:[%s6619_s29 + $0x590] sm:$0xff] }
 0x17c   : > { %v2980_v44 = vpop.f32.mrb[60].mxu0  ;;  %v4260_v45 = vpop.f32.mrb[60].mxu1 }
 0x17d   : > { %v2981_v46 = vadd.f32 %v7006_v55, %v2980_v44  ;;  %v4261_v47 = vadd.f32 %v7006_v55, %v4260_v45  ;;  %v2982_v48 = vpop.f32.mrb[61].mxu0  ;;  %3244 = vmatmul.mubr.f32.gmra.mrb[166].mxu0 %v337_v40  ;;  %v4262_v49 = vpop.f32.mrb[61].mxu1  ;;  %4524 = vmatmul.mubr.f32.gmra.mrb[166].mxu1 %v849_v41  ;;  %v864_v40 = vld [vmem:[%s6619_s29 + $0x15a8] sm:$0xff] }
 0x17e   : > { %6052 = vmatprep.mubr.msk.f32.mxu0 %vm1223_vm0, %v340_v42  ;;  %6308 = vmatprep.mubr.msk.f32.mxu1 %vm1223_vm0, %v852_v43  ;;  %v863_v48 = vld [vmem:[%s6619_s29 + $0x15a0] sm:$0xff]  ;;  %v354_v49 = vld [vmem:[%s6619_s29 + $0x5b8] sm:$0xff] }
 0x17f   : > { %5420 = vst.msk [vmem:[%s7017_s16 + $0xf0] sm:$0xff] %vm5389_vm2, %v2981_v46  ;;  %5676 = vst.msk [vmem:[%s7017_s16 + $0x8f0] sm:$0xff] %vm5389_vm2, %v4261_v47  ;;  %v351_v47 = vld [vmem:[%s6619_s29 + $0x5a0] sm:$0xff] }
 0x180   : > { %v2985_v54 = vpop.f32.mrb[62].mxu0  ;;  %v4265_v56 = vpop.f32.mrb[62].mxu1 }
 0x181   : > { %v2986_v57 = vadd.f32 %v7006_v55, %v2985_v54  ;;  %v4266_v58 = vadd.f32 %v7006_v55, %v4265_v56  ;;  %v2987_v59 = vpop.f32.mrb[63].mxu0  ;;  %3249 = vmatmul.mubr.f32.gmra.mrb[168].mxu0 %v339_v50  ;;  %v4267_v60 = vpop.f32.mrb[63].mxu1  ;;  %4529 = vmatmul.mubr.f32.gmra.mrb[168].mxu1 %v851_v51  ;;  %v856_v55 = vld [vmem:[%s6619_s29 + $0x1568] sm:$0xff]  ;;  %v866_v50 = vld [vmem:[%s6619_s29 + $0x15b8] sm:$0xff] }
 0x182   : > { %6053 = vmatprep.mubr.msk.f32.mxu0 %vm1223_vm0, %v342_v52  ;;  %6309 = vmatprep.mubr.msk.f32.mxu1 %vm1223_vm0, %v854_v53  ;;  %v865_v59 = vld [vmem:[%s6619_s29 + $0x15b0] sm:$0xff]  ;;  %v356_v60 = vld [vmem:[%s6619_s29 + $0x5c8] sm:$0xff] }
 0x183   : > { %5421 = vst.msk [vmem:[%s7017_s16 + $0xf8] sm:$0xff] %vm5389_vm2, %v2986_v57  ;;  %5677 = vst.msk [vmem:[%s7017_s16 + $0x8f8] sm:$0xff] %vm5389_vm2, %v4266_v58  ;;  %v353_v58 = vld [vmem:[%s6619_s29 + $0x5b0] sm:$0xff] }
 0x184   : > { %v2990_v0 = vpop.f32.mrb[64].mxu0  ;;  %v4270_v1 = vpop.f32.mrb[64].mxu1 }
 0x185   : > { %v2991_v3 = vadd.f32 %v7406_v2, %v2990_v0  ;;  %v4271_v4 = vadd.f32 %v7406_v2, %v4270_v1  ;;  %v2992_v5 = vpop.f32.mrb[65].mxu0  ;;  %3254 = vmatmul.mubr.f32.gmra.mrb[170].mxu0 %v341_v61  ;;  %v4272_v6 = vpop.f32.mrb[65].mxu1  ;;  %4534 = vmatmul.mubr.f32.gmra.mrb[170].mxu1 %v853_v62  ;;  %v868_v61 = vld [vmem:[%s6619_s29 + $0x15c8] sm:$0xff] }
 0x186   : > { %6054 = vmatprep.mubr.msk.f32.mxu0 %vm1223_vm0, %v344_v63  ;;  %6310 = vmatprep.mubr.msk.f32.mxu1 %vm1223_vm0, %v856_v55  ;;  %v867_v5 = vld [vmem:[%s6619_s29 + $0x15c0] sm:$0xff]  ;;  %v358_v6 = vld [vmem:[%s6619_s29 + $0x5d8] sm:$0xff] }
 0x187   : > { %5422 = vst.msk [vmem:[%s7017_s16 + $0x100] sm:$0xff] %vm5389_vm2, %v2991_v3  ;;  %5678 = vst.msk [vmem:[%s7017_s16 + $0x900] sm:$0xff] %vm5389_vm2, %v4271_v4  ;;  %v355_v4 = vld [vmem:[%s6619_s29 + $0x5c0] sm:$0xff] }
 0x188   : > { %v2995_v11 = vpop.f32.mrb[66].mxu0  ;;  %v4275_v12 = vpop.f32.mrb[66].mxu1 }
 0x189   : > { %v2996_v13 = vadd.f32 %v7406_v2, %v2995_v11  ;;  %v4276_v14 = vadd.f32 %v7406_v2, %v4275_v12  ;;  %v2997_v15 = vpop.f32.mrb[67].mxu0  ;;  %3259 = vmatmul.mubr.f32.gmra.mrb[172].mxu0 %v343_v7  ;;  %v4277_v16 = vpop.f32.mrb[67].mxu1  ;;  %4539 = vmatmul.mubr.f32.gmra.mrb[172].mxu1 %v855_v8  ;;  %v870_v7 = vld [vmem:[%s6619_s29 + $0x15d8] sm:$0xff] }
 0x18a   : > { %6055 = vmatprep.mubr.msk.f32.mxu0 %vm1223_vm0, %v346_v9  ;;  %6311 = vmatprep.mubr.msk.f32.mxu1 %vm1223_vm0, %v858_v10  ;;  %v869_v15 = vld [vmem:[%s6619_s29 + $0x15d0] sm:$0xff]  ;;  %v360_v16 = vld [vmem:[%s6619_s29 + $0x5e8] sm:$0xff] }
 0x18b   : > { %5423 = vst.msk [vmem:[%s7017_s16 + $0x108] sm:$0xff] %vm5389_vm2, %v2996_v13  ;;  %5679 = vst.msk [vmem:[%s7017_s16 + $0x908] sm:$0xff] %vm5389_vm2, %v4276_v14  ;;  %v357_v14 = vld [vmem:[%s6619_s29 + $0x5d0] sm:$0xff] }
 0x18c   : > { %v3000_v21 = vpop.f32.mrb[68].mxu0  ;;  %v4280_v22 = vpop.f32.mrb[68].mxu1 }
 0x18d   : > { %v3001_v23 = vadd.f32 %v7406_v2, %v3000_v21  ;;  %v4281_v24 = vadd.f32 %v7406_v2, %v4280_v22  ;;  %v3002_v25 = vpop.f32.mrb[69].mxu0  ;;  %3264 = vmatmul.mubr.f32.gmra.mrb[174].mxu0 %v345_v17  ;;  %v4282_v26 = vpop.f32.mrb[69].mxu1  ;;  %4544 = vmatmul.mubr.f32.gmra.mrb[174].mxu1 %v857_v18  ;;  %v872_v17 = vld [vmem:[%s6619_s29 + $0x15e8] sm:$0xff] }
 0x18e   : > { %6056 = vmatprep.mubr.msk.f32.mxu0 %vm1223_vm0, %v348_v19  ;;  %6312 = vmatprep.mubr.msk.f32.mxu1 %vm1223_vm0, %v860_v20  ;;  %v871_v25 = vld [vmem:[%s6619_s29 + $0x15e0] sm:$0xff]  ;;  %v362_v26 = vld [vmem:[%s6619_s29 + $0x5f8] sm:$0xff] }
 0x18f   : > { %5424 = vst.msk [vmem:[%s7017_s16 + $0x110] sm:$0xff] %vm5389_vm2, %v3001_v23  ;;  %5680 = vst.msk [vmem:[%s7017_s16 + $0x910] sm:$0xff] %vm5389_vm2, %v4281_v24  ;;  %v359_v24 = vld [vmem:[%s6619_s29 + $0x5e0] sm:$0xff] }
 0x190   : > { %v3005_v31 = vpop.f32.mrb[70].mxu0  ;;  %v4285_v32 = vpop.f32.mrb[70].mxu1 }
 0x191   : > { %v3006_v33 = vadd.f32 %v7406_v2, %v3005_v31  ;;  %v4286_v34 = vadd.f32 %v7406_v2, %v4285_v32  ;;  %v3007_v35 = vpop.f32.mrb[71].mxu0  ;;  %3269 = vmatmul.mubr.f32.gmra.mrb[176].mxu0 %v347_v27  ;;  %v4287_v36 = vpop.f32.mrb[71].mxu1  ;;  %4549 = vmatmul.mubr.f32.gmra.mrb[176].mxu1 %v859_v28  ;;  %v874_v27 = vld [vmem:[%s6619_s29 + $0x15f8] sm:$0xff] }
 0x192   : > { %6057 = vmatprep.mubr.msk.f32.mxu0 %vm1223_vm0, %v350_v29  ;;  %6313 = vmatprep.mubr.msk.f32.mxu1 %vm1223_vm0, %v862_v30  ;;  %v873_v35 = vld [vmem:[%s6619_s29 + $0x15f0] sm:$0xff]  ;;  %v364_v36 = vld [vmem:[%s6619_s29 + $0x608] sm:$0xff] }
 0x193   : > { %5425 = vst.msk [vmem:[%s7017_s16 + $0x118] sm:$0xff] %vm5389_vm2, %v3006_v33  ;;  %5681 = vst.msk [vmem:[%s7017_s16 + $0x918] sm:$0xff] %vm5389_vm2, %v4286_v34  ;;  %v361_v34 = vld [vmem:[%s6619_s29 + $0x5f0] sm:$0xff] }
 0x194   : > { %v3010_v41 = vpop.f32.mrb[72].mxu0  ;;  %v4290_v42 = vpop.f32.mrb[72].mxu1 }
 0x195   : > { %v3011_v43 = vadd.f32 %v7406_v2, %v3010_v41  ;;  %v4291_v44 = vadd.f32 %v7406_v2, %v4290_v42  ;;  %v3012_v45 = vpop.f32.mrb[73].mxu0  ;;  %3274 = vmatmul.mubr.f32.gmra.mrb[178].mxu0 %v349_v37  ;;  %v4292_v46 = vpop.f32.mrb[73].mxu1  ;;  %4554 = vmatmul.mubr.f32.gmra.mrb[178].mxu1 %v861_v38  ;;  %v876_v37 = vld [vmem:[%s6619_s29 + $0x1608] sm:$0xff] }
 0x196   : > { %6058 = vmatprep.mubr.msk.f32.mxu0 %vm1223_vm0, %v352_v39  ;;  %6314 = vmatprep.mubr.msk.f32.mxu1 %vm1223_vm0, %v864_v40  ;;  %v875_v45 = vld [vmem:[%s6619_s29 + $0x1600] sm:$0xff]  ;;  %v366_v46 = vld [vmem:[%s6619_s29 + $0x618] sm:$0xff] }
 0x197   : > { %5426 = vst.msk [vmem:[%s7017_s16 + $0x120] sm:$0xff] %vm5389_vm2, %v3011_v43  ;;  %5682 = vst.msk [vmem:[%s7017_s16 + $0x920] sm:$0xff] %vm5389_vm2, %v4291_v44  ;;  %v363_v44 = vld [vmem:[%s6619_s29 + $0x600] sm:$0xff] }
 0x198   : > { %v3015_v51 = vpop.f32.mrb[74].mxu0  ;;  %v4295_v52 = vpop.f32.mrb[74].mxu1 }
 0x199   : > { %v3016_v53 = vadd.f32 %v7406_v2, %v3015_v51  ;;  %v4296_v54 = vadd.f32 %v7406_v2, %v4295_v52  ;;  %v3017_v56 = vpop.f32.mrb[75].mxu0  ;;  %3279 = vmatmul.mubr.f32.gmra.mrb[180].mxu0 %v351_v47  ;;  %v4297_v57 = vpop.f32.mrb[75].mxu1  ;;  %4559 = vmatmul.mubr.f32.gmra.mrb[180].mxu1 %v863_v48  ;;  %v878_v47 = vld [vmem:[%s6619_s29 + $0x1618] sm:$0xff] }
 0x19a   : > { %6059 = vmatprep.mubr.msk.f32.mxu0 %vm1223_vm0, %v354_v49  ;;  %6315 = vmatprep.mubr.msk.f32.mxu1 %vm1223_vm0, %v866_v50  ;;  %v877_v56 = vld [vmem:[%s6619_s29 + $0x1610] sm:$0xff]  ;;  %v368_v57 = vld [vmem:[%s6619_s29 + $0x628] sm:$0xff] }
 0x19b   : > { %5427 = vst.msk [vmem:[%s7017_s16 + $0x128] sm:$0xff] %vm5389_vm2, %v3016_v53  ;;  %5683 = vst.msk [vmem:[%s7017_s16 + $0x928] sm:$0xff] %vm5389_vm2, %v4296_v54  ;;  %v365_v54 = vld [vmem:[%s6619_s29 + $0x610] sm:$0xff] }
 0x19c   : > { %v3020_v62 = vpop.f32.mrb[76].mxu0  ;;  %v4300_v63 = vpop.f32.mrb[76].mxu1 }
 0x19d   : > { %v3021_v55 = vadd.f32 %v7406_v2, %v3020_v62  ;;  %v4301_v0 = vadd.f32 %v7406_v2, %v4300_v63  ;;  %v3022_v1 = vpop.f32.mrb[77].mxu0  ;;  %3284 = vmatmul.mubr.f32.gmra.mrb[182].mxu0 %v353_v58  ;;  %v4302_v3 = vpop.f32.mrb[77].mxu1  ;;  %4564 = vmatmul.mubr.f32.gmra.mrb[182].mxu1 %v865_v59  ;;  %v880_v58 = vld [vmem:[%s6619_s29 + $0x1628] sm:$0xff] }
 0x19e   : > { %6060 = vmatprep.mubr.msk.f32.mxu0 %vm1223_vm0, %v356_v60  ;;  %6316 = vmatprep.mubr.msk.f32.mxu1 %vm1223_vm0, %v868_v61  ;;  %v879_v1 = vld [vmem:[%s6619_s29 + $0x1620] sm:$0xff]  ;;  %v370_v3 = vld [vmem:[%s6619_s29 + $0x638] sm:$0xff] }
 0x19f   : > { %5428 = vst.msk [vmem:[%s7017_s16 + $0x130] sm:$0xff] %vm5389_vm2, %v3021_v55  ;;  %5684 = vst.msk [vmem:[%s7017_s16 + $0x930] sm:$0xff] %vm5389_vm2, %v4301_v0  ;;  %v367_v0 = vld [vmem:[%s6619_s29 + $0x620] sm:$0xff] }
 0x1a0   : > { %v3025_v8 = vpop.f32.mrb[78].mxu0  ;;  %v4305_v9 = vpop.f32.mrb[78].mxu1 }
 0x1a1   : > { %v3026_v10 = vadd.f32 %v7406_v2, %v3025_v8  ;;  %v4306_v11 = vadd.f32 %v7406_v2, %v4305_v9  ;;  %v3027_v12 = vpop.f32.mrb[79].mxu0  ;;  %3289 = vmatmul.mubr.f32.gmra.mrb[184].mxu0 %v355_v4  ;;  %v4307_v13 = vpop.f32.mrb[79].mxu1  ;;  %4569 = vmatmul.mubr.f32.gmra.mrb[184].mxu1 %v867_v5  ;;  %v882_v4 = vld [vmem:[%s6619_s29 + $0x1638] sm:$0xff] }
 0x1a2   : > { %6061 = vmatprep.mubr.msk.f32.mxu0 %vm1223_vm0, %v358_v6  ;;  %6317 = vmatprep.mubr.msk.f32.mxu1 %vm1223_vm0, %v870_v7  ;;  %v881_v12 = vld [vmem:[%s6619_s29 + $0x1630] sm:$0xff]  ;;  %v372_v13 = vld [vmem:[%s6619_s29 + $0x648] sm:$0xff] }
 0x1a3   : > { %5429 = vst.msk [vmem:[%s7017_s16 + $0x138] sm:$0xff] %vm5389_vm2, %v3026_v10  ;;  %5685 = vst.msk [vmem:[%s7017_s16 + $0x938] sm:$0xff] %vm5389_vm2, %v4306_v11  ;;  %v369_v11 = vld [vmem:[%s6619_s29 + $0x630] sm:$0xff] }
 0x1a4   : > { %v3030_v18 = vpop.f32.mrb[80].mxu0  ;;  %v4310_v19 = vpop.f32.mrb[80].mxu1 }
 0x1a5   : > { %v3031_v20 = vadd.f32 %v7406_v2, %v3030_v18  ;;  %v4311_v21 = vadd.f32 %v7406_v2, %v4310_v19  ;;  %v3032_v22 = vpop.f32.mrb[81].mxu0  ;;  %3294 = vmatmul.mubr.f32.gmra.mrb[186].mxu0 %v357_v14  ;;  %v4312_v23 = vpop.f32.mrb[81].mxu1  ;;  %4574 = vmatmul.mubr.f32.gmra.mrb[186].mxu1 %v869_v15  ;;  %v884_v14 = vld [vmem:[%s6619_s29 + $0x1648] sm:$0xff] }
 0x1a6   : > { %6062 = vmatprep.mubr.msk.f32.mxu0 %vm1223_vm0, %v360_v16  ;;  %6318 = vmatprep.mubr.msk.f32.mxu1 %vm1223_vm0, %v872_v17  ;;  %v883_v22 = vld [vmem:[%s6619_s29 + $0x1640] sm:$0xff]  ;;  %v374_v23 = vld [vmem:[%s6619_s29 + $0x658] sm:$0xff] }
 0x1a7   : > { %5430 = vst.msk [vmem:[%s7017_s16 + $0x140] sm:$0xff] %vm5389_vm2, %v3031_v20  ;;  %5686 = vst.msk [vmem:[%s7017_s16 + $0x940] sm:$0xff] %vm5389_vm2, %v4311_v21  ;;  %v371_v21 = vld [vmem:[%s6619_s29 + $0x640] sm:$0xff] }
 0x1a8   : > { %v3035_v28 = vpop.f32.mrb[82].mxu0  ;;  %v4315_v29 = vpop.f32.mrb[82].mxu1 }
 0x1a9   : > { %v3036_v30 = vadd.f32 %v7406_v2, %v3035_v28  ;;  %v4316_v31 = vadd.f32 %v7406_v2, %v4315_v29  ;;  %v3037_v32 = vpop.f32.mrb[83].mxu0  ;;  %3299 = vmatmul.mubr.f32.gmra.mrb[188].mxu0 %v359_v24  ;;  %v4317_v33 = vpop.f32.mrb[83].mxu1  ;;  %4579 = vmatmul.mubr.f32.gmra.mrb[188].mxu1 %v871_v25  ;;  %v886_v24 = vld [vmem:[%s6619_s29 + $0x1658] sm:$0xff] }
 0x1aa   : > { %6063 = vmatprep.mubr.msk.f32.mxu0 %vm1223_vm0, %v362_v26  ;;  %6319 = vmatprep.mubr.msk.f32.mxu1 %vm1223_vm0, %v874_v27  ;;  %v885_v32 = vld [vmem:[%s6619_s29 + $0x1650] sm:$0xff]  ;;  %v376_v33 = vld [vmem:[%s6619_s29 + $0x668] sm:$0xff] }
 0x1ab   : > { %5431 = vst.msk [vmem:[%s7017_s16 + $0x148] sm:$0xff] %vm5389_vm2, %v3036_v30  ;;  %5687 = vst.msk [vmem:[%s7017_s16 + $0x948] sm:$0xff] %vm5389_vm2, %v4316_v31  ;;  %v373_v31 = vld [vmem:[%s6619_s29 + $0x650] sm:$0xff] }
 0x1ac   : > { %v3040_v38 = vpop.f32.mrb[84].mxu0  ;;  %v4320_v39 = vpop.f32.mrb[84].mxu1 }
 0x1ad   : > { %v3041_v40 = vadd.f32 %v7406_v2, %v3040_v38  ;;  %v4321_v41 = vadd.f32 %v7406_v2, %v4320_v39  ;;  %v3042_v42 = vpop.f32.mrb[85].mxu0  ;;  %3304 = vmatmul.mubr.f32.gmra.mrb[190].mxu0 %v361_v34  ;;  %v4322_v43 = vpop.f32.mrb[85].mxu1  ;;  %4584 = vmatmul.mubr.f32.gmra.mrb[190].mxu1 %v873_v35  ;;  %v888_v34 = vld [vmem:[%s6619_s29 + $0x1668] sm:$0xff] }
 0x1ae   : > { %6064 = vmatprep.mubr.msk.f32.mxu0 %vm1223_vm0, %v364_v36  ;;  %6320 = vmatprep.mubr.msk.f32.mxu1 %vm1223_vm0, %v876_v37  ;;  %v887_v42 = vld [vmem:[%s6619_s29 + $0x1660] sm:$0xff]  ;;  %v378_v43 = vld [vmem:[%s6619_s29 + $0x678] sm:$0xff] }
 0x1af   : > { %5432 = vst.msk [vmem:[%s7017_s16 + $0x150] sm:$0xff] %vm5389_vm2, %v3041_v40  ;;  %5688 = vst.msk [vmem:[%s7017_s16 + $0x950] sm:$0xff] %vm5389_vm2, %v4321_v41  ;;  %v375_v41 = vld [vmem:[%s6619_s29 + $0x660] sm:$0xff] }
 0x1b0   : > { %v3045_v48 = vpop.f32.mrb[86].mxu0  ;;  %v4325_v49 = vpop.f32.mrb[86].mxu1 }
 0x1b1   : > { %v3046_v50 = vadd.f32 %v7406_v2, %v3045_v48  ;;  %v4326_v51 = vadd.f32 %v7406_v2, %v4325_v49  ;;  %v3047_v52 = vpop.f32.mrb[87].mxu0  ;;  %3309 = vmatmul.mubr.f32.gmra.mrb[192].mxu0 %v363_v44  ;;  %v4327_v53 = vpop.f32.mrb[87].mxu1  ;;  %4589 = vmatmul.mubr.f32.gmra.mrb[192].mxu1 %v875_v45  ;;  %v890_v44 = vld [vmem:[%s6619_s29 + $0x1678] sm:$0xff] }
 0x1b2   : > { %6065 = vmatprep.mubr.msk.f32.mxu0 %vm1223_vm0, %v366_v46  ;;  %6321 = vmatprep.mubr.msk.f32.mxu1 %vm1223_vm0, %v878_v47  ;;  %v889_v52 = vld [vmem:[%s6619_s29 + $0x1670] sm:$0xff]  ;;  %v380_v53 = vld [vmem:[%s6619_s29 + $0x688] sm:$0xff] }
 0x1b3   : > { %5433 = vst.msk [vmem:[%s7017_s16 + $0x158] sm:$0xff] %vm5389_vm2, %v3046_v50  ;;  %5689 = vst.msk [vmem:[%s7017_s16 + $0x958] sm:$0xff] %vm5389_vm2, %v4326_v51  ;;  %v377_v51 = vld [vmem:[%s6619_s29 + $0x670] sm:$0xff] }
 0x1b4   : > { %v3050_v59 = vpop.f32.mrb[88].mxu0  ;;  %v4330_v60 = vpop.f32.mrb[88].mxu1 }
 0x1b5   : > { %v3051_v61 = vadd.f32 %v7406_v2, %v3050_v59  ;;  %v4331_v62 = vadd.f32 %v7406_v2, %v4330_v60  ;;  %v3052_v63 = vpop.f32.mrb[89].mxu0  ;;  %3314 = vmatmul.mubr.f32.gmra.mrb[194].mxu0 %v365_v54  ;;  %v4332_v55 = vpop.f32.mrb[89].mxu1  ;;  %4594 = vmatmul.mubr.f32.gmra.mrb[194].mxu1 %v877_v56  ;;  %v892_v54 = vld [vmem:[%s6619_s29 + $0x1688] sm:$0xff] }
 0x1b6   : > { %6066 = vmatprep.mubr.msk.f32.mxu0 %vm1223_vm0, %v368_v57  ;;  %6322 = vmatprep.mubr.msk.f32.mxu1 %vm1223_vm0, %v880_v58  ;;  %v891_v63 = vld [vmem:[%s6619_s29 + $0x1680] sm:$0xff]  ;;  %v382_v55 = vld [vmem:[%s6619_s29 + $0x698] sm:$0xff] }
 0x1b7   : > { %5434 = vst.msk [vmem:[%s7017_s16 + $0x160] sm:$0xff] %vm5389_vm2, %v3051_v61  ;;  %5690 = vst.msk [vmem:[%s7017_s16 + $0x960] sm:$0xff] %vm5389_vm2, %v4331_v62  ;;  %v379_v62 = vld [vmem:[%s6619_s29 + $0x680] sm:$0xff] }
 0x1b8   : > { %v3055_v5 = vpop.f32.mrb[90].mxu0  ;;  %v4335_v6 = vpop.f32.mrb[90].mxu1 }
 0x1b9   : > { %v3056_v7 = vadd.f32 %v7406_v2, %v3055_v5  ;;  %v4336_v8 = vadd.f32 %v7406_v2, %v4335_v6  ;;  %v3057_v9 = vpop.f32.mrb[91].mxu0  ;;  %3319 = vmatmul.mubr.f32.gmra.mrb[196].mxu0 %v367_v0  ;;  %v4337_v10 = vpop.f32.mrb[91].mxu1  ;;  %4599 = vmatmul.mubr.f32.gmra.mrb[196].mxu1 %v879_v1  ;;  %v894_v0 = vld [vmem:[%s6619_s29 + $0x1698] sm:$0xff] }
 0x1ba   : > { %6067 = vmatprep.mubr.msk.f32.mxu0 %vm1223_vm0, %v370_v3  ;;  %6323 = vmatprep.mubr.msk.f32.mxu1 %vm1223_vm0, %v882_v4  ;;  %v893_v9 = vld [vmem:[%s6619_s29 + $0x1690] sm:$0xff]  ;;  %v384_v10 = vld [vmem:[%s6619_s29 + $0x6a8] sm:$0xff] }
 0x1bb   : > { %5435 = vst.msk [vmem:[%s7017_s16 + $0x168] sm:$0xff] %vm5389_vm2, %v3056_v7  ;;  %5691 = vst.msk [vmem:[%s7017_s16 + $0x968] sm:$0xff] %vm5389_vm2, %v4336_v8  ;;  %v381_v8 = vld [vmem:[%s6619_s29 + $0x690] sm:$0xff] }
 0x1bc   : > { %v3060_v15 = vpop.f32.mrb[92].mxu0  ;;  %v4340_v16 = vpop.f32.mrb[92].mxu1 }
 0x1bd   : > { %v3061_v17 = vadd.f32 %v7406_v2, %v3060_v15  ;;  %v4341_v18 = vadd.f32 %v7406_v2, %v4340_v16  ;;  %v3062_v19 = vpop.f32.mrb[93].mxu0  ;;  %3324 = vmatmul.mubr.f32.gmra.mrb[198].mxu0 %v369_v11  ;;  %v4342_v20 = vpop.f32.mrb[93].mxu1  ;;  %4604 = vmatmul.mubr.f32.gmra.mrb[198].mxu1 %v881_v12  ;;  %v896_v11 = vld [vmem:[%s6619_s29 + $0x16a8] sm:$0xff] }
 0x1be   : > { %6068 = vmatprep.mubr.msk.f32.mxu0 %vm1223_vm0, %v372_v13  ;;  %6324 = vmatprep.mubr.msk.f32.mxu1 %vm1223_vm0, %v884_v14  ;;  %v895_v19 = vld [vmem:[%s6619_s29 + $0x16a0] sm:$0xff]  ;;  %v386_v20 = vld [vmem:[%s6619_s29 + $0x6b8] sm:$0xff] }
 0x1bf   : > { %5436 = vst.msk [vmem:[%s7017_s16 + $0x170] sm:$0xff] %vm5389_vm2, %v3061_v17  ;;  %5692 = vst.msk [vmem:[%s7017_s16 + $0x970] sm:$0xff] %vm5389_vm2, %v4341_v18  ;;  %v383_v18 = vld [vmem:[%s6619_s29 + $0x6a0] sm:$0xff] }
 0x1c0   : > { %v3065_v25 = vpop.f32.mrb[94].mxu0  ;;  %v4345_v26 = vpop.f32.mrb[94].mxu1 }
 0x1c1   : > { %v3066_v27 = vadd.f32 %v7406_v2, %v3065_v25  ;;  %v4346_v28 = vadd.f32 %v7406_v2, %v4345_v26  ;;  %v3067_v29 = vpop.f32.mrb[95].mxu0  ;;  %3329 = vmatmul.mubr.f32.gmra.mrb[200].mxu0 %v371_v21  ;;  %v4347_v30 = vpop.f32.mrb[95].mxu1  ;;  %4609 = vmatmul.mubr.f32.gmra.mrb[200].mxu1 %v883_v22  ;;  %v898_v21 = vld [vmem:[%s6619_s29 + $0x16b8] sm:$0xff] }
 0x1c2   : > { %6069 = vmatprep.mubr.msk.f32.mxu0 %vm1223_vm0, %v374_v23  ;;  %6325 = vmatprep.mubr.msk.f32.mxu1 %vm1223_vm0, %v886_v24  ;;  %v897_v29 = vld [vmem:[%s6619_s29 + $0x16b0] sm:$0xff]  ;;  %v388_v30 = vld [vmem:[%s6619_s29 + $0x6c8] sm:$0xff] }
 0x1c3   : > { %5437 = vst.msk [vmem:[%s7017_s16 + $0x178] sm:$0xff] %vm5389_vm2, %v3066_v27  ;;  %5693 = vst.msk [vmem:[%s7017_s16 + $0x978] sm:$0xff] %vm5389_vm2, %v4346_v28  ;;  %v385_v28 = vld [vmem:[%s6619_s29 + $0x6b0] sm:$0xff] }
 0x1c4   : > { %v3070_v35 = vpop.f32.mrb[96].mxu0  ;;  %v4350_v36 = vpop.f32.mrb[96].mxu1 }
 0x1c5   : > { %v3071_v37 = vadd.f32 %v7406_v2, %v3070_v35  ;;  %v4351_v38 = vadd.f32 %v7406_v2, %v4350_v36  ;;  %v3072_v39 = vpop.f32.mrb[97].mxu0  ;;  %3334 = vmatmul.mubr.f32.gmra.mrb[202].mxu0 %v373_v31  ;;  %v4352_v40 = vpop.f32.mrb[97].mxu1  ;;  %4614 = vmatmul.mubr.f32.gmra.mrb[202].mxu1 %v885_v32  ;;  %v900_v31 = vld [vmem:[%s6619_s29 + $0x16c8] sm:$0xff] }
 0x1c6   : > { %6070 = vmatprep.mubr.msk.f32.mxu0 %vm1223_vm0, %v376_v33  ;;  %6326 = vmatprep.mubr.msk.f32.mxu1 %vm1223_vm0, %v888_v34  ;;  %v899_v39 = vld [vmem:[%s6619_s29 + $0x16c0] sm:$0xff]  ;;  %v390_v40 = vld [vmem:[%s6619_s29 + $0x6d8] sm:$0xff] }
 0x1c7   : > { %5438 = vst.msk [vmem:[%s7017_s16 + $0x180] sm:$0xff] %vm5389_vm2, %v3071_v37  ;;  %5694 = vst.msk [vmem:[%s7017_s16 + $0x980] sm:$0xff] %vm5389_vm2, %v4351_v38  ;;  %v387_v38 = vld [vmem:[%s6619_s29 + $0x6c0] sm:$0xff] }
 0x1c8   : > { %v3075_v45 = vpop.f32.mrb[98].mxu0  ;;  %v4355_v46 = vpop.f32.mrb[98].mxu1 }
 0x1c9   : > { %v3076_v47 = vadd.f32 %v7406_v2, %v3075_v45  ;;  %v4356_v48 = vadd.f32 %v7406_v2, %v4355_v46  ;;  %v3077_v49 = vpop.f32.mrb[99].mxu0  ;;  %3339 = vmatmul.mubr.f32.gmra.mrb[204].mxu0 %v375_v41  ;;  %v4357_v50 = vpop.f32.mrb[99].mxu1  ;;  %4619 = vmatmul.mubr.f32.gmra.mrb[204].mxu1 %v887_v42  ;;  %v902_v41 = vld [vmem:[%s6619_s29 + $0x16d8] sm:$0xff] }
 0x1ca   : > { %6071 = vmatprep.mubr.msk.f32.mxu0 %vm1223_vm0, %v378_v43  ;;  %6327 = vmatprep.mubr.msk.f32.mxu1 %vm1223_vm0, %v890_v44  ;;  %v901_v49 = vld [vmem:[%s6619_s29 + $0x16d0] sm:$0xff]  ;;  %v392_v50 = vld [vmem:[%s6619_s29 + $0x6e8] sm:$0xff] }
 0x1cb   : > { %5439 = vst.msk [vmem:[%s7017_s16 + $0x188] sm:$0xff] %vm5389_vm2, %v3076_v47  ;;  %5695 = vst.msk [vmem:[%s7017_s16 + $0x988] sm:$0xff] %vm5389_vm2, %v4356_v48  ;;  %v389_v48 = vld [vmem:[%s6619_s29 + $0x6d0] sm:$0xff] }
 0x1cc   : > { %v3080_v56 = vpop.f32.mrb[100].mxu0  ;;  %v4360_v57 = vpop.f32.mrb[100].mxu1 }
 0x1cd   : > { %v3081_v58 = vadd.f32 %v7406_v2, %v3080_v56  ;;  %v4361_v59 = vadd.f32 %v7406_v2, %v4360_v57  ;;  %v3082_v60 = vpop.f32.mrb[101].mxu0  ;;  %3344 = vmatmul.mubr.f32.gmra.mrb[206].mxu0 %v377_v51  ;;  %v4362_v61 = vpop.f32.mrb[101].mxu1  ;;  %4624 = vmatmul.mubr.f32.gmra.mrb[206].mxu1 %v889_v52  ;;  %v904_v51 = vld [vmem:[%s6619_s29 + $0x16e8] sm:$0xff] }
 0x1ce   : > { %6072 = vmatprep.mubr.msk.f32.mxu0 %vm1223_vm0, %v380_v53  ;;  %6328 = vmatprep.mubr.msk.f32.mxu1 %vm1223_vm0, %v892_v54  ;;  %v903_v60 = vld [vmem:[%s6619_s29 + $0x16e0] sm:$0xff]  ;;  %v394_v61 = vld [vmem:[%s6619_s29 + $0x6f8] sm:$0xff] }
 0x1cf   : > { %5440 = vst.msk [vmem:[%s7017_s16 + $0x190] sm:$0xff] %vm5389_vm2, %v3081_v58  ;;  %5696 = vst.msk [vmem:[%s7017_s16 + $0x990] sm:$0xff] %vm5389_vm2, %v4361_v59  ;;  %v391_v59 = vld [vmem:[%s6619_s29 + $0x6e0] sm:$0xff] }
 0x1d0   : > { %v3085_v1 = vpop.f32.mrb[102].mxu0  ;;  %v4365_v3 = vpop.f32.mrb[102].mxu1 }
 0x1d1   : > { %v3086_v4 = vadd.f32 %v7406_v2, %v3085_v1  ;;  %v4366_v5 = vadd.f32 %v7406_v2, %v4365_v3  ;;  %v3087_v6 = vpop.f32.mrb[103].mxu0  ;;  %3349 = vmatmul.mubr.f32.gmra.mrb[208].mxu0 %v379_v62  ;;  %v4367_v7 = vpop.f32.mrb[103].mxu1  ;;  %4629 = vmatmul.mubr.f32.gmra.mrb[208].mxu1 %v891_v63  ;;  %v906_v62 = vld [vmem:[%s6619_s29 + $0x16f8] sm:$0xff] }
 0x1d2   : > { %6073 = vmatprep.mubr.msk.f32.mxu0 %vm1223_vm0, %v382_v55  ;;  %6329 = vmatprep.mubr.msk.f32.mxu1 %vm1223_vm0, %v894_v0  ;;  %v905_v6 = vld [vmem:[%s6619_s29 + $0x16f0] sm:$0xff]  ;;  %v396_v7 = vld [vmem:[%s6619_s29 + $0x708] sm:$0xff] }
 0x1d3   : > { %5441 = vst.msk [vmem:[%s7017_s16 + $0x198] sm:$0xff] %vm5389_vm2, %v3086_v4  ;;  %5697 = vst.msk [vmem:[%s7017_s16 + $0x998] sm:$0xff] %vm5389_vm2, %v4366_v5  ;;  %v393_v5 = vld [vmem:[%s6619_s29 + $0x6f0] sm:$0xff] }
 0x1d4   : > { %v3090_v12 = vpop.f32.mrb[104].mxu0  ;;  %v4370_v13 = vpop.f32.mrb[104].mxu1 }
 0x1d5   : > { %v3091_v14 = vadd.f32 %v7406_v2, %v3090_v12  ;;  %v4371_v15 = vadd.f32 %v7406_v2, %v4370_v13  ;;  %v3092_v16 = vpop.f32.mrb[105].mxu0  ;;  %3354 = vmatmul.mubr.f32.gmra.mrb[210].mxu0 %v381_v8  ;;  %v4372_v17 = vpop.f32.mrb[105].mxu1  ;;  %4634 = vmatmul.mubr.f32.gmra.mrb[210].mxu1 %v893_v9  ;;  %v908_v8 = vld [vmem:[%s6619_s29 + $0x1708] sm:$0xff] }
 0x1d6   : > { %6074 = vmatprep.mubr.msk.f32.mxu0 %vm1223_vm0, %v384_v10  ;;  %6330 = vmatprep.mubr.msk.f32.mxu1 %vm1223_vm0, %v896_v11  ;;  %v907_v16 = vld [vmem:[%s6619_s29 + $0x1700] sm:$0xff]  ;;  %v398_v17 = vld [vmem:[%s6619_s29 + $0x718] sm:$0xff] }
 0x1d7   : > { %5442 = vst.msk [vmem:[%s7017_s16 + $0x1a0] sm:$0xff] %vm5389_vm2, %v3091_v14  ;;  %5698 = vst.msk [vmem:[%s7017_s16 + $0x9a0] sm:$0xff] %vm5389_vm2, %v4371_v15  ;;  %v395_v15 = vld [vmem:[%s6619_s29 + $0x700] sm:$0xff] }
 0x1d8   : > { %v3095_v22 = vpop.f32.mrb[106].mxu0  ;;  %v4375_v23 = vpop.f32.mrb[106].mxu1 }
 0x1d9   : > { %v3096_v24 = vadd.f32 %v7406_v2, %v3095_v22  ;;  %v4376_v25 = vadd.f32 %v7406_v2, %v4375_v23  ;;  %v3097_v26 = vpop.f32.mrb[107].mxu0  ;;  %3359 = vmatmul.mubr.f32.gmra.mrb[212].mxu0 %v383_v18  ;;  %v4377_v27 = vpop.f32.mrb[107].mxu1  ;;  %4639 = vmatmul.mubr.f32.gmra.mrb[212].mxu1 %v895_v19  ;;  %v910_v18 = vld [vmem:[%s6619_s29 + $0x1718] sm:$0xff] }
 0x1da   : > { %6075 = vmatprep.mubr.msk.f32.mxu0 %vm1223_vm0, %v386_v20  ;;  %6331 = vmatprep.mubr.msk.f32.mxu1 %vm1223_vm0, %v898_v21  ;;  %v909_v26 = vld [vmem:[%s6619_s29 + $0x1710] sm:$0xff]  ;;  %v400_v27 = vld [vmem:[%s6619_s29 + $0x728] sm:$0xff] }
 0x1db   : > { %5443 = vst.msk [vmem:[%s7017_s16 + $0x1a8] sm:$0xff] %vm5389_vm2, %v3096_v24  ;;  %5699 = vst.msk [vmem:[%s7017_s16 + $0x9a8] sm:$0xff] %vm5389_vm2, %v4376_v25  ;;  %v397_v25 = vld [vmem:[%s6619_s29 + $0x710] sm:$0xff] }
 0x1dc   : > { %v3100_v32 = vpop.f32.mrb[108].mxu0  ;;  %v4380_v33 = vpop.f32.mrb[108].mxu1 }
 0x1dd   : > { %v3101_v34 = vadd.f32 %v7406_v2, %v3100_v32  ;;  %v4381_v35 = vadd.f32 %v7406_v2, %v4380_v33  ;;  %v3102_v36 = vpop.f32.mrb[109].mxu0  ;;  %3364 = vmatmul.mubr.f32.gmra.mrb[214].mxu0 %v385_v28  ;;  %v4382_v37 = vpop.f32.mrb[109].mxu1  ;;  %4644 = vmatmul.mubr.f32.gmra.mrb[214].mxu1 %v897_v29  ;;  %v912_v28 = vld [vmem:[%s6619_s29 + $0x1728] sm:$0xff] }
 0x1de   : > { %6076 = vmatprep.mubr.msk.f32.mxu0 %vm1223_vm0, %v388_v30  ;;  %6332 = vmatprep.mubr.msk.f32.mxu1 %vm1223_vm0, %v900_v31  ;;  %v911_v36 = vld [vmem:[%s6619_s29 + $0x1720] sm:$0xff]  ;;  %v402_v37 = vld [vmem:[%s6619_s29 + $0x738] sm:$0xff] }
 0x1df   : > { %5444 = vst.msk [vmem:[%s7017_s16 + $0x1b0] sm:$0xff] %vm5389_vm2, %v3101_v34  ;;  %5700 = vst.msk [vmem:[%s7017_s16 + $0x9b0] sm:$0xff] %vm5389_vm2, %v4381_v35  ;;  %v399_v35 = vld [vmem:[%s6619_s29 + $0x720] sm:$0xff] }
 0x1e0   : > { %v3105_v42 = vpop.f32.mrb[110].mxu0  ;;  %v4385_v43 = vpop.f32.mrb[110].mxu1 }
 0x1e1   : > { %v3106_v44 = vadd.f32 %v7406_v2, %v3105_v42  ;;  %v4386_v45 = vadd.f32 %v7406_v2, %v4385_v43  ;;  %v3107_v46 = vpop.f32.mrb[111].mxu0  ;;  %3369 = vmatmul.mubr.f32.gmra.mrb[216].mxu0 %v387_v38  ;;  %v4387_v47 = vpop.f32.mrb[111].mxu1  ;;  %4649 = vmatmul.mubr.f32.gmra.mrb[216].mxu1 %v899_v39  ;;  %v914_v38 = vld [vmem:[%s6619_s29 + $0x1738] sm:$0xff] }
 0x1e2   : > { %6077 = vmatprep.mubr.msk.f32.mxu0 %vm1223_vm0, %v390_v40  ;;  %6333 = vmatprep.mubr.msk.f32.mxu1 %vm1223_vm0, %v902_v41  ;;  %v913_v46 = vld [vmem:[%s6619_s29 + $0x1730] sm:$0xff]  ;;  %v404_v47 = vld [vmem:[%s6619_s29 + $0x748] sm:$0xff] }
 0x1e3   : > { %5445 = vst.msk [vmem:[%s7017_s16 + $0x1b8] sm:$0xff] %vm5389_vm2, %v3106_v44  ;;  %5701 = vst.msk [vmem:[%s7017_s16 + $0x9b8] sm:$0xff] %vm5389_vm2, %v4386_v45  ;;  %v401_v45 = vld [vmem:[%s6619_s29 + $0x730] sm:$0xff] }
 0x1e4   : > { %v3110_v52 = vpop.f32.mrb[112].mxu0  ;;  %v4390_v53 = vpop.f32.mrb[112].mxu1 }
 0x1e5   : > { %v3111_v54 = vadd.f32 %v7406_v2, %v3110_v52  ;;  %v4391_v56 = vadd.f32 %v7406_v2, %v4390_v53  ;;  %v3112_v57 = vpop.f32.mrb[113].mxu0  ;;  %3374 = vmatmul.mubr.f32.gmra.mrb[218].mxu0 %v389_v48  ;;  %v4392_v58 = vpop.f32.mrb[113].mxu1  ;;  %4654 = vmatmul.mubr.f32.gmra.mrb[218].mxu1 %v901_v49  ;;  %v916_v48 = vld [vmem:[%s6619_s29 + $0x1748] sm:$0xff] }
 0x1e6   : > { %6078 = vmatprep.mubr.msk.f32.mxu0 %vm1223_vm0, %v392_v50  ;;  %6334 = vmatprep.mubr.msk.f32.mxu1 %vm1223_vm0, %v904_v51  ;;  %v915_v57 = vld [vmem:[%s6619_s29 + $0x1740] sm:$0xff]  ;;  %v406_v58 = vld [vmem:[%s6619_s29 + $0x758] sm:$0xff] }
 0x1e7   : > { %5446 = vst.msk [vmem:[%s7017_s16 + $0x1c0] sm:$0xff] %vm5389_vm2, %v3111_v54  ;;  %5702 = vst.msk [vmem:[%s7017_s16 + $0x9c0] sm:$0xff] %vm5389_vm2, %v4391_v56  ;;  %v403_v56 = vld [vmem:[%s6619_s29 + $0x740] sm:$0xff] }
 0x1e8   : > { %v3115_v63 = vpop.f32.mrb[114].mxu0  ;;  %v4395_v55 = vpop.f32.mrb[114].mxu1 }
 0x1e9   : > { %v3116_v0 = vadd.f32 %v7406_v2, %v3115_v63  ;;  %v4396_v1 = vadd.f32 %v7406_v2, %v4395_v55  ;;  %v3117_v3 = vpop.f32.mrb[115].mxu0  ;;  %3379 = vmatmul.mubr.f32.gmra.mrb[220].mxu0 %v391_v59  ;;  %v4397_v4 = vpop.f32.mrb[115].mxu1  ;;  %4659 = vmatmul.mubr.f32.gmra.mrb[220].mxu1 %v903_v60  ;;  %v918_v59 = vld [vmem:[%s6619_s29 + $0x1758] sm:$0xff] }
 0x1ea   : > { %6079 = vmatprep.mubr.msk.f32.mxu0 %vm1223_vm0, %v394_v61  ;;  %6335 = vmatprep.mubr.msk.f32.mxu1 %vm1223_vm0, %v906_v62  ;;  %v917_v3 = vld [vmem:[%s6619_s29 + $0x1750] sm:$0xff]  ;;  %v408_v4 = vld [vmem:[%s6619_s29 + $0x768] sm:$0xff] }
 0x1eb   : > { %5447 = vst.msk [vmem:[%s7017_s16 + $0x1c8] sm:$0xff] %vm5389_vm2, %v3116_v0  ;;  %5703 = vst.msk [vmem:[%s7017_s16 + $0x9c8] sm:$0xff] %vm5389_vm2, %v4396_v1  ;;  %v405_v1 = vld [vmem:[%s6619_s29 + $0x750] sm:$0xff] }
 0x1ec   : > { %v3120_v9 = vpop.f32.mrb[116].mxu0  ;;  %v4400_v10 = vpop.f32.mrb[116].mxu1 }
 0x1ed   : > { %v3121_v11 = vadd.f32 %v7406_v2, %v3120_v9  ;;  %v4401_v12 = vadd.f32 %v7406_v2, %v4400_v10  ;;  %v3122_v13 = vpop.f32.mrb[117].mxu0  ;;  %3384 = vmatmul.mubr.f32.gmra.mrb[222].mxu0 %v393_v5  ;;  %v4402_v14 = vpop.f32.mrb[117].mxu1  ;;  %4664 = vmatmul.mubr.f32.gmra.mrb[222].mxu1 %v905_v6 }
 0x1ee   : > { %6080 = vmatprep.mubr.msk.f32.mxu0 %vm1223_vm0, %v396_v7  ;;  %6336 = vmatprep.mubr.msk.f32.mxu1 %vm1223_vm0, %v908_v8  ;;  %v7795_v7 = vld [vmem:[%s9805_s2] ss:$0 sm:$0xff]  ;;  %v410_v14 = vld [vmem:[%s6619_s29 + $0x778] sm:$0xff] }
 0x1ef   : > { %5448 = vst.msk [vmem:[%s7017_s16 + $0x1d0] sm:$0xff] %vm5389_vm2, %v3121_v11  ;;  %5704 = vst.msk [vmem:[%s7017_s16 + $0x9d0] sm:$0xff] %vm5389_vm2, %v4401_v12  ;;  %v407_v12 = vld [vmem:[%s6619_s29 + $0x760] sm:$0xff] }
 0x1f0   : > { %v3125_v19 = vpop.f32.mrb[118].mxu0  ;;  %v4405_v20 = vpop.f32.mrb[118].mxu1  ;;  %v919_v13 = vld [vmem:[%s6619_s29 + $0x1760] sm:$0xff] }
 0x1f1   : > { %v3126_v21 = vadd.f32 %v7406_v2, %v3125_v19  ;;  %v4406_v22 = vadd.f32 %v7406_v2, %v4405_v20  ;;  %v3127_v23 = vpop.f32.mrb[119].mxu0  ;;  %3389 = vmatmul.mubr.f32.gmra.mrb[224].mxu0 %v395_v15  ;;  %v4407_v24 = vpop.f32.mrb[119].mxu1  ;;  %4669 = vmatmul.mubr.f32.gmra.mrb[224].mxu1 %v907_v16  ;;  %v922_v15 = vld [vmem:[%s6619_s29 + $0x1778] sm:$0xff] }
 0x1f2   : > { %6081 = vmatprep.mubr.msk.f32.mxu0 %vm1223_vm0, %v398_v17  ;;  %6337 = vmatprep.mubr.msk.f32.mxu1 %vm1223_vm0, %v910_v18  ;;  %v921_v23 = vld [vmem:[%s6619_s29 + $0x1770] sm:$0xff]  ;;  %v412_v24 = vld [vmem:[%s6619_s29 + $0x788] sm:$0xff] }
 0x1f3   : > { %5449 = vst.msk [vmem:[%s7017_s16 + $0x1d8] sm:$0xff] %vm5389_vm2, %v3126_v21  ;;  %5705 = vst.msk [vmem:[%s7017_s16 + $0x9d8] sm:$0xff] %vm5389_vm2, %v4406_v22  ;;  %v409_v22 = vld [vmem:[%s6619_s29 + $0x770] sm:$0xff] }
 0x1f4   : > { %v3130_v29 = vpop.f32.mrb[120].mxu0  ;;  %v4410_v30 = vpop.f32.mrb[120].mxu1 }
 0x1f5   : > { %v3131_v31 = vadd.f32 %v7406_v2, %v3130_v29  ;;  %v4411_v32 = vadd.f32 %v7406_v2, %v4410_v30  ;;  %v3132_v33 = vpop.f32.mrb[121].mxu0  ;;  %3394 = vmatmul.mubr.f32.gmra.mrb[226].mxu0 %v397_v25  ;;  %v4412_v34 = vpop.f32.mrb[121].mxu1  ;;  %4674 = vmatmul.mubr.f32.gmra.mrb[226].mxu1 %v909_v26  ;;  %v924_v25 = vld [vmem:[%s6619_s29 + $0x1788] sm:$0xff] }
 0x1f6   : > { %6082 = vmatprep.mubr.msk.f32.mxu0 %vm1223_vm0, %v400_v27  ;;  %6338 = vmatprep.mubr.msk.f32.mxu1 %vm1223_vm0, %v912_v28  ;;  %v923_v33 = vld [vmem:[%s6619_s29 + $0x1780] sm:$0xff]  ;;  %v414_v34 = vld [vmem:[%s6619_s29 + $0x798] sm:$0xff] }
 0x1f7   : > { %5450 = vst.msk [vmem:[%s7017_s16 + $0x1e0] sm:$0xff] %vm5389_vm2, %v3131_v31  ;;  %5706 = vst.msk [vmem:[%s7017_s16 + $0x9e0] sm:$0xff] %vm5389_vm2, %v4411_v32  ;;  %v411_v32 = vld [vmem:[%s6619_s29 + $0x780] sm:$0xff] }
 0x1f8   : > { %v3135_v39 = vpop.f32.mrb[122].mxu0  ;;  %v4415_v40 = vpop.f32.mrb[122].mxu1 }
 0x1f9   : > { %v3136_v41 = vadd.f32 %v7406_v2, %v3135_v39  ;;  %v4416_v42 = vadd.f32 %v7406_v2, %v4415_v40  ;;  %v3137_v43 = vpop.f32.mrb[123].mxu0  ;;  %3399 = vmatmul.mubr.f32.gmra.mrb[228].mxu0 %v399_v35  ;;  %v4417_v44 = vpop.f32.mrb[123].mxu1  ;;  %4679 = vmatmul.mubr.f32.gmra.mrb[228].mxu1 %v911_v36  ;;  %v926_v35 = vld [vmem:[%s6619_s29 + $0x1798] sm:$0xff] }
 0x1fa   : > { %6083 = vmatprep.mubr.msk.f32.mxu0 %vm1223_vm0, %v402_v37  ;;  %6339 = vmatprep.mubr.msk.f32.mxu1 %vm1223_vm0, %v914_v38  ;;  %v925_v43 = vld [vmem:[%s6619_s29 + $0x1790] sm:$0xff]  ;;  %v416_v44 = vld [vmem:[%s6619_s29 + $0x7a8] sm:$0xff] }
 0x1fb   : > { %5451 = vst.msk [vmem:[%s7017_s16 + $0x1e8] sm:$0xff] %vm5389_vm2, %v3136_v41  ;;  %5707 = vst.msk [vmem:[%s7017_s16 + $0x9e8] sm:$0xff] %vm5389_vm2, %v4416_v42  ;;  %v413_v42 = vld [vmem:[%s6619_s29 + $0x790] sm:$0xff] }
 0x1fc   : > { %v3140_v49 = vpop.f32.mrb[124].mxu0  ;;  %v4420_v50 = vpop.f32.mrb[124].mxu1 }
 0x1fd   : > { %v3141_v51 = vadd.f32 %v7406_v2, %v3140_v49  ;;  %v4421_v52 = vadd.f32 %v7406_v2, %v4420_v50  ;;  %v3142_v53 = vpop.f32.mrb[125].mxu0  ;;  %3404 = vmatmul.mubr.f32.gmra.mrb[230].mxu0 %v401_v45  ;;  %v4422_v54 = vpop.f32.mrb[125].mxu1  ;;  %4684 = vmatmul.mubr.f32.gmra.mrb[230].mxu1 %v913_v46  ;;  %v928_v45 = vld [vmem:[%s6619_s29 + $0x17a8] sm:$0xff] }
 0x1fe   : > { %6084 = vmatprep.mubr.msk.f32.mxu0 %vm1223_vm0, %v404_v47  ;;  %6340 = vmatprep.mubr.msk.f32.mxu1 %vm1223_vm0, %v916_v48  ;;  %v927_v53 = vld [vmem:[%s6619_s29 + $0x17a0] sm:$0xff]  ;;  %v418_v54 = vld [vmem:[%s6619_s29 + $0x7b8] sm:$0xff] }
 0x1ff   : > { %5452 = vst.msk [vmem:[%s7017_s16 + $0x1f0] sm:$0xff] %vm5389_vm2, %v3141_v51  ;;  %5708 = vst.msk [vmem:[%s7017_s16 + $0x9f0] sm:$0xff] %vm5389_vm2, %v4421_v52  ;;  %v415_v52 = vld [vmem:[%s6619_s29 + $0x7a0] sm:$0xff] }
 0x200   : > { %v3145_v60 = vpop.f32.mrb[126].mxu0  ;;  %v4425_v61 = vpop.f32.mrb[126].mxu1 }
 0x201   : > { %v3146_v62 = vadd.f32 %v7406_v2, %v3145_v60  ;;  %v4426_v63 = vadd.f32 %v7406_v2, %v4425_v61  ;;  %v3147_v55 = vpop.f32.mrb[127].mxu0  ;;  %3409 = vmatmul.mubr.f32.gmra.mrb[232].mxu0 %v403_v56  ;;  %v4427_v0 = vpop.f32.mrb[127].mxu1  ;;  %4689 = vmatmul.mubr.f32.gmra.mrb[232].mxu1 %v915_v57  ;;  %v920_v2 = vld [vmem:[%s6619_s29 + $0x1768] sm:$0xff]  ;;  %v930_v56 = vld [vmem:[%s6619_s29 + $0x17b8] sm:$0xff] }
 0x202   : > { %6085 = vmatprep.mubr.msk.f32.mxu0 %vm1223_vm0, %v406_v58  ;;  %6341 = vmatprep.mubr.msk.f32.mxu1 %vm1223_vm0, %v918_v59  ;;  %v929_v55 = vld [vmem:[%s6619_s29 + $0x17b0] sm:$0xff]  ;;  %v420_v0 = vld [vmem:[%s6619_s29 + $0x7c8] sm:$0xff] }
 0x203   : > { %5453 = vst.msk [vmem:[%s7017_s16 + $0x1f8] sm:$0xff] %vm5389_vm2, %v3146_v62  ;;  %5709 = vst.msk [vmem:[%s7017_s16 + $0x9f8] sm:$0xff] %vm5389_vm2, %v4426_v63  ;;  %v417_v63 = vld [vmem:[%s6619_s29 + $0x7b0] sm:$0xff] }
 0x204   : > { %v3150_v5 = vpop.f32.mrb[128].mxu0  ;;  %v4430_v6 = vpop.f32.mrb[128].mxu1 }
 0x205   : > { %v3151_v8 = vadd.f32 %v7795_v7, %v3150_v5  ;;  %v4431_v9 = vadd.f32 %v7795_v7, %v4430_v6  ;;  %v3152_v10 = vpop.f32.mrb[129].mxu0  ;;  %3414 = vmatmul.mubr.f32.gmra.mrb[234].mxu0 %v405_v1  ;;  %v4432_v11 = vpop.f32.mrb[129].mxu1  ;;  %4694 = vmatmul.mubr.f32.gmra.mrb[234].mxu1 %v917_v3  ;;  %v932_v1 = vld [vmem:[%s6619_s29 + $0x17c8] sm:$0xff] }
 0x206   : > { %6086 = vmatprep.mubr.msk.f32.mxu0 %vm1223_vm0, %v408_v4  ;;  %6342 = vmatprep.mubr.msk.f32.mxu1 %vm1223_vm0, %v920_v2  ;;  %v931_v10 = vld [vmem:[%s6619_s29 + $0x17c0] sm:$0xff]  ;;  %v422_v11 = vld [vmem:[%s6619_s29 + $0x7d8] sm:$0xff] }
 0x207   : > { %5454 = vst.msk [vmem:[%s7017_s16 + $0x200] sm:$0xff] %vm5389_vm2, %v3151_v8  ;;  %5710 = vst.msk [vmem:[%s7017_s16 + $0xa00] sm:$0xff] %vm5389_vm2, %v4431_v9  ;;  %v419_v9 = vld [vmem:[%s6619_s29 + $0x7c0] sm:$0xff] }
 0x208   : > { %v3155_v16 = vpop.f32.mrb[130].mxu0  ;;  %v4435_v17 = vpop.f32.mrb[130].mxu1 }
 0x209   : > { %v3156_v18 = vadd.f32 %v7795_v7, %v3155_v16  ;;  %v4436_v19 = vadd.f32 %v7795_v7, %v4435_v17  ;;  %v3157_v20 = vpop.f32.mrb[131].mxu0  ;;  %3419 = vmatmul.mubr.f32.gmra.mrb[236].mxu0 %v407_v12  ;;  %v4437_v21 = vpop.f32.mrb[131].mxu1  ;;  %4699 = vmatmul.mubr.f32.gmra.mrb[236].mxu1 %v919_v13  ;;  %v934_v12 = vld [vmem:[%s6619_s29 + $0x17d8] sm:$0xff] }
 0x20a   : > { %6087 = vmatprep.mubr.msk.f32.mxu0 %vm1223_vm0, %v410_v14  ;;  %6343 = vmatprep.mubr.msk.f32.mxu1 %vm1223_vm0, %v922_v15  ;;  %v933_v20 = vld [vmem:[%s6619_s29 + $0x17d0] sm:$0xff]  ;;  %v424_v21 = vld [vmem:[%s6619_s29 + $0x7e8] sm:$0xff] }
 0x20b   : > { %5455 = vst.msk [vmem:[%s7017_s16 + $0x208] sm:$0xff] %vm5389_vm2, %v3156_v18  ;;  %5711 = vst.msk [vmem:[%s7017_s16 + $0xa08] sm:$0xff] %vm5389_vm2, %v4436_v19  ;;  %v421_v19 = vld [vmem:[%s6619_s29 + $0x7d0] sm:$0xff] }
 0x20c   : > { %v3160_v26 = vpop.f32.mrb[132].mxu0  ;;  %v4440_v27 = vpop.f32.mrb[132].mxu1 }
 0x20d   : > { %v3161_v28 = vadd.f32 %v7795_v7, %v3160_v26  ;;  %v4441_v29 = vadd.f32 %v7795_v7, %v4440_v27  ;;  %v3162_v30 = vpop.f32.mrb[133].mxu0  ;;  %3424 = vmatmul.mubr.f32.gmra.mrb[238].mxu0 %v409_v22  ;;  %v4442_v31 = vpop.f32.mrb[133].mxu1  ;;  %4704 = vmatmul.mubr.f32.gmra.mrb[238].mxu1 %v921_v23  ;;  %v936_v22 = vld [vmem:[%s6619_s29 + $0x17e8] sm:$0xff] }
 0x20e   : > { %6088 = vmatprep.mubr.msk.f32.mxu0 %vm1223_vm0, %v412_v24  ;;  %6344 = vmatprep.mubr.msk.f32.mxu1 %vm1223_vm0, %v924_v25  ;;  %v935_v30 = vld [vmem:[%s6619_s29 + $0x17e0] sm:$0xff]  ;;  %v426_v31 = vld [vmem:[%s6619_s29 + $0x7f8] sm:$0xff] }
 0x20f   : > { %5456 = vst.msk [vmem:[%s7017_s16 + $0x210] sm:$0xff] %vm5389_vm2, %v3161_v28  ;;  %5712 = vst.msk [vmem:[%s7017_s16 + $0xa10] sm:$0xff] %vm5389_vm2, %v4441_v29  ;;  %v423_v29 = vld [vmem:[%s6619_s29 + $0x7e0] sm:$0xff] }
 0x210   : > { %v3165_v36 = vpop.f32.mrb[134].mxu0  ;;  %v4445_v37 = vpop.f32.mrb[134].mxu1 }
 0x211   : > { %v3166_v38 = vadd.f32 %v7795_v7, %v3165_v36  ;;  %v4446_v39 = vadd.f32 %v7795_v7, %v4445_v37  ;;  %v3167_v40 = vpop.f32.mrb[135].mxu0  ;;  %3429 = vmatmul.mubr.f32.gmra.mrb[240].mxu0 %v411_v32  ;;  %v4447_v41 = vpop.f32.mrb[135].mxu1  ;;  %4709 = vmatmul.mubr.f32.gmra.mrb[240].mxu1 %v923_v33  ;;  %v938_v32 = vld [vmem:[%s6619_s29 + $0x17f8] sm:$0xff] }
 0x212   : > { %6089 = vmatprep.mubr.msk.f32.mxu0 %vm1223_vm0, %v414_v34  ;;  %6345 = vmatprep.mubr.msk.f32.mxu1 %vm1223_vm0, %v926_v35  ;;  %v937_v40 = vld [vmem:[%s6619_s29 + $0x17f0] sm:$0xff]  ;;  %v428_v41 = vld [vmem:[%s6619_s29 + $0x808] sm:$0xff] }
 0x213   : > { %5457 = vst.msk [vmem:[%s7017_s16 + $0x218] sm:$0xff] %vm5389_vm2, %v3166_v38  ;;  %5713 = vst.msk [vmem:[%s7017_s16 + $0xa18] sm:$0xff] %vm5389_vm2, %v4446_v39  ;;  %v425_v39 = vld [vmem:[%s6619_s29 + $0x7f0] sm:$0xff] }
 0x214   : > { %v3170_v46 = vpop.f32.mrb[136].mxu0  ;;  %v4450_v47 = vpop.f32.mrb[136].mxu1 }
 0x215   : > { %v3171_v48 = vadd.f32 %v7795_v7, %v3170_v46  ;;  %v4451_v49 = vadd.f32 %v7795_v7, %v4450_v47  ;;  %v3172_v50 = vpop.f32.mrb[137].mxu0  ;;  %3434 = vmatmul.mubr.f32.gmra.mrb[242].mxu0 %v413_v42  ;;  %v4452_v51 = vpop.f32.mrb[137].mxu1  ;;  %4714 = vmatmul.mubr.f32.gmra.mrb[242].mxu1 %v925_v43  ;;  %v940_v42 = vld [vmem:[%s6619_s29 + $0x1808] sm:$0xff] }
 0x216   : > { %6090 = vmatprep.mubr.msk.f32.mxu0 %vm1223_vm0, %v416_v44  ;;  %6346 = vmatprep.mubr.msk.f32.mxu1 %vm1223_vm0, %v928_v45  ;;  %v939_v50 = vld [vmem:[%s6619_s29 + $0x1800] sm:$0xff]  ;;  %v430_v51 = vld [vmem:[%s6619_s29 + $0x818] sm:$0xff] }
 0x217   : > { %5458 = vst.msk [vmem:[%s7017_s16 + $0x220] sm:$0xff] %vm5389_vm2, %v3171_v48  ;;  %5714 = vst.msk [vmem:[%s7017_s16 + $0xa20] sm:$0xff] %vm5389_vm2, %v4451_v49  ;;  %v427_v49 = vld [vmem:[%s6619_s29 + $0x800] sm:$0xff] }
 0x218   : > { %v3175_v57 = vpop.f32.mrb[138].mxu0  ;;  %v4455_v58 = vpop.f32.mrb[138].mxu1 }
 0x219   : > { %v3176_v59 = vadd.f32 %v7795_v7, %v3175_v57  ;;  %v4456_v60 = vadd.f32 %v7795_v7, %v4455_v58  ;;  %v3177_v61 = vpop.f32.mrb[139].mxu0  ;;  %3439 = vmatmul.mubr.f32.gmra.mrb[244].mxu0 %v415_v52  ;;  %v4457_v62 = vpop.f32.mrb[139].mxu1  ;;  %4719 = vmatmul.mubr.f32.gmra.mrb[244].mxu1 %v927_v53  ;;  %v942_v52 = vld [vmem:[%s6619_s29 + $0x1818] sm:$0xff] }
 0x21a   : > { %6091 = vmatprep.mubr.msk.f32.mxu0 %vm1223_vm0, %v418_v54  ;;  %6347 = vmatprep.mubr.msk.f32.mxu1 %vm1223_vm0, %v930_v56  ;;  %v941_v61 = vld [vmem:[%s6619_s29 + $0x1810] sm:$0xff]  ;;  %v432_v62 = vld [vmem:[%s6619_s29 + $0x828] sm:$0xff] }
 0x21b   : > { %5459 = vst.msk [vmem:[%s7017_s16 + $0x228] sm:$0xff] %vm5389_vm2, %v3176_v59  ;;  %5715 = vst.msk [vmem:[%s7017_s16 + $0xa28] sm:$0xff] %vm5389_vm2, %v4456_v60  ;;  %v429_v60 = vld [vmem:[%s6619_s29 + $0x810] sm:$0xff] }
 0x21c   : > { %v3180_v3 = vpop.f32.mrb[140].mxu0  ;;  %v4460_v4 = vpop.f32.mrb[140].mxu1 }
 0x21d   : > { %v3181_v2 = vadd.f32 %v7795_v7, %v3180_v3  ;;  %v4461_v5 = vadd.f32 %v7795_v7, %v4460_v4  ;;  %v3182_v6 = vpop.f32.mrb[141].mxu0  ;;  %3444 = vmatmul.mubr.f32.gmra.mrb[246].mxu0 %v417_v63  ;;  %v4462_v8 = vpop.f32.mrb[141].mxu1  ;;  %4724 = vmatmul.mubr.f32.gmra.mrb[246].mxu1 %v929_v55  ;;  %v944_v63 = vld [vmem:[%s6619_s29 + $0x1828] sm:$0xff] }
 0x21e   : > { %6092 = vmatprep.mubr.msk.f32.mxu0 %vm1223_vm0, %v420_v0  ;;  %6348 = vmatprep.mubr.msk.f32.mxu1 %vm1223_vm0, %v932_v1  ;;  %v943_v6 = vld [vmem:[%s6619_s29 + $0x1820] sm:$0xff]  ;;  %v434_v8 = vld [vmem:[%s6619_s29 + $0x838] sm:$0xff] }
 0x21f   : > { %5460 = vst.msk [vmem:[%s7017_s16 + $0x230] sm:$0xff] %vm5389_vm2, %v3181_v2  ;;  %5716 = vst.msk [vmem:[%s7017_s16 + $0xa30] sm:$0xff] %vm5389_vm2, %v4461_v5  ;;  %v431_v5 = vld [vmem:[%s6619_s29 + $0x820] sm:$0xff] }
 0x220   : > { %v3185_v13 = vpop.f32.mrb[142].mxu0  ;;  %v4465_v14 = vpop.f32.mrb[142].mxu1 }
 0x221   : > { %v3186_v15 = vadd.f32 %v7795_v7, %v3185_v13  ;;  %v4466_v16 = vadd.f32 %v7795_v7, %v4465_v14  ;;  %v3187_v17 = vpop.f32.mrb[143].mxu0  ;;  %3449 = vmatmul.mubr.f32.gmra.mrb[248].mxu0 %v419_v9  ;;  %v4467_v18 = vpop.f32.mrb[143].mxu1  ;;  %4729 = vmatmul.mubr.f32.gmra.mrb[248].mxu1 %v931_v10  ;;  %v946_v9 = vld [vmem:[%s6619_s29 + $0x1838] sm:$0xff] }
 0x222   : > { %6093 = vmatprep.mubr.msk.f32.mxu0 %vm1223_vm0, %v422_v11  ;;  %6349 = vmatprep.mubr.msk.f32.mxu1 %vm1223_vm0, %v934_v12  ;;  %v945_v17 = vld [vmem:[%s6619_s29 + $0x1830] sm:$0xff]  ;;  %v436_v18 = vld [vmem:[%s6619_s29 + $0x848] sm:$0xff] }
 0x223   : > { %5461 = vst.msk [vmem:[%s7017_s16 + $0x238] sm:$0xff] %vm5389_vm2, %v3186_v15  ;;  %5717 = vst.msk [vmem:[%s7017_s16 + $0xa38] sm:$0xff] %vm5389_vm2, %v4466_v16  ;;  %v433_v16 = vld [vmem:[%s6619_s29 + $0x830] sm:$0xff] }
 0x224   : > { %v3190_v23 = vpop.f32.mrb[144].mxu0  ;;  %v4470_v24 = vpop.f32.mrb[144].mxu1 }
 0x225   : > { %v3191_v25 = vadd.f32 %v7795_v7, %v3190_v23  ;;  %v4471_v26 = vadd.f32 %v7795_v7, %v4470_v24  ;;  %v3192_v27 = vpop.f32.mrb[145].mxu0  ;;  %3454 = vmatmul.mubr.f32.gmra.mrb[250].mxu0 %v421_v19  ;;  %v4472_v28 = vpop.f32.mrb[145].mxu1  ;;  %4734 = vmatmul.mubr.f32.gmra.mrb[250].mxu1 %v933_v20  ;;  %v948_v19 = vld [vmem:[%s6619_s29 + $0x1848] sm:$0xff] }
 0x226   : > { %6094 = vmatprep.mubr.msk.f32.mxu0 %vm1223_vm0, %v424_v21  ;;  %6350 = vmatprep.mubr.msk.f32.mxu1 %vm1223_vm0, %v936_v22  ;;  %v947_v27 = vld [vmem:[%s6619_s29 + $0x1840] sm:$0xff]  ;;  %v438_v28 = vld [vmem:[%s6619_s29 + $0x858] sm:$0xff] }
 0x227   : > { %5462 = vst.msk [vmem:[%s7017_s16 + $0x240] sm:$0xff] %vm5389_vm2, %v3191_v25  ;;  %5718 = vst.msk [vmem:[%s7017_s16 + $0xa40] sm:$0xff] %vm5389_vm2, %v4471_v26  ;;  %v435_v26 = vld [vmem:[%s6619_s29 + $0x840] sm:$0xff] }
 0x228   : > { %v3195_v33 = vpop.f32.mrb[146].mxu0  ;;  %v4475_v34 = vpop.f32.mrb[146].mxu1 }
 0x229   : > { %v3196_v35 = vadd.f32 %v7795_v7, %v3195_v33  ;;  %v4476_v36 = vadd.f32 %v7795_v7, %v4475_v34  ;;  %v3197_v37 = vpop.f32.mrb[147].mxu0  ;;  %3459 = vmatmul.mubr.f32.gmra.mrb[252].mxu0 %v423_v29  ;;  %v4477_v38 = vpop.f32.mrb[147].mxu1  ;;  %4739 = vmatmul.mubr.f32.gmra.mrb[252].mxu1 %v935_v30  ;;  %v950_v29 = vld [vmem:[%s6619_s29 + $0x1858] sm:$0xff] }
 0x22a   : > { %6095 = vmatprep.mubr.msk.f32.mxu0 %vm1223_vm0, %v426_v31  ;;  %6351 = vmatprep.mubr.msk.f32.mxu1 %vm1223_vm0, %v938_v32  ;;  %v949_v37 = vld [vmem:[%s6619_s29 + $0x1850] sm:$0xff]  ;;  %v440_v38 = vld [vmem:[%s6619_s29 + $0x868] sm:$0xff] }
 0x22b   : > { %5463 = vst.msk [vmem:[%s7017_s16 + $0x248] sm:$0xff] %vm5389_vm2, %v3196_v35  ;;  %5719 = vst.msk [vmem:[%s7017_s16 + $0xa48] sm:$0xff] %vm5389_vm2, %v4476_v36  ;;  %v437_v36 = vld [vmem:[%s6619_s29 + $0x850] sm:$0xff] }
 0x22c   : > { %v3200_v43 = vpop.f32.mrb[148].mxu0  ;;  %v4480_v44 = vpop.f32.mrb[148].mxu1 }
 0x22d   : > { %v3201_v45 = vadd.f32 %v7795_v7, %v3200_v43  ;;  %v4481_v46 = vadd.f32 %v7795_v7, %v4480_v44  ;;  %v3202_v47 = vpop.f32.mrb[149].mxu0  ;;  %3464 = vmatmul.mubr.f32.gmra.mrb[254].mxu0 %v425_v39  ;;  %v4482_v48 = vpop.f32.mrb[149].mxu1  ;;  %4744 = vmatmul.mubr.f32.gmra.mrb[254].mxu1 %v937_v40  ;;  %v952_v39 = vld [vmem:[%s6619_s29 + $0x1868] sm:$0xff] }
 0x22e   : > { %6096 = vmatprep.mubr.msk.f32.mxu0 %vm1223_vm0, %v428_v41  ;;  %6352 = vmatprep.mubr.msk.f32.mxu1 %vm1223_vm0, %v940_v42  ;;  %v951_v47 = vld [vmem:[%s6619_s29 + $0x1860] sm:$0xff]  ;;  %v442_v48 = vld [vmem:[%s6619_s29 + $0x878] sm:$0xff] }
 0x22f   : > { %5464 = vst.msk [vmem:[%s7017_s16 + $0x250] sm:$0xff] %vm5389_vm2, %v3201_v45  ;;  %5720 = vst.msk [vmem:[%s7017_s16 + $0xa50] sm:$0xff] %vm5389_vm2, %v4481_v46  ;;  %v439_v46 = vld [vmem:[%s6619_s29 + $0x860] sm:$0xff] }
 0x230   : > { %v3205_v53 = vpop.f32.mrb[150].mxu0  ;;  %v4485_v54 = vpop.f32.mrb[150].mxu1 }
 0x231   : > { %v3206_v56 = vadd.f32 %v7795_v7, %v3205_v53  ;;  %v4486_v57 = vadd.f32 %v7795_v7, %v4485_v54  ;;  %v3207_v58 = vpop.f32.mrb[151].mxu0  ;;  %3469 = vmatmul.mubr.f32.gmra.mrb[0].mxu0 %v427_v49  ;;  %v4487_v59 = vpop.f32.mrb[151].mxu1  ;;  %4749 = vmatmul.mubr.f32.gmra.mrb[0].mxu1 %v939_v50  ;;  %v954_v49 = vld [vmem:[%s6619_s29 + $0x1878] sm:$0xff] }
 0x232   : > { %6097 = vmatprep.mubr.msk.f32.mxu0 %vm1223_vm0, %v430_v51  ;;  %6353 = vmatprep.mubr.msk.f32.mxu1 %vm1223_vm0, %v942_v52  ;;  %v953_v58 = vld [vmem:[%s6619_s29 + $0x1870] sm:$0xff]  ;;  %v444_v59 = vld [vmem:[%s6619_s29 + $0x888] sm:$0xff] }
 0x233   : > { %5465 = vst.msk [vmem:[%s7017_s16 + $0x258] sm:$0xff] %vm5389_vm2, %v3206_v56  ;;  %5721 = vst.msk [vmem:[%s7017_s16 + $0xa58] sm:$0xff] %vm5389_vm2, %v4486_v57  ;;  %v441_v57 = vld [vmem:[%s6619_s29 + $0x870] sm:$0xff] }
 0x234   : > { %v3210_v55 = vpop.f32.mrb[152].mxu0  ;;  %v4490_v0 = vpop.f32.mrb[152].mxu1 }
 0x235   : > { %v3211_v1 = vadd.f32 %v7795_v7, %v3210_v55  ;;  %v4491_v3 = vadd.f32 %v7795_v7, %v4490_v0  ;;  %v3212_v4 = vpop.f32.mrb[153].mxu0  ;;  %3474 = vmatmul.mubr.f32.gmra.mrb[2].mxu0 %v429_v60  ;;  %v4492_v2 = vpop.f32.mrb[153].mxu1  ;;  %4754 = vmatmul.mubr.f32.gmra.mrb[2].mxu1 %v941_v61  ;;  %v956_v60 = vld [vmem:[%s6619_s29 + $0x1888] sm:$0xff] }
 0x236   : > { %6098 = vmatprep.mubr.msk.f32.mxu0 %vm1223_vm0, %v432_v62  ;;  %6354 = vmatprep.mubr.msk.f32.mxu1 %vm1223_vm0, %v944_v63  ;;  %v955_v4 = vld [vmem:[%s6619_s29 + $0x1880] sm:$0xff]  ;;  %v446_v2 = vld [vmem:[%s6619_s29 + $0x898] sm:$0xff] }
 0x237   : > { %5466 = vst.msk [vmem:[%s7017_s16 + $0x260] sm:$0xff] %vm5389_vm2, %v3211_v1  ;;  %5722 = vst.msk [vmem:[%s7017_s16 + $0xa60] sm:$0xff] %vm5389_vm2, %v4491_v3  ;;  %v443_v3 = vld [vmem:[%s6619_s29 + $0x880] sm:$0xff] }
 0x238   : > { %v3215_v10 = vpop.f32.mrb[154].mxu0  ;;  %v4495_v11 = vpop.f32.mrb[154].mxu1 }
 0x239   : > { %v3216_v12 = vadd.f32 %v7795_v7, %v3215_v10  ;;  %v4496_v13 = vadd.f32 %v7795_v7, %v4495_v11  ;;  %v3217_v14 = vpop.f32.mrb[155].mxu0  ;;  %3479 = vmatmul.mubr.f32.gmra.mrb[4].mxu0 %v431_v5  ;;  %v4497_v15 = vpop.f32.mrb[155].mxu1  ;;  %4759 = vmatmul.mubr.f32.gmra.mrb[4].mxu1 %v943_v6  ;;  %v958_v5 = vld [vmem:[%s6619_s29 + $0x1898] sm:$0xff] }
 0x23a   : > { %6099 = vmatprep.mubr.msk.f32.mxu0 %vm1223_vm0, %v434_v8  ;;  %6355 = vmatprep.mubr.msk.f32.mxu1 %vm1223_vm0, %v946_v9  ;;  %v957_v14 = vld [vmem:[%s6619_s29 + $0x1890] sm:$0xff]  ;;  %v448_v15 = vld [vmem:[%s6619_s29 + $0x8a8] sm:$0xff] }
 0x23b   : > { %5467 = vst.msk [vmem:[%s7017_s16 + $0x268] sm:$0xff] %vm5389_vm2, %v3216_v12  ;;  %5723 = vst.msk [vmem:[%s7017_s16 + $0xa68] sm:$0xff] %vm5389_vm2, %v4496_v13  ;;  %v445_v13 = vld [vmem:[%s6619_s29 + $0x890] sm:$0xff] }
 0x23c   : > { %v3220_v20 = vpop.f32.mrb[156].mxu0  ;;  %v4500_v21 = vpop.f32.mrb[156].mxu1 }
 0x23d   : > { %v3221_v22 = vadd.f32 %v7795_v7, %v3220_v20  ;;  %v4501_v23 = vadd.f32 %v7795_v7, %v4500_v21  ;;  %v3222_v24 = vpop.f32.mrb[157].mxu0  ;;  %3484 = vmatmul.mubr.f32.gmra.mrb[6].mxu0 %v433_v16  ;;  %v4502_v25 = vpop.f32.mrb[157].mxu1  ;;  %4764 = vmatmul.mubr.f32.gmra.mrb[6].mxu1 %v945_v17  ;;  %v960_v16 = vld [vmem:[%s6619_s29 + $0x18a8] sm:$0xff] }
 0x23e   : > { %6100 = vmatprep.mubr.msk.f32.mxu0 %vm1223_vm0, %v436_v18  ;;  %6356 = vmatprep.mubr.msk.f32.mxu1 %vm1223_vm0, %v948_v19  ;;  %v959_v24 = vld [vmem:[%s6619_s29 + $0x18a0] sm:$0xff]  ;;  %v450_v25 = vld [vmem:[%s6619_s29 + $0x8b8] sm:$0xff] }
 0x23f   : > { %5468 = vst.msk [vmem:[%s7017_s16 + $0x270] sm:$0xff] %vm5389_vm2, %v3221_v22  ;;  %5724 = vst.msk [vmem:[%s7017_s16 + $0xa70] sm:$0xff] %vm5389_vm2, %v4501_v23  ;;  %v447_v23 = vld [vmem:[%s6619_s29 + $0x8a0] sm:$0xff] }
 0x240   : > { %v3225_v30 = vpop.f32.mrb[158].mxu0  ;;  %v4505_v31 = vpop.f32.mrb[158].mxu1 }
 0x241   : > { %v3226_v32 = vadd.f32 %v7795_v7, %v3225_v30  ;;  %v4506_v33 = vadd.f32 %v7795_v7, %v4505_v31  ;;  %v3227_v34 = vpop.f32.mrb[159].mxu0  ;;  %3489 = vmatmul.mubr.f32.gmra.mrb[8].mxu0 %v435_v26  ;;  %v4507_v35 = vpop.f32.mrb[159].mxu1  ;;  %4769 = vmatmul.mubr.f32.gmra.mrb[8].mxu1 %v947_v27  ;;  %v962_v26 = vld [vmem:[%s6619_s29 + $0x18b8] sm:$0xff] }
 0x242   : > { %6101 = vmatprep.mubr.msk.f32.mxu0 %vm1223_vm0, %v438_v28  ;;  %6357 = vmatprep.mubr.msk.f32.mxu1 %vm1223_vm0, %v950_v29  ;;  %v961_v34 = vld [vmem:[%s6619_s29 + $0x18b0] sm:$0xff]  ;;  %v452_v35 = vld [vmem:[%s6619_s29 + $0x8c8] sm:$0xff] }
 0x243   : > { %5469 = vst.msk [vmem:[%s7017_s16 + $0x278] sm:$0xff] %vm5389_vm2, %v3226_v32  ;;  %5725 = vst.msk [vmem:[%s7017_s16 + $0xa78] sm:$0xff] %vm5389_vm2, %v4506_v33  ;;  %v449_v33 = vld [vmem:[%s6619_s29 + $0x8b0] sm:$0xff] }
 0x244   : > { %v3230_v40 = vpop.f32.mrb[160].mxu0  ;;  %v4510_v41 = vpop.f32.mrb[160].mxu1 }
 0x245   : > { %v3231_v42 = vadd.f32 %v7795_v7, %v3230_v40  ;;  %v4511_v43 = vadd.f32 %v7795_v7, %v4510_v41  ;;  %v3232_v44 = vpop.f32.mrb[161].mxu0  ;;  %3494 = vmatmul.mubr.f32.gmra.mrb[10].mxu0 %v437_v36  ;;  %v4512_v45 = vpop.f32.mrb[161].mxu1  ;;  %4774 = vmatmul.mubr.f32.gmra.mrb[10].mxu1 %v949_v37  ;;  %v964_v36 = vld [vmem:[%s6619_s29 + $0x18c8] sm:$0xff] }
 0x246   : > { %6102 = vmatprep.mubr.msk.f32.mxu0 %vm1223_vm0, %v440_v38  ;;  %6358 = vmatprep.mubr.msk.f32.mxu1 %vm1223_vm0, %v952_v39  ;;  %v963_v44 = vld [vmem:[%s6619_s29 + $0x18c0] sm:$0xff]  ;;  %v454_v45 = vld [vmem:[%s6619_s29 + $0x8d8] sm:$0xff] }
 0x247   : > { %5470 = vst.msk [vmem:[%s7017_s16 + $0x280] sm:$0xff] %vm5389_vm2, %v3231_v42  ;;  %5726 = vst.msk [vmem:[%s7017_s16 + $0xa80] sm:$0xff] %vm5389_vm2, %v4511_v43  ;;  %v451_v43 = vld [vmem:[%s6619_s29 + $0x8c0] sm:$0xff] }
 0x248   : > { %v3235_v50 = vpop.f32.mrb[162].mxu0  ;;  %v4515_v51 = vpop.f32.mrb[162].mxu1 }
 0x249   : > { %v3236_v52 = vadd.f32 %v7795_v7, %v3235_v50  ;;  %v4516_v53 = vadd.f32 %v7795_v7, %v4515_v51  ;;  %v3237_v54 = vpop.f32.mrb[163].mxu0  ;;  %3499 = vmatmul.mubr.f32.gmra.mrb[12].mxu0 %v439_v46  ;;  %v4517_v56 = vpop.f32.mrb[163].mxu1  ;;  %4779 = vmatmul.mubr.f32.gmra.mrb[12].mxu1 %v951_v47  ;;  %v966_v46 = vld [vmem:[%s6619_s29 + $0x18d8] sm:$0xff] }
 0x24a   : > { %6103 = vmatprep.mubr.msk.f32.mxu0 %vm1223_vm0, %v442_v48  ;;  %6359 = vmatprep.mubr.msk.f32.mxu1 %vm1223_vm0, %v954_v49  ;;  %v965_v54 = vld [vmem:[%s6619_s29 + $0x18d0] sm:$0xff]  ;;  %v456_v56 = vld [vmem:[%s6619_s29 + $0x8e8] sm:$0xff] }
 0x24b   : > { %5471 = vst.msk [vmem:[%s7017_s16 + $0x288] sm:$0xff] %vm5389_vm2, %v3236_v52  ;;  %5727 = vst.msk [vmem:[%s7017_s16 + $0xa88] sm:$0xff] %vm5389_vm2, %v4516_v53  ;;  %v453_v53 = vld [vmem:[%s6619_s29 + $0x8d0] sm:$0xff] }
 0x24c   : > { %v3240_v61 = vpop.f32.mrb[164].mxu0  ;;  %v4520_v62 = vpop.f32.mrb[164].mxu1 }
 0x24d   : > { %v3241_v63 = vadd.f32 %v7795_v7, %v3240_v61  ;;  %v4521_v55 = vadd.f32 %v7795_v7, %v4520_v62  ;;  %v3242_v0 = vpop.f32.mrb[165].mxu0  ;;  %3504 = vmatmul.mubr.f32.gmra.mrb[14].mxu0 %v441_v57  ;;  %v4522_v1 = vpop.f32.mrb[165].mxu1  ;;  %4784 = vmatmul.mubr.f32.gmra.mrb[14].mxu1 %v953_v58  ;;  %v968_v57 = vld [vmem:[%s6619_s29 + $0x18e8] sm:$0xff] }
 0x24e   : > { %6104 = vmatprep.mubr.msk.f32.mxu0 %vm1223_vm0, %v444_v59  ;;  %6360 = vmatprep.mubr.msk.f32.mxu1 %vm1223_vm0, %v956_v60  ;;  %v967_v0 = vld [vmem:[%s6619_s29 + $0x18e0] sm:$0xff]  ;;  %v458_v1 = vld [vmem:[%s6619_s29 + $0x8f8] sm:$0xff] }
 0x24f   : > { %5472 = vst.msk [vmem:[%s7017_s16 + $0x290] sm:$0xff] %vm5389_vm2, %v3241_v63  ;;  %5728 = vst.msk [vmem:[%s7017_s16 + $0xa90] sm:$0xff] %vm5389_vm2, %v4521_v55  ;;  %v455_v55 = vld [vmem:[%s6619_s29 + $0x8e0] sm:$0xff] }
 0x250   : > { %v3245_v6 = vpop.f32.mrb[166].mxu0  ;;  %v4525_v8 = vpop.f32.mrb[166].mxu1 }
 0x251   : > { %v3246_v9 = vadd.f32 %v7795_v7, %v3245_v6  ;;  %v4526_v10 = vadd.f32 %v7795_v7, %v4525_v8  ;;  %v3247_v11 = vpop.f32.mrb[167].mxu0  ;;  %3509 = vmatmul.mubr.f32.gmra.mrb[16].mxu0 %v443_v3  ;;  %v4527_v12 = vpop.f32.mrb[167].mxu1  ;;  %4789 = vmatmul.mubr.f32.gmra.mrb[16].mxu1 %v955_v4  ;;  %v970_v3 = vld [vmem:[%s6619_s29 + $0x18f8] sm:$0xff] }
 0x252   : > { %6105 = vmatprep.mubr.msk.f32.mxu0 %vm1223_vm0, %v446_v2  ;;  %6361 = vmatprep.mubr.msk.f32.mxu1 %vm1223_vm0, %v958_v5  ;;  %v969_v11 = vld [vmem:[%s6619_s29 + $0x18f0] sm:$0xff]  ;;  %v460_v12 = vld [vmem:[%s6619_s29 + $0x908] sm:$0xff] }
 0x253   : > { %5473 = vst.msk [vmem:[%s7017_s16 + $0x298] sm:$0xff] %vm5389_vm2, %v3246_v9  ;;  %5729 = vst.msk [vmem:[%s7017_s16 + $0xa98] sm:$0xff] %vm5389_vm2, %v4526_v10  ;;  %v457_v10 = vld [vmem:[%s6619_s29 + $0x8f0] sm:$0xff] }
 0x254   : > { %v3250_v17 = vpop.f32.mrb[168].mxu0  ;;  %v4530_v18 = vpop.f32.mrb[168].mxu1 }
 0x255   : > { %v3251_v19 = vadd.f32 %v7795_v7, %v3250_v17  ;;  %v4531_v20 = vadd.f32 %v7795_v7, %v4530_v18  ;;  %v3252_v21 = vpop.f32.mrb[169].mxu0  ;;  %3514 = vmatmul.mubr.f32.gmra.mrb[18].mxu0 %v445_v13  ;;  %v4532_v22 = vpop.f32.mrb[169].mxu1  ;;  %4794 = vmatmul.mubr.f32.gmra.mrb[18].mxu1 %v957_v14  ;;  %v972_v13 = vld [vmem:[%s6619_s29 + $0x1908] sm:$0xff] }
 0x256   : > { %6106 = vmatprep.mubr.msk.f32.mxu0 %vm1223_vm0, %v448_v15  ;;  %6362 = vmatprep.mubr.msk.f32.mxu1 %vm1223_vm0, %v960_v16  ;;  %v971_v21 = vld [vmem:[%s6619_s29 + $0x1900] sm:$0xff]  ;;  %v462_v22 = vld [vmem:[%s6619_s29 + $0x918] sm:$0xff] }
 0x257   : > { %5474 = vst.msk [vmem:[%s7017_s16 + $0x2a0] sm:$0xff] %vm5389_vm2, %v3251_v19  ;;  %5730 = vst.msk [vmem:[%s7017_s16 + $0xaa0] sm:$0xff] %vm5389_vm2, %v4531_v20  ;;  %v459_v20 = vld [vmem:[%s6619_s29 + $0x900] sm:$0xff] }
 0x258   : > { %v3255_v27 = vpop.f32.mrb[170].mxu0  ;;  %v4535_v28 = vpop.f32.mrb[170].mxu1 }
 0x259   : > { %v3256_v29 = vadd.f32 %v7795_v7, %v3255_v27  ;;  %v4536_v30 = vadd.f32 %v7795_v7, %v4535_v28  ;;  %v3257_v31 = vpop.f32.mrb[171].mxu0  ;;  %3519 = vmatmul.mubr.f32.gmra.mrb[20].mxu0 %v447_v23  ;;  %v4537_v32 = vpop.f32.mrb[171].mxu1  ;;  %4799 = vmatmul.mubr.f32.gmra.mrb[20].mxu1 %v959_v24  ;;  %v974_v23 = vld [vmem:[%s6619_s29 + $0x1918] sm:$0xff] }
 0x25a   : > { %6107 = vmatprep.mubr.msk.f32.mxu0 %vm1223_vm0, %v450_v25  ;;  %6363 = vmatprep.mubr.msk.f32.mxu1 %vm1223_vm0, %v962_v26  ;;  %v973_v31 = vld [vmem:[%s6619_s29 + $0x1910] sm:$0xff]  ;;  %v464_v32 = vld [vmem:[%s6619_s29 + $0x928] sm:$0xff] }
 0x25b   : > { %5475 = vst.msk [vmem:[%s7017_s16 + $0x2a8] sm:$0xff] %vm5389_vm2, %v3256_v29  ;;  %5731 = vst.msk [vmem:[%s7017_s16 + $0xaa8] sm:$0xff] %vm5389_vm2, %v4536_v30  ;;  %v461_v30 = vld [vmem:[%s6619_s29 + $0x910] sm:$0xff] }
 0x25c   : > { %v3260_v37 = vpop.f32.mrb[172].mxu0  ;;  %v4540_v38 = vpop.f32.mrb[172].mxu1 }
 0x25d   : > { %v3261_v39 = vadd.f32 %v7795_v7, %v3260_v37  ;;  %v4541_v40 = vadd.f32 %v7795_v7, %v4540_v38  ;;  %v3262_v41 = vpop.f32.mrb[173].mxu0  ;;  %3524 = vmatmul.mubr.f32.gmra.mrb[22].mxu0 %v449_v33  ;;  %v4542_v42 = vpop.f32.mrb[173].mxu1  ;;  %4804 = vmatmul.mubr.f32.gmra.mrb[22].mxu1 %v961_v34  ;;  %v976_v33 = vld [vmem:[%s6619_s29 + $0x1928] sm:$0xff] }
 0x25e   : > { %6108 = vmatprep.mubr.msk.f32.mxu0 %vm1223_vm0, %v452_v35  ;;  %6364 = vmatprep.mubr.msk.f32.mxu1 %vm1223_vm0, %v964_v36  ;;  %v975_v41 = vld [vmem:[%s6619_s29 + $0x1920] sm:$0xff]  ;;  %v466_v42 = vld [vmem:[%s6619_s29 + $0x938] sm:$0xff] }
 0x25f   : > { %5476 = vst.msk [vmem:[%s7017_s16 + $0x2b0] sm:$0xff] %vm5389_vm2, %v3261_v39  ;;  %5732 = vst.msk [vmem:[%s7017_s16 + $0xab0] sm:$0xff] %vm5389_vm2, %v4541_v40  ;;  %v463_v40 = vld [vmem:[%s6619_s29 + $0x920] sm:$0xff] }
 0x260   : > { %v3265_v47 = vpop.f32.mrb[174].mxu0  ;;  %v4545_v48 = vpop.f32.mrb[174].mxu1 }
 0x261   : > { %v3266_v49 = vadd.f32 %v7795_v7, %v3265_v47  ;;  %v4546_v50 = vadd.f32 %v7795_v7, %v4545_v48  ;;  %v3267_v51 = vpop.f32.mrb[175].mxu0  ;;  %3529 = vmatmul.mubr.f32.gmra.mrb[24].mxu0 %v451_v43  ;;  %v4547_v52 = vpop.f32.mrb[175].mxu1  ;;  %4809 = vmatmul.mubr.f32.gmra.mrb[24].mxu1 %v963_v44  ;;  %v978_v43 = vld [vmem:[%s6619_s29 + $0x1938] sm:$0xff] }
 0x262   : > { %6109 = vmatprep.mubr.msk.f32.mxu0 %vm1223_vm0, %v454_v45  ;;  %6365 = vmatprep.mubr.msk.f32.mxu1 %vm1223_vm0, %v966_v46  ;;  %v977_v51 = vld [vmem:[%s6619_s29 + $0x1930] sm:$0xff]  ;;  %v468_v52 = vld [vmem:[%s6619_s29 + $0x948] sm:$0xff] }
 0x263   : > { %5477 = vst.msk [vmem:[%s7017_s16 + $0x2b8] sm:$0xff] %vm5389_vm2, %v3266_v49  ;;  %5733 = vst.msk [vmem:[%s7017_s16 + $0xab8] sm:$0xff] %vm5389_vm2, %v4546_v50  ;;  %v465_v50 = vld [vmem:[%s6619_s29 + $0x930] sm:$0xff] }
 0x264   : > { %v3270_v58 = vpop.f32.mrb[176].mxu0  ;;  %v4550_v59 = vpop.f32.mrb[176].mxu1 }
 0x265   : > { %v3271_v60 = vadd.f32 %v7795_v7, %v3270_v58  ;;  %v4551_v61 = vadd.f32 %v7795_v7, %v4550_v59  ;;  %v3272_v62 = vpop.f32.mrb[177].mxu0  ;;  %3534 = vmatmul.mubr.f32.gmra.mrb[26].mxu0 %v453_v53  ;;  %v4552_v63 = vpop.f32.mrb[177].mxu1  ;;  %4814 = vmatmul.mubr.f32.gmra.mrb[26].mxu1 %v965_v54  ;;  %v980_v53 = vld [vmem:[%s6619_s29 + $0x1948] sm:$0xff] }
 0x266   : > { %6110 = vmatprep.mubr.msk.f32.mxu0 %vm1223_vm0, %v456_v56  ;;  %6366 = vmatprep.mubr.msk.f32.mxu1 %vm1223_vm0, %v968_v57  ;;  %v979_v62 = vld [vmem:[%s6619_s29 + $0x1940] sm:$0xff]  ;;  %v470_v63 = vld [vmem:[%s6619_s29 + $0x958] sm:$0xff] }
 0x267   : > { %5478 = vst.msk [vmem:[%s7017_s16 + $0x2c0] sm:$0xff] %vm5389_vm2, %v3271_v60  ;;  %5734 = vst.msk [vmem:[%s7017_s16 + $0xac0] sm:$0xff] %vm5389_vm2, %v4551_v61  ;;  %v467_v61 = vld [vmem:[%s6619_s29 + $0x940] sm:$0xff] }
 0x268   : > { %v3275_v4 = vpop.f32.mrb[178].mxu0  ;;  %v4555_v2 = vpop.f32.mrb[178].mxu1 }
 0x269   : > { %v3276_v5 = vadd.f32 %v7795_v7, %v3275_v4  ;;  %v4556_v6 = vadd.f32 %v7795_v7, %v4555_v2  ;;  %v3277_v8 = vpop.f32.mrb[179].mxu0  ;;  %3539 = vmatmul.mubr.f32.gmra.mrb[28].mxu0 %v455_v55  ;;  %v4557_v9 = vpop.f32.mrb[179].mxu1  ;;  %4819 = vmatmul.mubr.f32.gmra.mrb[28].mxu1 %v967_v0  ;;  %v982_v55 = vld [vmem:[%s6619_s29 + $0x1958] sm:$0xff] }
 0x26a   : > { %6111 = vmatprep.mubr.msk.f32.mxu0 %vm1223_vm0, %v458_v1  ;;  %6367 = vmatprep.mubr.msk.f32.mxu1 %vm1223_vm0, %v970_v3  ;;  %v981_v8 = vld [vmem:[%s6619_s29 + $0x1950] sm:$0xff]  ;;  %v472_v9 = vld [vmem:[%s6619_s29 + $0x968] sm:$0xff] }
 0x26b   : > { %5479 = vst.msk [vmem:[%s7017_s16 + $0x2c8] sm:$0xff] %vm5389_vm2, %v3276_v5  ;;  %5735 = vst.msk [vmem:[%s7017_s16 + $0xac8] sm:$0xff] %vm5389_vm2, %v4556_v6  ;;  %v469_v6 = vld [vmem:[%s6619_s29 + $0x950] sm:$0xff] }
 0x26c   : > { %v3280_v14 = vpop.f32.mrb[180].mxu0  ;;  %v4560_v15 = vpop.f32.mrb[180].mxu1 }
 0x26d   : > { %v3281_v16 = vadd.f32 %v7795_v7, %v3280_v14  ;;  %v4561_v17 = vadd.f32 %v7795_v7, %v4560_v15  ;;  %v3282_v18 = vpop.f32.mrb[181].mxu0  ;;  %3544 = vmatmul.mubr.f32.gmra.mrb[30].mxu0 %v457_v10  ;;  %v4562_v19 = vpop.f32.mrb[181].mxu1  ;;  %4824 = vmatmul.mubr.f32.gmra.mrb[30].mxu1 %v969_v11 }
 0x26e   : > { %6112 = vmatprep.mubr.msk.f32.mxu0 %vm1223_vm0, %v460_v12  ;;  %6368 = vmatprep.mubr.msk.f32.mxu1 %vm1223_vm0, %v972_v13  ;;  %v8184_v12 = vld [vmem:[%s9805_s2] ss:$0 sm:$0xff]  ;;  %v474_v19 = vld [vmem:[%s6619_s29 + $0x978] sm:$0xff] }
 0x26f   : > { %5480 = vst.msk [vmem:[%s7017_s16 + $0x2d0] sm:$0xff] %vm5389_vm2, %v3281_v16  ;;  %5736 = vst.msk [vmem:[%s7017_s16 + $0xad0] sm:$0xff] %vm5389_vm2, %v4561_v17  ;;  %v471_v17 = vld [vmem:[%s6619_s29 + $0x960] sm:$0xff] }
 0x270   : > { %v3285_v24 = vpop.f32.mrb[182].mxu0  ;;  %v4565_v25 = vpop.f32.mrb[182].mxu1  ;;  %v983_v18 = vld [vmem:[%s6619_s29 + $0x1960] sm:$0xff] }
 0x271   : > { %v3286_v26 = vadd.f32 %v7795_v7, %v3285_v24  ;;  %v4566_v27 = vadd.f32 %v7795_v7, %v4565_v25  ;;  %v3287_v28 = vpop.f32.mrb[183].mxu0  ;;  %3549 = vmatmul.mubr.f32.gmra.mrb[32].mxu0 %v459_v20  ;;  %v4567_v29 = vpop.f32.mrb[183].mxu1  ;;  %4829 = vmatmul.mubr.f32.gmra.mrb[32].mxu1 %v971_v21  ;;  %v986_v20 = vld [vmem:[%s6619_s29 + $0x1978] sm:$0xff] }
 0x272   : > { %6113 = vmatprep.mubr.msk.f32.mxu0 %vm1223_vm0, %v462_v22  ;;  %6369 = vmatprep.mubr.msk.f32.mxu1 %vm1223_vm0, %v974_v23  ;;  %v985_v28 = vld [vmem:[%s6619_s29 + $0x1970] sm:$0xff]  ;;  %v476_v29 = vld [vmem:[%s6619_s29 + $0x988] sm:$0xff] }
 0x273   : > { %5481 = vst.msk [vmem:[%s7017_s16 + $0x2d8] sm:$0xff] %vm5389_vm2, %v3286_v26  ;;  %5737 = vst.msk [vmem:[%s7017_s16 + $0xad8] sm:$0xff] %vm5389_vm2, %v4566_v27  ;;  %v473_v27 = vld [vmem:[%s6619_s29 + $0x970] sm:$0xff] }
 0x274   : > { %v3290_v34 = vpop.f32.mrb[184].mxu0  ;;  %v4570_v35 = vpop.f32.mrb[184].mxu1 }
 0x275   : > { %v3291_v36 = vadd.f32 %v7795_v7, %v3290_v34  ;;  %v4571_v37 = vadd.f32 %v7795_v7, %v4570_v35  ;;  %v3292_v38 = vpop.f32.mrb[185].mxu0  ;;  %3554 = vmatmul.mubr.f32.gmra.mrb[34].mxu0 %v461_v30  ;;  %v4572_v39 = vpop.f32.mrb[185].mxu1  ;;  %4834 = vmatmul.mubr.f32.gmra.mrb[34].mxu1 %v973_v31  ;;  %v988_v30 = vld [vmem:[%s6619_s29 + $0x1988] sm:$0xff] }
 0x276   : > { %6114 = vmatprep.mubr.msk.f32.mxu0 %vm1223_vm0, %v464_v32  ;;  %6370 = vmatprep.mubr.msk.f32.mxu1 %vm1223_vm0, %v976_v33  ;;  %v987_v38 = vld [vmem:[%s6619_s29 + $0x1980] sm:$0xff]  ;;  %v478_v39 = vld [vmem:[%s6619_s29 + $0x998] sm:$0xff] }
 0x277   : > { %5482 = vst.msk [vmem:[%s7017_s16 + $0x2e0] sm:$0xff] %vm5389_vm2, %v3291_v36  ;;  %5738 = vst.msk [vmem:[%s7017_s16 + $0xae0] sm:$0xff] %vm5389_vm2, %v4571_v37  ;;  %v475_v37 = vld [vmem:[%s6619_s29 + $0x980] sm:$0xff] }
 0x278   : > { %v3295_v44 = vpop.f32.mrb[186].mxu0  ;;  %v4575_v45 = vpop.f32.mrb[186].mxu1 }
 0x279   : > { %v3296_v46 = vadd.f32 %v7795_v7, %v3295_v44  ;;  %v4576_v47 = vadd.f32 %v7795_v7, %v4575_v45  ;;  %v3297_v48 = vpop.f32.mrb[187].mxu0  ;;  %3559 = vmatmul.mubr.f32.gmra.mrb[36].mxu0 %v463_v40  ;;  %v4577_v49 = vpop.f32.mrb[187].mxu1  ;;  %4839 = vmatmul.mubr.f32.gmra.mrb[36].mxu1 %v975_v41  ;;  %v990_v40 = vld [vmem:[%s6619_s29 + $0x1998] sm:$0xff] }
 0x27a   : > { %6115 = vmatprep.mubr.msk.f32.mxu0 %vm1223_vm0, %v466_v42  ;;  %6371 = vmatprep.mubr.msk.f32.mxu1 %vm1223_vm0, %v978_v43  ;;  %v989_v48 = vld [vmem:[%s6619_s29 + $0x1990] sm:$0xff]  ;;  %v480_v49 = vld [vmem:[%s6619_s29 + $0x9a8] sm:$0xff] }
 0x27b   : > { %5483 = vst.msk [vmem:[%s7017_s16 + $0x2e8] sm:$0xff] %vm5389_vm2, %v3296_v46  ;;  %5739 = vst.msk [vmem:[%s7017_s16 + $0xae8] sm:$0xff] %vm5389_vm2, %v4576_v47  ;;  %v477_v47 = vld [vmem:[%s6619_s29 + $0x990] sm:$0xff] }
 0x27c   : > { %v3300_v54 = vpop.f32.mrb[188].mxu0  ;;  %v4580_v56 = vpop.f32.mrb[188].mxu1 }
 0x27d   : > { %v3301_v57 = vadd.f32 %v7795_v7, %v3300_v54  ;;  %v4581_v58 = vadd.f32 %v7795_v7, %v4580_v56  ;;  %v3302_v59 = vpop.f32.mrb[189].mxu0  ;;  %3564 = vmatmul.mubr.f32.gmra.mrb[38].mxu0 %v465_v50  ;;  %v4582_v60 = vpop.f32.mrb[189].mxu1  ;;  %4844 = vmatmul.mubr.f32.gmra.mrb[38].mxu1 %v977_v51  ;;  %v992_v50 = vld [vmem:[%s6619_s29 + $0x19a8] sm:$0xff] }
 0x27e   : > { %6116 = vmatprep.mubr.msk.f32.mxu0 %vm1223_vm0, %v468_v52  ;;  %6372 = vmatprep.mubr.msk.f32.mxu1 %vm1223_vm0, %v980_v53  ;;  %v991_v59 = vld [vmem:[%s6619_s29 + $0x19a0] sm:$0xff]  ;;  %v482_v60 = vld [vmem:[%s6619_s29 + $0x9b8] sm:$0xff] }
 0x27f   : > { %5484 = vst.msk [vmem:[%s7017_s16 + $0x2f0] sm:$0xff] %vm5389_vm2, %v3301_v57  ;;  %5740 = vst.msk [vmem:[%s7017_s16 + $0xaf0] sm:$0xff] %vm5389_vm2, %v4581_v58  ;;  %v479_v58 = vld [vmem:[%s6619_s29 + $0x9a0] sm:$0xff] }
 0x280   : > { %v3305_v0 = vpop.f32.mrb[190].mxu0  ;;  %v4585_v1 = vpop.f32.mrb[190].mxu1 }
 0x281   : > { %v3306_v3 = vadd.f32 %v7795_v7, %v3305_v0  ;;  %v4586_v4 = vadd.f32 %v7795_v7, %v4585_v1  ;;  %v3307_v2 = vpop.f32.mrb[191].mxu0  ;;  %3569 = vmatmul.mubr.f32.gmra.mrb[40].mxu0 %v467_v61  ;;  %v4587_v5 = vpop.f32.mrb[191].mxu1  ;;  %4849 = vmatmul.mubr.f32.gmra.mrb[40].mxu1 %v979_v62  ;;  %v984_v7 = vld [vmem:[%s6619_s29 + $0x1968] sm:$0xff]  ;;  %v994_v61 = vld [vmem:[%s6619_s29 + $0x19b8] sm:$0xff] }
 0x282   : > { %6117 = vmatprep.mubr.msk.f32.mxu0 %vm1223_vm0, %v470_v63  ;;  %6373 = vmatprep.mubr.msk.f32.mxu1 %vm1223_vm0, %v982_v55  ;;  %v993_v2 = vld [vmem:[%s6619_s29 + $0x19b0] sm:$0xff]  ;;  %v484_v5 = vld [vmem:[%s6619_s29 + $0x9c8] sm:$0xff] }
 0x283   : > { %5485 = vst.msk [vmem:[%s7017_s16 + $0x2f8] sm:$0xff] %vm5389_vm2, %v3306_v3  ;;  %5741 = vst.msk [vmem:[%s7017_s16 + $0xaf8] sm:$0xff] %vm5389_vm2, %v4586_v4  ;;  %v481_v4 = vld [vmem:[%s6619_s29 + $0x9b0] sm:$0xff] }
 0x284   : > { %v3310_v10 = vpop.f32.mrb[192].mxu0  ;;  %v4590_v11 = vpop.f32.mrb[192].mxu1 }
 0x285   : > { %v3311_v13 = vadd.f32 %v8184_v12, %v3310_v10  ;;  %v4591_v14 = vadd.f32 %v8184_v12, %v4590_v11  ;;  %v3312_v15 = vpop.f32.mrb[193].mxu0  ;;  %3574 = vmatmul.mubr.f32.gmra.mrb[42].mxu0 %v469_v6  ;;  %v4592_v16 = vpop.f32.mrb[193].mxu1  ;;  %4854 = vmatmul.mubr.f32.gmra.mrb[42].mxu1 %v981_v8  ;;  %v996_v6 = vld [vmem:[%s6619_s29 + $0x19c8] sm:$0xff] }
 0x286   : > { %6118 = vmatprep.mubr.msk.f32.mxu0 %vm1223_vm0, %v472_v9  ;;  %6374 = vmatprep.mubr.msk.f32.mxu1 %vm1223_vm0, %v984_v7  ;;  %v995_v15 = vld [vmem:[%s6619_s29 + $0x19c0] sm:$0xff]  ;;  %v486_v16 = vld [vmem:[%s6619_s29 + $0x9d8] sm:$0xff] }
 0x287   : > { %5486 = vst.msk [vmem:[%s7017_s16 + $0x300] sm:$0xff] %vm5389_vm2, %v3311_v13  ;;  %5742 = vst.msk [vmem:[%s7017_s16 + $0xb00] sm:$0xff] %vm5389_vm2, %v4591_v14  ;;  %v483_v14 = vld [vmem:[%s6619_s29 + $0x9c0] sm:$0xff] }
 0x288   : > { %v3315_v21 = vpop.f32.mrb[194].mxu0  ;;  %v4595_v22 = vpop.f32.mrb[194].mxu1 }
 0x289   : > { %v3316_v23 = vadd.f32 %v8184_v12, %v3315_v21  ;;  %v4596_v24 = vadd.f32 %v8184_v12, %v4595_v22  ;;  %v3317_v25 = vpop.f32.mrb[195].mxu0  ;;  %3579 = vmatmul.mubr.f32.gmra.mrb[44].mxu0 %v471_v17  ;;  %v4597_v26 = vpop.f32.mrb[195].mxu1  ;;  %4859 = vmatmul.mubr.f32.gmra.mrb[44].mxu1 %v983_v18  ;;  %v998_v17 = vld [vmem:[%s6619_s29 + $0x19d8] sm:$0xff] }
 0x28a   : > { %6119 = vmatprep.mubr.msk.f32.mxu0 %vm1223_vm0, %v474_v19  ;;  %6375 = vmatprep.mubr.msk.f32.mxu1 %vm1223_vm0, %v986_v20  ;;  %v997_v25 = vld [vmem:[%s6619_s29 + $0x19d0] sm:$0xff]  ;;  %v488_v26 = vld [vmem:[%s6619_s29 + $0x9e8] sm:$0xff] }
 0x28b   : > { %5487 = vst.msk [vmem:[%s7017_s16 + $0x308] sm:$0xff] %vm5389_vm2, %v3316_v23  ;;  %5743 = vst.msk [vmem:[%s7017_s16 + $0xb08] sm:$0xff] %vm5389_vm2, %v4596_v24  ;;  %v485_v24 = vld [vmem:[%s6619_s29 + $0x9d0] sm:$0xff] }
 0x28c   : > { %v3320_v31 = vpop.f32.mrb[196].mxu0  ;;  %v4600_v32 = vpop.f32.mrb[196].mxu1 }
 0x28d   : > { %v3321_v33 = vadd.f32 %v8184_v12, %v3320_v31  ;;  %v4601_v34 = vadd.f32 %v8184_v12, %v4600_v32  ;;  %v3322_v35 = vpop.f32.mrb[197].mxu0  ;;  %3584 = vmatmul.mubr.f32.gmra.mrb[46].mxu0 %v473_v27  ;;  %v4602_v36 = vpop.f32.mrb[197].mxu1  ;;  %4864 = vmatmul.mubr.f32.gmra.mrb[46].mxu1 %v985_v28  ;;  %v1000_v27 = vld [vmem:[%s6619_s29 + $0x19e8] sm:$0xff] }
 0x28e   : > { %6120 = vmatprep.mubr.msk.f32.mxu0 %vm1223_vm0, %v476_v29  ;;  %6376 = vmatprep.mubr.msk.f32.mxu1 %vm1223_vm0, %v988_v30  ;;  %v999_v35 = vld [vmem:[%s6619_s29 + $0x19e0] sm:$0xff]  ;;  %v490_v36 = vld [vmem:[%s6619_s29 + $0x9f8] sm:$0xff] }
 0x28f   : > { %5488 = vst.msk [vmem:[%s7017_s16 + $0x310] sm:$0xff] %vm5389_vm2, %v3321_v33  ;;  %5744 = vst.msk [vmem:[%s7017_s16 + $0xb10] sm:$0xff] %vm5389_vm2, %v4601_v34  ;;  %v487_v34 = vld [vmem:[%s6619_s29 + $0x9e0] sm:$0xff] }
 0x290   : > { %v3325_v41 = vpop.f32.mrb[198].mxu0  ;;  %v4605_v42 = vpop.f32.mrb[198].mxu1 }
 0x291   : > { %v3326_v43 = vadd.f32 %v8184_v12, %v3325_v41  ;;  %v4606_v44 = vadd.f32 %v8184_v12, %v4605_v42  ;;  %v3327_v45 = vpop.f32.mrb[199].mxu0  ;;  %3589 = vmatmul.mubr.f32.gmra.mrb[48].mxu0 %v475_v37  ;;  %v4607_v46 = vpop.f32.mrb[199].mxu1  ;;  %4869 = vmatmul.mubr.f32.gmra.mrb[48].mxu1 %v987_v38  ;;  %v1002_v37 = vld [vmem:[%s6619_s29 + $0x19f8] sm:$0xff] }
 0x292   : > { %6121 = vmatprep.mubr.msk.f32.mxu0 %vm1223_vm0, %v478_v39  ;;  %6377 = vmatprep.mubr.msk.f32.mxu1 %vm1223_vm0, %v990_v40  ;;  %v1001_v45 = vld [vmem:[%s6619_s29 + $0x19f0] sm:$0xff]  ;;  %v492_v46 = vld [vmem:[%s6619_s29 + $0xa08] sm:$0xff] }
 0x293   : > { %5489 = vst.msk [vmem:[%s7017_s16 + $0x318] sm:$0xff] %vm5389_vm2, %v3326_v43  ;;  %5745 = vst.msk [vmem:[%s7017_s16 + $0xb18] sm:$0xff] %vm5389_vm2, %v4606_v44  ;;  %v489_v44 = vld [vmem:[%s6619_s29 + $0x9f0] sm:$0xff] }
 0x294   : > { %v3330_v51 = vpop.f32.mrb[200].mxu0  ;;  %v4610_v52 = vpop.f32.mrb[200].mxu1 }
 0x295   : > { %v3331_v53 = vadd.f32 %v8184_v12, %v3330_v51  ;;  %v4611_v54 = vadd.f32 %v8184_v12, %v4610_v52  ;;  %v3332_v56 = vpop.f32.mrb[201].mxu0  ;;  %3594 = vmatmul.mubr.f32.gmra.mrb[50].mxu0 %v477_v47  ;;  %v4612_v57 = vpop.f32.mrb[201].mxu1  ;;  %4874 = vmatmul.mubr.f32.gmra.mrb[50].mxu1 %v989_v48  ;;  %v1004_v47 = vld [vmem:[%s6619_s29 + $0x1a08] sm:$0xff] }
 0x296   : > { %6122 = vmatprep.mubr.msk.f32.mxu0 %vm1223_vm0, %v480_v49  ;;  %6378 = vmatprep.mubr.msk.f32.mxu1 %vm1223_vm0, %v992_v50  ;;  %v1003_v56 = vld [vmem:[%s6619_s29 + $0x1a00] sm:$0xff]  ;;  %v494_v57 = vld [vmem:[%s6619_s29 + $0xa18] sm:$0xff] }
 0x297   : > { %5490 = vst.msk [vmem:[%s7017_s16 + $0x320] sm:$0xff] %vm5389_vm2, %v3331_v53  ;;  %5746 = vst.msk [vmem:[%s7017_s16 + $0xb20] sm:$0xff] %vm5389_vm2, %v4611_v54  ;;  %v491_v54 = vld [vmem:[%s6619_s29 + $0xa00] sm:$0xff] }
 0x298   : > { %v3335_v62 = vpop.f32.mrb[202].mxu0  ;;  %v4615_v63 = vpop.f32.mrb[202].mxu1 }
 0x299   : > { %v3336_v55 = vadd.f32 %v8184_v12, %v3335_v62  ;;  %v4616_v0 = vadd.f32 %v8184_v12, %v4615_v63  ;;  %v3337_v1 = vpop.f32.mrb[203].mxu0  ;;  %3599 = vmatmul.mubr.f32.gmra.mrb[52].mxu0 %v479_v58  ;;  %v4617_v3 = vpop.f32.mrb[203].mxu1  ;;  %4879 = vmatmul.mubr.f32.gmra.mrb[52].mxu1 %v991_v59  ;;  %v1006_v58 = vld [vmem:[%s6619_s29 + $0x1a18] sm:$0xff] }
 0x29a   : > { %6123 = vmatprep.mubr.msk.f32.mxu0 %vm1223_vm0, %v482_v60  ;;  %6379 = vmatprep.mubr.msk.f32.mxu1 %vm1223_vm0, %v994_v61  ;;  %v1005_v1 = vld [vmem:[%s6619_s29 + $0x1a10] sm:$0xff]  ;;  %v496_v3 = vld [vmem:[%s6619_s29 + $0xa28] sm:$0xff] }
 0x29b   : > { %5491 = vst.msk [vmem:[%s7017_s16 + $0x328] sm:$0xff] %vm5389_vm2, %v3336_v55  ;;  %5747 = vst.msk [vmem:[%s7017_s16 + $0xb28] sm:$0xff] %vm5389_vm2, %v4616_v0  ;;  %v493_v0 = vld [vmem:[%s6619_s29 + $0xa10] sm:$0xff] }
 0x29c   : > { %v3340_v8 = vpop.f32.mrb[204].mxu0  ;;  %v4620_v9 = vpop.f32.mrb[204].mxu1 }
 0x29d   : > { %v3341_v7 = vadd.f32 %v8184_v12, %v3340_v8  ;;  %v4621_v10 = vadd.f32 %v8184_v12, %v4620_v9  ;;  %v3342_v11 = vpop.f32.mrb[205].mxu0  ;;  %3604 = vmatmul.mubr.f32.gmra.mrb[54].mxu0 %v481_v4  ;;  %v4622_v13 = vpop.f32.mrb[205].mxu1  ;;  %4884 = vmatmul.mubr.f32.gmra.mrb[54].mxu1 %v993_v2  ;;  %v1008_v4 = vld [vmem:[%s6619_s29 + $0x1a28] sm:$0xff] }
 0x29e   : > { %6124 = vmatprep.mubr.msk.f32.mxu0 %vm1223_vm0, %v484_v5  ;;  %6380 = vmatprep.mubr.msk.f32.mxu1 %vm1223_vm0, %v996_v6  ;;  %v1007_v11 = vld [vmem:[%s6619_s29 + $0x1a20] sm:$0xff]  ;;  %v498_v13 = vld [vmem:[%s6619_s29 + $0xa38] sm:$0xff] }
 0x29f   : > { %5492 = vst.msk [vmem:[%s7017_s16 + $0x330] sm:$0xff] %vm5389_vm2, %v3341_v7  ;;  %5748 = vst.msk [vmem:[%s7017_s16 + $0xb30] sm:$0xff] %vm5389_vm2, %v4621_v10  ;;  %v495_v10 = vld [vmem:[%s6619_s29 + $0xa20] sm:$0xff] }
 0x2a0   : > { %v3345_v18 = vpop.f32.mrb[206].mxu0  ;;  %v4625_v19 = vpop.f32.mrb[206].mxu1 }
 0x2a1   : > { %v3346_v20 = vadd.f32 %v8184_v12, %v3345_v18  ;;  %v4626_v21 = vadd.f32 %v8184_v12, %v4625_v19  ;;  %v3347_v22 = vpop.f32.mrb[207].mxu0  ;;  %3609 = vmatmul.mubr.f32.gmra.mrb[56].mxu0 %v483_v14  ;;  %v4627_v23 = vpop.f32.mrb[207].mxu1  ;;  %4889 = vmatmul.mubr.f32.gmra.mrb[56].mxu1 %v995_v15  ;;  %v1010_v14 = vld [vmem:[%s6619_s29 + $0x1a38] sm:$0xff] }
 0x2a2   : > { %6125 = vmatprep.mubr.msk.f32.mxu0 %vm1223_vm0, %v486_v16  ;;  %6381 = vmatprep.mubr.msk.f32.mxu1 %vm1223_vm0, %v998_v17  ;;  %v1009_v22 = vld [vmem:[%s6619_s29 + $0x1a30] sm:$0xff]  ;;  %v500_v23 = vld [vmem:[%s6619_s29 + $0xa48] sm:$0xff] }
 0x2a3   : > { %5493 = vst.msk [vmem:[%s7017_s16 + $0x338] sm:$0xff] %vm5389_vm2, %v3346_v20  ;;  %5749 = vst.msk [vmem:[%s7017_s16 + $0xb38] sm:$0xff] %vm5389_vm2, %v4626_v21  ;;  %v497_v21 = vld [vmem:[%s6619_s29 + $0xa30] sm:$0xff] }
 0x2a4   : > { %v3350_v28 = vpop.f32.mrb[208].mxu0  ;;  %v4630_v29 = vpop.f32.mrb[208].mxu1 }
 0x2a5   : > { %v3351_v30 = vadd.f32 %v8184_v12, %v3350_v28  ;;  %v4631_v31 = vadd.f32 %v8184_v12, %v4630_v29  ;;  %v3352_v32 = vpop.f32.mrb[209].mxu0  ;;  %3614 = vmatmul.mubr.f32.gmra.mrb[58].mxu0 %v485_v24  ;;  %v4632_v33 = vpop.f32.mrb[209].mxu1  ;;  %4894 = vmatmul.mubr.f32.gmra.mrb[58].mxu1 %v997_v25  ;;  %v1012_v24 = vld [vmem:[%s6619_s29 + $0x1a48] sm:$0xff] }
 0x2a6   : > { %6126 = vmatprep.mubr.msk.f32.mxu0 %vm1223_vm0, %v488_v26  ;;  %6382 = vmatprep.mubr.msk.f32.mxu1 %vm1223_vm0, %v1000_v27  ;;  %v1011_v32 = vld [vmem:[%s6619_s29 + $0x1a40] sm:$0xff]  ;;  %v502_v33 = vld [vmem:[%s6619_s29 + $0xa58] sm:$0xff] }
 0x2a7   : > { %5494 = vst.msk [vmem:[%s7017_s16 + $0x340] sm:$0xff] %vm5389_vm2, %v3351_v30  ;;  %5750 = vst.msk [vmem:[%s7017_s16 + $0xb40] sm:$0xff] %vm5389_vm2, %v4631_v31  ;;  %v499_v31 = vld [vmem:[%s6619_s29 + $0xa40] sm:$0xff] }
 0x2a8   : > { %v3355_v38 = vpop.f32.mrb[210].mxu0  ;;  %v4635_v39 = vpop.f32.mrb[210].mxu1 }
 0x2a9   : > { %v3356_v40 = vadd.f32 %v8184_v12, %v3355_v38  ;;  %v4636_v41 = vadd.f32 %v8184_v12, %v4635_v39  ;;  %v3357_v42 = vpop.f32.mrb[211].mxu0  ;;  %3619 = vmatmul.mubr.f32.gmra.mrb[60].mxu0 %v487_v34  ;;  %v4637_v43 = vpop.f32.mrb[211].mxu1  ;;  %4899 = vmatmul.mubr.f32.gmra.mrb[60].mxu1 %v999_v35  ;;  %v1014_v34 = vld [vmem:[%s6619_s29 + $0x1a58] sm:$0xff] }
 0x2aa   : > { %6127 = vmatprep.mubr.msk.f32.mxu0 %vm1223_vm0, %v490_v36  ;;  %6383 = vmatprep.mubr.msk.f32.mxu1 %vm1223_vm0, %v1002_v37  ;;  %v1013_v42 = vld [vmem:[%s6619_s29 + $0x1a50] sm:$0xff]  ;;  %v504_v43 = vld [vmem:[%s6619_s29 + $0xa68] sm:$0xff] }
 0x2ab   : > { %5495 = vst.msk [vmem:[%s7017_s16 + $0x348] sm:$0xff] %vm5389_vm2, %v3356_v40  ;;  %5751 = vst.msk [vmem:[%s7017_s16 + $0xb48] sm:$0xff] %vm5389_vm2, %v4636_v41  ;;  %v501_v41 = vld [vmem:[%s6619_s29 + $0xa50] sm:$0xff] }
 0x2ac   : > { %v3360_v48 = vpop.f32.mrb[212].mxu0  ;;  %v4640_v49 = vpop.f32.mrb[212].mxu1 }
 0x2ad   : > { %v3361_v50 = vadd.f32 %v8184_v12, %v3360_v48  ;;  %v4641_v51 = vadd.f32 %v8184_v12, %v4640_v49  ;;  %v3362_v52 = vpop.f32.mrb[213].mxu0  ;;  %3624 = vmatmul.mubr.f32.gmra.mrb[62].mxu0 %v489_v44  ;;  %v4642_v53 = vpop.f32.mrb[213].mxu1  ;;  %4904 = vmatmul.mubr.f32.gmra.mrb[62].mxu1 %v1001_v45  ;;  %v1016_v44 = vld [vmem:[%s6619_s29 + $0x1a68] sm:$0xff] }
 0x2ae   : > { %6128 = vmatprep.mubr.msk.f32.mxu0 %vm1223_vm0, %v492_v46  ;;  %6384 = vmatprep.mubr.msk.f32.mxu1 %vm1223_vm0, %v1004_v47  ;;  %v1015_v52 = vld [vmem:[%s6619_s29 + $0x1a60] sm:$0xff]  ;;  %v506_v53 = vld [vmem:[%s6619_s29 + $0xa78] sm:$0xff] }
 0x2af   : > { %5496 = vst.msk [vmem:[%s7017_s16 + $0x350] sm:$0xff] %vm5389_vm2, %v3361_v50  ;;  %5752 = vst.msk [vmem:[%s7017_s16 + $0xb50] sm:$0xff] %vm5389_vm2, %v4641_v51  ;;  %v503_v51 = vld [vmem:[%s6619_s29 + $0xa60] sm:$0xff] }
 0x2b0   : > { %v3365_v59 = vpop.f32.mrb[214].mxu0  ;;  %v4645_v60 = vpop.f32.mrb[214].mxu1 }
 0x2b1   : > { %v3366_v61 = vadd.f32 %v8184_v12, %v3365_v59  ;;  %v4646_v62 = vadd.f32 %v8184_v12, %v4645_v60  ;;  %v3367_v63 = vpop.f32.mrb[215].mxu0  ;;  %3629 = vmatmul.mubr.f32.gmra.mrb[64].mxu0 %v491_v54  ;;  %v4647_v55 = vpop.f32.mrb[215].mxu1  ;;  %4909 = vmatmul.mubr.f32.gmra.mrb[64].mxu1 %v1003_v56  ;;  %v1018_v54 = vld [vmem:[%s6619_s29 + $0x1a78] sm:$0xff] }
 0x2b2   : > { %6129 = vmatprep.mubr.msk.f32.mxu0 %vm1223_vm0, %v494_v57  ;;  %6385 = vmatprep.mubr.msk.f32.mxu1 %vm1223_vm0, %v1006_v58  ;;  %v1017_v63 = vld [vmem:[%s6619_s29 + $0x1a70] sm:$0xff]  ;;  %v508_v55 = vld [vmem:[%s6619_s29 + $0xa88] sm:$0xff] }
 0x2b3   : > { %5497 = vst.msk [vmem:[%s7017_s16 + $0x358] sm:$0xff] %vm5389_vm2, %v3366_v61  ;;  %5753 = vst.msk [vmem:[%s7017_s16 + $0xb58] sm:$0xff] %vm5389_vm2, %v4646_v62  ;;  %v505_v62 = vld [vmem:[%s6619_s29 + $0xa70] sm:$0xff] }
 0x2b4   : > { %v3370_v2 = vpop.f32.mrb[216].mxu0  ;;  %v4650_v5 = vpop.f32.mrb[216].mxu1 }
 0x2b5   : > { %v3371_v6 = vadd.f32 %v8184_v12, %v3370_v2  ;;  %v4651_v8 = vadd.f32 %v8184_v12, %v4650_v5  ;;  %v3372_v9 = vpop.f32.mrb[217].mxu0  ;;  %3634 = vmatmul.mubr.f32.gmra.mrb[66].mxu0 %v493_v0  ;;  %v4652_v7 = vpop.f32.mrb[217].mxu1  ;;  %4914 = vmatmul.mubr.f32.gmra.mrb[66].mxu1 %v1005_v1  ;;  %v1020_v0 = vld [vmem:[%s6619_s29 + $0x1a88] sm:$0xff] }
 0x2b6   : > { %6130 = vmatprep.mubr.msk.f32.mxu0 %vm1223_vm0, %v496_v3  ;;  %6386 = vmatprep.mubr.msk.f32.mxu1 %vm1223_vm0, %v1008_v4  ;;  %v1019_v9 = vld [vmem:[%s6619_s29 + $0x1a80] sm:$0xff]  ;;  %v510_v7 = vld [vmem:[%s6619_s29 + $0xa98] sm:$0xff] }
 0x2b7   : > { %5498 = vst.msk [vmem:[%s7017_s16 + $0x360] sm:$0xff] %vm5389_vm2, %v3371_v6  ;;  %5754 = vst.msk [vmem:[%s7017_s16 + $0xb60] sm:$0xff] %vm5389_vm2, %v4651_v8  ;;  %v507_v8 = vld [vmem:[%s6619_s29 + $0xa80] sm:$0xff] }
 0x2b8   : > { %v3375_v15 = vpop.f32.mrb[218].mxu0  ;;  %v4655_v16 = vpop.f32.mrb[218].mxu1 }
 0x2b9   : > { %v3376_v17 = vadd.f32 %v8184_v12, %v3375_v15  ;;  %v4656_v18 = vadd.f32 %v8184_v12, %v4655_v16  ;;  %v3377_v19 = vpop.f32.mrb[219].mxu0  ;;  %3639 = vmatmul.mubr.f32.gmra.mrb[68].mxu0 %v495_v10  ;;  %v4657_v20 = vpop.f32.mrb[219].mxu1  ;;  %4919 = vmatmul.mubr.f32.gmra.mrb[68].mxu1 %v1007_v11  ;;  %v1022_v10 = vld [vmem:[%s6619_s29 + $0x1a98] sm:$0xff] }
 0x2ba   : > { %6131 = vmatprep.mubr.msk.f32.mxu0 %vm1223_vm0, %v498_v13  ;;  %6387 = vmatprep.mubr.msk.f32.mxu1 %vm1223_vm0, %v1010_v14  ;;  %v1021_v19 = vld [vmem:[%s6619_s29 + $0x1a90] sm:$0xff]  ;;  %v512_v20 = vld [vmem:[%s6619_s29 + $0xaa8] sm:$0xff] }
 0x2bb   : > { %5499 = vst.msk [vmem:[%s7017_s16 + $0x368] sm:$0xff] %vm5389_vm2, %v3376_v17  ;;  %5755 = vst.msk [vmem:[%s7017_s16 + $0xb68] sm:$0xff] %vm5389_vm2, %v4656_v18  ;;  %v509_v18 = vld [vmem:[%s6619_s29 + $0xa90] sm:$0xff] }
 0x2bc   : > { %v3380_v25 = vpop.f32.mrb[220].mxu0  ;;  %v4660_v26 = vpop.f32.mrb[220].mxu1 }
 0x2bd   : > { %v3381_v27 = vadd.f32 %v8184_v12, %v3380_v25  ;;  %v4661_v28 = vadd.f32 %v8184_v12, %v4660_v26  ;;  %v3382_v29 = vpop.f32.mrb[221].mxu0  ;;  %3644 = vmatmul.mubr.f32.gmra.mrb[70].mxu0 %v497_v21  ;;  %v4662_v30 = vpop.f32.mrb[221].mxu1  ;;  %4924 = vmatmul.mubr.f32.gmra.mrb[70].mxu1 %v1009_v22  ;;  %v1024_v21 = vld [vmem:[%s6619_s29 + $0x1aa8] sm:$0xff] }
 0x2be   : > { %6132 = vmatprep.mubr.msk.f32.mxu0 %vm1223_vm0, %v500_v23  ;;  %6388 = vmatprep.mubr.msk.f32.mxu1 %vm1223_vm0, %v1012_v24  ;;  %v1023_v29 = vld [vmem:[%s6619_s29 + $0x1aa0] sm:$0xff]  ;;  %v514_v30 = vld [vmem:[%s6619_s29 + $0xab8] sm:$0xff] }
 0x2bf   : > { %5500 = vst.msk [vmem:[%s7017_s16 + $0x370] sm:$0xff] %vm5389_vm2, %v3381_v27  ;;  %5756 = vst.msk [vmem:[%s7017_s16 + $0xb70] sm:$0xff] %vm5389_vm2, %v4661_v28  ;;  %v511_v28 = vld [vmem:[%s6619_s29 + $0xaa0] sm:$0xff] }
 0x2c0   : > { %v3385_v35 = vpop.f32.mrb[222].mxu0  ;;  %v4665_v36 = vpop.f32.mrb[222].mxu1 }
 0x2c1   : > { %v3386_v37 = vadd.f32 %v8184_v12, %v3385_v35  ;;  %v4666_v38 = vadd.f32 %v8184_v12, %v4665_v36  ;;  %v3387_v39 = vpop.f32.mrb[223].mxu0  ;;  %3649 = vmatmul.mubr.f32.gmra.mrb[72].mxu0 %v499_v31  ;;  %v4667_v40 = vpop.f32.mrb[223].mxu1  ;;  %4929 = vmatmul.mubr.f32.gmra.mrb[72].mxu1 %v1011_v32  ;;  %v1026_v31 = vld [vmem:[%s6619_s29 + $0x1ab8] sm:$0xff] }
 0x2c2   : > { %6133 = vmatprep.mubr.msk.f32.mxu0 %vm1223_vm0, %v502_v33  ;;  %6389 = vmatprep.mubr.msk.f32.mxu1 %vm1223_vm0, %v1014_v34  ;;  %v1025_v39 = vld [vmem:[%s6619_s29 + $0x1ab0] sm:$0xff]  ;;  %v516_v40 = vld [vmem:[%s6619_s29 + $0xac8] sm:$0xff] }
 0x2c3   : > { %5501 = vst.msk [vmem:[%s7017_s16 + $0x378] sm:$0xff] %vm5389_vm2, %v3386_v37  ;;  %5757 = vst.msk [vmem:[%s7017_s16 + $0xb78] sm:$0xff] %vm5389_vm2, %v4666_v38  ;;  %v513_v38 = vld [vmem:[%s6619_s29 + $0xab0] sm:$0xff] }
 0x2c4   : > { %v3390_v45 = vpop.f32.mrb[224].mxu0  ;;  %v4670_v46 = vpop.f32.mrb[224].mxu1 }
 0x2c5   : > { %v3391_v47 = vadd.f32 %v8184_v12, %v3390_v45  ;;  %v4671_v48 = vadd.f32 %v8184_v12, %v4670_v46  ;;  %v3392_v49 = vpop.f32.mrb[225].mxu0  ;;  %3654 = vmatmul.mubr.f32.gmra.mrb[74].mxu0 %v501_v41  ;;  %v4672_v50 = vpop.f32.mrb[225].mxu1  ;;  %4934 = vmatmul.mubr.f32.gmra.mrb[74].mxu1 %v1013_v42  ;;  %v1028_v41 = vld [vmem:[%s6619_s29 + $0x1ac8] sm:$0xff] }
 0x2c6   : > { %6134 = vmatprep.mubr.msk.f32.mxu0 %vm1223_vm0, %v504_v43  ;;  %6390 = vmatprep.mubr.msk.f32.mxu1 %vm1223_vm0, %v1016_v44  ;;  %v1027_v49 = vld [vmem:[%s6619_s29 + $0x1ac0] sm:$0xff]  ;;  %v518_v50 = vld [vmem:[%s6619_s29 + $0xad8] sm:$0xff] }
 0x2c7   : > { %5502 = vst.msk [vmem:[%s7017_s16 + $0x380] sm:$0xff] %vm5389_vm2, %v3391_v47  ;;  %5758 = vst.msk [vmem:[%s7017_s16 + $0xb80] sm:$0xff] %vm5389_vm2, %v4671_v48  ;;  %v515_v48 = vld [vmem:[%s6619_s29 + $0xac0] sm:$0xff] }
 0x2c8   : > { %v3395_v56 = vpop.f32.mrb[226].mxu0  ;;  %v4675_v57 = vpop.f32.mrb[226].mxu1 }
 0x2c9   : > { %v3396_v58 = vadd.f32 %v8184_v12, %v3395_v56  ;;  %v4676_v59 = vadd.f32 %v8184_v12, %v4675_v57  ;;  %v3397_v60 = vpop.f32.mrb[227].mxu0  ;;  %3659 = vmatmul.mubr.f32.gmra.mrb[76].mxu0 %v503_v51  ;;  %v4677_v61 = vpop.f32.mrb[227].mxu1  ;;  %4939 = vmatmul.mubr.f32.gmra.mrb[76].mxu1 %v1015_v52  ;;  %v1030_v51 = vld [vmem:[%s6619_s29 + $0x1ad8] sm:$0xff] }
 0x2ca   : > { %6135 = vmatprep.mubr.msk.f32.mxu0 %vm1223_vm0, %v506_v53  ;;  %6391 = vmatprep.mubr.msk.f32.mxu1 %vm1223_vm0, %v1018_v54  ;;  %v1029_v60 = vld [vmem:[%s6619_s29 + $0x1ad0] sm:$0xff]  ;;  %v520_v61 = vld [vmem:[%s6619_s29 + $0xae8] sm:$0xff] }
 0x2cb   : > { %5503 = vst.msk [vmem:[%s7017_s16 + $0x388] sm:$0xff] %vm5389_vm2, %v3396_v58  ;;  %5759 = vst.msk [vmem:[%s7017_s16 + $0xb88] sm:$0xff] %vm5389_vm2, %v4676_v59  ;;  %v517_v59 = vld [vmem:[%s6619_s29 + $0xad0] sm:$0xff] }
 0x2cc   : > { %v3400_v1 = vpop.f32.mrb[228].mxu0  ;;  %v4680_v3 = vpop.f32.mrb[228].mxu1 }
 0x2cd   : > { %v3401_v4 = vadd.f32 %v8184_v12, %v3400_v1  ;;  %v4681_v2 = vadd.f32 %v8184_v12, %v4680_v3  ;;  %v3402_v5 = vpop.f32.mrb[229].mxu0  ;;  %3664 = vmatmul.mubr.f32.gmra.mrb[78].mxu0 %v505_v62  ;;  %v4682_v6 = vpop.f32.mrb[229].mxu1  ;;  %4944 = vmatmul.mubr.f32.gmra.mrb[78].mxu1 %v1017_v63  ;;  %v1032_v62 = vld [vmem:[%s6619_s29 + $0x1ae8] sm:$0xff] }
 0x2ce   : > { %6136 = vmatprep.mubr.msk.f32.mxu0 %vm1223_vm0, %v508_v55  ;;  %6392 = vmatprep.mubr.msk.f32.mxu1 %vm1223_vm0, %v1020_v0  ;;  %v1031_v5 = vld [vmem:[%s6619_s29 + $0x1ae0] sm:$0xff]  ;;  %v522_v6 = vld [vmem:[%s6619_s29 + $0xaf8] sm:$0xff] }
 0x2cf   : > { %5504 = vst.msk [vmem:[%s7017_s16 + $0x390] sm:$0xff] %vm5389_vm2, %v3401_v4  ;;  %5760 = vst.msk [vmem:[%s7017_s16 + $0xb90] sm:$0xff] %vm5389_vm2, %v4681_v2  ;;  %v519_v2 = vld [vmem:[%s6619_s29 + $0xae0] sm:$0xff] }
 0x2d0   : > { %v3405_v11 = vpop.f32.mrb[230].mxu0  ;;  %v4685_v13 = vpop.f32.mrb[230].mxu1 }
 0x2d1   : > { %v3406_v14 = vadd.f32 %v8184_v12, %v3405_v11  ;;  %v4686_v15 = vadd.f32 %v8184_v12, %v4685_v13  ;;  %v3407_v16 = vpop.f32.mrb[231].mxu0  ;;  %3669 = vmatmul.mubr.f32.gmra.mrb[80].mxu0 %v507_v8  ;;  %v4687_v17 = vpop.f32.mrb[231].mxu1  ;;  %4949 = vmatmul.mubr.f32.gmra.mrb[80].mxu1 %v1019_v9  ;;  %v1034_v8 = vld [vmem:[%s6619_s29 + $0x1af8] sm:$0xff] }
 0x2d2   : > { %6137 = vmatprep.mubr.msk.f32.mxu0 %vm1223_vm0, %v510_v7  ;;  %6393 = vmatprep.mubr.msk.f32.mxu1 %vm1223_vm0, %v1022_v10  ;;  %v1033_v16 = vld [vmem:[%s6619_s29 + $0x1af0] sm:$0xff]  ;;  %v524_v17 = vld [vmem:[%s6619_s29 + $0xb08] sm:$0xff] }
 0x2d3   : > { %5505 = vst.msk [vmem:[%s7017_s16 + $0x398] sm:$0xff] %vm5389_vm2, %v3406_v14  ;;  %5761 = vst.msk [vmem:[%s7017_s16 + $0xb98] sm:$0xff] %vm5389_vm2, %v4686_v15  ;;  %v521_v15 = vld [vmem:[%s6619_s29 + $0xaf0] sm:$0xff] }
 0x2d4   : > { %v3410_v22 = vpop.f32.mrb[232].mxu0  ;;  %v4690_v23 = vpop.f32.mrb[232].mxu1 }
 0x2d5   : > { %v3411_v24 = vadd.f32 %v8184_v12, %v3410_v22  ;;  %v4691_v25 = vadd.f32 %v8184_v12, %v4690_v23  ;;  %v3412_v26 = vpop.f32.mrb[233].mxu0  ;;  %3674 = vmatmul.mubr.f32.gmra.mrb[82].mxu0 %v509_v18  ;;  %v4692_v27 = vpop.f32.mrb[233].mxu1  ;;  %4954 = vmatmul.mubr.f32.gmra.mrb[82].mxu1 %v1021_v19  ;;  %v1036_v18 = vld [vmem:[%s6619_s29 + $0x1b08] sm:$0xff] }
 0x2d6   : > { %6138 = vmatprep.mubr.msk.f32.mxu0 %vm1223_vm0, %v512_v20  ;;  %6394 = vmatprep.mubr.msk.f32.mxu1 %vm1223_vm0, %v1024_v21  ;;  %v1035_v26 = vld [vmem:[%s6619_s29 + $0x1b00] sm:$0xff]  ;;  %v526_v27 = vld [vmem:[%s6619_s29 + $0xb18] sm:$0xff] }
 0x2d7   : > { %5506 = vst.msk [vmem:[%s7017_s16 + $0x3a0] sm:$0xff] %vm5389_vm2, %v3411_v24  ;;  %5762 = vst.msk [vmem:[%s7017_s16 + $0xba0] sm:$0xff] %vm5389_vm2, %v4691_v25  ;;  %v523_v25 = vld [vmem:[%s6619_s29 + $0xb00] sm:$0xff] }
 0x2d8   : > { %v3415_v32 = vpop.f32.mrb[234].mxu0  ;;  %v4695_v33 = vpop.f32.mrb[234].mxu1 }
 0x2d9   : > { %v3416_v34 = vadd.f32 %v8184_v12, %v3415_v32  ;;  %v4696_v35 = vadd.f32 %v8184_v12, %v4695_v33  ;;  %v3417_v36 = vpop.f32.mrb[235].mxu0  ;;  %3679 = vmatmul.mubr.f32.gmra.mrb[84].mxu0 %v511_v28  ;;  %v4697_v37 = vpop.f32.mrb[235].mxu1  ;;  %4959 = vmatmul.mubr.f32.gmra.mrb[84].mxu1 %v1023_v29  ;;  %v1038_v28 = vld [vmem:[%s6619_s29 + $0x1b18] sm:$0xff] }
 0x2da   : > { %6139 = vmatprep.mubr.msk.f32.mxu0 %vm1223_vm0, %v514_v30  ;;  %6395 = vmatprep.mubr.msk.f32.mxu1 %vm1223_vm0, %v1026_v31  ;;  %v1037_v36 = vld [vmem:[%s6619_s29 + $0x1b10] sm:$0xff]  ;;  %v528_v37 = vld [vmem:[%s6619_s29 + $0xb28] sm:$0xff] }
 0x2db   : > { %5507 = vst.msk [vmem:[%s7017_s16 + $0x3a8] sm:$0xff] %vm5389_vm2, %v3416_v34  ;;  %5763 = vst.msk [vmem:[%s7017_s16 + $0xba8] sm:$0xff] %vm5389_vm2, %v4696_v35  ;;  %v525_v35 = vld [vmem:[%s6619_s29 + $0xb10] sm:$0xff] }
 0x2dc   : > { %v3420_v42 = vpop.f32.mrb[236].mxu0  ;;  %v4700_v43 = vpop.f32.mrb[236].mxu1 }
 0x2dd   : > { %v3421_v44 = vadd.f32 %v8184_v12, %v3420_v42  ;;  %v4701_v45 = vadd.f32 %v8184_v12, %v4700_v43  ;;  %v3422_v46 = vpop.f32.mrb[237].mxu0  ;;  %3684 = vmatmul.mubr.f32.gmra.mrb[86].mxu0 %v513_v38  ;;  %v4702_v47 = vpop.f32.mrb[237].mxu1  ;;  %4964 = vmatmul.mubr.f32.gmra.mrb[86].mxu1 %v1025_v39  ;;  %v1040_v38 = vld [vmem:[%s6619_s29 + $0x1b28] sm:$0xff] }
 0x2de   : > { %6140 = vmatprep.mubr.msk.f32.mxu0 %vm1223_vm0, %v516_v40  ;;  %6396 = vmatprep.mubr.msk.f32.mxu1 %vm1223_vm0, %v1028_v41  ;;  %v1039_v46 = vld [vmem:[%s6619_s29 + $0x1b20] sm:$0xff]  ;;  %v530_v47 = vld [vmem:[%s6619_s29 + $0xb38] sm:$0xff] }
 0x2df   : > { %5508 = vst.msk [vmem:[%s7017_s16 + $0x3b0] sm:$0xff] %vm5389_vm2, %v3421_v44  ;;  %5764 = vst.msk [vmem:[%s7017_s16 + $0xbb0] sm:$0xff] %vm5389_vm2, %v4701_v45  ;;  %v527_v45 = vld [vmem:[%s6619_s29 + $0xb20] sm:$0xff] }
 0x2e0   : > { %v3425_v52 = vpop.f32.mrb[238].mxu0  ;;  %v4705_v53 = vpop.f32.mrb[238].mxu1 }
 0x2e1   : > { %v3426_v54 = vadd.f32 %v8184_v12, %v3425_v52  ;;  %v4706_v56 = vadd.f32 %v8184_v12, %v4705_v53  ;;  %v3427_v57 = vpop.f32.mrb[239].mxu0  ;;  %3689 = vmatmul.mubr.f32.gmra.mrb[88].mxu0 %v515_v48  ;;  %v4707_v58 = vpop.f32.mrb[239].mxu1  ;;  %4969 = vmatmul.mubr.f32.gmra.mrb[88].mxu1 %v1027_v49  ;;  %v1042_v48 = vld [vmem:[%s6619_s29 + $0x1b38] sm:$0xff] }
 0x2e2   : > { %6141 = vmatprep.mubr.msk.f32.mxu0 %vm1223_vm0, %v518_v50  ;;  %6397 = vmatprep.mubr.msk.f32.mxu1 %vm1223_vm0, %v1030_v51  ;;  %v1041_v57 = vld [vmem:[%s6619_s29 + $0x1b30] sm:$0xff]  ;;  %v532_v58 = vld [vmem:[%s6619_s29 + $0xb48] sm:$0xff] }
 0x2e3   : > { %5509 = vst.msk [vmem:[%s7017_s16 + $0x3b8] sm:$0xff] %vm5389_vm2, %v3426_v54  ;;  %5765 = vst.msk [vmem:[%s7017_s16 + $0xbb8] sm:$0xff] %vm5389_vm2, %v4706_v56  ;;  %v529_v56 = vld [vmem:[%s6619_s29 + $0xb30] sm:$0xff] }
 0x2e4   : > { %v3430_v63 = vpop.f32.mrb[240].mxu0  ;;  %v4710_v55 = vpop.f32.mrb[240].mxu1 }
 0x2e5   : > { %v3431_v0 = vadd.f32 %v8184_v12, %v3430_v63  ;;  %v4711_v1 = vadd.f32 %v8184_v12, %v4710_v55  ;;  %v3432_v3 = vpop.f32.mrb[241].mxu0  ;;  %3694 = vmatmul.mubr.f32.gmra.mrb[90].mxu0 %v517_v59  ;;  %v4712_v4 = vpop.f32.mrb[241].mxu1  ;;  %4974 = vmatmul.mubr.f32.gmra.mrb[90].mxu1 %v1029_v60  ;;  %v1044_v59 = vld [vmem:[%s6619_s29 + $0x1b48] sm:$0xff] }
 0x2e6   : > { %6142 = vmatprep.mubr.msk.f32.mxu0 %vm1223_vm0, %v520_v61  ;;  %6398 = vmatprep.mubr.msk.f32.mxu1 %vm1223_vm0, %v1032_v62  ;;  %v1043_v3 = vld [vmem:[%s6619_s29 + $0x1b40] sm:$0xff]  ;;  %v534_v4 = vld [vmem:[%s6619_s29 + $0xb58] sm:$0xff] }
 0x2e7   : > { %5510 = vst.msk [vmem:[%s7017_s16 + $0x3c0] sm:$0xff] %vm5389_vm2, %v3431_v0  ;;  %5766 = vst.msk [vmem:[%s7017_s16 + $0xbc0] sm:$0xff] %vm5389_vm2, %v4711_v1  ;;  %v531_v1 = vld [vmem:[%s6619_s29 + $0xb40] sm:$0xff] }
 0x2e8   : > { %v3435_v9 = vpop.f32.mrb[242].mxu0  ;;  %v4715_v7 = vpop.f32.mrb[242].mxu1 }
 0x2e9   : > { %v3436_v10 = vadd.f32 %v8184_v12, %v3435_v9  ;;  %v4716_v11 = vadd.f32 %v8184_v12, %v4715_v7  ;;  %v3437_v13 = vpop.f32.mrb[243].mxu0  ;;  %3699 = vmatmul.mubr.f32.gmra.mrb[92].mxu0 %v519_v2  ;;  %v4717_v14 = vpop.f32.mrb[243].mxu1  ;;  %4979 = vmatmul.mubr.f32.gmra.mrb[92].mxu1 %v1031_v5  ;;  %v1046_v2 = vld [vmem:[%s6619_s29 + $0x1b58] sm:$0xff] }
 0x2ea   : > { %6143 = vmatprep.mubr.msk.f32.mxu0 %vm1223_vm0, %v522_v6  ;;  %6399 = vmatprep.mubr.msk.f32.mxu1 %vm1223_vm0, %v1034_v8  ;;  %v1045_v13 = vld [vmem:[%s6619_s29 + $0x1b50] sm:$0xff]  ;;  %v536_v14 = vld [vmem:[%s6619_s29 + $0xb68] sm:$0xff] }
 0x2eb   : > { %5511 = vst.msk [vmem:[%s7017_s16 + $0x3c8] sm:$0xff] %vm5389_vm2, %v3436_v10  ;;  %5767 = vst.msk [vmem:[%s7017_s16 + $0xbc8] sm:$0xff] %vm5389_vm2, %v4716_v11  ;;  %v533_v11 = vld [vmem:[%s6619_s29 + $0xb50] sm:$0xff] }
 0x2ec   : > { %v3440_v19 = vpop.f32.mrb[244].mxu0  ;;  %v4720_v20 = vpop.f32.mrb[244].mxu1 }
 0x2ed   : > { %v3441_v21 = vadd.f32 %v8184_v12, %v3440_v19  ;;  %v4721_v22 = vadd.f32 %v8184_v12, %v4720_v20  ;;  %v3442_v23 = vpop.f32.mrb[245].mxu0  ;;  %3704 = vmatmul.mubr.f32.gmra.mrb[94].mxu0 %v521_v15  ;;  %v4722_v24 = vpop.f32.mrb[245].mxu1  ;;  %4984 = vmatmul.mubr.f32.gmra.mrb[94].mxu1 %v1033_v16 }
 0x2ee   : > { %6144 = vmatprep.mubr.msk.f32.mxu0 %vm1223_vm0, %v524_v17  ;;  %6400 = vmatprep.mubr.msk.f32.mxu1 %vm1223_vm0, %v1036_v18  ;;  %v8573_v17 = vld [vmem:[%s9805_s2] ss:$0 sm:$0xff]  ;;  %v538_v24 = vld [vmem:[%s6619_s29 + $0xb78] sm:$0xff] }
 0x2ef   : > { %5512 = vst.msk [vmem:[%s7017_s16 + $0x3d0] sm:$0xff] %vm5389_vm2, %v3441_v21  ;;  %5768 = vst.msk [vmem:[%s7017_s16 + $0xbd0] sm:$0xff] %vm5389_vm2, %v4721_v22  ;;  %v535_v22 = vld [vmem:[%s6619_s29 + $0xb60] sm:$0xff] }
 0x2f0   : > { %v3445_v29 = vpop.f32.mrb[246].mxu0  ;;  %v4725_v30 = vpop.f32.mrb[246].mxu1  ;;  %v1047_v23 = vld [vmem:[%s6619_s29 + $0x1b60] sm:$0xff] }
 0x2f1   : > { %v3446_v31 = vadd.f32 %v8184_v12, %v3445_v29  ;;  %v4726_v32 = vadd.f32 %v8184_v12, %v4725_v30  ;;  %v3447_v33 = vpop.f32.mrb[247].mxu0  ;;  %3709 = vmatmul.mubr.f32.gmra.mrb[96].mxu0 %v523_v25  ;;  %v4727_v34 = vpop.f32.mrb[247].mxu1  ;;  %4989 = vmatmul.mubr.f32.gmra.mrb[96].mxu1 %v1035_v26  ;;  %v1050_v25 = vld [vmem:[%s6619_s29 + $0x1b78] sm:$0xff] }
 0x2f2   : > { %6145 = vmatprep.mubr.msk.f32.mxu0 %vm1223_vm0, %v526_v27  ;;  %6401 = vmatprep.mubr.msk.f32.mxu1 %vm1223_vm0, %v1038_v28  ;;  %v1049_v33 = vld [vmem:[%s6619_s29 + $0x1b70] sm:$0xff]  ;;  %v540_v34 = vld [vmem:[%s6619_s29 + $0xb88] sm:$0xff] }
 0x2f3   : > { %5513 = vst.msk [vmem:[%s7017_s16 + $0x3d8] sm:$0xff] %vm5389_vm2, %v3446_v31  ;;  %5769 = vst.msk [vmem:[%s7017_s16 + $0xbd8] sm:$0xff] %vm5389_vm2, %v4726_v32  ;;  %v537_v32 = vld [vmem:[%s6619_s29 + $0xb70] sm:$0xff] }
 0x2f4   : > { %v3450_v39 = vpop.f32.mrb[248].mxu0  ;;  %v4730_v40 = vpop.f32.mrb[248].mxu1 }
 0x2f5   : > { %v3451_v41 = vadd.f32 %v8184_v12, %v3450_v39  ;;  %v4731_v42 = vadd.f32 %v8184_v12, %v4730_v40  ;;  %v3452_v43 = vpop.f32.mrb[249].mxu0  ;;  %3714 = vmatmul.mubr.f32.gmra.mrb[98].mxu0 %v525_v35  ;;  %v4732_v44 = vpop.f32.mrb[249].mxu1  ;;  %4994 = vmatmul.mubr.f32.gmra.mrb[98].mxu1 %v1037_v36  ;;  %v1052_v35 = vld [vmem:[%s6619_s29 + $0x1b88] sm:$0xff] }
 0x2f6   : > { %6146 = vmatprep.mubr.msk.f32.mxu0 %vm1223_vm0, %v528_v37  ;;  %6402 = vmatprep.mubr.msk.f32.mxu1 %vm1223_vm0, %v1040_v38  ;;  %v1051_v43 = vld [vmem:[%s6619_s29 + $0x1b80] sm:$0xff]  ;;  %v542_v44 = vld [vmem:[%s6619_s29 + $0xb98] sm:$0xff] }
 0x2f7   : > { %5514 = vst.msk [vmem:[%s7017_s16 + $0x3e0] sm:$0xff] %vm5389_vm2, %v3451_v41  ;;  %5770 = vst.msk [vmem:[%s7017_s16 + $0xbe0] sm:$0xff] %vm5389_vm2, %v4731_v42  ;;  %v539_v42 = vld [vmem:[%s6619_s29 + $0xb80] sm:$0xff] }
 0x2f8   : > { %v3455_v49 = vpop.f32.mrb[250].mxu0  ;;  %v4735_v50 = vpop.f32.mrb[250].mxu1 }
 0x2f9   : > { %v3456_v51 = vadd.f32 %v8184_v12, %v3455_v49  ;;  %v4736_v52 = vadd.f32 %v8184_v12, %v4735_v50  ;;  %v3457_v53 = vpop.f32.mrb[251].mxu0  ;;  %3719 = vmatmul.mubr.f32.gmra.mrb[100].mxu0 %v527_v45  ;;  %v4737_v54 = vpop.f32.mrb[251].mxu1  ;;  %4999 = vmatmul.mubr.f32.gmra.mrb[100].mxu1 %v1039_v46  ;;  %v1054_v45 = vld [vmem:[%s6619_s29 + $0x1b98] sm:$0xff] }
 0x2fa   : > { %6147 = vmatprep.mubr.msk.f32.mxu0 %vm1223_vm0, %v530_v47  ;;  %6403 = vmatprep.mubr.msk.f32.mxu1 %vm1223_vm0, %v1042_v48  ;;  %v1053_v53 = vld [vmem:[%s6619_s29 + $0x1b90] sm:$0xff]  ;;  %v544_v54 = vld [vmem:[%s6619_s29 + $0xba8] sm:$0xff] }
 0x2fb   : > { %5515 = vst.msk [vmem:[%s7017_s16 + $0x3e8] sm:$0xff] %vm5389_vm2, %v3456_v51  ;;  %5771 = vst.msk [vmem:[%s7017_s16 + $0xbe8] sm:$0xff] %vm5389_vm2, %v4736_v52  ;;  %v541_v52 = vld [vmem:[%s6619_s29 + $0xb90] sm:$0xff] }
 0x2fc   : > { %v3460_v60 = vpop.f32.mrb[252].mxu0  ;;  %v4740_v61 = vpop.f32.mrb[252].mxu1 }
 0x2fd   : > { %v3461_v62 = vadd.f32 %v8184_v12, %v3460_v60  ;;  %v4741_v63 = vadd.f32 %v8184_v12, %v4740_v61  ;;  %v3462_v55 = vpop.f32.mrb[253].mxu0  ;;  %3724 = vmatmul.mubr.f32.gmra.mrb[102].mxu0 %v529_v56  ;;  %v4742_v0 = vpop.f32.mrb[253].mxu1  ;;  %5004 = vmatmul.mubr.f32.gmra.mrb[102].mxu1 %v1041_v57  ;;  %v1056_v56 = vld [vmem:[%s6619_s29 + $0x1ba8] sm:$0xff] }
 0x2fe   : > { %6148 = vmatprep.mubr.msk.f32.mxu0 %vm1223_vm0, %v532_v58  ;;  %6404 = vmatprep.mubr.msk.f32.mxu1 %vm1223_vm0, %v1044_v59  ;;  %v1055_v55 = vld [vmem:[%s6619_s29 + $0x1ba0] sm:$0xff]  ;;  %v546_v0 = vld [vmem:[%s6619_s29 + $0xbb8] sm:$0xff] }
 0x2ff   : > { %5516 = vst.msk [vmem:[%s7017_s16 + $0x3f0] sm:$0xff] %vm5389_vm2, %v3461_v62  ;;  %5772 = vst.msk [vmem:[%s7017_s16 + $0xbf0] sm:$0xff] %vm5389_vm2, %v4741_v63  ;;  %v543_v63 = vld [vmem:[%s6619_s29 + $0xba0] sm:$0xff] }
 0x300   : > { %v3465_v5 = vpop.f32.mrb[254].mxu0  ;;  %v4745_v6 = vpop.f32.mrb[254].mxu1 }
 0x301   : > { %v3466_v8 = vadd.f32 %v8184_v12, %v3465_v5  ;;  %v4746_v9 = vadd.f32 %v8184_v12, %v4745_v6  ;;  %v3467_v7 = vpop.f32.mrb[255].mxu0  ;;  %3729 = vmatmul.mubr.f32.gmra.mrb[104].mxu0 %v531_v1  ;;  %v4747_v10 = vpop.f32.mrb[255].mxu1  ;;  %5009 = vmatmul.mubr.f32.gmra.mrb[104].mxu1 %v1043_v3  ;;  %v1048_v12 = vld [vmem:[%s6619_s29 + $0x1b68] sm:$0xff]  ;;  %v1058_v1 = vld [vmem:[%s6619_s29 + $0x1bb8] sm:$0xff] }
 0x302   : > { %6149 = vmatprep.mubr.msk.f32.mxu0 %vm1223_vm0, %v534_v4  ;;  %6405 = vmatprep.mubr.msk.f32.mxu1 %vm1223_vm0, %v1046_v2  ;;  %v1057_v7 = vld [vmem:[%s6619_s29 + $0x1bb0] sm:$0xff]  ;;  %v548_v10 = vld [vmem:[%s6619_s29 + $0xbc8] sm:$0xff] }
 0x303   : > { %5517 = vst.msk [vmem:[%s7017_s16 + $0x3f8] sm:$0xff] %vm5389_vm2, %v3466_v8  ;;  %5773 = vst.msk [vmem:[%s7017_s16 + $0xbf8] sm:$0xff] %vm5389_vm2, %v4746_v9  ;;  %v545_v9 = vld [vmem:[%s6619_s29 + $0xbb0] sm:$0xff] }
 0x304   : > { %v3470_v15 = vpop.f32.mrb[0].mxu0  ;;  %v4750_v16 = vpop.f32.mrb[0].mxu1 }
 0x305   : > { %v3471_v18 = vadd.f32 %v8573_v17, %v3470_v15  ;;  %v4751_v19 = vadd.f32 %v8573_v17, %v4750_v16  ;;  %v3472_v20 = vpop.f32.mrb[1].mxu0  ;;  %3734 = vmatmul.mubr.f32.gmra.mrb[106].mxu0 %v533_v11  ;;  %v4752_v21 = vpop.f32.mrb[1].mxu1  ;;  %5014 = vmatmul.mubr.f32.gmra.mrb[106].mxu1 %v1045_v13  ;;  %v1060_v11 = vld [vmem:[%s6619_s29 + $0x1bc8] sm:$0xff] }
 0x306   : > { %6150 = vmatprep.mubr.msk.f32.mxu0 %vm1223_vm0, %v536_v14  ;;  %6406 = vmatprep.mubr.msk.f32.mxu1 %vm1223_vm0, %v1048_v12  ;;  %v1059_v20 = vld [vmem:[%s6619_s29 + $0x1bc0] sm:$0xff]  ;;  %v550_v21 = vld [vmem:[%s6619_s29 + $0xbd8] sm:$0xff] }
 0x307   : > { %5518 = vst.msk [vmem:[%s7017_s16 + $0x400] sm:$0xff] %vm5389_vm2, %v3471_v18  ;;  %5774 = vst.msk [vmem:[%s7017_s16 + $0xc00] sm:$0xff] %vm5389_vm2, %v4751_v19  ;;  %v547_v19 = vld [vmem:[%s6619_s29 + $0xbc0] sm:$0xff] }
 0x308   : > { %v3475_v26 = vpop.f32.mrb[2].mxu0  ;;  %v4755_v27 = vpop.f32.mrb[2].mxu1 }
 0x309   : > { %v3476_v28 = vadd.f32 %v8573_v17, %v3475_v26  ;;  %v4756_v29 = vadd.f32 %v8573_v17, %v4755_v27  ;;  %v3477_v30 = vpop.f32.mrb[3].mxu0  ;;  %3739 = vmatmul.mubr.f32.gmra.mrb[108].mxu0 %v535_v22  ;;  %v4757_v31 = vpop.f32.mrb[3].mxu1  ;;  %5019 = vmatmul.mubr.f32.gmra.mrb[108].mxu1 %v1047_v23  ;;  %v1062_v22 = vld [vmem:[%s6619_s29 + $0x1bd8] sm:$0xff] }
 0x30a   : > { %6151 = vmatprep.mubr.msk.f32.mxu0 %vm1223_vm0, %v538_v24  ;;  %6407 = vmatprep.mubr.msk.f32.mxu1 %vm1223_vm0, %v1050_v25  ;;  %v1061_v30 = vld [vmem:[%s6619_s29 + $0x1bd0] sm:$0xff]  ;;  %v552_v31 = vld [vmem:[%s6619_s29 + $0xbe8] sm:$0xff] }
 0x30b   : > { %5519 = vst.msk [vmem:[%s7017_s16 + $0x408] sm:$0xff] %vm5389_vm2, %v3476_v28  ;;  %5775 = vst.msk [vmem:[%s7017_s16 + $0xc08] sm:$0xff] %vm5389_vm2, %v4756_v29  ;;  %v549_v29 = vld [vmem:[%s6619_s29 + $0xbd0] sm:$0xff] }
 0x30c   : > { %v3480_v36 = vpop.f32.mrb[4].mxu0  ;;  %v4760_v37 = vpop.f32.mrb[4].mxu1 }
 0x30d   : > { %v3481_v38 = vadd.f32 %v8573_v17, %v3480_v36  ;;  %v4761_v39 = vadd.f32 %v8573_v17, %v4760_v37  ;;  %v3482_v40 = vpop.f32.mrb[5].mxu0  ;;  %3744 = vmatmul.mubr.f32.gmra.mrb[110].mxu0 %v537_v32  ;;  %v4762_v41 = vpop.f32.mrb[5].mxu1  ;;  %5024 = vmatmul.mubr.f32.gmra.mrb[110].mxu1 %v1049_v33  ;;  %v1064_v32 = vld [vmem:[%s6619_s29 + $0x1be8] sm:$0xff] }
 0x30e   : > { %6152 = vmatprep.mubr.msk.f32.mxu0 %vm1223_vm0, %v540_v34  ;;  %6408 = vmatprep.mubr.msk.f32.mxu1 %vm1223_vm0, %v1052_v35  ;;  %v1063_v40 = vld [vmem:[%s6619_s29 + $0x1be0] sm:$0xff]  ;;  %v554_v41 = vld [vmem:[%s6619_s29 + $0xbf8] sm:$0xff] }
 0x30f   : > { %5520 = vst.msk [vmem:[%s7017_s16 + $0x410] sm:$0xff] %vm5389_vm2, %v3481_v38  ;;  %5776 = vst.msk [vmem:[%s7017_s16 + $0xc10] sm:$0xff] %vm5389_vm2, %v4761_v39  ;;  %v551_v39 = vld [vmem:[%s6619_s29 + $0xbe0] sm:$0xff] }
 0x310   : > { %v3485_v46 = vpop.f32.mrb[6].mxu0  ;;  %v4765_v47 = vpop.f32.mrb[6].mxu1 }
 0x311   : > { %v3486_v48 = vadd.f32 %v8573_v17, %v3485_v46  ;;  %v4766_v49 = vadd.f32 %v8573_v17, %v4765_v47  ;;  %v3487_v50 = vpop.f32.mrb[7].mxu0  ;;  %3749 = vmatmul.mubr.f32.gmra.mrb[112].mxu0 %v539_v42  ;;  %v4767_v51 = vpop.f32.mrb[7].mxu1  ;;  %5029 = vmatmul.mubr.f32.gmra.mrb[112].mxu1 %v1051_v43  ;;  %v1066_v42 = vld [vmem:[%s6619_s29 + $0x1bf8] sm:$0xff] }
 0x312   : > { %6153 = vmatprep.mubr.msk.f32.mxu0 %vm1223_vm0, %v542_v44  ;;  %6409 = vmatprep.mubr.msk.f32.mxu1 %vm1223_vm0, %v1054_v45  ;;  %v1065_v50 = vld [vmem:[%s6619_s29 + $0x1bf0] sm:$0xff]  ;;  %v556_v51 = vld [vmem:[%s6619_s29 + $0xc08] sm:$0xff] }
 0x313   : > { %5521 = vst.msk [vmem:[%s7017_s16 + $0x418] sm:$0xff] %vm5389_vm2, %v3486_v48  ;;  %5777 = vst.msk [vmem:[%s7017_s16 + $0xc18] sm:$0xff] %vm5389_vm2, %v4766_v49  ;;  %v553_v49 = vld [vmem:[%s6619_s29 + $0xbf0] sm:$0xff] }
 0x314   : > { %v3490_v57 = vpop.f32.mrb[8].mxu0  ;;  %v4770_v58 = vpop.f32.mrb[8].mxu1 }
 0x315   : > { %v3491_v59 = vadd.f32 %v8573_v17, %v3490_v57  ;;  %v4771_v60 = vadd.f32 %v8573_v17, %v4770_v58  ;;  %v3492_v61 = vpop.f32.mrb[9].mxu0  ;;  %3754 = vmatmul.mubr.f32.gmra.mrb[114].mxu0 %v541_v52  ;;  %v4772_v62 = vpop.f32.mrb[9].mxu1  ;;  %5034 = vmatmul.mubr.f32.gmra.mrb[114].mxu1 %v1053_v53  ;;  %v1068_v52 = vld [vmem:[%s6619_s29 + $0x1c08] sm:$0xff] }
 0x316   : > { %6154 = vmatprep.mubr.msk.f32.mxu0 %vm1223_vm0, %v544_v54  ;;  %6410 = vmatprep.mubr.msk.f32.mxu1 %vm1223_vm0, %v1056_v56  ;;  %v1067_v61 = vld [vmem:[%s6619_s29 + $0x1c00] sm:$0xff]  ;;  %v558_v62 = vld [vmem:[%s6619_s29 + $0xc18] sm:$0xff] }
 0x317   : > { %5522 = vst.msk [vmem:[%s7017_s16 + $0x420] sm:$0xff] %vm5389_vm2, %v3491_v59  ;;  %5778 = vst.msk [vmem:[%s7017_s16 + $0xc20] sm:$0xff] %vm5389_vm2, %v4771_v60  ;;  %v555_v60 = vld [vmem:[%s6619_s29 + $0xc00] sm:$0xff] }
 0x318   : > { %v3495_v3 = vpop.f32.mrb[10].mxu0  ;;  %v4775_v4 = vpop.f32.mrb[10].mxu1 }
 0x319   : > { %v3496_v2 = vadd.f32 %v8573_v17, %v3495_v3  ;;  %v4776_v5 = vadd.f32 %v8573_v17, %v4775_v4  ;;  %v3497_v6 = vpop.f32.mrb[11].mxu0  ;;  %3759 = vmatmul.mubr.f32.gmra.mrb[116].mxu0 %v543_v63  ;;  %v4777_v8 = vpop.f32.mrb[11].mxu1  ;;  %5039 = vmatmul.mubr.f32.gmra.mrb[116].mxu1 %v1055_v55  ;;  %v1070_v63 = vld [vmem:[%s6619_s29 + $0x1c18] sm:$0xff] }
 0x31a   : > { %6155 = vmatprep.mubr.msk.f32.mxu0 %vm1223_vm0, %v546_v0  ;;  %6411 = vmatprep.mubr.msk.f32.mxu1 %vm1223_vm0, %v1058_v1  ;;  %v1069_v6 = vld [vmem:[%s6619_s29 + $0x1c10] sm:$0xff]  ;;  %v560_v8 = vld [vmem:[%s6619_s29 + $0xc28] sm:$0xff] }
 0x31b   : > { %5523 = vst.msk [vmem:[%s7017_s16 + $0x428] sm:$0xff] %vm5389_vm2, %v3496_v2  ;;  %5779 = vst.msk [vmem:[%s7017_s16 + $0xc28] sm:$0xff] %vm5389_vm2, %v4776_v5  ;;  %v557_v5 = vld [vmem:[%s6619_s29 + $0xc10] sm:$0xff] }
 0x31c   : > { %v3500_v13 = vpop.f32.mrb[12].mxu0  ;;  %v4780_v14 = vpop.f32.mrb[12].mxu1 }
 0x31d   : > { %v3501_v12 = vadd.f32 %v8573_v17, %v3500_v13  ;;  %v4781_v15 = vadd.f32 %v8573_v17, %v4780_v14  ;;  %v3502_v16 = vpop.f32.mrb[13].mxu0  ;;  %3764 = vmatmul.mubr.f32.gmra.mrb[118].mxu0 %v545_v9  ;;  %v4782_v18 = vpop.f32.mrb[13].mxu1  ;;  %5044 = vmatmul.mubr.f32.gmra.mrb[118].mxu1 %v1057_v7  ;;  %v1072_v9 = vld [vmem:[%s6619_s29 + $0x1c28] sm:$0xff] }
 0x31e   : > { %6156 = vmatprep.mubr.msk.f32.mxu0 %vm1223_vm0, %v548_v10  ;;  %6412 = vmatprep.mubr.msk.f32.mxu1 %vm1223_vm0, %v1060_v11  ;;  %v1071_v16 = vld [vmem:[%s6619_s29 + $0x1c20] sm:$0xff]  ;;  %v562_v18 = vld [vmem:[%s6619_s29 + $0xc38] sm:$0xff] }
 0x31f   : > { %5524 = vst.msk [vmem:[%s7017_s16 + $0x430] sm:$0xff] %vm5389_vm2, %v3501_v12  ;;  %5780 = vst.msk [vmem:[%s7017_s16 + $0xc30] sm:$0xff] %vm5389_vm2, %v4781_v15  ;;  %v559_v15 = vld [vmem:[%s6619_s29 + $0xc20] sm:$0xff] }
 0x320   : > { %v3505_v23 = vpop.f32.mrb[14].mxu0  ;;  %v4785_v24 = vpop.f32.mrb[14].mxu1 }
 0x321   : > { %v3506_v25 = vadd.f32 %v8573_v17, %v3505_v23  ;;  %v4786_v26 = vadd.f32 %v8573_v17, %v4785_v24  ;;  %v3507_v27 = vpop.f32.mrb[15].mxu0  ;;  %3769 = vmatmul.mubr.f32.gmra.mrb[120].mxu0 %v547_v19  ;;  %v4787_v28 = vpop.f32.mrb[15].mxu1  ;;  %5049 = vmatmul.mubr.f32.gmra.mrb[120].mxu1 %v1059_v20  ;;  %v1074_v19 = vld [vmem:[%s6619_s29 + $0x1c38] sm:$0xff] }
 0x322   : > { %6157 = vmatprep.mubr.msk.f32.mxu0 %vm1223_vm0, %v550_v21  ;;  %6413 = vmatprep.mubr.msk.f32.mxu1 %vm1223_vm0, %v1062_v22  ;;  %v1073_v27 = vld [vmem:[%s6619_s29 + $0x1c30] sm:$0xff]  ;;  %v564_v28 = vld [vmem:[%s6619_s29 + $0xc48] sm:$0xff] }
 0x323   : > { %5525 = vst.msk [vmem:[%s7017_s16 + $0x438] sm:$0xff] %vm5389_vm2, %v3506_v25  ;;  %5781 = vst.msk [vmem:[%s7017_s16 + $0xc38] sm:$0xff] %vm5389_vm2, %v4786_v26  ;;  %v561_v26 = vld [vmem:[%s6619_s29 + $0xc30] sm:$0xff] }
 0x324   : > { %v3510_v33 = vpop.f32.mrb[16].mxu0  ;;  %v4790_v34 = vpop.f32.mrb[16].mxu1 }
 0x325   : > { %v3511_v35 = vadd.f32 %v8573_v17, %v3510_v33  ;;  %v4791_v36 = vadd.f32 %v8573_v17, %v4790_v34  ;;  %v3512_v37 = vpop.f32.mrb[17].mxu0  ;;  %3774 = vmatmul.mubr.f32.gmra.mrb[122].mxu0 %v549_v29  ;;  %v4792_v38 = vpop.f32.mrb[17].mxu1  ;;  %5054 = vmatmul.mubr.f32.gmra.mrb[122].mxu1 %v1061_v30  ;;  %v1076_v29 = vld [vmem:[%s6619_s29 + $0x1c48] sm:$0xff] }
 0x326   : > { %6158 = vmatprep.mubr.msk.f32.mxu0 %vm1223_vm0, %v552_v31  ;;  %6414 = vmatprep.mubr.msk.f32.mxu1 %vm1223_vm0, %v1064_v32  ;;  %v1075_v37 = vld [vmem:[%s6619_s29 + $0x1c40] sm:$0xff]  ;;  %v566_v38 = vld [vmem:[%s6619_s29 + $0xc58] sm:$0xff] }
 0x327   : > { %5526 = vst.msk [vmem:[%s7017_s16 + $0x440] sm:$0xff] %vm5389_vm2, %v3511_v35  ;;  %5782 = vst.msk [vmem:[%s7017_s16 + $0xc40] sm:$0xff] %vm5389_vm2, %v4791_v36  ;;  %v563_v36 = vld [vmem:[%s6619_s29 + $0xc40] sm:$0xff] }
 0x328   : > { %v3515_v43 = vpop.f32.mrb[18].mxu0  ;;  %v4795_v44 = vpop.f32.mrb[18].mxu1 }
 0x329   : > { %v3516_v45 = vadd.f32 %v8573_v17, %v3515_v43  ;;  %v4796_v46 = vadd.f32 %v8573_v17, %v4795_v44  ;;  %v3517_v47 = vpop.f32.mrb[19].mxu0  ;;  %3779 = vmatmul.mubr.f32.gmra.mrb[124].mxu0 %v551_v39  ;;  %v4797_v48 = vpop.f32.mrb[19].mxu1  ;;  %5059 = vmatmul.mubr.f32.gmra.mrb[124].mxu1 %v1063_v40  ;;  %v1078_v39 = vld [vmem:[%s6619_s29 + $0x1c58] sm:$0xff] }
 0x32a   : > { %6159 = vmatprep.mubr.msk.f32.mxu0 %vm1223_vm0, %v554_v41  ;;  %6415 = vmatprep.mubr.msk.f32.mxu1 %vm1223_vm0, %v1066_v42  ;;  %v1077_v47 = vld [vmem:[%s6619_s29 + $0x1c50] sm:$0xff]  ;;  %v568_v48 = vld [vmem:[%s6619_s29 + $0xc68] sm:$0xff] }
 0x32b   : > { %5527 = vst.msk [vmem:[%s7017_s16 + $0x448] sm:$0xff] %vm5389_vm2, %v3516_v45  ;;  %5783 = vst.msk [vmem:[%s7017_s16 + $0xc48] sm:$0xff] %vm5389_vm2, %v4796_v46  ;;  %v565_v46 = vld [vmem:[%s6619_s29 + $0xc50] sm:$0xff] }
 0x32c   : > { %v3520_v53 = vpop.f32.mrb[20].mxu0  ;;  %v4800_v54 = vpop.f32.mrb[20].mxu1 }
 0x32d   : > { %v3521_v56 = vadd.f32 %v8573_v17, %v3520_v53  ;;  %v4801_v57 = vadd.f32 %v8573_v17, %v4800_v54  ;;  %v3522_v58 = vpop.f32.mrb[21].mxu0  ;;  %3784 = vmatmul.mubr.f32.gmra.mrb[126].mxu0 %v553_v49  ;;  %v4802_v59 = vpop.f32.mrb[21].mxu1  ;;  %5064 = vmatmul.mubr.f32.gmra.mrb[126].mxu1 %v1065_v50  ;;  %v1080_v49 = vld [vmem:[%s6619_s29 + $0x1c68] sm:$0xff] }
 0x32e   : > { %6160 = vmatprep.mubr.msk.f32.mxu0 %vm1223_vm0, %v556_v51  ;;  %6416 = vmatprep.mubr.msk.f32.mxu1 %vm1223_vm0, %v1068_v52  ;;  %v1079_v58 = vld [vmem:[%s6619_s29 + $0x1c60] sm:$0xff]  ;;  %v570_v59 = vld [vmem:[%s6619_s29 + $0xc78] sm:$0xff] }
 0x32f   : > { %5528 = vst.msk [vmem:[%s7017_s16 + $0x450] sm:$0xff] %vm5389_vm2, %v3521_v56  ;;  %5784 = vst.msk [vmem:[%s7017_s16 + $0xc50] sm:$0xff] %vm5389_vm2, %v4801_v57  ;;  %v567_v57 = vld [vmem:[%s6619_s29 + $0xc60] sm:$0xff] }
 0x330   : > { %v3525_v55 = vpop.f32.mrb[22].mxu0  ;;  %v4805_v0 = vpop.f32.mrb[22].mxu1 }
 0x331   : > { %v3526_v1 = vadd.f32 %v8573_v17, %v3525_v55  ;;  %v4806_v3 = vadd.f32 %v8573_v17, %v4805_v0  ;;  %v3527_v4 = vpop.f32.mrb[23].mxu0  ;;  %3789 = vmatmul.mubr.f32.gmra.mrb[128].mxu0 %v555_v60  ;;  %v4807_v2 = vpop.f32.mrb[23].mxu1  ;;  %5069 = vmatmul.mubr.f32.gmra.mrb[128].mxu1 %v1067_v61  ;;  %v1082_v60 = vld [vmem:[%s6619_s29 + $0x1c78] sm:$0xff] }
 0x332   : > { %6161 = vmatprep.mubr.msk.f32.mxu0 %vm1223_vm0, %v558_v62  ;;  %6417 = vmatprep.mubr.msk.f32.mxu1 %vm1223_vm0, %v1070_v63  ;;  %v1081_v4 = vld [vmem:[%s6619_s29 + $0x1c70] sm:$0xff]  ;;  %v572_v2 = vld [vmem:[%s6619_s29 + $0xc88] sm:$0xff] }
 0x333   : > { %5529 = vst.msk [vmem:[%s7017_s16 + $0x458] sm:$0xff] %vm5389_vm2, %v3526_v1  ;;  %5785 = vst.msk [vmem:[%s7017_s16 + $0xc58] sm:$0xff] %vm5389_vm2, %v4806_v3  ;;  %v569_v3 = vld [vmem:[%s6619_s29 + $0xc70] sm:$0xff] }
 0x334   : > { %v3530_v7 = vpop.f32.mrb[24].mxu0  ;;  %v4810_v10 = vpop.f32.mrb[24].mxu1 }
 0x335   : > { %v3531_v11 = vadd.f32 %v8573_v17, %v3530_v7  ;;  %v4811_v13 = vadd.f32 %v8573_v17, %v4810_v10  ;;  %v3532_v14 = vpop.f32.mrb[25].mxu0  ;;  %3794 = vmatmul.mubr.f32.gmra.mrb[130].mxu0 %v557_v5  ;;  %v4812_v12 = vpop.f32.mrb[25].mxu1  ;;  %5074 = vmatmul.mubr.f32.gmra.mrb[130].mxu1 %v1069_v6  ;;  %v1084_v5 = vld [vmem:[%s6619_s29 + $0x1c88] sm:$0xff] }
 0x336   : > { %6162 = vmatprep.mubr.msk.f32.mxu0 %vm1223_vm0, %v560_v8  ;;  %6418 = vmatprep.mubr.msk.f32.mxu1 %vm1223_vm0, %v1072_v9  ;;  %v1083_v14 = vld [vmem:[%s6619_s29 + $0x1c80] sm:$0xff]  ;;  %v574_v12 = vld [vmem:[%s6619_s29 + $0xc98] sm:$0xff] }
 0x337   : > { %5530 = vst.msk [vmem:[%s7017_s16 + $0x460] sm:$0xff] %vm5389_vm2, %v3531_v11  ;;  %5786 = vst.msk [vmem:[%s7017_s16 + $0xc60] sm:$0xff] %vm5389_vm2, %v4811_v13  ;;  %v571_v13 = vld [vmem:[%s6619_s29 + $0xc80] sm:$0xff] }
 0x338   : > { %v3535_v20 = vpop.f32.mrb[26].mxu0  ;;  %v4815_v21 = vpop.f32.mrb[26].mxu1 }
 0x339   : > { %v3536_v22 = vadd.f32 %v8573_v17, %v3535_v20  ;;  %v4816_v23 = vadd.f32 %v8573_v17, %v4815_v21  ;;  %v3537_v24 = vpop.f32.mrb[27].mxu0  ;;  %3799 = vmatmul.mubr.f32.gmra.mrb[132].mxu0 %v559_v15  ;;  %v4817_v25 = vpop.f32.mrb[27].mxu1  ;;  %5079 = vmatmul.mubr.f32.gmra.mrb[132].mxu1 %v1071_v16  ;;  %v1086_v15 = vld [vmem:[%s6619_s29 + $0x1c98] sm:$0xff] }
 0x33a   : > { %6163 = vmatprep.mubr.msk.f32.mxu0 %vm1223_vm0, %v562_v18  ;;  %6419 = vmatprep.mubr.msk.f32.mxu1 %vm1223_vm0, %v1074_v19  ;;  %v1085_v24 = vld [vmem:[%s6619_s29 + $0x1c90] sm:$0xff]  ;;  %v576_v25 = vld [vmem:[%s6619_s29 + $0xca8] sm:$0xff] }
 0x33b   : > { %5531 = vst.msk [vmem:[%s7017_s16 + $0x468] sm:$0xff] %vm5389_vm2, %v3536_v22  ;;  %5787 = vst.msk [vmem:[%s7017_s16 + $0xc68] sm:$0xff] %vm5389_vm2, %v4816_v23  ;;  %v573_v23 = vld [vmem:[%s6619_s29 + $0xc90] sm:$0xff] }
 0x33c   : > { %v3540_v30 = vpop.f32.mrb[28].mxu0  ;;  %v4820_v31 = vpop.f32.mrb[28].mxu1 }
 0x33d   : > { %v3541_v32 = vadd.f32 %v8573_v17, %v3540_v30  ;;  %v4821_v33 = vadd.f32 %v8573_v17, %v4820_v31  ;;  %v3542_v34 = vpop.f32.mrb[29].mxu0  ;;  %3804 = vmatmul.mubr.f32.gmra.mrb[134].mxu0 %v561_v26  ;;  %v4822_v35 = vpop.f32.mrb[29].mxu1  ;;  %5084 = vmatmul.mubr.f32.gmra.mrb[134].mxu1 %v1073_v27  ;;  %v1088_v26 = vld [vmem:[%s6619_s29 + $0x1ca8] sm:$0xff] }
 0x33e   : > { %6164 = vmatprep.mubr.msk.f32.mxu0 %vm1223_vm0, %v564_v28  ;;  %6420 = vmatprep.mubr.msk.f32.mxu1 %vm1223_vm0, %v1076_v29  ;;  %v1087_v34 = vld [vmem:[%s6619_s29 + $0x1ca0] sm:$0xff]  ;;  %v578_v35 = vld [vmem:[%s6619_s29 + $0xcb8] sm:$0xff] }
 0x33f   : > { %5532 = vst.msk [vmem:[%s7017_s16 + $0x470] sm:$0xff] %vm5389_vm2, %v3541_v32  ;;  %5788 = vst.msk [vmem:[%s7017_s16 + $0xc70] sm:$0xff] %vm5389_vm2, %v4821_v33  ;;  %v575_v33 = vld [vmem:[%s6619_s29 + $0xca0] sm:$0xff] }
 0x340   : > { %v3545_v40 = vpop.f32.mrb[30].mxu0  ;;  %v4825_v41 = vpop.f32.mrb[30].mxu1 }
 0x341   : > { %v3546_v42 = vadd.f32 %v8573_v17, %v3545_v40  ;;  %v4826_v43 = vadd.f32 %v8573_v17, %v4825_v41  ;;  %v3547_v44 = vpop.f32.mrb[31].mxu0  ;;  %3809 = vmatmul.mubr.f32.gmra.mrb[136].mxu0 %v563_v36  ;;  %v4827_v45 = vpop.f32.mrb[31].mxu1  ;;  %5089 = vmatmul.mubr.f32.gmra.mrb[136].mxu1 %v1075_v37  ;;  %v1090_v36 = vld [vmem:[%s6619_s29 + $0x1cb8] sm:$0xff] }
 0x342   : > { %6165 = vmatprep.mubr.msk.f32.mxu0 %vm1223_vm0, %v566_v38  ;;  %6421 = vmatprep.mubr.msk.f32.mxu1 %vm1223_vm0, %v1078_v39  ;;  %v1089_v44 = vld [vmem:[%s6619_s29 + $0x1cb0] sm:$0xff]  ;;  %v580_v45 = vld [vmem:[%s6619_s29 + $0xcc8] sm:$0xff] }
 0x343   : > { %5533 = vst.msk [vmem:[%s7017_s16 + $0x478] sm:$0xff] %vm5389_vm2, %v3546_v42  ;;  %5789 = vst.msk [vmem:[%s7017_s16 + $0xc78] sm:$0xff] %vm5389_vm2, %v4826_v43  ;;  %v577_v43 = vld [vmem:[%s6619_s29 + $0xcb0] sm:$0xff] }
 0x344   : > { %v3550_v50 = vpop.f32.mrb[32].mxu0  ;;  %v4830_v51 = vpop.f32.mrb[32].mxu1 }
 0x345   : > { %v3551_v52 = vadd.f32 %v8573_v17, %v3550_v50  ;;  %v4831_v53 = vadd.f32 %v8573_v17, %v4830_v51  ;;  %v3552_v54 = vpop.f32.mrb[33].mxu0  ;;  %3814 = vmatmul.mubr.f32.gmra.mrb[138].mxu0 %v565_v46  ;;  %v4832_v56 = vpop.f32.mrb[33].mxu1  ;;  %5094 = vmatmul.mubr.f32.gmra.mrb[138].mxu1 %v1077_v47  ;;  %v1092_v46 = vld [vmem:[%s6619_s29 + $0x1cc8] sm:$0xff] }
 0x346   : > { %6166 = vmatprep.mubr.msk.f32.mxu0 %vm1223_vm0, %v568_v48  ;;  %6422 = vmatprep.mubr.msk.f32.mxu1 %vm1223_vm0, %v1080_v49  ;;  %v1091_v54 = vld [vmem:[%s6619_s29 + $0x1cc0] sm:$0xff]  ;;  %v582_v56 = vld [vmem:[%s6619_s29 + $0xcd8] sm:$0xff] }
 0x347   : > { %5534 = vst.msk [vmem:[%s7017_s16 + $0x480] sm:$0xff] %vm5389_vm2, %v3551_v52  ;;  %5790 = vst.msk [vmem:[%s7017_s16 + $0xc80] sm:$0xff] %vm5389_vm2, %v4831_v53  ;;  %v579_v53 = vld [vmem:[%s6619_s29 + $0xcc0] sm:$0xff] }
 0x348   : > { %v3555_v61 = vpop.f32.mrb[34].mxu0  ;;  %v4835_v62 = vpop.f32.mrb[34].mxu1 }
 0x349   : > { %v3556_v63 = vadd.f32 %v8573_v17, %v3555_v61  ;;  %v4836_v55 = vadd.f32 %v8573_v17, %v4835_v62  ;;  %v3557_v0 = vpop.f32.mrb[35].mxu0  ;;  %3819 = vmatmul.mubr.f32.gmra.mrb[140].mxu0 %v567_v57  ;;  %v4837_v1 = vpop.f32.mrb[35].mxu1  ;;  %5099 = vmatmul.mubr.f32.gmra.mrb[140].mxu1 %v1079_v58  ;;  %v1094_v57 = vld [vmem:[%s6619_s29 + $0x1cd8] sm:$0xff] }
 0x34a   : > { %6167 = vmatprep.mubr.msk.f32.mxu0 %vm1223_vm0, %v570_v59  ;;  %6423 = vmatprep.mubr.msk.f32.mxu1 %vm1223_vm0, %v1082_v60  ;;  %v1093_v0 = vld [vmem:[%s6619_s29 + $0x1cd0] sm:$0xff]  ;;  %v584_v1 = vld [vmem:[%s6619_s29 + $0xce8] sm:$0xff] }
 0x34b   : > { %5535 = vst.msk [vmem:[%s7017_s16 + $0x488] sm:$0xff] %vm5389_vm2, %v3556_v63  ;;  %5791 = vst.msk [vmem:[%s7017_s16 + $0xc88] sm:$0xff] %vm5389_vm2, %v4836_v55  ;;  %v581_v55 = vld [vmem:[%s6619_s29 + $0xcd0] sm:$0xff] }
 0x34c   : > { %v3560_v6 = vpop.f32.mrb[36].mxu0  ;;  %v4840_v8 = vpop.f32.mrb[36].mxu1 }
 0x34d   : > { %v3561_v9 = vadd.f32 %v8573_v17, %v3560_v6  ;;  %v4841_v7 = vadd.f32 %v8573_v17, %v4840_v8  ;;  %v3562_v10 = vpop.f32.mrb[37].mxu0  ;;  %3824 = vmatmul.mubr.f32.gmra.mrb[142].mxu0 %v569_v3  ;;  %v4842_v11 = vpop.f32.mrb[37].mxu1  ;;  %5104 = vmatmul.mubr.f32.gmra.mrb[142].mxu1 %v1081_v4  ;;  %v1096_v3 = vld [vmem:[%s6619_s29 + $0x1ce8] sm:$0xff] }
 0x34e   : > { %6168 = vmatprep.mubr.msk.f32.mxu0 %vm1223_vm0, %v572_v2  ;;  %6424 = vmatprep.mubr.msk.f32.mxu1 %vm1223_vm0, %v1084_v5  ;;  %v1095_v10 = vld [vmem:[%s6619_s29 + $0x1ce0] sm:$0xff]  ;;  %v586_v11 = vld [vmem:[%s6619_s29 + $0xcf8] sm:$0xff] }
 0x34f   : > { %5536 = vst.msk [vmem:[%s7017_s16 + $0x490] sm:$0xff] %vm5389_vm2, %v3561_v9  ;;  %5792 = vst.msk [vmem:[%s7017_s16 + $0xc90] sm:$0xff] %vm5389_vm2, %v4841_v7  ;;  %v583_v7 = vld [vmem:[%s6619_s29 + $0xce0] sm:$0xff] }
 0x350   : > { %v3565_v16 = vpop.f32.mrb[38].mxu0  ;;  %v4845_v18 = vpop.f32.mrb[38].mxu1 }
 0x351   : > { %v3566_v19 = vadd.f32 %v8573_v17, %v3565_v16  ;;  %v4846_v20 = vadd.f32 %v8573_v17, %v4845_v18  ;;  %v3567_v21 = vpop.f32.mrb[39].mxu0  ;;  %3829 = vmatmul.mubr.f32.gmra.mrb[144].mxu0 %v571_v13  ;;  %v4847_v22 = vpop.f32.mrb[39].mxu1  ;;  %5109 = vmatmul.mubr.f32.gmra.mrb[144].mxu1 %v1083_v14  ;;  %v1098_v13 = vld [vmem:[%s6619_s29 + $0x1cf8] sm:$0xff] }
 0x352   : > { %6169 = vmatprep.mubr.msk.f32.mxu0 %vm1223_vm0, %v574_v12  ;;  %6425 = vmatprep.mubr.msk.f32.mxu1 %vm1223_vm0, %v1086_v15  ;;  %v1097_v21 = vld [vmem:[%s6619_s29 + $0x1cf0] sm:$0xff]  ;;  %v588_v22 = vld [vmem:[%s6619_s29 + $0xd08] sm:$0xff] }
 0x353   : > { %5537 = vst.msk [vmem:[%s7017_s16 + $0x498] sm:$0xff] %vm5389_vm2, %v3566_v19  ;;  %5793 = vst.msk [vmem:[%s7017_s16 + $0xc98] sm:$0xff] %vm5389_vm2, %v4846_v20  ;;  %v585_v20 = vld [vmem:[%s6619_s29 + $0xcf0] sm:$0xff] }
 0x354   : > { %v3570_v27 = vpop.f32.mrb[40].mxu0  ;;  %v4850_v28 = vpop.f32.mrb[40].mxu1 }
 0x355   : > { %v3571_v29 = vadd.f32 %v8573_v17, %v3570_v27  ;;  %v4851_v30 = vadd.f32 %v8573_v17, %v4850_v28  ;;  %v3572_v31 = vpop.f32.mrb[41].mxu0  ;;  %3834 = vmatmul.mubr.f32.gmra.mrb[146].mxu0 %v573_v23  ;;  %v4852_v32 = vpop.f32.mrb[41].mxu1  ;;  %5114 = vmatmul.mubr.f32.gmra.mrb[146].mxu1 %v1085_v24  ;;  %v1100_v23 = vld [vmem:[%s6619_s29 + $0x1d08] sm:$0xff] }
 0x356   : > { %6170 = vmatprep.mubr.msk.f32.mxu0 %vm1223_vm0, %v576_v25  ;;  %6426 = vmatprep.mubr.msk.f32.mxu1 %vm1223_vm0, %v1088_v26  ;;  %v1099_v31 = vld [vmem:[%s6619_s29 + $0x1d00] sm:$0xff]  ;;  %v590_v32 = vld [vmem:[%s6619_s29 + $0xd18] sm:$0xff] }
 0x357   : > { %5538 = vst.msk [vmem:[%s7017_s16 + $0x4a0] sm:$0xff] %vm5389_vm2, %v3571_v29  ;;  %5794 = vst.msk [vmem:[%s7017_s16 + $0xca0] sm:$0xff] %vm5389_vm2, %v4851_v30  ;;  %v587_v30 = vld [vmem:[%s6619_s29 + $0xd00] sm:$0xff] }
 0x358   : > { %v3575_v37 = vpop.f32.mrb[42].mxu0  ;;  %v4855_v38 = vpop.f32.mrb[42].mxu1 }
 0x359   : > { %v3576_v39 = vadd.f32 %v8573_v17, %v3575_v37  ;;  %v4856_v40 = vadd.f32 %v8573_v17, %v4855_v38  ;;  %v3577_v41 = vpop.f32.mrb[43].mxu0  ;;  %3839 = vmatmul.mubr.f32.gmra.mrb[148].mxu0 %v575_v33  ;;  %v4857_v42 = vpop.f32.mrb[43].mxu1  ;;  %5119 = vmatmul.mubr.f32.gmra.mrb[148].mxu1 %v1087_v34  ;;  %v1102_v33 = vld [vmem:[%s6619_s29 + $0x1d18] sm:$0xff] }
 0x35a   : > { %6171 = vmatprep.mubr.msk.f32.mxu0 %vm1223_vm0, %v578_v35  ;;  %6427 = vmatprep.mubr.msk.f32.mxu1 %vm1223_vm0, %v1090_v36  ;;  %v1101_v41 = vld [vmem:[%s6619_s29 + $0x1d10] sm:$0xff]  ;;  %v592_v42 = vld [vmem:[%s6619_s29 + $0xd28] sm:$0xff] }
 0x35b   : > { %5539 = vst.msk [vmem:[%s7017_s16 + $0x4a8] sm:$0xff] %vm5389_vm2, %v3576_v39  ;;  %5795 = vst.msk [vmem:[%s7017_s16 + $0xca8] sm:$0xff] %vm5389_vm2, %v4856_v40  ;;  %v589_v40 = vld [vmem:[%s6619_s29 + $0xd10] sm:$0xff] }
 0x35c   : > { %v3580_v47 = vpop.f32.mrb[44].mxu0  ;;  %v4860_v48 = vpop.f32.mrb[44].mxu1 }
 0x35d   : > { %v3581_v49 = vadd.f32 %v8573_v17, %v3580_v47  ;;  %v4861_v50 = vadd.f32 %v8573_v17, %v4860_v48  ;;  %v3582_v51 = vpop.f32.mrb[45].mxu0  ;;  %3844 = vmatmul.mubr.f32.gmra.mrb[150].mxu0 %v577_v43  ;;  %v4862_v52 = vpop.f32.mrb[45].mxu1  ;;  %5124 = vmatmul.mubr.f32.gmra.mrb[150].mxu1 %v1089_v44  ;;  %v1104_v43 = vld [vmem:[%s6619_s29 + $0x1d28] sm:$0xff] }
 0x35e   : > { %6172 = vmatprep.mubr.msk.f32.mxu0 %vm1223_vm0, %v580_v45  ;;  %6428 = vmatprep.mubr.msk.f32.mxu1 %vm1223_vm0, %v1092_v46  ;;  %v1103_v51 = vld [vmem:[%s6619_s29 + $0x1d20] sm:$0xff]  ;;  %v594_v52 = vld [vmem:[%s6619_s29 + $0xd38] sm:$0xff] }
 0x35f   : > { %5540 = vst.msk [vmem:[%s7017_s16 + $0x4b0] sm:$0xff] %vm5389_vm2, %v3581_v49  ;;  %5796 = vst.msk [vmem:[%s7017_s16 + $0xcb0] sm:$0xff] %vm5389_vm2, %v4861_v50  ;;  %v591_v50 = vld [vmem:[%s6619_s29 + $0xd20] sm:$0xff] }
 0x360   : > { %v3585_v58 = vpop.f32.mrb[46].mxu0  ;;  %v4865_v59 = vpop.f32.mrb[46].mxu1 }
 0x361   : > { %v3586_v60 = vadd.f32 %v8573_v17, %v3585_v58  ;;  %v4866_v61 = vadd.f32 %v8573_v17, %v4865_v59  ;;  %v3587_v62 = vpop.f32.mrb[47].mxu0  ;;  %3849 = vmatmul.mubr.f32.gmra.mrb[152].mxu0 %v579_v53  ;;  %v4867_v63 = vpop.f32.mrb[47].mxu1  ;;  %5129 = vmatmul.mubr.f32.gmra.mrb[152].mxu1 %v1091_v54  ;;  %v1106_v53 = vld [vmem:[%s6619_s29 + $0x1d38] sm:$0xff] }
 0x362   : > { %6173 = vmatprep.mubr.msk.f32.mxu0 %vm1223_vm0, %v582_v56  ;;  %6429 = vmatprep.mubr.msk.f32.mxu1 %vm1223_vm0, %v1094_v57  ;;  %v1105_v62 = vld [vmem:[%s6619_s29 + $0x1d30] sm:$0xff]  ;;  %v596_v63 = vld [vmem:[%s6619_s29 + $0xd48] sm:$0xff] }
 0x363   : > { %5541 = vst.msk [vmem:[%s7017_s16 + $0x4b8] sm:$0xff] %vm5389_vm2, %v3586_v60  ;;  %5797 = vst.msk [vmem:[%s7017_s16 + $0xcb8] sm:$0xff] %vm5389_vm2, %v4866_v61  ;;  %v593_v61 = vld [vmem:[%s6619_s29 + $0xd30] sm:$0xff] }
 0x364   : > { %v3590_v4 = vpop.f32.mrb[48].mxu0  ;;  %v4870_v2 = vpop.f32.mrb[48].mxu1 }
 0x365   : > { %v3591_v5 = vadd.f32 %v8573_v17, %v3590_v4  ;;  %v4871_v6 = vadd.f32 %v8573_v17, %v4870_v2  ;;  %v3592_v8 = vpop.f32.mrb[49].mxu0  ;;  %3854 = vmatmul.mubr.f32.gmra.mrb[154].mxu0 %v581_v55  ;;  %v4872_v9 = vpop.f32.mrb[49].mxu1  ;;  %5134 = vmatmul.mubr.f32.gmra.mrb[154].mxu1 %v1093_v0  ;;  %v1108_v55 = vld [vmem:[%s6619_s29 + $0x1d48] sm:$0xff] }
 0x366   : > { %6174 = vmatprep.mubr.msk.f32.mxu0 %vm1223_vm0, %v584_v1  ;;  %6430 = vmatprep.mubr.msk.f32.mxu1 %vm1223_vm0, %v1096_v3  ;;  %v1107_v8 = vld [vmem:[%s6619_s29 + $0x1d40] sm:$0xff]  ;;  %v598_v9 = vld [vmem:[%s6619_s29 + $0xd58] sm:$0xff] }
 0x367   : > { %5542 = vst.msk [vmem:[%s7017_s16 + $0x4c0] sm:$0xff] %vm5389_vm2, %v3591_v5  ;;  %5798 = vst.msk [vmem:[%s7017_s16 + $0xcc0] sm:$0xff] %vm5389_vm2, %v4871_v6  ;;  %v595_v6 = vld [vmem:[%s6619_s29 + $0xd40] sm:$0xff] }
 0x368   : > { %v3595_v14 = vpop.f32.mrb[50].mxu0  ;;  %v4875_v12 = vpop.f32.mrb[50].mxu1 }
 0x369   : > { %v3596_v15 = vadd.f32 %v8573_v17, %v3595_v14  ;;  %v4876_v16 = vadd.f32 %v8573_v17, %v4875_v12  ;;  %v3597_v18 = vpop.f32.mrb[51].mxu0  ;;  %3859 = vmatmul.mubr.f32.gmra.mrb[156].mxu0 %v583_v7  ;;  %v4877_v19 = vpop.f32.mrb[51].mxu1  ;;  %5139 = vmatmul.mubr.f32.gmra.mrb[156].mxu1 %v1095_v10  ;;  %v1110_v7 = vld [vmem:[%s6619_s29 + $0x1d58] sm:$0xff] }
 0x36a   : > { %6175 = vmatprep.mubr.msk.f32.mxu0 %vm1223_vm0, %v586_v11  ;;  %6431 = vmatprep.mubr.msk.f32.mxu1 %vm1223_vm0, %v1098_v13  ;;  %v1109_v18 = vld [vmem:[%s6619_s29 + $0x1d50] sm:$0xff]  ;;  %v600_v19 = vld [vmem:[%s6619_s29 + $0xd68] sm:$0xff] }
 0x36b   : > { %5543 = vst.msk [vmem:[%s7017_s16 + $0x4c8] sm:$0xff] %vm5389_vm2, %v3596_v15  ;;  %5799 = vst.msk [vmem:[%s7017_s16 + $0xcc8] sm:$0xff] %vm5389_vm2, %v4876_v16  ;;  %v597_v16 = vld [vmem:[%s6619_s29 + $0xd50] sm:$0xff] }
 0x36c   : > { %v3600_v24 = vpop.f32.mrb[52].mxu0  ;;  %v4880_v25 = vpop.f32.mrb[52].mxu1 }
 0x36d   : > { %v3601_v26 = vadd.f32 %v8573_v17, %v3600_v24  ;;  %v4881_v27 = vadd.f32 %v8573_v17, %v4880_v25  ;;  %v3602_v28 = vpop.f32.mrb[53].mxu0  ;;  %3864 = vmatmul.mubr.f32.gmra.mrb[158].mxu0 %v585_v20  ;;  %v4882_v29 = vpop.f32.mrb[53].mxu1  ;;  %5144 = vmatmul.mubr.f32.gmra.mrb[158].mxu1 %v1097_v21 }
 0x36e   : > { %6176 = vmatprep.mubr.msk.f32.mxu0 %vm1223_vm0, %v588_v22  ;;  %6432 = vmatprep.mubr.msk.f32.mxu1 %vm1223_vm0, %v1100_v23  ;;  %v8962_v22 = vld [vmem:[%s9805_s2] ss:$0 sm:$0xff]  ;;  %v602_v29 = vld [vmem:[%s6619_s29 + $0xd78] sm:$0xff] }
 0x36f   : > { %5544 = vst.msk [vmem:[%s7017_s16 + $0x4d0] sm:$0xff] %vm5389_vm2, %v3601_v26  ;;  %5800 = vst.msk [vmem:[%s7017_s16 + $0xcd0] sm:$0xff] %vm5389_vm2, %v4881_v27  ;;  %v599_v27 = vld [vmem:[%s6619_s29 + $0xd60] sm:$0xff] }
 0x370   : > { %v3605_v34 = vpop.f32.mrb[54].mxu0  ;;  %v4885_v35 = vpop.f32.mrb[54].mxu1  ;;  %v1111_v28 = vld [vmem:[%s6619_s29 + $0x1d60] sm:$0xff] }
 0x371   : > { %v3606_v36 = vadd.f32 %v8573_v17, %v3605_v34  ;;  %v4886_v37 = vadd.f32 %v8573_v17, %v4885_v35  ;;  %v3607_v38 = vpop.f32.mrb[55].mxu0  ;;  %3869 = vmatmul.mubr.f32.gmra.mrb[160].mxu0 %v587_v30  ;;  %v4887_v39 = vpop.f32.mrb[55].mxu1  ;;  %5149 = vmatmul.mubr.f32.gmra.mrb[160].mxu1 %v1099_v31  ;;  %v1114_v30 = vld [vmem:[%s6619_s29 + $0x1d78] sm:$0xff] }
 0x372   : > { %6177 = vmatprep.mubr.msk.f32.mxu0 %vm1223_vm0, %v590_v32  ;;  %6433 = vmatprep.mubr.msk.f32.mxu1 %vm1223_vm0, %v1102_v33  ;;  %v1113_v38 = vld [vmem:[%s6619_s29 + $0x1d70] sm:$0xff]  ;;  %v604_v39 = vld [vmem:[%s6619_s29 + $0xd88] sm:$0xff] }
 0x373   : > { %5545 = vst.msk [vmem:[%s7017_s16 + $0x4d8] sm:$0xff] %vm5389_vm2, %v3606_v36  ;;  %5801 = vst.msk [vmem:[%s7017_s16 + $0xcd8] sm:$0xff] %vm5389_vm2, %v4886_v37  ;;  %v601_v37 = vld [vmem:[%s6619_s29 + $0xd70] sm:$0xff] }
 0x374   : > { %v3610_v44 = vpop.f32.mrb[56].mxu0  ;;  %v4890_v45 = vpop.f32.mrb[56].mxu1 }
 0x375   : > { %v3611_v46 = vadd.f32 %v8573_v17, %v3610_v44  ;;  %v4891_v47 = vadd.f32 %v8573_v17, %v4890_v45  ;;  %v3612_v48 = vpop.f32.mrb[57].mxu0  ;;  %3874 = vmatmul.mubr.f32.gmra.mrb[162].mxu0 %v589_v40  ;;  %v4892_v49 = vpop.f32.mrb[57].mxu1  ;;  %5154 = vmatmul.mubr.f32.gmra.mrb[162].mxu1 %v1101_v41  ;;  %v1116_v40 = vld [vmem:[%s6619_s29 + $0x1d88] sm:$0xff] }
 0x376   : > { %6178 = vmatprep.mubr.msk.f32.mxu0 %vm1223_vm0, %v592_v42  ;;  %6434 = vmatprep.mubr.msk.f32.mxu1 %vm1223_vm0, %v1104_v43  ;;  %v1115_v48 = vld [vmem:[%s6619_s29 + $0x1d80] sm:$0xff]  ;;  %v606_v49 = vld [vmem:[%s6619_s29 + $0xd98] sm:$0xff] }
 0x377   : > { %5546 = vst.msk [vmem:[%s7017_s16 + $0x4e0] sm:$0xff] %vm5389_vm2, %v3611_v46  ;;  %5802 = vst.msk [vmem:[%s7017_s16 + $0xce0] sm:$0xff] %vm5389_vm2, %v4891_v47  ;;  %v603_v47 = vld [vmem:[%s6619_s29 + $0xd80] sm:$0xff] }
 0x378   : > { %v3615_v54 = vpop.f32.mrb[58].mxu0  ;;  %v4895_v56 = vpop.f32.mrb[58].mxu1 }
 0x379   : > { %v3616_v57 = vadd.f32 %v8573_v17, %v3615_v54  ;;  %v4896_v58 = vadd.f32 %v8573_v17, %v4895_v56  ;;  %v3617_v59 = vpop.f32.mrb[59].mxu0  ;;  %3879 = vmatmul.mubr.f32.gmra.mrb[164].mxu0 %v591_v50  ;;  %v4897_v60 = vpop.f32.mrb[59].mxu1  ;;  %5159 = vmatmul.mubr.f32.gmra.mrb[164].mxu1 %v1103_v51  ;;  %v1118_v50 = vld [vmem:[%s6619_s29 + $0x1d98] sm:$0xff] }
 0x37a   : > { %6179 = vmatprep.mubr.msk.f32.mxu0 %vm1223_vm0, %v594_v52  ;;  %6435 = vmatprep.mubr.msk.f32.mxu1 %vm1223_vm0, %v1106_v53  ;;  %v1117_v59 = vld [vmem:[%s6619_s29 + $0x1d90] sm:$0xff]  ;;  %v608_v60 = vld [vmem:[%s6619_s29 + $0xda8] sm:$0xff] }
 0x37b   : > { %5547 = vst.msk [vmem:[%s7017_s16 + $0x4e8] sm:$0xff] %vm5389_vm2, %v3616_v57  ;;  %5803 = vst.msk [vmem:[%s7017_s16 + $0xce8] sm:$0xff] %vm5389_vm2, %v4896_v58  ;;  %v605_v58 = vld [vmem:[%s6619_s29 + $0xd90] sm:$0xff] }
 0x37c   : > { %v3620_v0 = vpop.f32.mrb[60].mxu0  ;;  %v4900_v1 = vpop.f32.mrb[60].mxu1 }
 0x37d   : > { %v3621_v3 = vadd.f32 %v8573_v17, %v3620_v0  ;;  %v4901_v4 = vadd.f32 %v8573_v17, %v4900_v1  ;;  %v3622_v2 = vpop.f32.mrb[61].mxu0  ;;  %3884 = vmatmul.mubr.f32.gmra.mrb[166].mxu0 %v593_v61  ;;  %v4902_v5 = vpop.f32.mrb[61].mxu1  ;;  %5164 = vmatmul.mubr.f32.gmra.mrb[166].mxu1 %v1105_v62  ;;  %v1120_v61 = vld [vmem:[%s6619_s29 + $0x1da8] sm:$0xff] }
 0x37e   : > { %6180 = vmatprep.mubr.msk.f32.mxu0 %vm1223_vm0, %v596_v63  ;;  %6436 = vmatprep.mubr.msk.f32.mxu1 %vm1223_vm0, %v1108_v55  ;;  %v1119_v2 = vld [vmem:[%s6619_s29 + $0x1da0] sm:$0xff]  ;;  %v610_v5 = vld [vmem:[%s6619_s29 + $0xdb8] sm:$0xff] }
 0x37f   : > { %5548 = vst.msk [vmem:[%s7017_s16 + $0x4f0] sm:$0xff] %vm5389_vm2, %v3621_v3  ;;  %5804 = vst.msk [vmem:[%s7017_s16 + $0xcf0] sm:$0xff] %vm5389_vm2, %v4901_v4  ;;  %v607_v4 = vld [vmem:[%s6619_s29 + $0xda0] sm:$0xff] }
 0x380   : > { %v3625_v10 = vpop.f32.mrb[62].mxu0  ;;  %v4905_v11 = vpop.f32.mrb[62].mxu1 }
 0x381   : > { %v3626_v13 = vadd.f32 %v8573_v17, %v3625_v10  ;;  %v4906_v14 = vadd.f32 %v8573_v17, %v4905_v11  ;;  %v3627_v12 = vpop.f32.mrb[63].mxu0  ;;  %3889 = vmatmul.mubr.f32.gmra.mrb[168].mxu0 %v595_v6  ;;  %v4907_v15 = vpop.f32.mrb[63].mxu1  ;;  %5169 = vmatmul.mubr.f32.gmra.mrb[168].mxu1 %v1107_v8  ;;  %v1112_v17 = vld [vmem:[%s6619_s29 + $0x1d68] sm:$0xff]  ;;  %v1122_v6 = vld [vmem:[%s6619_s29 + $0x1db8] sm:$0xff] }
 0x382   : > { %6181 = vmatprep.mubr.msk.f32.mxu0 %vm1223_vm0, %v598_v9  ;;  %6437 = vmatprep.mubr.msk.f32.mxu1 %vm1223_vm0, %v1110_v7  ;;  %v1121_v12 = vld [vmem:[%s6619_s29 + $0x1db0] sm:$0xff]  ;;  %v612_v15 = vld [vmem:[%s6619_s29 + $0xdc8] sm:$0xff] }
 0x383   : > { %5549 = vst.msk [vmem:[%s7017_s16 + $0x4f8] sm:$0xff] %vm5389_vm2, %v3626_v13  ;;  %5805 = vst.msk [vmem:[%s7017_s16 + $0xcf8] sm:$0xff] %vm5389_vm2, %v4906_v14  ;;  %v609_v14 = vld [vmem:[%s6619_s29 + $0xdb0] sm:$0xff] }
 0x384   : > { %v3630_v20 = vpop.f32.mrb[64].mxu0  ;;  %v4910_v21 = vpop.f32.mrb[64].mxu1 }
 0x385   : > { %v3631_v23 = vadd.f32 %v8962_v22, %v3630_v20  ;;  %v4911_v24 = vadd.f32 %v8962_v22, %v4910_v21  ;;  %v3632_v25 = vpop.f32.mrb[65].mxu0  ;;  %3894 = vmatmul.mubr.f32.gmra.mrb[170].mxu0 %v597_v16  ;;  %v4912_v26 = vpop.f32.mrb[65].mxu1  ;;  %5174 = vmatmul.mubr.f32.gmra.mrb[170].mxu1 %v1109_v18  ;;  %v1124_v16 = vld [vmem:[%s6619_s29 + $0x1dc8] sm:$0xff] }
 0x386   : > { %6182 = vmatprep.mubr.msk.f32.mxu0 %vm1223_vm0, %v600_v19  ;;  %6438 = vmatprep.mubr.msk.f32.mxu1 %vm1223_vm0, %v1112_v17  ;;  %v1123_v25 = vld [vmem:[%s6619_s29 + $0x1dc0] sm:$0xff]  ;;  %v614_v26 = vld [vmem:[%s6619_s29 + $0xdd8] sm:$0xff] }
 0x387   : > { %5550 = vst.msk [vmem:[%s7017_s16 + $0x500] sm:$0xff] %vm5389_vm2, %v3631_v23  ;;  %5806 = vst.msk [vmem:[%s7017_s16 + $0xd00] sm:$0xff] %vm5389_vm2, %v4911_v24  ;;  %v611_v24 = vld [vmem:[%s6619_s29 + $0xdc0] sm:$0xff] }
 0x388   : > { %v3635_v31 = vpop.f32.mrb[66].mxu0  ;;  %v4915_v32 = vpop.f32.mrb[66].mxu1 }
 0x389   : > { %v3636_v33 = vadd.f32 %v8962_v22, %v3635_v31  ;;  %v4916_v34 = vadd.f32 %v8962_v22, %v4915_v32  ;;  %v3637_v35 = vpop.f32.mrb[67].mxu0  ;;  %3899 = vmatmul.mubr.f32.gmra.mrb[172].mxu0 %v599_v27  ;;  %v4917_v36 = vpop.f32.mrb[67].mxu1  ;;  %5179 = vmatmul.mubr.f32.gmra.mrb[172].mxu1 %v1111_v28  ;;  %v1126_v27 = vld [vmem:[%s6619_s29 + $0x1dd8] sm:$0xff] }
 0x38a   : > { %6183 = vmatprep.mubr.msk.f32.mxu0 %vm1223_vm0, %v602_v29  ;;  %6439 = vmatprep.mubr.msk.f32.mxu1 %vm1223_vm0, %v1114_v30  ;;  %v1125_v35 = vld [vmem:[%s6619_s29 + $0x1dd0] sm:$0xff]  ;;  %v616_v36 = vld [vmem:[%s6619_s29 + $0xde8] sm:$0xff] }
 0x38b   : > { %5551 = vst.msk [vmem:[%s7017_s16 + $0x508] sm:$0xff] %vm5389_vm2, %v3636_v33  ;;  %5807 = vst.msk [vmem:[%s7017_s16 + $0xd08] sm:$0xff] %vm5389_vm2, %v4916_v34  ;;  %v613_v34 = vld [vmem:[%s6619_s29 + $0xdd0] sm:$0xff] }
 0x38c   : > { %v3640_v41 = vpop.f32.mrb[68].mxu0  ;;  %v4920_v42 = vpop.f32.mrb[68].mxu1 }
 0x38d   : > { %v3641_v43 = vadd.f32 %v8962_v22, %v3640_v41  ;;  %v4921_v44 = vadd.f32 %v8962_v22, %v4920_v42  ;;  %v3642_v45 = vpop.f32.mrb[69].mxu0  ;;  %3904 = vmatmul.mubr.f32.gmra.mrb[174].mxu0 %v601_v37  ;;  %v4922_v46 = vpop.f32.mrb[69].mxu1  ;;  %5184 = vmatmul.mubr.f32.gmra.mrb[174].mxu1 %v1113_v38  ;;  %v1128_v37 = vld [vmem:[%s6619_s29 + $0x1de8] sm:$0xff] }
 0x38e   : > { %6184 = vmatprep.mubr.msk.f32.mxu0 %vm1223_vm0, %v604_v39  ;;  %6440 = vmatprep.mubr.msk.f32.mxu1 %vm1223_vm0, %v1116_v40  ;;  %v1127_v45 = vld [vmem:[%s6619_s29 + $0x1de0] sm:$0xff]  ;;  %v618_v46 = vld [vmem:[%s6619_s29 + $0xdf8] sm:$0xff] }
 0x38f   : > { %5552 = vst.msk [vmem:[%s7017_s16 + $0x510] sm:$0xff] %vm5389_vm2, %v3641_v43  ;;  %5808 = vst.msk [vmem:[%s7017_s16 + $0xd10] sm:$0xff] %vm5389_vm2, %v4921_v44  ;;  %v615_v44 = vld [vmem:[%s6619_s29 + $0xde0] sm:$0xff] }
 0x390   : > { %v3645_v51 = vpop.f32.mrb[70].mxu0  ;;  %v4925_v52 = vpop.f32.mrb[70].mxu1 }
 0x391   : > { %v3646_v53 = vadd.f32 %v8962_v22, %v3645_v51  ;;  %v4926_v54 = vadd.f32 %v8962_v22, %v4925_v52  ;;  %v3647_v56 = vpop.f32.mrb[71].mxu0  ;;  %3909 = vmatmul.mubr.f32.gmra.mrb[176].mxu0 %v603_v47  ;;  %v4927_v57 = vpop.f32.mrb[71].mxu1  ;;  %5189 = vmatmul.mubr.f32.gmra.mrb[176].mxu1 %v1115_v48  ;;  %v1130_v47 = vld [vmem:[%s6619_s29 + $0x1df8] sm:$0xff] }
 0x392   : > { %6185 = vmatprep.mubr.msk.f32.mxu0 %vm1223_vm0, %v606_v49  ;;  %6441 = vmatprep.mubr.msk.f32.mxu1 %vm1223_vm0, %v1118_v50  ;;  %v1129_v56 = vld [vmem:[%s6619_s29 + $0x1df0] sm:$0xff]  ;;  %v620_v57 = vld [vmem:[%s6619_s29 + $0xe08] sm:$0xff] }
 0x393   : > { %5553 = vst.msk [vmem:[%s7017_s16 + $0x518] sm:$0xff] %vm5389_vm2, %v3646_v53  ;;  %5809 = vst.msk [vmem:[%s7017_s16 + $0xd18] sm:$0xff] %vm5389_vm2, %v4926_v54  ;;  %v617_v54 = vld [vmem:[%s6619_s29 + $0xdf0] sm:$0xff] }
 0x394   : > { %v3650_v62 = vpop.f32.mrb[72].mxu0  ;;  %v4930_v63 = vpop.f32.mrb[72].mxu1 }
 0x395   : > { %v3651_v55 = vadd.f32 %v8962_v22, %v3650_v62  ;;  %v4931_v0 = vadd.f32 %v8962_v22, %v4930_v63  ;;  %v3652_v1 = vpop.f32.mrb[73].mxu0  ;;  %3914 = vmatmul.mubr.f32.gmra.mrb[178].mxu0 %v605_v58  ;;  %v4932_v3 = vpop.f32.mrb[73].mxu1  ;;  %5194 = vmatmul.mubr.f32.gmra.mrb[178].mxu1 %v1117_v59  ;;  %v1132_v58 = vld [vmem:[%s6619_s29 + $0x1e08] sm:$0xff] }
 0x396   : > { %6186 = vmatprep.mubr.msk.f32.mxu0 %vm1223_vm0, %v608_v60  ;;  %6442 = vmatprep.mubr.msk.f32.mxu1 %vm1223_vm0, %v1120_v61  ;;  %v1131_v1 = vld [vmem:[%s6619_s29 + $0x1e00] sm:$0xff]  ;;  %v622_v3 = vld [vmem:[%s6619_s29 + $0xe18] sm:$0xff] }
 0x397   : > { %5554 = vst.msk [vmem:[%s7017_s16 + $0x520] sm:$0xff] %vm5389_vm2, %v3651_v55  ;;  %5810 = vst.msk [vmem:[%s7017_s16 + $0xd20] sm:$0xff] %vm5389_vm2, %v4931_v0  ;;  %v619_v0 = vld [vmem:[%s6619_s29 + $0xe00] sm:$0xff] }
 0x398   : > { %v3655_v8 = vpop.f32.mrb[74].mxu0  ;;  %v4935_v9 = vpop.f32.mrb[74].mxu1 }
 0x399   : > { %v3656_v7 = vadd.f32 %v8962_v22, %v3655_v8  ;;  %v4936_v10 = vadd.f32 %v8962_v22, %v4935_v9  ;;  %v3657_v11 = vpop.f32.mrb[75].mxu0  ;;  %3919 = vmatmul.mubr.f32.gmra.mrb[180].mxu0 %v607_v4  ;;  %v4937_v13 = vpop.f32.mrb[75].mxu1  ;;  %5199 = vmatmul.mubr.f32.gmra.mrb[180].mxu1 %v1119_v2  ;;  %v1134_v4 = vld [vmem:[%s6619_s29 + $0x1e18] sm:$0xff] }
 0x39a   : > { %6187 = vmatprep.mubr.msk.f32.mxu0 %vm1223_vm0, %v610_v5  ;;  %6443 = vmatprep.mubr.msk.f32.mxu1 %vm1223_vm0, %v1122_v6  ;;  %v1133_v11 = vld [vmem:[%s6619_s29 + $0x1e10] sm:$0xff]  ;;  %v624_v13 = vld [vmem:[%s6619_s29 + $0xe28] sm:$0xff] }
 0x39b   : > { %5555 = vst.msk [vmem:[%s7017_s16 + $0x528] sm:$0xff] %vm5389_vm2, %v3656_v7  ;;  %5811 = vst.msk [vmem:[%s7017_s16 + $0xd28] sm:$0xff] %vm5389_vm2, %v4936_v10  ;;  %v621_v10 = vld [vmem:[%s6619_s29 + $0xe10] sm:$0xff] }
 0x39c   : > { %v3660_v18 = vpop.f32.mrb[76].mxu0  ;;  %v4940_v19 = vpop.f32.mrb[76].mxu1 }
 0x39d   : > { %v3661_v17 = vadd.f32 %v8962_v22, %v3660_v18  ;;  %v4941_v20 = vadd.f32 %v8962_v22, %v4940_v19  ;;  %v3662_v21 = vpop.f32.mrb[77].mxu0  ;;  %3924 = vmatmul.mubr.f32.gmra.mrb[182].mxu0 %v609_v14  ;;  %v4942_v23 = vpop.f32.mrb[77].mxu1  ;;  %5204 = vmatmul.mubr.f32.gmra.mrb[182].mxu1 %v1121_v12  ;;  %v1136_v14 = vld [vmem:[%s6619_s29 + $0x1e28] sm:$0xff] }
 0x39e   : > { %6188 = vmatprep.mubr.msk.f32.mxu0 %vm1223_vm0, %v612_v15  ;;  %6444 = vmatprep.mubr.msk.f32.mxu1 %vm1223_vm0, %v1124_v16  ;;  %v1135_v21 = vld [vmem:[%s6619_s29 + $0x1e20] sm:$0xff]  ;;  %v626_v23 = vld [vmem:[%s6619_s29 + $0xe38] sm:$0xff] }
 0x39f   : > { %5556 = vst.msk [vmem:[%s7017_s16 + $0x530] sm:$0xff] %vm5389_vm2, %v3661_v17  ;;  %5812 = vst.msk [vmem:[%s7017_s16 + $0xd30] sm:$0xff] %vm5389_vm2, %v4941_v20  ;;  %v623_v20 = vld [vmem:[%s6619_s29 + $0xe20] sm:$0xff] }
 0x3a0   : > { %v3665_v28 = vpop.f32.mrb[78].mxu0  ;;  %v4945_v29 = vpop.f32.mrb[78].mxu1 }
 0x3a1   : > { %v3666_v30 = vadd.f32 %v8962_v22, %v3665_v28  ;;  %v4946_v31 = vadd.f32 %v8962_v22, %v4945_v29  ;;  %v3667_v32 = vpop.f32.mrb[79].mxu0  ;;  %3929 = vmatmul.mubr.f32.gmra.mrb[184].mxu0 %v611_v24  ;;  %v4947_v33 = vpop.f32.mrb[79].mxu1  ;;  %5209 = vmatmul.mubr.f32.gmra.mrb[184].mxu1 %v1123_v25  ;;  %v1138_v24 = vld [vmem:[%s6619_s29 + $0x1e38] sm:$0xff] }
 0x3a2   : > { %6189 = vmatprep.mubr.msk.f32.mxu0 %vm1223_vm0, %v614_v26  ;;  %6445 = vmatprep.mubr.msk.f32.mxu1 %vm1223_vm0, %v1126_v27  ;;  %v1137_v32 = vld [vmem:[%s6619_s29 + $0x1e30] sm:$0xff]  ;;  %v628_v33 = vld [vmem:[%s6619_s29 + $0xe48] sm:$0xff] }
 0x3a3   : > { %5557 = vst.msk [vmem:[%s7017_s16 + $0x538] sm:$0xff] %vm5389_vm2, %v3666_v30  ;;  %5813 = vst.msk [vmem:[%s7017_s16 + $0xd38] sm:$0xff] %vm5389_vm2, %v4946_v31  ;;  %v625_v31 = vld [vmem:[%s6619_s29 + $0xe30] sm:$0xff] }
 0x3a4   : > { %v3670_v38 = vpop.f32.mrb[80].mxu0  ;;  %v4950_v39 = vpop.f32.mrb[80].mxu1 }
 0x3a5   : > { %v3671_v40 = vadd.f32 %v8962_v22, %v3670_v38  ;;  %v4951_v41 = vadd.f32 %v8962_v22, %v4950_v39  ;;  %v3672_v42 = vpop.f32.mrb[81].mxu0  ;;  %3934 = vmatmul.mubr.f32.gmra.mrb[186].mxu0 %v613_v34  ;;  %v4952_v43 = vpop.f32.mrb[81].mxu1  ;;  %5214 = vmatmul.mubr.f32.gmra.mrb[186].mxu1 %v1125_v35  ;;  %v1140_v34 = vld [vmem:[%s6619_s29 + $0x1e48] sm:$0xff] }
 0x3a6   : > { %6190 = vmatprep.mubr.msk.f32.mxu0 %vm1223_vm0, %v616_v36  ;;  %6446 = vmatprep.mubr.msk.f32.mxu1 %vm1223_vm0, %v1128_v37  ;;  %v1139_v42 = vld [vmem:[%s6619_s29 + $0x1e40] sm:$0xff]  ;;  %v630_v43 = vld [vmem:[%s6619_s29 + $0xe58] sm:$0xff] }
 0x3a7   : > { %5558 = vst.msk [vmem:[%s7017_s16 + $0x540] sm:$0xff] %vm5389_vm2, %v3671_v40  ;;  %5814 = vst.msk [vmem:[%s7017_s16 + $0xd40] sm:$0xff] %vm5389_vm2, %v4951_v41  ;;  %v627_v41 = vld [vmem:[%s6619_s29 + $0xe40] sm:$0xff] }
 0x3a8   : > { %v3675_v48 = vpop.f32.mrb[82].mxu0  ;;  %v4955_v49 = vpop.f32.mrb[82].mxu1 }
 0x3a9   : > { %v3676_v50 = vadd.f32 %v8962_v22, %v3675_v48  ;;  %v4956_v51 = vadd.f32 %v8962_v22, %v4955_v49  ;;  %v3677_v52 = vpop.f32.mrb[83].mxu0  ;;  %3939 = vmatmul.mubr.f32.gmra.mrb[188].mxu0 %v615_v44  ;;  %v4957_v53 = vpop.f32.mrb[83].mxu1  ;;  %5219 = vmatmul.mubr.f32.gmra.mrb[188].mxu1 %v1127_v45  ;;  %v1142_v44 = vld [vmem:[%s6619_s29 + $0x1e58] sm:$0xff] }
 0x3aa   : > { %6191 = vmatprep.mubr.msk.f32.mxu0 %vm1223_vm0, %v618_v46  ;;  %6447 = vmatprep.mubr.msk.f32.mxu1 %vm1223_vm0, %v1130_v47  ;;  %v1141_v52 = vld [vmem:[%s6619_s29 + $0x1e50] sm:$0xff]  ;;  %v632_v53 = vld [vmem:[%s6619_s29 + $0xe68] sm:$0xff] }
 0x3ab   : > { %5559 = vst.msk [vmem:[%s7017_s16 + $0x548] sm:$0xff] %vm5389_vm2, %v3676_v50  ;;  %5815 = vst.msk [vmem:[%s7017_s16 + $0xd48] sm:$0xff] %vm5389_vm2, %v4956_v51  ;;  %v629_v51 = vld [vmem:[%s6619_s29 + $0xe50] sm:$0xff] }
 0x3ac   : > { %v3680_v59 = vpop.f32.mrb[84].mxu0  ;;  %v4960_v60 = vpop.f32.mrb[84].mxu1 }
 0x3ad   : > { %v3681_v61 = vadd.f32 %v8962_v22, %v3680_v59  ;;  %v4961_v62 = vadd.f32 %v8962_v22, %v4960_v60  ;;  %v3682_v63 = vpop.f32.mrb[85].mxu0  ;;  %3944 = vmatmul.mubr.f32.gmra.mrb[190].mxu0 %v617_v54  ;;  %v4962_v55 = vpop.f32.mrb[85].mxu1  ;;  %5224 = vmatmul.mubr.f32.gmra.mrb[190].mxu1 %v1129_v56  ;;  %v1144_v54 = vld [vmem:[%s6619_s29 + $0x1e68] sm:$0xff] }
 0x3ae   : > { %6192 = vmatprep.mubr.msk.f32.mxu0 %vm1223_vm0, %v620_v57  ;;  %6448 = vmatprep.mubr.msk.f32.mxu1 %vm1223_vm0, %v1132_v58  ;;  %v1143_v63 = vld [vmem:[%s6619_s29 + $0x1e60] sm:$0xff]  ;;  %v634_v55 = vld [vmem:[%s6619_s29 + $0xe78] sm:$0xff] }
 0x3af   : > { %5560 = vst.msk [vmem:[%s7017_s16 + $0x550] sm:$0xff] %vm5389_vm2, %v3681_v61  ;;  %5816 = vst.msk [vmem:[%s7017_s16 + $0xd50] sm:$0xff] %vm5389_vm2, %v4961_v62  ;;  %v631_v62 = vld [vmem:[%s6619_s29 + $0xe60] sm:$0xff] }
 0x3b0   : > { %v3685_v2 = vpop.f32.mrb[86].mxu0  ;;  %v4965_v5 = vpop.f32.mrb[86].mxu1 }
 0x3b1   : > { %v3686_v6 = vadd.f32 %v8962_v22, %v3685_v2  ;;  %v4966_v8 = vadd.f32 %v8962_v22, %v4965_v5  ;;  %v3687_v9 = vpop.f32.mrb[87].mxu0  ;;  %3949 = vmatmul.mubr.f32.gmra.mrb[192].mxu0 %v619_v0  ;;  %v4967_v7 = vpop.f32.mrb[87].mxu1  ;;  %5229 = vmatmul.mubr.f32.gmra.mrb[192].mxu1 %v1131_v1  ;;  %v1146_v0 = vld [vmem:[%s6619_s29 + $0x1e78] sm:$0xff] }
 0x3b2   : > { %6193 = vmatprep.mubr.msk.f32.mxu0 %vm1223_vm0, %v622_v3  ;;  %6449 = vmatprep.mubr.msk.f32.mxu1 %vm1223_vm0, %v1134_v4  ;;  %v1145_v9 = vld [vmem:[%s6619_s29 + $0x1e70] sm:$0xff]  ;;  %v636_v7 = vld [vmem:[%s6619_s29 + $0xe88] sm:$0xff] }
 0x3b3   : > { %5561 = vst.msk [vmem:[%s7017_s16 + $0x558] sm:$0xff] %vm5389_vm2, %v3686_v6  ;;  %5817 = vst.msk [vmem:[%s7017_s16 + $0xd58] sm:$0xff] %vm5389_vm2, %v4966_v8  ;;  %v633_v8 = vld [vmem:[%s6619_s29 + $0xe70] sm:$0xff] }
 0x3b4   : > { %v3690_v12 = vpop.f32.mrb[88].mxu0  ;;  %v4970_v15 = vpop.f32.mrb[88].mxu1 }
 0x3b5   : > { %v3691_v16 = vadd.f32 %v8962_v22, %v3690_v12  ;;  %v4971_v18 = vadd.f32 %v8962_v22, %v4970_v15  ;;  %v3692_v19 = vpop.f32.mrb[89].mxu0  ;;  %3954 = vmatmul.mubr.f32.gmra.mrb[194].mxu0 %v621_v10  ;;  %v4972_v17 = vpop.f32.mrb[89].mxu1  ;;  %5234 = vmatmul.mubr.f32.gmra.mrb[194].mxu1 %v1133_v11  ;;  %v1148_v10 = vld [vmem:[%s6619_s29 + $0x1e88] sm:$0xff] }
 0x3b6   : > { %6194 = vmatprep.mubr.msk.f32.mxu0 %vm1223_vm0, %v624_v13  ;;  %6450 = vmatprep.mubr.msk.f32.mxu1 %vm1223_vm0, %v1136_v14  ;;  %v1147_v19 = vld [vmem:[%s6619_s29 + $0x1e80] sm:$0xff]  ;;  %v638_v17 = vld [vmem:[%s6619_s29 + $0xe98] sm:$0xff] }
 0x3b7   : > { %5562 = vst.msk [vmem:[%s7017_s16 + $0x560] sm:$0xff] %vm5389_vm2, %v3691_v16  ;;  %5818 = vst.msk [vmem:[%s7017_s16 + $0xd60] sm:$0xff] %vm5389_vm2, %v4971_v18  ;;  %v635_v18 = vld [vmem:[%s6619_s29 + $0xe80] sm:$0xff] }
 0x3b8   : > { %v3695_v25 = vpop.f32.mrb[90].mxu0  ;;  %v4975_v26 = vpop.f32.mrb[90].mxu1 }
 0x3b9   : > { %v3696_v27 = vadd.f32 %v8962_v22, %v3695_v25  ;;  %v4976_v28 = vadd.f32 %v8962_v22, %v4975_v26  ;;  %v3697_v29 = vpop.f32.mrb[91].mxu0  ;;  %3959 = vmatmul.mubr.f32.gmra.mrb[196].mxu0 %v623_v20  ;;  %v4977_v30 = vpop.f32.mrb[91].mxu1  ;;  %5239 = vmatmul.mubr.f32.gmra.mrb[196].mxu1 %v1135_v21  ;;  %v1150_v20 = vld [vmem:[%s6619_s29 + $0x1e98] sm:$0xff] }
 0x3ba   : > { %6195 = vmatprep.mubr.msk.f32.mxu0 %vm1223_vm0, %v626_v23  ;;  %6451 = vmatprep.mubr.msk.f32.mxu1 %vm1223_vm0, %v1138_v24  ;;  %v1149_v29 = vld [vmem:[%s6619_s29 + $0x1e90] sm:$0xff]  ;;  %v640_v30 = vld [vmem:[%s6619_s29 + $0xea8] sm:$0xff] }
 0x3bb   : > { %5563 = vst.msk [vmem:[%s7017_s16 + $0x568] sm:$0xff] %vm5389_vm2, %v3696_v27  ;;  %5819 = vst.msk [vmem:[%s7017_s16 + $0xd68] sm:$0xff] %vm5389_vm2, %v4976_v28  ;;  %v637_v28 = vld [vmem:[%s6619_s29 + $0xe90] sm:$0xff] }
 0x3bc   : > { %v3700_v35 = vpop.f32.mrb[92].mxu0  ;;  %v4980_v36 = vpop.f32.mrb[92].mxu1 }
 0x3bd   : > { %v3701_v37 = vadd.f32 %v8962_v22, %v3700_v35  ;;  %v4981_v38 = vadd.f32 %v8962_v22, %v4980_v36  ;;  %v3702_v39 = vpop.f32.mrb[93].mxu0  ;;  %3964 = vmatmul.mubr.f32.gmra.mrb[198].mxu0 %v625_v31  ;;  %v4982_v40 = vpop.f32.mrb[93].mxu1  ;;  %5244 = vmatmul.mubr.f32.gmra.mrb[198].mxu1 %v1137_v32  ;;  %v1152_v31 = vld [vmem:[%s6619_s29 + $0x1ea8] sm:$0xff] }
 0x3be   : > { %6196 = vmatprep.mubr.msk.f32.mxu0 %vm1223_vm0, %v628_v33  ;;  %6452 = vmatprep.mubr.msk.f32.mxu1 %vm1223_vm0, %v1140_v34  ;;  %v1151_v39 = vld [vmem:[%s6619_s29 + $0x1ea0] sm:$0xff]  ;;  %v642_v40 = vld [vmem:[%s6619_s29 + $0xeb8] sm:$0xff] }
 0x3bf   : > { %5564 = vst.msk [vmem:[%s7017_s16 + $0x570] sm:$0xff] %vm5389_vm2, %v3701_v37  ;;  %5820 = vst.msk [vmem:[%s7017_s16 + $0xd70] sm:$0xff] %vm5389_vm2, %v4981_v38  ;;  %v639_v38 = vld [vmem:[%s6619_s29 + $0xea0] sm:$0xff] }
 0x3c0   : > { %v3705_v45 = vpop.f32.mrb[94].mxu0  ;;  %v4985_v46 = vpop.f32.mrb[94].mxu1 }
 0x3c1   : > { %v3706_v47 = vadd.f32 %v8962_v22, %v3705_v45  ;;  %v4986_v48 = vadd.f32 %v8962_v22, %v4985_v46  ;;  %v3707_v49 = vpop.f32.mrb[95].mxu0  ;;  %3969 = vmatmul.mubr.f32.gmra.mrb[200].mxu0 %v627_v41  ;;  %v4987_v50 = vpop.f32.mrb[95].mxu1  ;;  %5249 = vmatmul.mubr.f32.gmra.mrb[200].mxu1 %v1139_v42  ;;  %v1154_v41 = vld [vmem:[%s6619_s29 + $0x1eb8] sm:$0xff] }
 0x3c2   : > { %6197 = vmatprep.mubr.msk.f32.mxu0 %vm1223_vm0, %v630_v43  ;;  %6453 = vmatprep.mubr.msk.f32.mxu1 %vm1223_vm0, %v1142_v44  ;;  %v1153_v49 = vld [vmem:[%s6619_s29 + $0x1eb0] sm:$0xff]  ;;  %v644_v50 = vld [vmem:[%s6619_s29 + $0xec8] sm:$0xff] }
 0x3c3   : > { %5565 = vst.msk [vmem:[%s7017_s16 + $0x578] sm:$0xff] %vm5389_vm2, %v3706_v47  ;;  %5821 = vst.msk [vmem:[%s7017_s16 + $0xd78] sm:$0xff] %vm5389_vm2, %v4986_v48  ;;  %v641_v48 = vld [vmem:[%s6619_s29 + $0xeb0] sm:$0xff] }
 0x3c4   : > { %v3710_v56 = vpop.f32.mrb[96].mxu0  ;;  %v4990_v57 = vpop.f32.mrb[96].mxu1 }
 0x3c5   : > { %v3711_v58 = vadd.f32 %v8962_v22, %v3710_v56  ;;  %v4991_v59 = vadd.f32 %v8962_v22, %v4990_v57  ;;  %v3712_v60 = vpop.f32.mrb[97].mxu0  ;;  %3974 = vmatmul.mubr.f32.gmra.mrb[202].mxu0 %v629_v51  ;;  %v4992_v61 = vpop.f32.mrb[97].mxu1  ;;  %5254 = vmatmul.mubr.f32.gmra.mrb[202].mxu1 %v1141_v52  ;;  %v1156_v51 = vld [vmem:[%s6619_s29 + $0x1ec8] sm:$0xff] }
 0x3c6   : > { %6198 = vmatprep.mubr.msk.f32.mxu0 %vm1223_vm0, %v632_v53  ;;  %6454 = vmatprep.mubr.msk.f32.mxu1 %vm1223_vm0, %v1144_v54  ;;  %v1155_v60 = vld [vmem:[%s6619_s29 + $0x1ec0] sm:$0xff]  ;;  %v646_v61 = vld [vmem:[%s6619_s29 + $0xed8] sm:$0xff] }
 0x3c7   : > { %5566 = vst.msk [vmem:[%s7017_s16 + $0x580] sm:$0xff] %vm5389_vm2, %v3711_v58  ;;  %5822 = vst.msk [vmem:[%s7017_s16 + $0xd80] sm:$0xff] %vm5389_vm2, %v4991_v59  ;;  %v643_v59 = vld [vmem:[%s6619_s29 + $0xec0] sm:$0xff] }
 0x3c8   : > { %v3715_v1 = vpop.f32.mrb[98].mxu0  ;;  %v4995_v3 = vpop.f32.mrb[98].mxu1 }
 0x3c9   : > { %v3716_v4 = vadd.f32 %v8962_v22, %v3715_v1  ;;  %v4996_v2 = vadd.f32 %v8962_v22, %v4995_v3  ;;  %v3717_v5 = vpop.f32.mrb[99].mxu0  ;;  %3979 = vmatmul.mubr.f32.gmra.mrb[204].mxu0 %v631_v62  ;;  %v4997_v6 = vpop.f32.mrb[99].mxu1  ;;  %5259 = vmatmul.mubr.f32.gmra.mrb[204].mxu1 %v1143_v63  ;;  %v1158_v62 = vld [vmem:[%s6619_s29 + $0x1ed8] sm:$0xff] }
 0x3ca   : > { %6199 = vmatprep.mubr.msk.f32.mxu0 %vm1223_vm0, %v634_v55  ;;  %6455 = vmatprep.mubr.msk.f32.mxu1 %vm1223_vm0, %v1146_v0  ;;  %v1157_v5 = vld [vmem:[%s6619_s29 + $0x1ed0] sm:$0xff]  ;;  %v648_v6 = vld [vmem:[%s6619_s29 + $0xee8] sm:$0xff] }
 0x3cb   : > { %5567 = vst.msk [vmem:[%s7017_s16 + $0x588] sm:$0xff] %vm5389_vm2, %v3716_v4  ;;  %5823 = vst.msk [vmem:[%s7017_s16 + $0xd88] sm:$0xff] %vm5389_vm2, %v4996_v2  ;;  %v645_v2 = vld [vmem:[%s6619_s29 + $0xed0] sm:$0xff] }
 0x3cc   : > { %v3720_v11 = vpop.f32.mrb[100].mxu0  ;;  %v5000_v13 = vpop.f32.mrb[100].mxu1 }
 0x3cd   : > { %v3721_v14 = vadd.f32 %v8962_v22, %v3720_v11  ;;  %v5001_v12 = vadd.f32 %v8962_v22, %v5000_v13  ;;  %v3722_v15 = vpop.f32.mrb[101].mxu0  ;;  %3984 = vmatmul.mubr.f32.gmra.mrb[206].mxu0 %v633_v8  ;;  %v5002_v16 = vpop.f32.mrb[101].mxu1  ;;  %5264 = vmatmul.mubr.f32.gmra.mrb[206].mxu1 %v1145_v9  ;;  %v1160_v8 = vld [vmem:[%s6619_s29 + $0x1ee8] sm:$0xff] }
 0x3ce   : > { %6200 = vmatprep.mubr.msk.f32.mxu0 %vm1223_vm0, %v636_v7  ;;  %6456 = vmatprep.mubr.msk.f32.mxu1 %vm1223_vm0, %v1148_v10  ;;  %v1159_v15 = vld [vmem:[%s6619_s29 + $0x1ee0] sm:$0xff]  ;;  %v650_v16 = vld [vmem:[%s6619_s29 + $0xef8] sm:$0xff] }
 0x3cf   : > { %5568 = vst.msk [vmem:[%s7017_s16 + $0x590] sm:$0xff] %vm5389_vm2, %v3721_v14  ;;  %5824 = vst.msk [vmem:[%s7017_s16 + $0xd90] sm:$0xff] %vm5389_vm2, %v5001_v12  ;;  %v647_v12 = vld [vmem:[%s6619_s29 + $0xee0] sm:$0xff] }
 0x3d0   : > { %v3725_v21 = vpop.f32.mrb[102].mxu0  ;;  %v5005_v23 = vpop.f32.mrb[102].mxu1 }
 0x3d1   : > { %v3726_v24 = vadd.f32 %v8962_v22, %v3725_v21  ;;  %v5006_v25 = vadd.f32 %v8962_v22, %v5005_v23  ;;  %v3727_v26 = vpop.f32.mrb[103].mxu0  ;;  %3989 = vmatmul.mubr.f32.gmra.mrb[208].mxu0 %v635_v18  ;;  %v5007_v27 = vpop.f32.mrb[103].mxu1  ;;  %5269 = vmatmul.mubr.f32.gmra.mrb[208].mxu1 %v1147_v19  ;;  %v1162_v18 = vld [vmem:[%s6619_s29 + $0x1ef8] sm:$0xff] }
 0x3d2   : > { %6201 = vmatprep.mubr.msk.f32.mxu0 %vm1223_vm0, %v638_v17  ;;  %6457 = vmatprep.mubr.msk.f32.mxu1 %vm1223_vm0, %v1150_v20  ;;  %v1161_v26 = vld [vmem:[%s6619_s29 + $0x1ef0] sm:$0xff]  ;;  %v652_v27 = vld [vmem:[%s6619_s29 + $0xf08] sm:$0xff] }
 0x3d3   : > { %5569 = vst.msk [vmem:[%s7017_s16 + $0x598] sm:$0xff] %vm5389_vm2, %v3726_v24  ;;  %5825 = vst.msk [vmem:[%s7017_s16 + $0xd98] sm:$0xff] %vm5389_vm2, %v5006_v25  ;;  %v649_v25 = vld [vmem:[%s6619_s29 + $0xef0] sm:$0xff] }
 0x3d4   : > { %v3730_v32 = vpop.f32.mrb[104].mxu0  ;;  %v5010_v33 = vpop.f32.mrb[104].mxu1 }
 0x3d5   : > { %v3731_v34 = vadd.f32 %v8962_v22, %v3730_v32  ;;  %v5011_v35 = vadd.f32 %v8962_v22, %v5010_v33  ;;  %v3732_v36 = vpop.f32.mrb[105].mxu0  ;;  %3994 = vmatmul.mubr.f32.gmra.mrb[210].mxu0 %v637_v28  ;;  %v5012_v37 = vpop.f32.mrb[105].mxu1  ;;  %5274 = vmatmul.mubr.f32.gmra.mrb[210].mxu1 %v1149_v29  ;;  %v1164_v28 = vld [vmem:[%s6619_s29 + $0x1f08] sm:$0xff] }
 0x3d6   : > { %6202 = vmatprep.mubr.msk.f32.mxu0 %vm1223_vm0, %v640_v30  ;;  %6458 = vmatprep.mubr.msk.f32.mxu1 %vm1223_vm0, %v1152_v31  ;;  %v1163_v36 = vld [vmem:[%s6619_s29 + $0x1f00] sm:$0xff]  ;;  %v654_v37 = vld [vmem:[%s6619_s29 + $0xf18] sm:$0xff] }
 0x3d7   : > { %5570 = vst.msk [vmem:[%s7017_s16 + $0x5a0] sm:$0xff] %vm5389_vm2, %v3731_v34  ;;  %5826 = vst.msk [vmem:[%s7017_s16 + $0xda0] sm:$0xff] %vm5389_vm2, %v5011_v35  ;;  %v651_v35 = vld [vmem:[%s6619_s29 + $0xf00] sm:$0xff] }
 0x3d8   : > { %v3735_v42 = vpop.f32.mrb[106].mxu0  ;;  %v5015_v43 = vpop.f32.mrb[106].mxu1 }
 0x3d9   : > { %v3736_v44 = vadd.f32 %v8962_v22, %v3735_v42  ;;  %v5016_v45 = vadd.f32 %v8962_v22, %v5015_v43  ;;  %v3737_v46 = vpop.f32.mrb[107].mxu0  ;;  %3999 = vmatmul.mubr.f32.gmra.mrb[212].mxu0 %v639_v38  ;;  %v5017_v47 = vpop.f32.mrb[107].mxu1  ;;  %5279 = vmatmul.mubr.f32.gmra.mrb[212].mxu1 %v1151_v39  ;;  %v1166_v38 = vld [vmem:[%s6619_s29 + $0x1f18] sm:$0xff] }
 0x3da   : > { %6203 = vmatprep.mubr.msk.f32.mxu0 %vm1223_vm0, %v642_v40  ;;  %6459 = vmatprep.mubr.msk.f32.mxu1 %vm1223_vm0, %v1154_v41  ;;  %v1165_v46 = vld [vmem:[%s6619_s29 + $0x1f10] sm:$0xff]  ;;  %v656_v47 = vld [vmem:[%s6619_s29 + $0xf28] sm:$0xff] }
 0x3db   : > { %5571 = vst.msk [vmem:[%s7017_s16 + $0x5a8] sm:$0xff] %vm5389_vm2, %v3736_v44  ;;  %5827 = vst.msk [vmem:[%s7017_s16 + $0xda8] sm:$0xff] %vm5389_vm2, %v5016_v45  ;;  %v653_v45 = vld [vmem:[%s6619_s29 + $0xf10] sm:$0xff] }
 0x3dc   : > { %v3740_v52 = vpop.f32.mrb[108].mxu0  ;;  %v5020_v53 = vpop.f32.mrb[108].mxu1 }
 0x3dd   : > { %v3741_v54 = vadd.f32 %v8962_v22, %v3740_v52  ;;  %v5021_v56 = vadd.f32 %v8962_v22, %v5020_v53  ;;  %v3742_v57 = vpop.f32.mrb[109].mxu0  ;;  %4004 = vmatmul.mubr.f32.gmra.mrb[214].mxu0 %v641_v48  ;;  %v5022_v58 = vpop.f32.mrb[109].mxu1  ;;  %5284 = vmatmul.mubr.f32.gmra.mrb[214].mxu1 %v1153_v49  ;;  %v1168_v48 = vld [vmem:[%s6619_s29 + $0x1f28] sm:$0xff] }
 0x3de   : > { %6204 = vmatprep.mubr.msk.f32.mxu0 %vm1223_vm0, %v644_v50  ;;  %6460 = vmatprep.mubr.msk.f32.mxu1 %vm1223_vm0, %v1156_v51  ;;  %v1167_v57 = vld [vmem:[%s6619_s29 + $0x1f20] sm:$0xff]  ;;  %v658_v58 = vld [vmem:[%s6619_s29 + $0xf38] sm:$0xff] }
 0x3df   : > { %5572 = vst.msk [vmem:[%s7017_s16 + $0x5b0] sm:$0xff] %vm5389_vm2, %v3741_v54  ;;  %5828 = vst.msk [vmem:[%s7017_s16 + $0xdb0] sm:$0xff] %vm5389_vm2, %v5021_v56  ;;  %v655_v56 = vld [vmem:[%s6619_s29 + $0xf20] sm:$0xff] }
 0x3e0   : > { %v3745_v63 = vpop.f32.mrb[110].mxu0  ;;  %v5025_v55 = vpop.f32.mrb[110].mxu1 }
 0x3e1   : > { %v3746_v0 = vadd.f32 %v8962_v22, %v3745_v63  ;;  %v5026_v1 = vadd.f32 %v8962_v22, %v5025_v55  ;;  %v3747_v3 = vpop.f32.mrb[111].mxu0  ;;  %4009 = vmatmul.mubr.f32.gmra.mrb[216].mxu0 %v643_v59  ;;  %v5027_v4 = vpop.f32.mrb[111].mxu1  ;;  %5289 = vmatmul.mubr.f32.gmra.mrb[216].mxu1 %v1155_v60  ;;  %v1170_v59 = vld [vmem:[%s6619_s29 + $0x1f38] sm:$0xff] }
 0x3e2   : > { %6205 = vmatprep.mubr.msk.f32.mxu0 %vm1223_vm0, %v646_v61  ;;  %6461 = vmatprep.mubr.msk.f32.mxu1 %vm1223_vm0, %v1158_v62  ;;  %v1169_v3 = vld [vmem:[%s6619_s29 + $0x1f30] sm:$0xff]  ;;  %v660_v4 = vld [vmem:[%s6619_s29 + $0xf48] sm:$0xff] }
 0x3e3   : > { %5573 = vst.msk [vmem:[%s7017_s16 + $0x5b8] sm:$0xff] %vm5389_vm2, %v3746_v0  ;;  %5829 = vst.msk [vmem:[%s7017_s16 + $0xdb8] sm:$0xff] %vm5389_vm2, %v5026_v1  ;;  %v657_v1 = vld [vmem:[%s6619_s29 + $0xf30] sm:$0xff] }
 0x3e4   : > { %v3750_v9 = vpop.f32.mrb[112].mxu0  ;;  %v5030_v7 = vpop.f32.mrb[112].mxu1 }
 0x3e5   : > { %v3751_v10 = vadd.f32 %v8962_v22, %v3750_v9  ;;  %v5031_v11 = vadd.f32 %v8962_v22, %v5030_v7  ;;  %v3752_v13 = vpop.f32.mrb[113].mxu0  ;;  %4014 = vmatmul.mubr.f32.gmra.mrb[218].mxu0 %v645_v2  ;;  %v5032_v14 = vpop.f32.mrb[113].mxu1  ;;  %5294 = vmatmul.mubr.f32.gmra.mrb[218].mxu1 %v1157_v5  ;;  %v1172_v2 = vld [vmem:[%s6619_s29 + $0x1f48] sm:$0xff] }
 0x3e6   : > { %6206 = vmatprep.mubr.msk.f32.mxu0 %vm1223_vm0, %v648_v6  ;;  %6462 = vmatprep.mubr.msk.f32.mxu1 %vm1223_vm0, %v1160_v8  ;;  %v1171_v13 = vld [vmem:[%s6619_s29 + $0x1f40] sm:$0xff]  ;;  %v662_v14 = vld [vmem:[%s6619_s29 + $0xf58] sm:$0xff] }
 0x3e7   : > { %5574 = vst.msk [vmem:[%s7017_s16 + $0x5c0] sm:$0xff] %vm5389_vm2, %v3751_v10  ;;  %5830 = vst.msk [vmem:[%s7017_s16 + $0xdc0] sm:$0xff] %vm5389_vm2, %v5031_v11  ;;  %v659_v11 = vld [vmem:[%s6619_s29 + $0xf40] sm:$0xff] }
 0x3e8   : > { %v3755_v19 = vpop.f32.mrb[114].mxu0  ;;  %v5035_v17 = vpop.f32.mrb[114].mxu1 }
 0x3e9   : > { %v3756_v20 = vadd.f32 %v8962_v22, %v3755_v19  ;;  %v5036_v21 = vadd.f32 %v8962_v22, %v5035_v17  ;;  %v3757_v23 = vpop.f32.mrb[115].mxu0  ;;  %4019 = vmatmul.mubr.f32.gmra.mrb[220].mxu0 %v647_v12  ;;  %v5037_v24 = vpop.f32.mrb[115].mxu1  ;;  %5299 = vmatmul.mubr.f32.gmra.mrb[220].mxu1 %v1159_v15  ;;  %v1174_v12 = vld [vmem:[%s6619_s29 + $0x1f58] sm:$0xff] }
 0x3ea   : > { %6207 = vmatprep.mubr.msk.f32.mxu0 %vm1223_vm0, %v650_v16  ;;  %6463 = vmatprep.mubr.msk.f32.mxu1 %vm1223_vm0, %v1162_v18  ;;  %v1173_v23 = vld [vmem:[%s6619_s29 + $0x1f50] sm:$0xff]  ;;  %v664_v24 = vld [vmem:[%s6619_s29 + $0xf68] sm:$0xff] }
 0x3eb   : > { %5575 = vst.msk [vmem:[%s7017_s16 + $0x5c8] sm:$0xff] %vm5389_vm2, %v3756_v20  ;;  %5831 = vst.msk [vmem:[%s7017_s16 + $0xdc8] sm:$0xff] %vm5389_vm2, %v5036_v21  ;;  %v661_v21 = vld [vmem:[%s6619_s29 + $0xf50] sm:$0xff] }
 0x3ec   : > { %v3760_v29 = vpop.f32.mrb[116].mxu0  ;;  %v5040_v30 = vpop.f32.mrb[116].mxu1 }
 0x3ed   : > { %v3761_v31 = vadd.f32 %v8962_v22, %v3760_v29  ;;  %v5041_v32 = vadd.f32 %v8962_v22, %v5040_v30  ;;  %v3762_v33 = vpop.f32.mrb[117].mxu0  ;;  %4024 = vmatmul.mubr.f32.gmra.mrb[222].mxu0 %v649_v25  ;;  %v5042_v34 = vpop.f32.mrb[117].mxu1  ;;  %5304 = vmatmul.mubr.f32.gmra.mrb[222].mxu1 %v1161_v26 }
 0x3ee   : > { %6208 = vmatprep.mubr.msk.f32.mxu0 %vm1223_vm0, %v652_v27  ;;  %6464 = vmatprep.mubr.msk.f32.mxu1 %vm1223_vm0, %v1164_v28  ;;  %v9351_v27 = vld [vmem:[%s9805_s2] ss:$0 sm:$0xff]  ;;  %v666_v34 = vld [vmem:[%s6619_s29 + $0xf78] sm:$0xff] }
 0x3ef   : > { %5576 = vst.msk [vmem:[%s7017_s16 + $0x5d0] sm:$0xff] %vm5389_vm2, %v3761_v31  ;;  %5832 = vst.msk [vmem:[%s7017_s16 + $0xdd0] sm:$0xff] %vm5389_vm2, %v5041_v32  ;;  %v663_v32 = vld [vmem:[%s6619_s29 + $0xf60] sm:$0xff] }
 0x3f0   : > { %v3765_v39 = vpop.f32.mrb[118].mxu0  ;;  %v5045_v40 = vpop.f32.mrb[118].mxu1  ;;  %v1175_v33 = vld [vmem:[%s6619_s29 + $0x1f60] sm:$0xff] }
 0x3f1   : > { %v3766_v41 = vadd.f32 %v8962_v22, %v3765_v39  ;;  %v5046_v42 = vadd.f32 %v8962_v22, %v5045_v40  ;;  %v3767_v43 = vpop.f32.mrb[119].mxu0  ;;  %4029 = vmatmul.mubr.f32.gmra.mrb[224].mxu0 %v651_v35  ;;  %v5047_v44 = vpop.f32.mrb[119].mxu1  ;;  %5309 = vmatmul.mubr.f32.gmra.mrb[224].mxu1 %v1163_v36  ;;  %v1178_v35 = vld [vmem:[%s6619_s29 + $0x1f78] sm:$0xff] }
 0x3f2   : > { %6209 = vmatprep.mubr.msk.f32.mxu0 %vm1223_vm0, %v654_v37  ;;  %6465 = vmatprep.mubr.msk.f32.mxu1 %vm1223_vm0, %v1166_v38  ;;  %v1177_v43 = vld [vmem:[%s6619_s29 + $0x1f70] sm:$0xff]  ;;  %v668_v44 = vld [vmem:[%s6619_s29 + $0xf88] sm:$0xff] }
 0x3f3   : > { %5577 = vst.msk [vmem:[%s7017_s16 + $0x5d8] sm:$0xff] %vm5389_vm2, %v3766_v41  ;;  %5833 = vst.msk [vmem:[%s7017_s16 + $0xdd8] sm:$0xff] %vm5389_vm2, %v5046_v42  ;;  %v665_v42 = vld [vmem:[%s6619_s29 + $0xf70] sm:$0xff] }
 0x3f4   : > { %v3770_v49 = vpop.f32.mrb[120].mxu0  ;;  %v5050_v50 = vpop.f32.mrb[120].mxu1 }
 0x3f5   : > { %v3771_v51 = vadd.f32 %v8962_v22, %v3770_v49  ;;  %v5051_v52 = vadd.f32 %v8962_v22, %v5050_v50  ;;  %v3772_v53 = vpop.f32.mrb[121].mxu0  ;;  %4034 = vmatmul.mubr.f32.gmra.mrb[226].mxu0 %v653_v45  ;;  %v5052_v54 = vpop.f32.mrb[121].mxu1  ;;  %5314 = vmatmul.mubr.f32.gmra.mrb[226].mxu1 %v1165_v46  ;;  %v1180_v45 = vld [vmem:[%s6619_s29 + $0x1f88] sm:$0xff] }
 0x3f6   : > { %6210 = vmatprep.mubr.msk.f32.mxu0 %vm1223_vm0, %v656_v47  ;;  %6466 = vmatprep.mubr.msk.f32.mxu1 %vm1223_vm0, %v1168_v48  ;;  %v1179_v53 = vld [vmem:[%s6619_s29 + $0x1f80] sm:$0xff]  ;;  %v670_v54 = vld [vmem:[%s6619_s29 + $0xf98] sm:$0xff] }
 0x3f7   : > { %5578 = vst.msk [vmem:[%s7017_s16 + $0x5e0] sm:$0xff] %vm5389_vm2, %v3771_v51  ;;  %5834 = vst.msk [vmem:[%s7017_s16 + $0xde0] sm:$0xff] %vm5389_vm2, %v5051_v52  ;;  %v667_v52 = vld [vmem:[%s6619_s29 + $0xf80] sm:$0xff] }
 0x3f8   : > { %v3775_v60 = vpop.f32.mrb[122].mxu0  ;;  %v5055_v61 = vpop.f32.mrb[122].mxu1 }
 0x3f9   : > { %v3776_v62 = vadd.f32 %v8962_v22, %v3775_v60  ;;  %v5056_v63 = vadd.f32 %v8962_v22, %v5055_v61  ;;  %v3777_v55 = vpop.f32.mrb[123].mxu0  ;;  %4039 = vmatmul.mubr.f32.gmra.mrb[228].mxu0 %v655_v56  ;;  %v5057_v0 = vpop.f32.mrb[123].mxu1  ;;  %5319 = vmatmul.mubr.f32.gmra.mrb[228].mxu1 %v1167_v57  ;;  %v1182_v56 = vld [vmem:[%s6619_s29 + $0x1f98] sm:$0xff] }
 0x3fa   : > { %6211 = vmatprep.mubr.msk.f32.mxu0 %vm1223_vm0, %v658_v58  ;;  %6467 = vmatprep.mubr.msk.f32.mxu1 %vm1223_vm0, %v1170_v59  ;;  %v1181_v55 = vld [vmem:[%s6619_s29 + $0x1f90] sm:$0xff]  ;;  %v672_v0 = vld [vmem:[%s6619_s29 + $0xfa8] sm:$0xff] }
 0x3fb   : > { %5579 = vst.msk [vmem:[%s7017_s16 + $0x5e8] sm:$0xff] %vm5389_vm2, %v3776_v62  ;;  %5835 = vst.msk [vmem:[%s7017_s16 + $0xde8] sm:$0xff] %vm5389_vm2, %v5056_v63  ;;  %v669_v63 = vld [vmem:[%s6619_s29 + $0xf90] sm:$0xff] }
 0x3fc   : > { %v3780_v5 = vpop.f32.mrb[124].mxu0  ;;  %v5060_v6 = vpop.f32.mrb[124].mxu1 }
 0x3fd   : > { %v3781_v8 = vadd.f32 %v8962_v22, %v3780_v5  ;;  %v5061_v9 = vadd.f32 %v8962_v22, %v5060_v6  ;;  %v3782_v7 = vpop.f32.mrb[125].mxu0  ;;  %4044 = vmatmul.mubr.f32.gmra.mrb[230].mxu0 %v657_v1  ;;  %v5062_v10 = vpop.f32.mrb[125].mxu1  ;;  %5324 = vmatmul.mubr.f32.gmra.mrb[230].mxu1 %v1169_v3  ;;  %v1184_v1 = vld [vmem:[%s6619_s29 + $0x1fa8] sm:$0xff] }
 0x3fe   : > { %6212 = vmatprep.mubr.msk.f32.mxu0 %vm1223_vm0, %v660_v4  ;;  %6468 = vmatprep.mubr.msk.f32.mxu1 %vm1223_vm0, %v1172_v2  ;;  %v1183_v7 = vld [vmem:[%s6619_s29 + $0x1fa0] sm:$0xff]  ;;  %v674_v10 = vld [vmem:[%s6619_s29 + $0xfb8] sm:$0xff] }
 0x3ff   : > { %5580 = vst.msk [vmem:[%s7017_s16 + $0x5f0] sm:$0xff] %vm5389_vm2, %v3781_v8  ;;  %5836 = vst.msk [vmem:[%s7017_s16 + $0xdf0] sm:$0xff] %vm5389_vm2, %v5061_v9  ;;  %v671_v9 = vld [vmem:[%s6619_s29 + $0xfa0] sm:$0xff] }
 0x400   : > { %v3785_v15 = vpop.f32.mrb[126].mxu0  ;;  %v5065_v16 = vpop.f32.mrb[126].mxu1 }
 0x401   : > { %v3786_v18 = vadd.f32 %v8962_v22, %v3785_v15  ;;  %v5066_v19 = vadd.f32 %v8962_v22, %v5065_v16  ;;  %v3787_v17 = vpop.f32.mrb[127].mxu0  ;;  %4049 = vmatmul.mubr.f32.gmra.mrb[232].mxu0 %v659_v11  ;;  %v5067_v20 = vpop.f32.mrb[127].mxu1  ;;  %5329 = vmatmul.mubr.f32.gmra.mrb[232].mxu1 %v1171_v13  ;;  %v1176_v22 = vld [vmem:[%s6619_s29 + $0x1f68] sm:$0xff]  ;;  %v1186_v11 = vld [vmem:[%s6619_s29 + $0x1fb8] sm:$0xff] }
 0x402   : > { %6213 = vmatprep.mubr.msk.f32.mxu0 %vm1223_vm0, %v662_v14  ;;  %6469 = vmatprep.mubr.msk.f32.mxu1 %vm1223_vm0, %v1174_v12  ;;  %v1185_v17 = vld [vmem:[%s6619_s29 + $0x1fb0] sm:$0xff]  ;;  %v676_v20 = vld [vmem:[%s6619_s29 + $0xfc8] sm:$0xff] }
 0x403   : > { %5581 = vst.msk [vmem:[%s7017_s16 + $0x5f8] sm:$0xff] %vm5389_vm2, %v3786_v18  ;;  %5837 = vst.msk [vmem:[%s7017_s16 + $0xdf8] sm:$0xff] %vm5389_vm2, %v5066_v19  ;;  %v673_v19 = vld [vmem:[%s6619_s29 + $0xfb0] sm:$0xff] }
 0x404   : > { %v3790_v25 = vpop.f32.mrb[128].mxu0  ;;  %v5070_v26 = vpop.f32.mrb[128].mxu1 }
 0x405   : > { %v3791_v28 = vadd.f32 %v9351_v27, %v3790_v25  ;;  %v5071_v29 = vadd.f32 %v9351_v27, %v5070_v26  ;;  %v3792_v30 = vpop.f32.mrb[129].mxu0  ;;  %4054 = vmatmul.mubr.f32.gmra.mrb[234].mxu0 %v661_v21  ;;  %v5072_v31 = vpop.f32.mrb[129].mxu1  ;;  %5334 = vmatmul.mubr.f32.gmra.mrb[234].mxu1 %v1173_v23  ;;  %v1188_v21 = vld [vmem:[%s6619_s29 + $0x1fc8] sm:$0xff] }
 0x406   : > { %6214 = vmatprep.mubr.msk.f32.mxu0 %vm1223_vm0, %v664_v24  ;;  %6470 = vmatprep.mubr.msk.f32.mxu1 %vm1223_vm0, %v1176_v22  ;;  %v1187_v30 = vld [vmem:[%s6619_s29 + $0x1fc0] sm:$0xff]  ;;  %v678_v31 = vld [vmem:[%s6619_s29 + $0xfd8] sm:$0xff] }
 0x407   : > { %5582 = vst.msk [vmem:[%s7017_s16 + $0x600] sm:$0xff] %vm5389_vm2, %v3791_v28  ;;  %5838 = vst.msk [vmem:[%s7017_s16 + $0xe00] sm:$0xff] %vm5389_vm2, %v5071_v29  ;;  %v675_v29 = vld [vmem:[%s6619_s29 + $0xfc0] sm:$0xff] }
 0x408   : > { %v3795_v36 = vpop.f32.mrb[130].mxu0  ;;  %v5075_v37 = vpop.f32.mrb[130].mxu1 }
 0x409   : > { %v3796_v38 = vadd.f32 %v9351_v27, %v3795_v36  ;;  %v5076_v39 = vadd.f32 %v9351_v27, %v5075_v37  ;;  %v3797_v40 = vpop.f32.mrb[131].mxu0  ;;  %4059 = vmatmul.mubr.f32.gmra.mrb[236].mxu0 %v663_v32  ;;  %v5077_v41 = vpop.f32.mrb[131].mxu1  ;;  %5339 = vmatmul.mubr.f32.gmra.mrb[236].mxu1 %v1175_v33  ;;  %v1190_v32 = vld [vmem:[%s6619_s29 + $0x1fd8] sm:$0xff] }
 0x40a   : > { %6215 = vmatprep.mubr.msk.f32.mxu0 %vm1223_vm0, %v666_v34  ;;  %6471 = vmatprep.mubr.msk.f32.mxu1 %vm1223_vm0, %v1178_v35  ;;  %v1189_v40 = vld [vmem:[%s6619_s29 + $0x1fd0] sm:$0xff]  ;;  %v680_v41 = vld [vmem:[%s6619_s29 + $0xfe8] sm:$0xff] }
 0x40b   : > { %5583 = vst.msk [vmem:[%s7017_s16 + $0x608] sm:$0xff] %vm5389_vm2, %v3796_v38  ;;  %5839 = vst.msk [vmem:[%s7017_s16 + $0xe08] sm:$0xff] %vm5389_vm2, %v5076_v39  ;;  %v677_v39 = vld [vmem:[%s6619_s29 + $0xfd0] sm:$0xff] }
 0x40c   : > { %v3800_v46 = vpop.f32.mrb[132].mxu0  ;;  %v5080_v47 = vpop.f32.mrb[132].mxu1 }
 0x40d   : > { %v3801_v48 = vadd.f32 %v9351_v27, %v3800_v46  ;;  %v5081_v49 = vadd.f32 %v9351_v27, %v5080_v47  ;;  %v3802_v50 = vpop.f32.mrb[133].mxu0  ;;  %4064 = vmatmul.mubr.f32.gmra.mrb[238].mxu0 %v665_v42  ;;  %v5082_v51 = vpop.f32.mrb[133].mxu1  ;;  %5344 = vmatmul.mubr.f32.gmra.mrb[238].mxu1 %v1177_v43  ;;  %v1192_v42 = vld [vmem:[%s6619_s29 + $0x1fe8] sm:$0xff] }
 0x40e   : > { %6216 = vmatprep.mubr.msk.f32.mxu0 %vm1223_vm0, %v668_v44  ;;  %6472 = vmatprep.mubr.msk.f32.mxu1 %vm1223_vm0, %v1180_v45  ;;  %v1191_v50 = vld [vmem:[%s6619_s29 + $0x1fe0] sm:$0xff]  ;;  %v682_v51 = vld [vmem:[%s6619_s29 + $0xff8] sm:$0xff] }
 0x40f   : > { %5584 = vst.msk [vmem:[%s7017_s16 + $0x610] sm:$0xff] %vm5389_vm2, %v3801_v48  ;;  %5840 = vst.msk [vmem:[%s7017_s16 + $0xe10] sm:$0xff] %vm5389_vm2, %v5081_v49  ;;  %v679_v49 = vld [vmem:[%s6619_s29 + $0xfe0] sm:$0xff] }
 0x410   : > { %v3805_v57 = vpop.f32.mrb[134].mxu0  ;;  %v5085_v58 = vpop.f32.mrb[134].mxu1 }
 0x411   : > { %v3806_v59 = vadd.f32 %v9351_v27, %v3805_v57  ;;  %v5086_v60 = vadd.f32 %v9351_v27, %v5085_v58  ;;  %v3807_v61 = vpop.f32.mrb[135].mxu0  ;;  %4069 = vmatmul.mubr.f32.gmra.mrb[240].mxu0 %v667_v52  ;;  %v5087_v62 = vpop.f32.mrb[135].mxu1  ;;  %5349 = vmatmul.mubr.f32.gmra.mrb[240].mxu1 %v1179_v53  ;;  %v1194_v52 = vld [vmem:[%s6619_s29 + $0x1ff8] sm:$0xff] }
 0x412   : > { %6217 = vmatprep.mubr.msk.f32.mxu0 %vm1223_vm0, %v670_v54  ;;  %6473 = vmatprep.mubr.msk.f32.mxu1 %vm1223_vm0, %v1182_v56  ;;  %v1193_v61 = vld [vmem:[%s6619_s29 + $0x1ff0] sm:$0xff] }
 0x413   : > { %5585 = vst.msk [vmem:[%s7017_s16 + $0x618] sm:$0xff] %vm5389_vm2, %v3806_v59  ;;  %5841 = vst.msk [vmem:[%s7017_s16 + $0xe18] sm:$0xff] %vm5389_vm2, %v5086_v60  ;;  %v681_v60 = vld [vmem:[%s6619_s29 + $0xff0] sm:$0xff] }
 0x414   : > { %v3810_v3 = vpop.f32.mrb[136].mxu0  ;;  %v5090_v4 = vpop.f32.mrb[136].mxu1 }
 0x415   : > { %v3811_v2 = vadd.f32 %v9351_v27, %v3810_v3  ;;  %v5091_v5 = vadd.f32 %v9351_v27, %v5090_v4  ;;  %v3812_v6 = vpop.f32.mrb[137].mxu0  ;;  %4074 = vmatmul.mubr.f32.gmra.mrb[242].mxu0 %v669_v63  ;;  %v5092_v8 = vpop.f32.mrb[137].mxu1  ;;  %5354 = vmatmul.mubr.f32.gmra.mrb[242].mxu1 %v1181_v55 }
 0x416   : > { %6218 = vmatprep.mubr.msk.f32.mxu0 %vm1223_vm0, %v672_v0  ;;  %6474 = vmatprep.mubr.msk.f32.mxu1 %vm1223_vm0, %v1184_v1 }
 0x417   : > { %5586 = vst.msk [vmem:[%s7017_s16 + $0x620] sm:$0xff] %vm5389_vm2, %v3811_v2  ;;  %5842 = vst.msk [vmem:[%s7017_s16 + $0xe20] sm:$0xff] %vm5389_vm2, %v5091_v5 }
 0x418   : > { %v3815_v13 = vpop.f32.mrb[138].mxu0  ;;  %v5095_v14 = vpop.f32.mrb[138].mxu1 }
 0x419   : > { %v3816_v12 = vadd.f32 %v9351_v27, %v3815_v13  ;;  %v5096_v15 = vadd.f32 %v9351_v27, %v5095_v14  ;;  %v3817_v16 = vpop.f32.mrb[139].mxu0  ;;  %4079 = vmatmul.mubr.f32.gmra.mrb[244].mxu0 %v671_v9  ;;  %v5097_v18 = vpop.f32.mrb[139].mxu1  ;;  %5359 = vmatmul.mubr.f32.gmra.mrb[244].mxu1 %v1183_v7 }
 0x41a   : > { %6219 = vmatprep.mubr.msk.f32.mxu0 %vm1223_vm0, %v674_v10  ;;  %6475 = vmatprep.mubr.msk.f32.mxu1 %vm1223_vm0, %v1186_v11 }
 0x41b   : > { %5587 = vst.msk [vmem:[%s7017_s16 + $0x628] sm:$0xff] %vm5389_vm2, %v3816_v12  ;;  %5843 = vst.msk [vmem:[%s7017_s16 + $0xe28] sm:$0xff] %vm5389_vm2, %v5096_v15 }
 0x41c   : > { %v3820_v23 = vpop.f32.mrb[140].mxu0  ;;  %v5100_v24 = vpop.f32.mrb[140].mxu1 }
 0x41d   : > { %v3821_v22 = vadd.f32 %v9351_v27, %v3820_v23  ;;  %v5101_v25 = vadd.f32 %v9351_v27, %v5100_v24  ;;  %v3822_v26 = vpop.f32.mrb[141].mxu0  ;;  %4084 = vmatmul.mubr.f32.gmra.mrb[246].mxu0 %v673_v19  ;;  %v5102_v28 = vpop.f32.mrb[141].mxu1  ;;  %5364 = vmatmul.mubr.f32.gmra.mrb[246].mxu1 %v1185_v17 }
 0x41e   : > { %6220 = vmatprep.mubr.msk.f32.mxu0 %vm1223_vm0, %v676_v20  ;;  %6476 = vmatprep.mubr.msk.f32.mxu1 %vm1223_vm0, %v1188_v21 }
 0x41f   : > { %5588 = vst.msk [vmem:[%s7017_s16 + $0x630] sm:$0xff] %vm5389_vm2, %v3821_v22  ;;  %5844 = vst.msk [vmem:[%s7017_s16 + $0xe30] sm:$0xff] %vm5389_vm2, %v5101_v25 }
 0x420   : > { %v3825_v33 = vpop.f32.mrb[142].mxu0  ;;  %v5105_v34 = vpop.f32.mrb[142].mxu1 }
 0x421   : > { %v3826_v35 = vadd.f32 %v9351_v27, %v3825_v33  ;;  %v5106_v36 = vadd.f32 %v9351_v27, %v5105_v34  ;;  %v3827_v37 = vpop.f32.mrb[143].mxu0  ;;  %4089 = vmatmul.mubr.f32.gmra.mrb[248].mxu0 %v675_v29  ;;  %v5107_v38 = vpop.f32.mrb[143].mxu1  ;;  %5369 = vmatmul.mubr.f32.gmra.mrb[248].mxu1 %v1187_v30 }
 0x422   : > { %6221 = vmatprep.mubr.msk.f32.mxu0 %vm1223_vm0, %v678_v31  ;;  %6477 = vmatprep.mubr.msk.f32.mxu1 %vm1223_vm0, %v1190_v32 }
 0x423   : > { %5589 = vst.msk [vmem:[%s7017_s16 + $0x638] sm:$0xff] %vm5389_vm2, %v3826_v35  ;;  %5845 = vst.msk [vmem:[%s7017_s16 + $0xe38] sm:$0xff] %vm5389_vm2, %v5106_v36 }
 0x424   : > { %v3830_v43 = vpop.f32.mrb[144].mxu0  ;;  %v5110_v44 = vpop.f32.mrb[144].mxu1 }
 0x425   : > { %v3831_v45 = vadd.f32 %v9351_v27, %v3830_v43  ;;  %v5111_v46 = vadd.f32 %v9351_v27, %v5110_v44  ;;  %v3832_v47 = vpop.f32.mrb[145].mxu0  ;;  %4094 = vmatmul.mubr.f32.gmra.mrb[250].mxu0 %v677_v39  ;;  %v5112_v48 = vpop.f32.mrb[145].mxu1  ;;  %5374 = vmatmul.mubr.f32.gmra.mrb[250].mxu1 %v1189_v40 }
 0x426   : > { %6222 = vmatprep.mubr.msk.f32.mxu0 %vm1223_vm0, %v680_v41  ;;  %6478 = vmatprep.mubr.msk.f32.mxu1 %vm1223_vm0, %v1192_v42 }
 0x427   : > { %5590 = vst.msk [vmem:[%s7017_s16 + $0x640] sm:$0xff] %vm5389_vm2, %v3831_v45  ;;  %5846 = vst.msk [vmem:[%s7017_s16 + $0xe40] sm:$0xff] %vm5389_vm2, %v5111_v46 }
 0x428   : > { %v3835_v53 = vpop.f32.mrb[146].mxu0  ;;  %v5115_v54 = vpop.f32.mrb[146].mxu1 }
 0x429   : > { %v3836_v56 = vadd.f32 %v9351_v27, %v3835_v53  ;;  %v5116_v57 = vadd.f32 %v9351_v27, %v5115_v54  ;;  %v3837_v58 = vpop.f32.mrb[147].mxu0  ;;  %4099 = vmatmul.mubr.f32.gmra.mrb[252].mxu0 %v679_v49  ;;  %v5117_v59 = vpop.f32.mrb[147].mxu1  ;;  %5379 = vmatmul.mubr.f32.gmra.mrb[252].mxu1 %v1191_v50 }
 0x42a   : > { %6223 = vmatprep.mubr.msk.f32.mxu0 %vm1223_vm0, %v682_v51  ;;  %6479 = vmatprep.mubr.msk.f32.mxu1 %vm1223_vm0, %v1194_v52 }
 0x42b   : > { %5591 = vst.msk [vmem:[%s7017_s16 + $0x648] sm:$0xff] %vm5389_vm2, %v3836_v56  ;;  %5847 = vst.msk [vmem:[%s7017_s16 + $0xe48] sm:$0xff] %vm5389_vm2, %v5116_v57 }
 0x42c   : > { %v3840_v62 = vpop.f32.mrb[148].mxu0  ;;  %v5120_v63 = vpop.f32.mrb[148].mxu1 }
 0x42d   : > { %v3841_v55 = vadd.f32 %v9351_v27, %v3840_v62  ;;  %v5121_v0 = vadd.f32 %v9351_v27, %v5120_v63  ;;  %v3842_v1 = vpop.f32.mrb[149].mxu0  ;;  %4104 = vmatmul.mubr.f32.gmra.mrb[254].mxu0 %v681_v60  ;;  %v5122_v3 = vpop.f32.mrb[149].mxu1  ;;  %5384 = vmatmul.mubr.f32.gmra.mrb[254].mxu1 %v1193_v61 }
 0x42f   : > { %5592 = vst.msk [vmem:[%s7017_s16 + $0x650] sm:$0xff] %vm5389_vm2, %v3841_v55  ;;  %5848 = vst.msk [vmem:[%s7017_s16 + $0xe50] sm:$0xff] %vm5389_vm2, %v5121_v0 }
 0x430   : > { %v3845_v4 = vpop.f32.mrb[150].mxu0  ;;  %v5125_v2 = vpop.f32.mrb[150].mxu1 }
 0x431   : > { %v3846_v5 = vadd.f32 %v9351_v27, %v3845_v4  ;;  %v5126_v6 = vadd.f32 %v9351_v27, %v5125_v2  ;;  %v3847_v8 = vpop.f32.mrb[151].mxu0  ;;  %v5127_v9 = vpop.f32.mrb[151].mxu1 }
 0x433   : > { %5593 = vst.msk [vmem:[%s7017_s16 + $0x658] sm:$0xff] %vm5389_vm2, %v3846_v5  ;;  %5849 = vst.msk [vmem:[%s7017_s16 + $0xe58] sm:$0xff] %vm5389_vm2, %v5126_v6 }
 0x434   : > { %v3850_v7 = vpop.f32.mrb[152].mxu0  ;;  %v5130_v10 = vpop.f32.mrb[152].mxu1 }
 0x435   : > { %v3851_v11 = vadd.f32 %v9351_v27, %v3850_v7  ;;  %v5131_v13 = vadd.f32 %v9351_v27, %v5130_v10  ;;  %v3852_v14 = vpop.f32.mrb[153].mxu0  ;;  %v5132_v12 = vpop.f32.mrb[153].mxu1 }
 0x437   : > { %5594 = vst.msk [vmem:[%s7017_s16 + $0x660] sm:$0xff] %vm5389_vm2, %v3851_v11  ;;  %5850 = vst.msk [vmem:[%s7017_s16 + $0xe60] sm:$0xff] %vm5389_vm2, %v5131_v13 }
 0x438   : > { %v3855_v15 = vpop.f32.mrb[154].mxu0  ;;  %v5135_v16 = vpop.f32.mrb[154].mxu1 }
 0x439   : > { %v3856_v18 = vadd.f32 %v9351_v27, %v3855_v15  ;;  %v5136_v19 = vadd.f32 %v9351_v27, %v5135_v16  ;;  %v3857_v17 = vpop.f32.mrb[155].mxu0  ;;  %v5137_v20 = vpop.f32.mrb[155].mxu1 }
 0x43b   : > { %5595 = vst.msk [vmem:[%s7017_s16 + $0x668] sm:$0xff] %vm5389_vm2, %v3856_v18  ;;  %5851 = vst.msk [vmem:[%s7017_s16 + $0xe68] sm:$0xff] %vm5389_vm2, %v5136_v19 }
 0x43c   : > { %v3860_v21 = vpop.f32.mrb[156].mxu0  ;;  %v5140_v23 = vpop.f32.mrb[156].mxu1 }
 0x43d   : > { %v3861_v24 = vadd.f32 %v9351_v27, %v3860_v21  ;;  %v5141_v22 = vadd.f32 %v9351_v27, %v5140_v23  ;;  %v3862_v25 = vpop.f32.mrb[157].mxu0  ;;  %v5142_v26 = vpop.f32.mrb[157].mxu1 }
 0x43f   : > { %5596 = vst.msk [vmem:[%s7017_s16 + $0x670] sm:$0xff] %vm5389_vm2, %v3861_v24  ;;  %5852 = vst.msk [vmem:[%s7017_s16 + $0xe70] sm:$0xff] %vm5389_vm2, %v5141_v22 }
 0x440   : > { %v3865_v28 = vpop.f32.mrb[158].mxu0  ;;  %v5145_v29 = vpop.f32.mrb[158].mxu1 }
 0x441   : > { %v3866_v30 = vadd.f32 %v9351_v27, %v3865_v28  ;;  %v5146_v31 = vadd.f32 %v9351_v27, %v5145_v29  ;;  %v3867_v32 = vpop.f32.mrb[159].mxu0  ;;  %v5147_v33 = vpop.f32.mrb[159].mxu1 }
 0x443   : > { %5597 = vst.msk [vmem:[%s7017_s16 + $0x678] sm:$0xff] %vm5389_vm2, %v3866_v30  ;;  %5853 = vst.msk [vmem:[%s7017_s16 + $0xe78] sm:$0xff] %vm5389_vm2, %v5146_v31 }
 0x444   : > { %v3870_v34 = vpop.f32.mrb[160].mxu0  ;;  %v5150_v35 = vpop.f32.mrb[160].mxu1 }
 0x445   : > { %v3871_v36 = vadd.f32 %v9351_v27, %v3870_v34  ;;  %v5151_v37 = vadd.f32 %v9351_v27, %v5150_v35  ;;  %v3872_v38 = vpop.f32.mrb[161].mxu0  ;;  %v5152_v39 = vpop.f32.mrb[161].mxu1 }
 0x447   : > { %5598 = vst.msk [vmem:[%s7017_s16 + $0x680] sm:$0xff] %vm5389_vm2, %v3871_v36  ;;  %5854 = vst.msk [vmem:[%s7017_s16 + $0xe80] sm:$0xff] %vm5389_vm2, %v5151_v37 }
 0x448   : > { %v3875_v40 = vpop.f32.mrb[162].mxu0  ;;  %v5155_v41 = vpop.f32.mrb[162].mxu1 }
 0x449   : > { %v3876_v42 = vadd.f32 %v9351_v27, %v3875_v40  ;;  %v5156_v43 = vadd.f32 %v9351_v27, %v5155_v41  ;;  %v3877_v44 = vpop.f32.mrb[163].mxu0  ;;  %v5157_v45 = vpop.f32.mrb[163].mxu1 }
 0x44b   : > { %5599 = vst.msk [vmem:[%s7017_s16 + $0x688] sm:$0xff] %vm5389_vm2, %v3876_v42  ;;  %5855 = vst.msk [vmem:[%s7017_s16 + $0xe88] sm:$0xff] %vm5389_vm2, %v5156_v43 }
 0x44c   : > { %v3880_v46 = vpop.f32.mrb[164].mxu0  ;;  %v5160_v47 = vpop.f32.mrb[164].mxu1 }
 0x44d   : > { %v3881_v48 = vadd.f32 %v9351_v27, %v3880_v46  ;;  %v5161_v49 = vadd.f32 %v9351_v27, %v5160_v47  ;;  %v3882_v50 = vpop.f32.mrb[165].mxu0  ;;  %v5162_v51 = vpop.f32.mrb[165].mxu1 }
 0x44f   : > { %5600 = vst.msk [vmem:[%s7017_s16 + $0x690] sm:$0xff] %vm5389_vm2, %v3881_v48  ;;  %5856 = vst.msk [vmem:[%s7017_s16 + $0xe90] sm:$0xff] %vm5389_vm2, %v5161_v49 }
 0x450   : > { %v3885_v52 = vpop.f32.mrb[166].mxu0  ;;  %v5165_v53 = vpop.f32.mrb[166].mxu1 }
 0x451   : > { %v3886_v54 = vadd.f32 %v9351_v27, %v3885_v52  ;;  %v5166_v56 = vadd.f32 %v9351_v27, %v5165_v53  ;;  %v3887_v57 = vpop.f32.mrb[167].mxu0  ;;  %v5167_v58 = vpop.f32.mrb[167].mxu1 }
 0x453   : > { %5601 = vst.msk [vmem:[%s7017_s16 + $0x698] sm:$0xff] %vm5389_vm2, %v3886_v54  ;;  %5857 = vst.msk [vmem:[%s7017_s16 + $0xe98] sm:$0xff] %vm5389_vm2, %v5166_v56 }
 0x454   : > { %v3890_v59 = vpop.f32.mrb[168].mxu0  ;;  %v5170_v60 = vpop.f32.mrb[168].mxu1 }
 0x455   : > { %v3891_v61 = vadd.f32 %v9351_v27, %v3890_v59  ;;  %v5171_v62 = vadd.f32 %v9351_v27, %v5170_v60  ;;  %v3892_v63 = vpop.f32.mrb[169].mxu0  ;;  %v5172_v55 = vpop.f32.mrb[169].mxu1 }
 0x457   : > { %5602 = vst.msk [vmem:[%s7017_s16 + $0x6a0] sm:$0xff] %vm5389_vm2, %v3891_v61  ;;  %5858 = vst.msk [vmem:[%s7017_s16 + $0xea0] sm:$0xff] %vm5389_vm2, %v5171_v62 }
 0x458   : > { %v3895_v0 = vpop.f32.mrb[170].mxu0  ;;  %v5175_v1 = vpop.f32.mrb[170].mxu1 }
 0x459   : > { %v3896_v3 = vadd.f32 %v9351_v27, %v3895_v0  ;;  %v5176_v4 = vadd.f32 %v9351_v27, %v5175_v1  ;;  %v3897_v2 = vpop.f32.mrb[171].mxu0  ;;  %v5177_v5 = vpop.f32.mrb[171].mxu1 }
 0x45b   : > { %5603 = vst.msk [vmem:[%s7017_s16 + $0x6a8] sm:$0xff] %vm5389_vm2, %v3896_v3  ;;  %5859 = vst.msk [vmem:[%s7017_s16 + $0xea8] sm:$0xff] %vm5389_vm2, %v5176_v4 }
 0x45c   : > { %v3900_v6 = vpop.f32.mrb[172].mxu0  ;;  %v5180_v8 = vpop.f32.mrb[172].mxu1 }
 0x45d   : > { %v3901_v9 = vadd.f32 %v9351_v27, %v3900_v6  ;;  %v5181_v7 = vadd.f32 %v9351_v27, %v5180_v8  ;;  %v3902_v10 = vpop.f32.mrb[173].mxu0  ;;  %v5182_v11 = vpop.f32.mrb[173].mxu1 }
 0x45f   : > { %5604 = vst.msk [vmem:[%s7017_s16 + $0x6b0] sm:$0xff] %vm5389_vm2, %v3901_v9  ;;  %5860 = vst.msk [vmem:[%s7017_s16 + $0xeb0] sm:$0xff] %vm5389_vm2, %v5181_v7 }
 0x460   : > { %v3905_v13 = vpop.f32.mrb[174].mxu0  ;;  %v5185_v14 = vpop.f32.mrb[174].mxu1 }
 0x461   : > { %v3906_v12 = vadd.f32 %v9351_v27, %v3905_v13  ;;  %v5186_v15 = vadd.f32 %v9351_v27, %v5185_v14  ;;  %v3907_v16 = vpop.f32.mrb[175].mxu0  ;;  %v5187_v18 = vpop.f32.mrb[175].mxu1 }
 0x463   : > { %5605 = vst.msk [vmem:[%s7017_s16 + $0x6b8] sm:$0xff] %vm5389_vm2, %v3906_v12  ;;  %5861 = vst.msk [vmem:[%s7017_s16 + $0xeb8] sm:$0xff] %vm5389_vm2, %v5186_v15 }
 0x464   : > { %v3910_v19 = vpop.f32.mrb[176].mxu0  ;;  %v5190_v17 = vpop.f32.mrb[176].mxu1 }
 0x465   : > { %v3911_v20 = vadd.f32 %v9351_v27, %v3910_v19  ;;  %v5191_v21 = vadd.f32 %v9351_v27, %v5190_v17  ;;  %v3912_v23 = vpop.f32.mrb[177].mxu0  ;;  %v5192_v24 = vpop.f32.mrb[177].mxu1 }
 0x467   : > { %5606 = vst.msk [vmem:[%s7017_s16 + $0x6c0] sm:$0xff] %vm5389_vm2, %v3911_v20  ;;  %5862 = vst.msk [vmem:[%s7017_s16 + $0xec0] sm:$0xff] %vm5389_vm2, %v5191_v21 }
 0x468   : > { %v3915_v22 = vpop.f32.mrb[178].mxu0  ;;  %v5195_v25 = vpop.f32.mrb[178].mxu1 }
 0x469   : > { %v3916_v26 = vadd.f32 %v9351_v27, %v3915_v22  ;;  %v5196_v28 = vadd.f32 %v9351_v27, %v5195_v25  ;;  %v3917_v29 = vpop.f32.mrb[179].mxu0  ;;  %v5197_v30 = vpop.f32.mrb[179].mxu1 }
 0x46b   : > { %5607 = vst.msk [vmem:[%s7017_s16 + $0x6c8] sm:$0xff] %vm5389_vm2, %v3916_v26  ;;  %5863 = vst.msk [vmem:[%s7017_s16 + $0xec8] sm:$0xff] %vm5389_vm2, %v5196_v28 }
 0x46c   : > { %v3920_v31 = vpop.f32.mrb[180].mxu0  ;;  %v5200_v32 = vpop.f32.mrb[180].mxu1 }
 0x46d   : > { %v3921_v33 = vadd.f32 %v9351_v27, %v3920_v31  ;;  %v5201_v34 = vadd.f32 %v9351_v27, %v5200_v32  ;;  %v3922_v35 = vpop.f32.mrb[181].mxu0  ;;  %v5202_v36 = vpop.f32.mrb[181].mxu1 }
 0x46f   : > { %5608 = vst.msk [vmem:[%s7017_s16 + $0x6d0] sm:$0xff] %vm5389_vm2, %v3921_v33  ;;  %5864 = vst.msk [vmem:[%s7017_s16 + $0xed0] sm:$0xff] %vm5389_vm2, %v5201_v34 }
 0x470   : > { %v3925_v37 = vpop.f32.mrb[182].mxu0  ;;  %v5205_v38 = vpop.f32.mrb[182].mxu1 }
 0x471   : > { %v3926_v39 = vadd.f32 %v9351_v27, %v3925_v37  ;;  %v5206_v40 = vadd.f32 %v9351_v27, %v5205_v38  ;;  %v3927_v41 = vpop.f32.mrb[183].mxu0  ;;  %v5207_v42 = vpop.f32.mrb[183].mxu1 }
 0x473   : > { %5609 = vst.msk [vmem:[%s7017_s16 + $0x6d8] sm:$0xff] %vm5389_vm2, %v3926_v39  ;;  %5865 = vst.msk [vmem:[%s7017_s16 + $0xed8] sm:$0xff] %vm5389_vm2, %v5206_v40 }
 0x474   : > { %v3930_v43 = vpop.f32.mrb[184].mxu0  ;;  %v5210_v44 = vpop.f32.mrb[184].mxu1 }
 0x475   : > { %v3931_v45 = vadd.f32 %v9351_v27, %v3930_v43  ;;  %v5211_v46 = vadd.f32 %v9351_v27, %v5210_v44  ;;  %v3932_v47 = vpop.f32.mrb[185].mxu0  ;;  %v5212_v48 = vpop.f32.mrb[185].mxu1 }
 0x477   : > { %5610 = vst.msk [vmem:[%s7017_s16 + $0x6e0] sm:$0xff] %vm5389_vm2, %v3931_v45  ;;  %5866 = vst.msk [vmem:[%s7017_s16 + $0xee0] sm:$0xff] %vm5389_vm2, %v5211_v46 }
 0x478   : > { %v3935_v49 = vpop.f32.mrb[186].mxu0  ;;  %v5215_v50 = vpop.f32.mrb[186].mxu1 }
 0x479   : > { %v3936_v51 = vadd.f32 %v9351_v27, %v3935_v49  ;;  %v5216_v52 = vadd.f32 %v9351_v27, %v5215_v50  ;;  %v3937_v53 = vpop.f32.mrb[187].mxu0  ;;  %v5217_v54 = vpop.f32.mrb[187].mxu1 }
 0x47b   : > { %5611 = vst.msk [vmem:[%s7017_s16 + $0x6e8] sm:$0xff] %vm5389_vm2, %v3936_v51  ;;  %5867 = vst.msk [vmem:[%s7017_s16 + $0xee8] sm:$0xff] %vm5389_vm2, %v5216_v52 }
 0x47c   : > { %v3940_v56 = vpop.f32.mrb[188].mxu0  ;;  %v5220_v57 = vpop.f32.mrb[188].mxu1 }
 0x47d   : > { %v3941_v58 = vadd.f32 %v9351_v27, %v3940_v56  ;;  %v5221_v59 = vadd.f32 %v9351_v27, %v5220_v57  ;;  %v3942_v60 = vpop.f32.mrb[189].mxu0  ;;  %v5222_v61 = vpop.f32.mrb[189].mxu1 }
 0x47f   : > { %5612 = vst.msk [vmem:[%s7017_s16 + $0x6f0] sm:$0xff] %vm5389_vm2, %v3941_v58  ;;  %5868 = vst.msk [vmem:[%s7017_s16 + $0xef0] sm:$0xff] %vm5389_vm2, %v5221_v59 }
 0x480   : > { %v3945_v62 = vpop.f32.mrb[190].mxu0  ;;  %v5225_v63 = vpop.f32.mrb[190].mxu1 }
 0x481   : > { %v3946_v55 = vadd.f32 %v9351_v27, %v3945_v62  ;;  %v5226_v0 = vadd.f32 %v9351_v27, %v5225_v63  ;;  %v3947_v1 = vpop.f32.mrb[191].mxu0  ;;  %v5227_v3 = vpop.f32.mrb[191].mxu1 }
 0x483   : > { %5613 = vst.msk [vmem:[%s7017_s16 + $0x6f8] sm:$0xff] %vm5389_vm2, %v3946_v55  ;;  %5869 = vst.msk [vmem:[%s7017_s16 + $0xef8] sm:$0xff] %vm5389_vm2, %v5226_v0 }
 0x484   : > { %v3950_v4 = vpop.f32.mrb[192].mxu0  ;;  %v5230_v2 = vpop.f32.mrb[192].mxu1 }
 0x485   : > { %v3951_v5 = vadd.f32 %v9351_v27, %v3950_v4  ;;  %v5231_v6 = vadd.f32 %v9351_v27, %v5230_v2  ;;  %v3952_v8 = vpop.f32.mrb[193].mxu0  ;;  %v5232_v9 = vpop.f32.mrb[193].mxu1 }
 0x487   : > { %5614 = vst.msk [vmem:[%s7017_s16 + $0x700] sm:$0xff] %vm5389_vm2, %v3951_v5  ;;  %5870 = vst.msk [vmem:[%s7017_s16 + $0xf00] sm:$0xff] %vm5389_vm2, %v5231_v6 }
 0x488   : > { %v3955_v7 = vpop.f32.mrb[194].mxu0  ;;  %v5235_v10 = vpop.f32.mrb[194].mxu1 }
 0x489   : > { %v3956_v11 = vadd.f32 %v9351_v27, %v3955_v7  ;;  %v5236_v13 = vadd.f32 %v9351_v27, %v5235_v10  ;;  %v3957_v14 = vpop.f32.mrb[195].mxu0  ;;  %v5237_v12 = vpop.f32.mrb[195].mxu1 }
 0x48b   : > { %5615 = vst.msk [vmem:[%s7017_s16 + $0x708] sm:$0xff] %vm5389_vm2, %v3956_v11  ;;  %5871 = vst.msk [vmem:[%s7017_s16 + $0xf08] sm:$0xff] %vm5389_vm2, %v5236_v13 }
 0x48c   : > { %v3960_v15 = vpop.f32.mrb[196].mxu0  ;;  %v5240_v16 = vpop.f32.mrb[196].mxu1 }
 0x48d   : > { %v3961_v18 = vadd.f32 %v9351_v27, %v3960_v15  ;;  %v5241_v19 = vadd.f32 %v9351_v27, %v5240_v16  ;;  %v3962_v17 = vpop.f32.mrb[197].mxu0  ;;  %v5242_v20 = vpop.f32.mrb[197].mxu1 }
 0x48f   : > { %5616 = vst.msk [vmem:[%s7017_s16 + $0x710] sm:$0xff] %vm5389_vm2, %v3961_v18  ;;  %5872 = vst.msk [vmem:[%s7017_s16 + $0xf10] sm:$0xff] %vm5389_vm2, %v5241_v19 }
 0x490   : > { %v3965_v21 = vpop.f32.mrb[198].mxu0  ;;  %v5245_v23 = vpop.f32.mrb[198].mxu1 }
 0x491   : > { %v3966_v24 = vadd.f32 %v9351_v27, %v3965_v21  ;;  %v5246_v22 = vadd.f32 %v9351_v27, %v5245_v23  ;;  %v3967_v25 = vpop.f32.mrb[199].mxu0  ;;  %v5247_v26 = vpop.f32.mrb[199].mxu1 }
 0x493   : > { %5617 = vst.msk [vmem:[%s7017_s16 + $0x718] sm:$0xff] %vm5389_vm2, %v3966_v24  ;;  %5873 = vst.msk [vmem:[%s7017_s16 + $0xf18] sm:$0xff] %vm5389_vm2, %v5246_v22 }
 0x494   : > { %v3970_v28 = vpop.f32.mrb[200].mxu0  ;;  %v5250_v29 = vpop.f32.mrb[200].mxu1 }
 0x495   : > { %v3971_v30 = vadd.f32 %v9351_v27, %v3970_v28  ;;  %v5251_v31 = vadd.f32 %v9351_v27, %v5250_v29  ;;  %v3972_v32 = vpop.f32.mrb[201].mxu0  ;;  %v5252_v33 = vpop.f32.mrb[201].mxu1 }
 0x497   : > { %5618 = vst.msk [vmem:[%s7017_s16 + $0x720] sm:$0xff] %vm5389_vm2, %v3971_v30  ;;  %5874 = vst.msk [vmem:[%s7017_s16 + $0xf20] sm:$0xff] %vm5389_vm2, %v5251_v31 }
 0x498   : > { %v3975_v34 = vpop.f32.mrb[202].mxu0  ;;  %v5255_v35 = vpop.f32.mrb[202].mxu1 }
 0x499   : > { %v3976_v36 = vadd.f32 %v9351_v27, %v3975_v34  ;;  %v5256_v37 = vadd.f32 %v9351_v27, %v5255_v35  ;;  %v3977_v38 = vpop.f32.mrb[203].mxu0  ;;  %v5257_v39 = vpop.f32.mrb[203].mxu1 }
 0x49b   : > { %5619 = vst.msk [vmem:[%s7017_s16 + $0x728] sm:$0xff] %vm5389_vm2, %v3976_v36  ;;  %5875 = vst.msk [vmem:[%s7017_s16 + $0xf28] sm:$0xff] %vm5389_vm2, %v5256_v37 }
 0x49c   : > { %v3980_v40 = vpop.f32.mrb[204].mxu0  ;;  %v5260_v41 = vpop.f32.mrb[204].mxu1 }
 0x49d   : > { %v3981_v42 = vadd.f32 %v9351_v27, %v3980_v40  ;;  %v5261_v43 = vadd.f32 %v9351_v27, %v5260_v41  ;;  %v3982_v44 = vpop.f32.mrb[205].mxu0  ;;  %v5262_v45 = vpop.f32.mrb[205].mxu1 }
 0x49f   : > { %5620 = vst.msk [vmem:[%s7017_s16 + $0x730] sm:$0xff] %vm5389_vm2, %v3981_v42  ;;  %5876 = vst.msk [vmem:[%s7017_s16 + $0xf30] sm:$0xff] %vm5389_vm2, %v5261_v43 }
 0x4a0   : > { %v3985_v46 = vpop.f32.mrb[206].mxu0  ;;  %v5265_v47 = vpop.f32.mrb[206].mxu1 }
 0x4a1   : > { %v3986_v48 = vadd.f32 %v9351_v27, %v3985_v46  ;;  %v5266_v49 = vadd.f32 %v9351_v27, %v5265_v47  ;;  %v3987_v50 = vpop.f32.mrb[207].mxu0  ;;  %v5267_v51 = vpop.f32.mrb[207].mxu1 }
 0x4a3   : > { %5621 = vst.msk [vmem:[%s7017_s16 + $0x738] sm:$0xff] %vm5389_vm2, %v3986_v48  ;;  %5877 = vst.msk [vmem:[%s7017_s16 + $0xf38] sm:$0xff] %vm5389_vm2, %v5266_v49 }
 0x4a4   : > { %v3990_v52 = vpop.f32.mrb[208].mxu0  ;;  %v5270_v53 = vpop.f32.mrb[208].mxu1 }
 0x4a5   : > { %v3991_v54 = vadd.f32 %v9351_v27, %v3990_v52  ;;  %v5271_v56 = vadd.f32 %v9351_v27, %v5270_v53  ;;  %v3992_v57 = vpop.f32.mrb[209].mxu0  ;;  %v5272_v58 = vpop.f32.mrb[209].mxu1 }
 0x4a7   : > { %5622 = vst.msk [vmem:[%s7017_s16 + $0x740] sm:$0xff] %vm5389_vm2, %v3991_v54  ;;  %5878 = vst.msk [vmem:[%s7017_s16 + $0xf40] sm:$0xff] %vm5389_vm2, %v5271_v56 }
 0x4a8   : > { %v3995_v59 = vpop.f32.mrb[210].mxu0  ;;  %v5275_v60 = vpop.f32.mrb[210].mxu1 }
 0x4a9   : > { %v3996_v61 = vadd.f32 %v9351_v27, %v3995_v59  ;;  %v5276_v62 = vadd.f32 %v9351_v27, %v5275_v60  ;;  %v3997_v63 = vpop.f32.mrb[211].mxu0  ;;  %v5277_v55 = vpop.f32.mrb[211].mxu1 }
 0x4ab   : > { %5623 = vst.msk [vmem:[%s7017_s16 + $0x748] sm:$0xff] %vm5389_vm2, %v3996_v61  ;;  %5879 = vst.msk [vmem:[%s7017_s16 + $0xf48] sm:$0xff] %vm5389_vm2, %v5276_v62 }
 0x4ac   : > { %v4000_v0 = vpop.f32.mrb[212].mxu0  ;;  %v5280_v1 = vpop.f32.mrb[212].mxu1 }
 0x4ad   : > { %v4001_v3 = vadd.f32 %v9351_v27, %v4000_v0  ;;  %v5281_v4 = vadd.f32 %v9351_v27, %v5280_v1  ;;  %v4002_v2 = vpop.f32.mrb[213].mxu0  ;;  %v5282_v5 = vpop.f32.mrb[213].mxu1 }
 0x4af   : > { %5624 = vst.msk [vmem:[%s7017_s16 + $0x750] sm:$0xff] %vm5389_vm2, %v4001_v3  ;;  %5880 = vst.msk [vmem:[%s7017_s16 + $0xf50] sm:$0xff] %vm5389_vm2, %v5281_v4 }
 0x4b0   : > { %v4005_v6 = vpop.f32.mrb[214].mxu0  ;;  %v5285_v8 = vpop.f32.mrb[214].mxu1 }
 0x4b1   : > { %v4006_v9 = vadd.f32 %v9351_v27, %v4005_v6  ;;  %v5286_v7 = vadd.f32 %v9351_v27, %v5285_v8  ;;  %v4007_v10 = vpop.f32.mrb[215].mxu0  ;;  %v5287_v11 = vpop.f32.mrb[215].mxu1 }
 0x4b2   : > { %v9738_v11 = vld [vmem:[%s9805_s2] ss:$0 sm:$0xff] }
 0x4b3   : > { %5625 = vst.msk [vmem:[%s7017_s16 + $0x758] sm:$0xff] %vm5389_vm2, %v4006_v9  ;;  %5881 = vst.msk [vmem:[%s7017_s16 + $0xf58] sm:$0xff] %vm5389_vm2, %v5286_v7 }
 0x4b4   : > { %v4010_v13 = vpop.f32.mrb[216].mxu0  ;;  %v5290_v14 = vpop.f32.mrb[216].mxu1 }
 0x4b5   : > { %v4011_v12 = vadd.f32 %v9351_v27, %v4010_v13  ;;  %v5291_v15 = vadd.f32 %v9351_v27, %v5290_v14  ;;  %v4012_v16 = vpop.f32.mrb[217].mxu0  ;;  %v5292_v18 = vpop.f32.mrb[217].mxu1 }
 0x4b7   : > { %5626 = vst.msk [vmem:[%s7017_s16 + $0x760] sm:$0xff] %vm5389_vm2, %v4011_v12  ;;  %5882 = vst.msk [vmem:[%s7017_s16 + $0xf60] sm:$0xff] %vm5389_vm2, %v5291_v15 }
 0x4b8   : > { %v4015_v19 = vpop.f32.mrb[218].mxu0  ;;  %v5295_v17 = vpop.f32.mrb[218].mxu1 }
 0x4b9   : > { %v4016_v20 = vadd.f32 %v9351_v27, %v4015_v19  ;;  %v5296_v21 = vadd.f32 %v9351_v27, %v5295_v17  ;;  %v4017_v23 = vpop.f32.mrb[219].mxu0  ;;  %v5297_v24 = vpop.f32.mrb[219].mxu1 }
 0x4bb   : > { %5627 = vst.msk [vmem:[%s7017_s16 + $0x768] sm:$0xff] %vm5389_vm2, %v4016_v20  ;;  %5883 = vst.msk [vmem:[%s7017_s16 + $0xf68] sm:$0xff] %vm5389_vm2, %v5296_v21 }
 0x4bc   : > { %v4020_v22 = vpop.f32.mrb[220].mxu0  ;;  %v5300_v25 = vpop.f32.mrb[220].mxu1 }
 0x4bd   : > { %v4021_v26 = vadd.f32 %v9351_v27, %v4020_v22  ;;  %v5301_v28 = vadd.f32 %v9351_v27, %v5300_v25  ;;  %v4022_v29 = vpop.f32.mrb[221].mxu0  ;;  %v5302_v30 = vpop.f32.mrb[221].mxu1 }
 0x4bf   : > { %5628 = vst.msk [vmem:[%s7017_s16 + $0x770] sm:$0xff] %vm5389_vm2, %v4021_v26  ;;  %5884 = vst.msk [vmem:[%s7017_s16 + $0xf70] sm:$0xff] %vm5389_vm2, %v5301_v28 }
 0x4c0   : > { %v4025_v31 = vpop.f32.mrb[222].mxu0  ;;  %v5305_v32 = vpop.f32.mrb[222].mxu1 }
 0x4c1   : > { %v4026_v33 = vadd.f32 %v9351_v27, %v4025_v31  ;;  %v5306_v34 = vadd.f32 %v9351_v27, %v5305_v32  ;;  %v4027_v35 = vpop.f32.mrb[223].mxu0  ;;  %v5307_v36 = vpop.f32.mrb[223].mxu1 }
 0x4c3   : > { %5629 = vst.msk [vmem:[%s7017_s16 + $0x778] sm:$0xff] %vm5389_vm2, %v4026_v33  ;;  %5885 = vst.msk [vmem:[%s7017_s16 + $0xf78] sm:$0xff] %vm5389_vm2, %v5306_v34 }
 0x4c4   : > { %v4030_v37 = vpop.f32.mrb[224].mxu0  ;;  %v5310_v38 = vpop.f32.mrb[224].mxu1 }
 0x4c5   : > { %v4031_v39 = vadd.f32 %v9351_v27, %v4030_v37  ;;  %v5311_v40 = vadd.f32 %v9351_v27, %v5310_v38  ;;  %v4032_v41 = vpop.f32.mrb[225].mxu0  ;;  %v5312_v42 = vpop.f32.mrb[225].mxu1 }
 0x4c7   : > { %5630 = vst.msk [vmem:[%s7017_s16 + $0x780] sm:$0xff] %vm5389_vm2, %v4031_v39  ;;  %5886 = vst.msk [vmem:[%s7017_s16 + $0xf80] sm:$0xff] %vm5389_vm2, %v5311_v40 }
 0x4c8   : > { %v4035_v43 = vpop.f32.mrb[226].mxu0  ;;  %v5315_v44 = vpop.f32.mrb[226].mxu1 }
 0x4c9   : > { %v4036_v45 = vadd.f32 %v9351_v27, %v4035_v43  ;;  %v5316_v46 = vadd.f32 %v9351_v27, %v5315_v44  ;;  %v4037_v47 = vpop.f32.mrb[227].mxu0  ;;  %v5317_v48 = vpop.f32.mrb[227].mxu1 }
 0x4cb   : > { %5631 = vst.msk [vmem:[%s7017_s16 + $0x788] sm:$0xff] %vm5389_vm2, %v4036_v45  ;;  %5887 = vst.msk [vmem:[%s7017_s16 + $0xf88] sm:$0xff] %vm5389_vm2, %v5316_v46 }
 0x4cc   : > { %v4040_v49 = vpop.f32.mrb[228].mxu0  ;;  %v5320_v50 = vpop.f32.mrb[228].mxu1 }
 0x4cd   : > { %v4041_v51 = vadd.f32 %v9351_v27, %v4040_v49  ;;  %v5321_v52 = vadd.f32 %v9351_v27, %v5320_v50  ;;  %v4042_v53 = vpop.f32.mrb[229].mxu0  ;;  %v5322_v54 = vpop.f32.mrb[229].mxu1 }
 0x4cf   : > { %5632 = vst.msk [vmem:[%s7017_s16 + $0x790] sm:$0xff] %vm5389_vm2, %v4041_v51  ;;  %5888 = vst.msk [vmem:[%s7017_s16 + $0xf90] sm:$0xff] %vm5389_vm2, %v5321_v52 }
 0x4d0   : > { %v4045_v56 = vpop.f32.mrb[230].mxu0  ;;  %v5325_v57 = vpop.f32.mrb[230].mxu1 }
 0x4d1   : > { %v4046_v58 = vadd.f32 %v9351_v27, %v4045_v56  ;;  %v5326_v59 = vadd.f32 %v9351_v27, %v5325_v57  ;;  %v4047_v60 = vpop.f32.mrb[231].mxu0  ;;  %v5327_v61 = vpop.f32.mrb[231].mxu1 }
 0x4d3   : > { %5633 = vst.msk [vmem:[%s7017_s16 + $0x798] sm:$0xff] %vm5389_vm2, %v4046_v58  ;;  %5889 = vst.msk [vmem:[%s7017_s16 + $0xf98] sm:$0xff] %vm5389_vm2, %v5326_v59 }
 0x4d4   : > { %v4050_v62 = vpop.f32.mrb[232].mxu0  ;;  %v5330_v63 = vpop.f32.mrb[232].mxu1 }
 0x4d5   : > { %v4051_v55 = vadd.f32 %v9351_v27, %v4050_v62  ;;  %v5331_v0 = vadd.f32 %v9351_v27, %v5330_v63  ;;  %v4052_v1 = vpop.f32.mrb[233].mxu0  ;;  %v5332_v3 = vpop.f32.mrb[233].mxu1 }
 0x4d7   : > { %5634 = vst.msk [vmem:[%s7017_s16 + $0x7a0] sm:$0xff] %vm5389_vm2, %v4051_v55  ;;  %5890 = vst.msk [vmem:[%s7017_s16 + $0xfa0] sm:$0xff] %vm5389_vm2, %v5331_v0 }
 0x4d8   : > { %v4055_v4 = vpop.f32.mrb[234].mxu0  ;;  %v5335_v2 = vpop.f32.mrb[234].mxu1 }
 0x4d9   : > { %v4056_v5 = vadd.f32 %v9351_v27, %v4055_v4  ;;  %v5336_v6 = vadd.f32 %v9351_v27, %v5335_v2  ;;  %v4057_v8 = vpop.f32.mrb[235].mxu0  ;;  %v5337_v9 = vpop.f32.mrb[235].mxu1 }
 0x4db   : > { %5635 = vst.msk [vmem:[%s7017_s16 + $0x7a8] sm:$0xff] %vm5389_vm2, %v4056_v5  ;;  %5891 = vst.msk [vmem:[%s7017_s16 + $0xfa8] sm:$0xff] %vm5389_vm2, %v5336_v6 }
 0x4dc   : > { %v4060_v7 = vpop.f32.mrb[236].mxu0  ;;  %v5340_v10 = vpop.f32.mrb[236].mxu1 }
 0x4dd   : > { %v4061_v13 = vadd.f32 %v9738_v11, %v4060_v7  ;;  %v5341_v14 = vadd.f32 %v9738_v11, %v5340_v10  ;;  %v4062_v27 = vpop.f32.mrb[237].mxu0  ;;  %v5342_v12 = vpop.f32.mrb[237].mxu1 }
 0x4df   : > { %5636 = vst.msk [vmem:[%s7017_s16 + $0x7b0] sm:$0xff] %vm5389_vm2, %v4061_v13  ;;  %5892 = vst.msk [vmem:[%s7017_s16 + $0xfb0] sm:$0xff] %vm5389_vm2, %v5341_v14 }
 0x4e0   : > { %v4065_v15 = vpop.f32.mrb[238].mxu0  ;;  %v5345_v16 = vpop.f32.mrb[238].mxu1 }
 0x4e1   : > { %v4066_v18 = vadd.f32 %v9738_v11, %v4065_v15  ;;  %v5346_v19 = vadd.f32 %v9738_v11, %v5345_v16  ;;  %v4067_v17 = vpop.f32.mrb[239].mxu0  ;;  %v5347_v20 = vpop.f32.mrb[239].mxu1 }
 0x4e3   : > { %5637 = vst.msk [vmem:[%s7017_s16 + $0x7b8] sm:$0xff] %vm5389_vm2, %v4066_v18  ;;  %5893 = vst.msk [vmem:[%s7017_s16 + $0xfb8] sm:$0xff] %vm5389_vm2, %v5346_v19 }
 0x4e4   : > { %v4070_v21 = vpop.f32.mrb[240].mxu0  ;;  %v5350_v23 = vpop.f32.mrb[240].mxu1 }
 0x4e5   : > { %v4071_v24 = vadd.f32 %v9738_v11, %v4070_v21  ;;  %v5351_v22 = vadd.f32 %v9738_v11, %v5350_v23  ;;  %v4072_v25 = vpop.f32.mrb[241].mxu0  ;;  %v5352_v26 = vpop.f32.mrb[241].mxu1 }
 0x4e7   : > { %5638 = vst.msk [vmem:[%s7017_s16 + $0x7c0] sm:$0xff] %vm5389_vm2, %v4071_v24  ;;  %5894 = vst.msk [vmem:[%s7017_s16 + $0xfc0] sm:$0xff] %vm5389_vm2, %v5351_v22 }
 0x4e8   : > { %v4075_v28 = vpop.f32.mrb[242].mxu0  ;;  %v5355_v29 = vpop.f32.mrb[242].mxu1 }
 0x4e9   : > { %v4076_v30 = vadd.f32 %v9738_v11, %v4075_v28  ;;  %v5356_v31 = vadd.f32 %v9738_v11, %v5355_v29  ;;  %v4077_v32 = vpop.f32.mrb[243].mxu0  ;;  %v5357_v33 = vpop.f32.mrb[243].mxu1 }
 0x4eb   : > { %5639 = vst.msk [vmem:[%s7017_s16 + $0x7c8] sm:$0xff] %vm5389_vm2, %v4076_v30  ;;  %5895 = vst.msk [vmem:[%s7017_s16 + $0xfc8] sm:$0xff] %vm5389_vm2, %v5356_v31 }
 0x4ec   : > { %v4080_v34 = vpop.f32.mrb[244].mxu0  ;;  %v5360_v35 = vpop.f32.mrb[244].mxu1 }
 0x4ed   : > { %v4081_v36 = vadd.f32 %v9738_v11, %v4080_v34  ;;  %v5361_v37 = vadd.f32 %v9738_v11, %v5360_v35  ;;  %v4082_v38 = vpop.f32.mrb[245].mxu0  ;;  %v5362_v39 = vpop.f32.mrb[245].mxu1 }
 0x4ef   : > { %5640 = vst.msk [vmem:[%s7017_s16 + $0x7d0] sm:$0xff] %vm5389_vm2, %v4081_v36  ;;  %5896 = vst.msk [vmem:[%s7017_s16 + $0xfd0] sm:$0xff] %vm5389_vm2, %v5361_v37 }
 0x4f0   : > { %v4085_v40 = vpop.f32.mrb[246].mxu0  ;;  %v5365_v41 = vpop.f32.mrb[246].mxu1 }
 0x4f1   : > { %v4086_v42 = vadd.f32 %v9738_v11, %v4085_v40  ;;  %v5366_v43 = vadd.f32 %v9738_v11, %v5365_v41  ;;  %v4087_v44 = vpop.f32.mrb[247].mxu0  ;;  %v5367_v45 = vpop.f32.mrb[247].mxu1 }
 0x4f3   : > { %5641 = vst.msk [vmem:[%s7017_s16 + $0x7d8] sm:$0xff] %vm5389_vm2, %v4086_v42  ;;  %5897 = vst.msk [vmem:[%s7017_s16 + $0xfd8] sm:$0xff] %vm5389_vm2, %v5366_v43 }
 0x4f4   : > { %v4090_v46 = vpop.f32.mrb[248].mxu0  ;;  %v5370_v47 = vpop.f32.mrb[248].mxu1 }
 0x4f5   : > { %v4091_v48 = vadd.f32 %v9738_v11, %v4090_v46  ;;  %v5371_v49 = vadd.f32 %v9738_v11, %v5370_v47  ;;  %v4092_v50 = vpop.f32.mrb[249].mxu0  ;;  %v5372_v51 = vpop.f32.mrb[249].mxu1 }
 0x4f7   : > { %5642 = vst.msk [vmem:[%s7017_s16 + $0x7e0] sm:$0xff] %vm5389_vm2, %v4091_v48  ;;  %5898 = vst.msk [vmem:[%s7017_s16 + $0xfe0] sm:$0xff] %vm5389_vm2, %v5371_v49 }
 0x4f8   : > { %v4095_v52 = vpop.f32.mrb[250].mxu0  ;;  %v5375_v53 = vpop.f32.mrb[250].mxu1 }
 0x4f9   : > { %v4096_v54 = vadd.f32 %v9738_v11, %v4095_v52  ;;  %v5376_v56 = vadd.f32 %v9738_v11, %v5375_v53  ;;  %v4097_v57 = vpop.f32.mrb[251].mxu0  ;;  %v5377_v58 = vpop.f32.mrb[251].mxu1 }
 0x4fb   : > { %5643 = vst.msk [vmem:[%s7017_s16 + $0x7e8] sm:$0xff] %vm5389_vm2, %v4096_v54  ;;  %5899 = vst.msk [vmem:[%s7017_s16 + $0xfe8] sm:$0xff] %vm5389_vm2, %v5376_v56 }
 0x4fc   : > { %v4100_v59 = vpop.f32.mrb[252].mxu0  ;;  %v5380_v60 = vpop.f32.mrb[252].mxu1 }
 0x4fd   : > { %v4101_v61 = vadd.f32 %v9738_v11, %v4100_v59  ;;  %v5381_v62 = vadd.f32 %v9738_v11, %v5380_v60  ;;  %v4102_v63 = vpop.f32.mrb[253].mxu0  ;;  %v5382_v55 = vpop.f32.mrb[253].mxu1 }
 0x4ff   : > { %5644 = vst.msk [vmem:[%s7017_s16 + $0x7f0] sm:$0xff] %vm5389_vm2, %v4101_v61  ;;  %5900 = vst.msk [vmem:[%s7017_s16 + $0xff0] sm:$0xff] %vm5389_vm2, %v5381_v62 }
 0x500   : > { %v4105_v0 = vpop.f32.mrb[254].mxu0  ;;  %v5385_v1 = vpop.f32.mrb[254].mxu1 }
 0x501   : > { %v4106_v3 = vadd.f32 %v9738_v11, %v4105_v0  ;;  %v5386_v4 = vadd.f32 %v9738_v11, %v5385_v1  ;;  %v4107_v2 = vpop.f32.mrb[255].mxu0  ;;  %v5387_v5 = vpop.f32.mrb[255].mxu1 }
 0x503   : > { %5645 = vst.msk [vmem:[%s7017_s16 + $0x7f8] sm:$0xff] %vm5389_vm2, %v4106_v3  ;;  %5901 = vst.msk [vmem:[%s7017_s16 + $0xff8] sm:$0xff] %vm5389_vm2, %v5386_v4 }
 0x504 PF: > { %s13_s12 = sadd.s32 1, %s6559_s12  }
 0x505   : > { %p10_p4 = scmp.ge.s32.totalorder %s13_s12, 4  }
 0x507   :  { %12 = sbr.rel (!%p10_p4) target bundleno = 1 (0x1), region = 62 }

</bundles_post_ra>
